<compile_context>
chip_gen: v6e
topology: v6e:2x2x1
jax: 0.10.0
libtpu: 0.0.40
codegen_flags: <defaults>
</compile_context>

<pallas_src>
import functools

import jax
import jax.numpy as jnp
from jax.experimental import pallas as pl
from jax.experimental.pallas import tpu as pltpu


_LAYER_KEYS = ("ln1_g", "ln1_b", "w_q", "b_q", "w_k", "b_k", "w_v", "b_v",
               "w_o", "b_o", "ln2_g", "ln2_b", "w1", "b1", "w2", "b2")


# ----------------------------------------------------------------------------- kernel helpers

def _layernorm(v, g, b, eps):
    mu = jnp.mean(v, axis=-1, keepdims=True)
    vc = v - mu
    var = jnp.mean(vc * vc, axis=-1, keepdims=True)   # biased variance (PyTorch LayerNorm)
    return vc * jax.lax.rsqrt(var + eps) * g + b


def _run_branch(x, attn_bias, pool, lw, fng, fnb, *, num_heads, num_layers, eps):
    """Pre-norm Transformer encoder stack + branch LayerNorm + sequence mean-pool.

    x:         (M, E) packed tokens, M = batch*seq (all batch elements packed on sublanes).
    attn_bias: (M, M) additive bias, 0 within a batch element / -1e30 across (exact masking:
               cross-batch probabilities underflow to 0, every row keeps its own block).
    pool:      (batch, M) mean-pool matrix; pooled = pool @ tokens (avoids in-kernel reshape).
    """
    M, E = x.shape
    head_dim = E // num_heads
    scale = 1.0 / float(head_dim) ** 0.5

    for l in range(num_layers):
        # ---- self-attention sublayer (pre-norm) --------------------------------------------
        h = _layernorm(x, lw["ln1_g"][l], lw["ln1_b"][l], eps)
        q = jnp.dot(h, lw["w_q"][l], preferred_element_type=jnp.float32) + lw["b_q"][l]
        k = jnp.dot(h, lw["w_k"][l], preferred_element_type=jnp.float32) + lw["b_k"][l]
        v = jnp.dot(h, lw["w_v"][l], preferred_element_type=jnp.float32) + lw["b_v"][l]
        heads = []
        for hd in range(num_heads):
            lo, hi = hd * head_dim, (hd + 1) * head_dim
            s = jax.lax.dot_general(q[:, lo:hi], k[:, lo:hi], (((1,), (1,)), ((), ())),
                                    preferred_element_type=jnp.float32) * scale + attn_bias
            m = jnp.max(s, axis=-1, keepdims=True)
            p = jnp.exp(s - m)
            p = p / jnp.sum(p, axis=-1, keepdims=True)       # exact softmax
            heads.append(jnp.dot(p, v[:, lo:hi], preferred_element_type=jnp.float32))
        attn = jnp.concatenate(heads, axis=-1)               # (M, E) -> one out-proj matmul
        x = x + jnp.dot(attn, lw["w_o"][l], preferred_element_type=jnp.float32) + lw["b_o"][l]

        # ---- feed-forward sublayer (pre-norm, ReLU) ----------------------------------------
        h = _layernorm(x, lw["ln2_g"][l], lw["ln2_b"][l], eps)
        h = jnp.maximum(
            jnp.dot(h, lw["w1"][l], preferred_element_type=jnp.float32) + lw["b1"][l], 0.0)
        x = x + jnp.dot(h, lw["w2"][l], preferred_element_type=jnp.float32) + lw["b2"][l]

    z = _layernorm(x, fng, fnb, eps)                          # branch LayerNorm
    return jnp.dot(pool, z, preferred_element_type=jnp.float32)   # (batch, E) mean-pool


def _fused_kernel(*refs, num_heads, num_layers, eps):
    """Entire forward pass: temporal branch, channel branch, inter-attention head, classifier."""
    out_ref = refs[-1]
    it = iter(refs[:-1])

    def branch():
        tok, bias, pool = next(it), next(it), next(it)
        lw = {k: next(it) for k in _LAYER_KEYS}
        fng, fnb = next(it), next(it)
        return _run_branch(tok[...].astype(jnp.float32), bias[...], pool[...],
                           lw, fng[...], fnb[...],
                           num_heads=num_heads, num_layers=num_layers, eps=eps)

    temporal_pool = branch()                                  # (B, d_t)
    channel_pool = branch()                                   # (B, d_c)

    (wvt, wvc, bv, wio, bio, ing, inb, cw1, cb1, cw2, cb2) = (next(it) for _ in range(11))

    # Seq-len-1 inter attention collapses EXACTLY (softmax over one key == 1) to
    #   out_proj(v_proj(joint) + b_v) + b_o,  joint = concat(temporal_pool, channel_pool);
    # the concat is folded into a row-split value projection (two matmuls).
    vproj = (jnp.dot(temporal_pool, wvt[...], preferred_element_type=jnp.float32)
             + jnp.dot(channel_pool, wvc[...], preferred_element_type=jnp.float32)
             + bv[...])
    inter = jnp.dot(vproj, wio[...], preferred_element_type=jnp.float32) + bio[...]
    z = _layernorm(inter, ing[...], inb[...], eps)
    h = jnp.maximum(jnp.dot(z, cw1[...], preferred_element_type=jnp.float32) + cb1[...], 0.0)
    out_ref[...] = (jnp.dot(h, cw2[...], preferred_element_type=jnp.float32)
                    + cb2[...]).astype(out_ref.dtype)


# ----------------------------------------------------------------------------- wrapper

def _block_bias(batch, seq):
    """(M, M) additive attention bias: 0 within a batch element, -1e30 across."""
    idx = jnp.arange(batch * seq, dtype=jnp.int32) // seq
    return jnp.where(idx[:, None] == idx[None, :], 0.0, -1e30).astype(jnp.float32)


def _pool_matrix(batch, seq):
    """(batch, M) mean-pool matrix over the sequence of packed tokens."""
    idx = jnp.arange(batch * seq, dtype=jnp.int32) // seq
    return (idx[None, :] == jnp.arange(batch, dtype=jnp.int32)[:, None]).astype(
        jnp.float32) * (1.0 / seq)


def dual_attention_encoder(psd, params, num_heads, eps=1e-5):
    B, W, C, F = psd.shape
    d_t, d_c = C * F, W * F
    d_j = d_t + d_c
    num_layers = params["temporal_layers"]["w_q"].shape[0]
    n_cls = params["cls"]["w2"].shape[1]

    # psd_proj + token construction are tiny; leave them to XLA (no dedicated pallas launch).
    x = jnp.dot(psd.reshape(B * W * C, F), params["psd_proj"]["w"]) + params["psd_proj"]["b"]
    x = x.reshape(B, W, C, F)
    t_tok = x.reshape(B * W, d_t)                             # temporal tokens  (B*W, C*F)
    c_tok = jnp.transpose(x, (0, 2, 1, 3)).reshape(B * C, d_c)  # channel tokens (B*C, W*F)

    # Only the value path of the packed MHA in-projection matters (seq-len-1 collapse).
    w_v = params["inter_attn"]["w_qkv"][:, 2 * d_j:]
    b_v = params["inter_attn"]["b_qkv"][2 * d_j:]

    def branch_args(tok, lp, norm, seq, d):
        return ([tok, _block_bias(B, seq), _pool_matrix(B, seq)]
                + [lp[k] for k in _LAYER_KEYS]
                + [norm["g"].reshape(1, d), norm["b"].reshape(1, d)])

    args = (branch_args(t_tok, params["temporal_layers"], params["temporal_norm"], W, d_t)
            + branch_args(c_tok, params["channel_layers"], params["channel_norm"], C, d_c)
            + [w_v[:d_t], w_v[d_t:], b_v.reshape(1, d_j),
               params["inter_attn"]["w_o"], params["inter_attn"]["b_o"].reshape(1, d_j),
               params["inter_norm"]["g"].reshape(1, d_j),
               params["inter_norm"]["b"].reshape(1, d_j),
               params["cls"]["w1"], params["cls"]["b1"].reshape(1, -1),
               params["cls"]["w2"], params["cls"]["b2"].reshape(1, -1)])

    # Everything fits comfortably in VMEM (< 1 MiB total): full-array blocks, single grid step.
    in_specs = [pl.BlockSpec(a.shape, lambda i, nd=a.ndim: (0,) * nd) for a in args]

    kernel = functools.partial(_fused_kernel, num_heads=num_heads,
                               num_layers=num_layers, eps=eps)
    return pl.pallas_call(
        kernel,
        grid=(1,),
        in_specs=in_specs,
        out_specs=pl.BlockSpec((B, n_cls), lambda i: (0, 0)),
        out_shape=jax.ShapeDtypeStruct((B, n_cls), psd.dtype),
        compiler_params=pltpu.CompilerParams(dimension_semantics=("arbitrary",)),
    )(*args)


# ----------------------------------------------------------------------------- params

def init_params(key, W, C, F, num_heads, dff, num_layers, hidden, num_classes):
    keys = iter(jax.random.split(key, 64))

    def w(shape, scale=0.05):
        return scale * jax.random.normal(next(keys), shape, dtype=jnp.float32)

    def zeros(shape):
        return jnp.zeros(shape, jnp.float32)

    def ones(shape):
        return jnp.ones(shape, jnp.float32)

    def enc_stack(d):
        """Per-layer TransformerEncoderLayer weights stacked on a leading num_layers axis."""
        L = num_layers
        return {
            "ln1_g": ones((L, 1, d)), "ln1_b": zeros((L, 1, d)),
            "w_q": w((L, d, d)), "b_q": zeros((L, 1, d)),
            "w_k": w((L, d, d)), "b_k": zeros((L, 1, d)),
            "w_v": w((L, d, d)), "b_v": zeros((L, 1, d)),
            "w_o": w((L, d, d)), "b_o": zeros((L, 1, d)),
            "ln2_g": ones((L, 1, d)), "ln2_b": zeros((L, 1, d)),
            "w1": w((L, d, dff)), "b1": zeros((L, 1, dff)),
            "w2": w((L, dff, d)), "b2": zeros((L, 1, d)),
        }

    d_t = C * F          # temporal d_model
    d_c = W * F          # channel d_model
    d_j = d_t + d_c      # joint / inter-attention dim (forward-implied)

    return {
        "psd_proj": {"w": w((F, F)), "b": zeros((F,))},
        "temporal_layers": enc_stack(d_t),
        "channel_layers": enc_stack(d_c),
        "temporal_norm": {"g": ones((d_t,)), "b": zeros((d_t,))},
        "channel_norm": {"g": ones((d_c,)), "b": zeros((d_c,))},
        "inter_attn": {"w_qkv": w((d_j, 3 * d_j)), "b_qkv": zeros((3 * d_j,)),
                       "w_o": w((d_j, d_j)), "b_o": zeros((d_j,))},
        "inter_norm": {"g": ones((d_j,)), "b": zeros((d_j,))},
        "cls": {"w1": w((d_j, hidden)), "b1": zeros((hidden,)),
                "w2": w((hidden, num_classes)), "b2": zeros((num_classes,))},
    }


# ----------------------------------------------------------------------------- main

if __name__ == "__main__":
    # Small, self-consistent config (see TODO(synk) at top about the original constants).
    B, W, C, F = 2, 8, 16, 4         # batch, num_windows, num_channels, num_FBs
    num_heads = 4                    # divides both d_models (64, 32)
    dim_feedforward = 128
    num_layers = 2
    cls_hidden = 64
    num_classes = 3

    key = jax.random.PRNGKey(0)
    pkey, xkey = jax.random.split(key)
    params = init_params(pkey, W, C, F, num_heads, dim_feedforward, num_layers,
                         cls_hidden, num_classes)
    psd = jax.random.normal(xkey, (B, W, C, F), dtype=jnp.float32)

    fwd = jax.jit(functools.partial(dual_attention_encoder, num_heads=num_heads))
    logits = jax.block_until_ready(fwd(psd, params))

    assert logits.shape == (B, num_classes), logits.shape
    assert bool(jnp.all(jnp.isfinite(logits)))
    print("KERNEL_OK")
</pallas_src>

<mosaic_0001>
module attributes {stable_mosaic.version = 11 : i64} {
  func.func @_fused_kernel(%arg0: i32, %arg1: memref<16x64xf32, #tpu.memory_space<vmem>>, %arg2: memref<16x16xf32, #tpu.memory_space<vmem>>, %arg3: memref<2x16xf32, #tpu.memory_space<vmem>>, %arg4: memref<2x1x64xf32, #tpu.memory_space<vmem>>, %arg5: memref<2x1x64xf32, #tpu.memory_space<vmem>>, %arg6: memref<2x64x64xf32, #tpu.memory_space<vmem>>, %arg7: memref<2x1x64xf32, #tpu.memory_space<vmem>>, %arg8: memref<2x64x64xf32, #tpu.memory_space<vmem>>, %arg9: memref<2x1x64xf32, #tpu.memory_space<vmem>>, %arg10: memref<2x64x64xf32, #tpu.memory_space<vmem>>, %arg11: memref<2x1x64xf32, #tpu.memory_space<vmem>>, %arg12: memref<2x64x64xf32, #tpu.memory_space<vmem>>, %arg13: memref<2x1x64xf32, #tpu.memory_space<vmem>>, %arg14: memref<2x1x64xf32, #tpu.memory_space<vmem>>, %arg15: memref<2x1x64xf32, #tpu.memory_space<vmem>>, %arg16: memref<2x64x128xf32, #tpu.memory_space<vmem>>, %arg17: memref<2x1x128xf32, #tpu.memory_space<vmem>>, %arg18: memref<2x128x64xf32, #tpu.memory_space<vmem>>, %arg19: memref<2x1x64xf32, #tpu.memory_space<vmem>>, %arg20: memref<1x64xf32, #tpu.memory_space<vmem>>, %arg21: memref<1x64xf32, #tpu.memory_space<vmem>>, %arg22: memref<32x32xf32, #tpu.memory_space<vmem>>, %arg23: memref<32x32xf32, #tpu.memory_space<vmem>>, %arg24: memref<2x32xf32, #tpu.memory_space<vmem>>, %arg25: memref<2x1x32xf32, #tpu.memory_space<vmem>>, %arg26: memref<2x1x32xf32, #tpu.memory_space<vmem>>, %arg27: memref<2x32x32xf32, #tpu.memory_space<vmem>>, %arg28: memref<2x1x32xf32, #tpu.memory_space<vmem>>, %arg29: memref<2x32x32xf32, #tpu.memory_space<vmem>>, %arg30: memref<2x1x32xf32, #tpu.memory_space<vmem>>, %arg31: memref<2x32x32xf32, #tpu.memory_space<vmem>>, %arg32: memref<2x1x32xf32, #tpu.memory_space<vmem>>, %arg33: memref<2x32x32xf32, #tpu.memory_space<vmem>>, %arg34: memref<2x1x32xf32, #tpu.memory_space<vmem>>, %arg35: memref<2x1x32xf32, #tpu.memory_space<vmem>>, %arg36: memref<2x1x32xf32, #tpu.memory_space<vmem>>, %arg37: memref<2x32x128xf32, #tpu.memory_space<vmem>>, %arg38: memref<2x1x128xf32, #tpu.memory_space<vmem>>, %arg39: memref<2x128x32xf32, #tpu.memory_space<vmem>>, %arg40: memref<2x1x32xf32, #tpu.memory_space<vmem>>, %arg41: memref<1x32xf32, #tpu.memory_space<vmem>>, %arg42: memref<1x32xf32, #tpu.memory_space<vmem>>, %arg43: memref<64x96xf32, #tpu.memory_space<vmem>>, %arg44: memref<32x96xf32, #tpu.memory_space<vmem>>, %arg45: memref<1x96xf32, #tpu.memory_space<vmem>>, %arg46: memref<96x96xf32, #tpu.memory_space<vmem>>, %arg47: memref<1x96xf32, #tpu.memory_space<vmem>>, %arg48: memref<1x96xf32, #tpu.memory_space<vmem>>, %arg49: memref<1x96xf32, #tpu.memory_space<vmem>>, %arg50: memref<96x64xf32, #tpu.memory_space<vmem>>, %arg51: memref<1x64xf32, #tpu.memory_space<vmem>>, %arg52: memref<64x3xf32, #tpu.memory_space<vmem>>, %arg53: memref<1x3xf32, #tpu.memory_space<vmem>>, %arg54: memref<2x3xf32, #tpu.memory_space<vmem>>) attributes {dimension_semantics = [#tpu.dimension_semantics<arbitrary>], iteration_bounds = array<i64: 1>, scalar_prefetch = 0 : i64, scratch_operands = 0 : i64, tpu.core_type = #tpu.core_type<tc>, window_params = [{pipeline_mode = #tpu.pipeline_mode<synchronous>, transform_indices = @transform_0, window_bounds = array<i64: 16, 64>}, {pipeline_mode = #tpu.pipeline_mode<synchronous>, transform_indices = @transform_1, window_bounds = array<i64: 16, 16>}, {pipeline_mode = #tpu.pipeline_mode<synchronous>, transform_indices = @transform_2, window_bounds = array<i64: 2, 16>}, {pipeline_mode = #tpu.pipeline_mode<synchronous>, transform_indices = @transform_3, window_bounds = array<i64: 2, 1, 64>}, {pipeline_mode = #tpu.pipeline_mode<synchronous>, transform_indices = @transform_4, window_bounds = array<i64: 2, 1, 64>}, {pipeline_mode = #tpu.pipeline_mode<synchronous>, transform_indices = @transform_5, window_bounds = array<i64: 2, 64, 64>}, {pipeline_mode = #tpu.pipeline_mode<synchronous>, transform_indices = @transform_6, window_bounds = array<i64: 2, 1, 64>}, {pipeline_mode = #tpu.pipeline_mode<synchronous>, transform_indices = @transform_7, window_bounds = array<i64: 2, 64, 64>}, {pipeline_mode = #tpu.pipeline_mode<synchronous>, transform_indices = @transform_8, window_bounds = array<i64: 2, 1, 64>}, {pipeline_mode = #tpu.pipeline_mode<synchronous>, transform_indices = @transform_9, window_bounds = array<i64: 2, 64, 64>}, {pipeline_mode = #tpu.pipeline_mode<synchronous>, transform_indices = @transform_10, window_bounds = array<i64: 2, 1, 64>}, {pipeline_mode = #tpu.pipeline_mode<synchronous>, transform_indices = @transform_11, window_bounds = array<i64: 2, 64, 64>}, {pipeline_mode = #tpu.pipeline_mode<synchronous>, transform_indices = @transform_12, window_bounds = array<i64: 2, 1, 64>}, {pipeline_mode = #tpu.pipeline_mode<synchronous>, transform_indices = @transform_13, window_bounds = array<i64: 2, 1, 64>}, {pipeline_mode = #tpu.pipeline_mode<synchronous>, transform_indices = @transform_14, window_bounds = array<i64: 2, 1, 64>}, {pipeline_mode = #tpu.pipeline_mode<synchronous>, transform_indices = @transform_15, window_bounds = array<i64: 2, 64, 128>}, {pipeline_mode = #tpu.pipeline_mode<synchronous>, transform_indices = @transform_16, window_bounds = array<i64: 2, 1, 128>}, {pipeline_mode = #tpu.pipeline_mode<synchronous>, transform_indices = @transform_17, window_bounds = array<i64: 2, 128, 64>}, {pipeline_mode = #tpu.pipeline_mode<synchronous>, transform_indices = @transform_18, window_bounds = array<i64: 2, 1, 64>}, {pipeline_mode = #tpu.pipeline_mode<synchronous>, transform_indices = @transform_19, window_bounds = array<i64: 1, 64>}, {pipeline_mode = #tpu.pipeline_mode<synchronous>, transform_indices = @transform_20, window_bounds = array<i64: 1, 64>}, {pipeline_mode = #tpu.pipeline_mode<synchronous>, transform_indices = @transform_21, window_bounds = array<i64: 32, 32>}, {pipeline_mode = #tpu.pipeline_mode<synchronous>, transform_indices = @transform_22, window_bounds = array<i64: 32, 32>}, {pipeline_mode = #tpu.pipeline_mode<synchronous>, transform_indices = @transform_23, window_bounds = array<i64: 2, 32>}, {pipeline_mode = #tpu.pipeline_mode<synchronous>, transform_indices = @transform_24, window_bounds = array<i64: 2, 1, 32>}, {pipeline_mode = #tpu.pipeline_mode<synchronous>, transform_indices = @transform_25, window_bounds = array<i64: 2, 1, 32>}, {pipeline_mode = #tpu.pipeline_mode<synchronous>, transform_indices = @transform_26, window_bounds = array<i64: 2, 32, 32>}, {pipeline_mode = #tpu.pipeline_mode<synchronous>, transform_indices = @transform_27, window_bounds = array<i64: 2, 1, 32>}, {pipeline_mode = #tpu.pipeline_mode<synchronous>, transform_indices = @transform_28, window_bounds = array<i64: 2, 32, 32>}, {pipeline_mode = #tpu.pipeline_mode<synchronous>, transform_indices = @transform_29, window_bounds = array<i64: 2, 1, 32>}, {pipeline_mode = #tpu.pipeline_mode<synchronous>, transform_indices = @transform_30, window_bounds = array<i64: 2, 32, 32>}, {pipeline_mode = #tpu.pipeline_mode<synchronous>, transform_indices = @transform_31, window_bounds = array<i64: 2, 1, 32>}, {pipeline_mode = #tpu.pipeline_mode<synchronous>, transform_indices = @transform_32, window_bounds = array<i64: 2, 32, 32>}, {pipeline_mode = #tpu.pipeline_mode<synchronous>, transform_indices = @transform_33, window_bounds = array<i64: 2, 1, 32>}, {pipeline_mode = #tpu.pipeline_mode<synchronous>, transform_indices = @transform_34, window_bounds = array<i64: 2, 1, 32>}, {pipeline_mode = #tpu.pipeline_mode<synchronous>, transform_indices = @transform_35, window_bounds = array<i64: 2, 1, 32>}, {pipeline_mode = #tpu.pipeline_mode<synchronous>, transform_indices = @transform_36, window_bounds = array<i64: 2, 32, 128>}, {pipeline_mode = #tpu.pipeline_mode<synchronous>, transform_indices = @transform_37, window_bounds = array<i64: 2, 1, 128>}, {pipeline_mode = #tpu.pipeline_mode<synchronous>, transform_indices = @transform_38, window_bounds = array<i64: 2, 128, 32>}, {pipeline_mode = #tpu.pipeline_mode<synchronous>, transform_indices = @transform_39, window_bounds = array<i64: 2, 1, 32>}, {pipeline_mode = #tpu.pipeline_mode<synchronous>, transform_indices = @transform_40, window_bounds = array<i64: 1, 32>}, {pipeline_mode = #tpu.pipeline_mode<synchronous>, transform_indices = @transform_41, window_bounds = array<i64: 1, 32>}, {pipeline_mode = #tpu.pipeline_mode<synchronous>, transform_indices = @transform_42, window_bounds = array<i64: 64, 96>}, {pipeline_mode = #tpu.pipeline_mode<synchronous>, transform_indices = @transform_43, window_bounds = array<i64: 32, 96>}, {pipeline_mode = #tpu.pipeline_mode<synchronous>, transform_indices = @transform_44, window_bounds = array<i64: 1, 96>}, {pipeline_mode = #tpu.pipeline_mode<synchronous>, transform_indices = @transform_45, window_bounds = array<i64: 96, 96>}, {pipeline_mode = #tpu.pipeline_mode<synchronous>, transform_indices = @transform_46, window_bounds = array<i64: 1, 96>}, {pipeline_mode = #tpu.pipeline_mode<synchronous>, transform_indices = @transform_47, window_bounds = array<i64: 1, 96>}, {pipeline_mode = #tpu.pipeline_mode<synchronous>, transform_indices = @transform_48, window_bounds = array<i64: 1, 96>}, {pipeline_mode = #tpu.pipeline_mode<synchronous>, transform_indices = @transform_49, window_bounds = array<i64: 96, 64>}, {pipeline_mode = #tpu.pipeline_mode<synchronous>, transform_indices = @transform_50, window_bounds = array<i64: 1, 64>}, {pipeline_mode = #tpu.pipeline_mode<synchronous>, transform_indices = @transform_51, window_bounds = array<i64: 64, 3>}, {pipeline_mode = #tpu.pipeline_mode<synchronous>, transform_indices = @transform_52, window_bounds = array<i64: 1, 3>}, {pipeline_mode = #tpu.pipeline_mode<synchronous>, transform_indices = @transform_53, window_bounds = array<i64: 2, 3>}]} {
    %c0 = arith.constant 0 : index
    %c0_0 = arith.constant 0 : index
    %0 = vector.load %arg1[%c0, %c0_0] : memref<16x64xf32, #tpu.memory_space<vmem>>, vector<16x64xf32>
    %c0_1 = arith.constant 0 : index
    %c0_2 = arith.constant 0 : index
    %1 = vector.load %arg2[%c0_1, %c0_2] : memref<16x16xf32, #tpu.memory_space<vmem>>, vector<16x16xf32>
    %c0_3 = arith.constant 0 : index
    %c0_4 = arith.constant 0 : index
    %2 = vector.load %arg3[%c0_3, %c0_4] : memref<2x16xf32, #tpu.memory_space<vmem>>, vector<2x16xf32>
    %c0_5 = arith.constant 0 : index
    %c0_6 = arith.constant 0 : index
    %3 = vector.load %arg20[%c0_5, %c0_6] : memref<1x64xf32, #tpu.memory_space<vmem>>, vector<1x64xf32>
    %c0_7 = arith.constant 0 : index
    %c0_8 = arith.constant 0 : index
    %4 = vector.load %arg21[%c0_7, %c0_8] : memref<1x64xf32, #tpu.memory_space<vmem>>, vector<1x64xf32>
    %c0_9 = arith.constant 0 : index
    %c0_10 = arith.constant 0 : index
    %c0_11 = arith.constant 0 : index
    %5 = vector.load %arg4[%c0_9, %c0_10, %c0_11] : memref<2x1x64xf32, #tpu.memory_space<vmem>>, vector<1x1x64xf32>
    %6 = vector.shape_cast %5 : vector<1x1x64xf32> to vector<1x64xf32>
    %c0_12 = arith.constant 0 : index
    %c0_13 = arith.constant 0 : index
    %c0_14 = arith.constant 0 : index
    %7 = vector.load %arg5[%c0_12, %c0_13, %c0_14] : memref<2x1x64xf32, #tpu.memory_space<vmem>>, vector<1x1x64xf32>
    %8 = vector.shape_cast %7 : vector<1x1x64xf32> to vector<1x64xf32>
    %cst = arith.constant dense<0.000000e+00> : vector<16xf32>
    %9 = vector.multi_reduction <add>, %0, %cst [1] : vector<16x64xf32> to vector<16xf32>
    %10 = vector.shape_cast %9 : vector<16xf32> to vector<16x1xf32>
    %cst_15 = arith.constant 6.400000e+01 : f32
    %11 = vector.broadcast %cst_15 : f32 to vector<16x1xf32>
    %12 = arith.divf %10, %11 : vector<16x1xf32>
    %13 = vector.broadcast %12 : vector<16x1xf32> to vector<16x64xf32>
    %14 = arith.subf %0, %13 : vector<16x64xf32>
    %15 = arith.mulf %14, %14 : vector<16x64xf32>
    %cst_16 = arith.constant dense<0.000000e+00> : vector<16xf32>
    %16 = vector.multi_reduction <add>, %15, %cst_16 [1] : vector<16x64xf32> to vector<16xf32>
    %17 = vector.shape_cast %16 : vector<16xf32> to vector<16x1xf32>
    %cst_17 = arith.constant 6.400000e+01 : f32
    %18 = vector.broadcast %cst_17 : f32 to vector<16x1xf32>
    %19 = arith.divf %17, %18 : vector<16x1xf32>
    %cst_18 = arith.constant 9.99999974E-6 : f32
    %20 = vector.broadcast %cst_18 : f32 to vector<16x1xf32>
    %21 = arith.addf %19, %20 : vector<16x1xf32>
    %22 = math.rsqrt %21 : vector<16x1xf32>
    %23 = vector.broadcast %22 : vector<16x1xf32> to vector<16x64xf32>
    %24 = arith.mulf %14, %23 : vector<16x64xf32>
    %25 = vector.broadcast %6 : vector<1x64xf32> to vector<16x64xf32>
    %26 = arith.mulf %24, %25 : vector<16x64xf32>
    %27 = vector.broadcast %8 : vector<1x64xf32> to vector<16x64xf32>
    %28 = arith.addf %26, %27 : vector<16x64xf32>
    %c0_19 = arith.constant 0 : index
    %c0_20 = arith.constant 0 : index
    %c0_21 = arith.constant 0 : index
    %29 = vector.load %arg6[%c0_19, %c0_20, %c0_21] : memref<2x64x64xf32, #tpu.memory_space<vmem>>, vector<1x64x64xf32>
    %30 = vector.shape_cast %29 : vector<1x64x64xf32> to vector<64x64xf32>
    %cst_22 = arith.constant dense<0.000000e+00> : vector<16x64xf32>
    %31 = tpu.matmul %28, %30, %cst_22 {dimension_numbers = #tpu.dot_dimension_numbers<[1], [0], [0], [1], [0, 0, 1, 1], [], []>} : vector<16x64xf32>, vector<64x64xf32>, vector<16x64xf32> -> vector<16x64xf32>
    %c0_23 = arith.constant 0 : index
    %c0_24 = arith.constant 0 : index
    %c0_25 = arith.constant 0 : index
    %32 = vector.load %arg7[%c0_23, %c0_24, %c0_25] : memref<2x1x64xf32, #tpu.memory_space<vmem>>, vector<1x1x64xf32>
    %33 = vector.shape_cast %32 : vector<1x1x64xf32> to vector<1x64xf32>
    %34 = vector.broadcast %33 : vector<1x64xf32> to vector<16x64xf32>
    %35 = arith.addf %31, %34 : vector<16x64xf32>
    %c0_26 = arith.constant 0 : index
    %c0_27 = arith.constant 0 : index
    %c0_28 = arith.constant 0 : index
    %36 = vector.load %arg8[%c0_26, %c0_27, %c0_28] : memref<2x64x64xf32, #tpu.memory_space<vmem>>, vector<1x64x64xf32>
    %37 = vector.shape_cast %36 : vector<1x64x64xf32> to vector<64x64xf32>
    %cst_29 = arith.constant dense<0.000000e+00> : vector<16x64xf32>
    %38 = tpu.matmul %28, %37, %cst_29 {dimension_numbers = #tpu.dot_dimension_numbers<[1], [0], [0], [1], [0, 0, 1, 1], [], []>} : vector<16x64xf32>, vector<64x64xf32>, vector<16x64xf32> -> vector<16x64xf32>
    %c0_30 = arith.constant 0 : index
    %c0_31 = arith.constant 0 : index
    %c0_32 = arith.constant 0 : index
    %39 = vector.load %arg9[%c0_30, %c0_31, %c0_32] : memref<2x1x64xf32, #tpu.memory_space<vmem>>, vector<1x1x64xf32>
    %40 = vector.shape_cast %39 : vector<1x1x64xf32> to vector<1x64xf32>
    %41 = vector.broadcast %40 : vector<1x64xf32> to vector<16x64xf32>
    %42 = arith.addf %38, %41 : vector<16x64xf32>
    %c0_33 = arith.constant 0 : index
    %c0_34 = arith.constant 0 : index
    %c0_35 = arith.constant 0 : index
    %43 = vector.load %arg10[%c0_33, %c0_34, %c0_35] : memref<2x64x64xf32, #tpu.memory_space<vmem>>, vector<1x64x64xf32>
    %44 = vector.shape_cast %43 : vector<1x64x64xf32> to vector<64x64xf32>
    %cst_36 = arith.constant dense<0.000000e+00> : vector<16x64xf32>
    %45 = tpu.matmul %28, %44, %cst_36 {dimension_numbers = #tpu.dot_dimension_numbers<[1], [0], [0], [1], [0, 0, 1, 1], [], []>} : vector<16x64xf32>, vector<64x64xf32>, vector<16x64xf32> -> vector<16x64xf32>
    %c0_37 = arith.constant 0 : index
    %c0_38 = arith.constant 0 : index
    %c0_39 = arith.constant 0 : index
    %46 = vector.load %arg11[%c0_37, %c0_38, %c0_39] : memref<2x1x64xf32, #tpu.memory_space<vmem>>, vector<1x1x64xf32>
    %47 = vector.shape_cast %46 : vector<1x1x64xf32> to vector<1x64xf32>
    %48 = vector.broadcast %47 : vector<1x64xf32> to vector<16x64xf32>
    %49 = arith.addf %45, %48 : vector<16x64xf32>
    %50 = vector.extract_strided_slice %35 {offsets = [0, 0], sizes = [16, 16], strides = [1, 1]} : vector<16x64xf32> to vector<16x16xf32>
    %51 = vector.extract_strided_slice %42 {offsets = [0, 0], sizes = [16, 16], strides = [1, 1]} : vector<16x64xf32> to vector<16x16xf32>
    %cst_40 = arith.constant dense<0.000000e+00> : vector<16x16xf32>
    %52 = tpu.matmul %50, %51, %cst_40 {dimension_numbers = #tpu.dot_dimension_numbers<[1], [1], [0], [0], [0, 0, 1, 0], [], []>} : vector<16x16xf32>, vector<16x16xf32>, vector<16x16xf32> -> vector<16x16xf32>
    %cst_41 = arith.constant 2.500000e-01 : f32
    %53 = vector.broadcast %cst_41 : f32 to vector<16x16xf32>
    %54 = arith.mulf %52, %53 : vector<16x16xf32>
    %55 = arith.addf %54, %1 : vector<16x16xf32>
    %cst_42 = arith.constant dense<0xFF800000> : vector<16xf32>
    %56 = vector.multi_reduction <maximumf>, %55, %cst_42 [1] : vector<16x16xf32> to vector<16xf32>
    %57 = vector.shape_cast %56 : vector<16xf32> to vector<16x1xf32>
    %58 = vector.broadcast %57 : vector<16x1xf32> to vector<16x16xf32>
    %59 = arith.subf %55, %58 : vector<16x16xf32>
    %60 = math.exp %59 : vector<16x16xf32>
    %cst_43 = arith.constant dense<0.000000e+00> : vector<16xf32>
    %61 = vector.multi_reduction <add>, %60, %cst_43 [1] : vector<16x16xf32> to vector<16xf32>
    %62 = vector.shape_cast %61 : vector<16xf32> to vector<16x1xf32>
    %63 = vector.broadcast %62 : vector<16x1xf32> to vector<16x16xf32>
    %64 = arith.divf %60, %63 : vector<16x16xf32>
    %65 = vector.extract_strided_slice %49 {offsets = [0, 0], sizes = [16, 16], strides = [1, 1]} : vector<16x64xf32> to vector<16x16xf32>
    %cst_44 = arith.constant dense<0.000000e+00> : vector<16x16xf32>
    %66 = tpu.matmul %64, %65, %cst_44 {dimension_numbers = #tpu.dot_dimension_numbers<[1], [0], [0], [1], [0, 0, 1, 1], [], []>} : vector<16x16xf32>, vector<16x16xf32>, vector<16x16xf32> -> vector<16x16xf32>
    %67 = vector.extract_strided_slice %35 {offsets = [0, 16], sizes = [16, 16], strides = [1, 1]} : vector<16x64xf32> to vector<16x16xf32>
    %68 = vector.extract_strided_slice %42 {offsets = [0, 16], sizes = [16, 16], strides = [1, 1]} : vector<16x64xf32> to vector<16x16xf32>
    %cst_45 = arith.constant dense<0.000000e+00> : vector<16x16xf32>
    %69 = tpu.matmul %67, %68, %cst_45 {dimension_numbers = #tpu.dot_dimension_numbers<[1], [1], [0], [0], [0, 0, 1, 0], [], []>} : vector<16x16xf32>, vector<16x16xf32>, vector<16x16xf32> -> vector<16x16xf32>
    %cst_46 = arith.constant 2.500000e-01 : f32
    %70 = vector.broadcast %cst_46 : f32 to vector<16x16xf32>
    %71 = arith.mulf %69, %70 : vector<16x16xf32>
    %72 = arith.addf %71, %1 : vector<16x16xf32>
    %cst_47 = arith.constant dense<0xFF800000> : vector<16xf32>
    %73 = vector.multi_reduction <maximumf>, %72, %cst_47 [1] : vector<16x16xf32> to vector<16xf32>
    %74 = vector.shape_cast %73 : vector<16xf32> to vector<16x1xf32>
    %75 = vector.broadcast %74 : vector<16x1xf32> to vector<16x16xf32>
    %76 = arith.subf %72, %75 : vector<16x16xf32>
    %77 = math.exp %76 : vector<16x16xf32>
    %cst_48 = arith.constant dense<0.000000e+00> : vector<16xf32>
    %78 = vector.multi_reduction <add>, %77, %cst_48 [1] : vector<16x16xf32> to vector<16xf32>
    %79 = vector.shape_cast %78 : vector<16xf32> to vector<16x1xf32>
    %80 = vector.broadcast %79 : vector<16x1xf32> to vector<16x16xf32>
    %81 = arith.divf %77, %80 : vector<16x16xf32>
    %82 = vector.extract_strided_slice %49 {offsets = [0, 16], sizes = [16, 16], strides = [1, 1]} : vector<16x64xf32> to vector<16x16xf32>
    %cst_49 = arith.constant dense<0.000000e+00> : vector<16x16xf32>
    %83 = tpu.matmul %81, %82, %cst_49 {dimension_numbers = #tpu.dot_dimension_numbers<[1], [0], [0], [1], [0, 0, 1, 1], [], []>} : vector<16x16xf32>, vector<16x16xf32>, vector<16x16xf32> -> vector<16x16xf32>
    %84 = vector.extract_strided_slice %35 {offsets = [0, 32], sizes = [16, 16], strides = [1, 1]} : vector<16x64xf32> to vector<16x16xf32>
    %85 = vector.extract_strided_slice %42 {offsets = [0, 32], sizes = [16, 16], strides = [1, 1]} : vector<16x64xf32> to vector<16x16xf32>
    %cst_50 = arith.constant dense<0.000000e+00> : vector<16x16xf32>
    %86 = tpu.matmul %84, %85, %cst_50 {dimension_numbers = #tpu.dot_dimension_numbers<[1], [1], [0], [0], [0, 0, 1, 0], [], []>} : vector<16x16xf32>, vector<16x16xf32>, vector<16x16xf32> -> vector<16x16xf32>
    %cst_51 = arith.constant 2.500000e-01 : f32
    %87 = vector.broadcast %cst_51 : f32 to vector<16x16xf32>
    %88 = arith.mulf %86, %87 : vector<16x16xf32>
    %89 = arith.addf %88, %1 : vector<16x16xf32>
    %cst_52 = arith.constant dense<0xFF800000> : vector<16xf32>
    %90 = vector.multi_reduction <maximumf>, %89, %cst_52 [1] : vector<16x16xf32> to vector<16xf32>
    %91 = vector.shape_cast %90 : vector<16xf32> to vector<16x1xf32>
    %92 = vector.broadcast %91 : vector<16x1xf32> to vector<16x16xf32>
    %93 = arith.subf %89, %92 : vector<16x16xf32>
    %94 = math.exp %93 : vector<16x16xf32>
    %cst_53 = arith.constant dense<0.000000e+00> : vector<16xf32>
    %95 = vector.multi_reduction <add>, %94, %cst_53 [1] : vector<16x16xf32> to vector<16xf32>
    %96 = vector.shape_cast %95 : vector<16xf32> to vector<16x1xf32>
    %97 = vector.broadcast %96 : vector<16x1xf32> to vector<16x16xf32>
    %98 = arith.divf %94, %97 : vector<16x16xf32>
    %99 = vector.extract_strided_slice %49 {offsets = [0, 32], sizes = [16, 16], strides = [1, 1]} : vector<16x64xf32> to vector<16x16xf32>
    %cst_54 = arith.constant dense<0.000000e+00> : vector<16x16xf32>
    %100 = tpu.matmul %98, %99, %cst_54 {dimension_numbers = #tpu.dot_dimension_numbers<[1], [0], [0], [1], [0, 0, 1, 1], [], []>} : vector<16x16xf32>, vector<16x16xf32>, vector<16x16xf32> -> vector<16x16xf32>
    %101 = vector.extract_strided_slice %35 {offsets = [0, 48], sizes = [16, 16], strides = [1, 1]} : vector<16x64xf32> to vector<16x16xf32>
    %102 = vector.extract_strided_slice %42 {offsets = [0, 48], sizes = [16, 16], strides = [1, 1]} : vector<16x64xf32> to vector<16x16xf32>
    %cst_55 = arith.constant dense<0.000000e+00> : vector<16x16xf32>
    %103 = tpu.matmul %101, %102, %cst_55 {dimension_numbers = #tpu.dot_dimension_numbers<[1], [1], [0], [0], [0, 0, 1, 0], [], []>} : vector<16x16xf32>, vector<16x16xf32>, vector<16x16xf32> -> vector<16x16xf32>
    %cst_56 = arith.constant 2.500000e-01 : f32
    %104 = vector.broadcast %cst_56 : f32 to vector<16x16xf32>
    %105 = arith.mulf %103, %104 : vector<16x16xf32>
    %106 = arith.addf %105, %1 : vector<16x16xf32>
    %cst_57 = arith.constant dense<0xFF800000> : vector<16xf32>
    %107 = vector.multi_reduction <maximumf>, %106, %cst_57 [1] : vector<16x16xf32> to vector<16xf32>
    %108 = vector.shape_cast %107 : vector<16xf32> to vector<16x1xf32>
    %109 = vector.broadcast %108 : vector<16x1xf32> to vector<16x16xf32>
    %110 = arith.subf %106, %109 : vector<16x16xf32>
    %111 = math.exp %110 : vector<16x16xf32>
    %cst_58 = arith.constant dense<0.000000e+00> : vector<16xf32>
    %112 = vector.multi_reduction <add>, %111, %cst_58 [1] : vector<16x16xf32> to vector<16xf32>
    %113 = vector.shape_cast %112 : vector<16xf32> to vector<16x1xf32>
    %114 = vector.broadcast %113 : vector<16x1xf32> to vector<16x16xf32>
    %115 = arith.divf %111, %114 : vector<16x16xf32>
    %116 = vector.extract_strided_slice %49 {offsets = [0, 48], sizes = [16, 16], strides = [1, 1]} : vector<16x64xf32> to vector<16x16xf32>
    %cst_59 = arith.constant dense<0.000000e+00> : vector<16x16xf32>
    %117 = tpu.matmul %115, %116, %cst_59 {dimension_numbers = #tpu.dot_dimension_numbers<[1], [0], [0], [1], [0, 0, 1, 1], [], []>} : vector<16x16xf32>, vector<16x16xf32>, vector<16x16xf32> -> vector<16x16xf32>
    %118 = tpu.concatenate %66, %83, %100, %117 in 1 : vector<16x16xf32>, vector<16x16xf32>, vector<16x16xf32>, vector<16x16xf32> -> vector<16x64xf32>
    %c0_60 = arith.constant 0 : index
    %c0_61 = arith.constant 0 : index
    %c0_62 = arith.constant 0 : index
    %119 = vector.load %arg12[%c0_60, %c0_61, %c0_62] : memref<2x64x64xf32, #tpu.memory_space<vmem>>, vector<1x64x64xf32>
    %120 = vector.shape_cast %119 : vector<1x64x64xf32> to vector<64x64xf32>
    %cst_63 = arith.constant dense<0.000000e+00> : vector<16x64xf32>
    %121 = tpu.matmul %118, %120, %cst_63 {dimension_numbers = #tpu.dot_dimension_numbers<[1], [0], [0], [1], [0, 0, 1, 1], [], []>} : vector<16x64xf32>, vector<64x64xf32>, vector<16x64xf32> -> vector<16x64xf32>
    %122 = arith.addf %0, %121 : vector<16x64xf32>
    %c0_64 = arith.constant 0 : index
    %c0_65 = arith.constant 0 : index
    %c0_66 = arith.constant 0 : index
    %123 = vector.load %arg13[%c0_64, %c0_65, %c0_66] : memref<2x1x64xf32, #tpu.memory_space<vmem>>, vector<1x1x64xf32>
    %124 = vector.shape_cast %123 : vector<1x1x64xf32> to vector<1x64xf32>
    %125 = vector.broadcast %124 : vector<1x64xf32> to vector<16x64xf32>
    %126 = arith.addf %122, %125 : vector<16x64xf32>
    %c0_67 = arith.constant 0 : index
    %c0_68 = arith.constant 0 : index
    %c0_69 = arith.constant 0 : index
    %127 = vector.load %arg14[%c0_67, %c0_68, %c0_69] : memref<2x1x64xf32, #tpu.memory_space<vmem>>, vector<1x1x64xf32>
    %128 = vector.shape_cast %127 : vector<1x1x64xf32> to vector<1x64xf32>
    %c0_70 = arith.constant 0 : index
    %c0_71 = arith.constant 0 : index
    %c0_72 = arith.constant 0 : index
    %129 = vector.load %arg15[%c0_70, %c0_71, %c0_72] : memref<2x1x64xf32, #tpu.memory_space<vmem>>, vector<1x1x64xf32>
    %130 = vector.shape_cast %129 : vector<1x1x64xf32> to vector<1x64xf32>
    %cst_73 = arith.constant dense<0.000000e+00> : vector<16xf32>
    %131 = vector.multi_reduction <add>, %126, %cst_73 [1] : vector<16x64xf32> to vector<16xf32>
    %132 = vector.shape_cast %131 : vector<16xf32> to vector<16x1xf32>
    %cst_74 = arith.constant 6.400000e+01 : f32
    %133 = vector.broadcast %cst_74 : f32 to vector<16x1xf32>
    %134 = arith.divf %132, %133 : vector<16x1xf32>
    %135 = vector.broadcast %134 : vector<16x1xf32> to vector<16x64xf32>
    %136 = arith.subf %126, %135 : vector<16x64xf32>
    %137 = arith.mulf %136, %136 : vector<16x64xf32>
    %cst_75 = arith.constant dense<0.000000e+00> : vector<16xf32>
    %138 = vector.multi_reduction <add>, %137, %cst_75 [1] : vector<16x64xf32> to vector<16xf32>
    %139 = vector.shape_cast %138 : vector<16xf32> to vector<16x1xf32>
    %cst_76 = arith.constant 6.400000e+01 : f32
    %140 = vector.broadcast %cst_76 : f32 to vector<16x1xf32>
    %141 = arith.divf %139, %140 : vector<16x1xf32>
    %cst_77 = arith.constant 9.99999974E-6 : f32
    %142 = vector.broadcast %cst_77 : f32 to vector<16x1xf32>
    %143 = arith.addf %141, %142 : vector<16x1xf32>
    %144 = math.rsqrt %143 : vector<16x1xf32>
    %145 = vector.broadcast %144 : vector<16x1xf32> to vector<16x64xf32>
    %146 = arith.mulf %136, %145 : vector<16x64xf32>
    %147 = vector.broadcast %128 : vector<1x64xf32> to vector<16x64xf32>
    %148 = arith.mulf %146, %147 : vector<16x64xf32>
    %149 = vector.broadcast %130 : vector<1x64xf32> to vector<16x64xf32>
    %150 = arith.addf %148, %149 : vector<16x64xf32>
    %c0_78 = arith.constant 0 : index
    %c0_79 = arith.constant 0 : index
    %c0_80 = arith.constant 0 : index
    %151 = vector.load %arg16[%c0_78, %c0_79, %c0_80] : memref<2x64x128xf32, #tpu.memory_space<vmem>>, vector<1x64x128xf32>
    %152 = vector.shape_cast %151 : vector<1x64x128xf32> to vector<64x128xf32>
    %cst_81 = arith.constant dense<0.000000e+00> : vector<16x128xf32>
    %153 = tpu.matmul %150, %152, %cst_81 {dimension_numbers = #tpu.dot_dimension_numbers<[1], [0], [0], [1], [0, 0, 1, 1], [], []>} : vector<16x64xf32>, vector<64x128xf32>, vector<16x128xf32> -> vector<16x128xf32>
    %c0_82 = arith.constant 0 : index
    %c0_83 = arith.constant 0 : index
    %c0_84 = arith.constant 0 : index
    %154 = vector.load %arg17[%c0_82, %c0_83, %c0_84] : memref<2x1x128xf32, #tpu.memory_space<vmem>>, vector<1x1x128xf32>
    %155 = vector.shape_cast %154 : vector<1x1x128xf32> to vector<1x128xf32>
    %156 = vector.broadcast %155 : vector<1x128xf32> to vector<16x128xf32>
    %157 = arith.addf %153, %156 : vector<16x128xf32>
    %cst_85 = arith.constant 0.000000e+00 : f32
    %158 = vector.broadcast %cst_85 : f32 to vector<16x128xf32>
    %159 = arith.maximumf %157, %158 : vector<16x128xf32>
    %c0_86 = arith.constant 0 : index
    %c0_87 = arith.constant 0 : index
    %c0_88 = arith.constant 0 : index
    %160 = vector.load %arg18[%c0_86, %c0_87, %c0_88] : memref<2x128x64xf32, #tpu.memory_space<vmem>>, vector<1x128x64xf32>
    %161 = vector.shape_cast %160 : vector<1x128x64xf32> to vector<128x64xf32>
    %cst_89 = arith.constant dense<0.000000e+00> : vector<16x64xf32>
    %162 = tpu.matmul %159, %161, %cst_89 {dimension_numbers = #tpu.dot_dimension_numbers<[1], [0], [0], [1], [0, 0, 1, 1], [], []>} : vector<16x128xf32>, vector<128x64xf32>, vector<16x64xf32> -> vector<16x64xf32>
    %163 = arith.addf %126, %162 : vector<16x64xf32>
    %c0_90 = arith.constant 0 : index
    %c0_91 = arith.constant 0 : index
    %c0_92 = arith.constant 0 : index
    %164 = vector.load %arg19[%c0_90, %c0_91, %c0_92] : memref<2x1x64xf32, #tpu.memory_space<vmem>>, vector<1x1x64xf32>
    %165 = vector.shape_cast %164 : vector<1x1x64xf32> to vector<1x64xf32>
    %166 = vector.broadcast %165 : vector<1x64xf32> to vector<16x64xf32>
    %167 = arith.addf %163, %166 : vector<16x64xf32>
    %c1 = arith.constant 1 : index
    %c0_93 = arith.constant 0 : index
    %c0_94 = arith.constant 0 : index
    %168 = vector.load %arg4[%c1, %c0_93, %c0_94] : memref<2x1x64xf32, #tpu.memory_space<vmem>>, vector<1x1x64xf32>
    %169 = vector.shape_cast %168 : vector<1x1x64xf32> to vector<1x64xf32>
    %c1_95 = arith.constant 1 : index
    %c0_96 = arith.constant 0 : index
    %c0_97 = arith.constant 0 : index
    %170 = vector.load %arg5[%c1_95, %c0_96, %c0_97] : memref<2x1x64xf32, #tpu.memory_space<vmem>>, vector<1x1x64xf32>
    %171 = vector.shape_cast %170 : vector<1x1x64xf32> to vector<1x64xf32>
    %cst_98 = arith.constant dense<0.000000e+00> : vector<16xf32>
    %172 = vector.multi_reduction <add>, %167, %cst_98 [1] : vector<16x64xf32> to vector<16xf32>
    %173 = vector.shape_cast %172 : vector<16xf32> to vector<16x1xf32>
    %cst_99 = arith.constant 6.400000e+01 : f32
    %174 = vector.broadcast %cst_99 : f32 to vector<16x1xf32>
    %175 = arith.divf %173, %174 : vector<16x1xf32>
    %176 = vector.broadcast %175 : vector<16x1xf32> to vector<16x64xf32>
    %177 = arith.subf %167, %176 : vector<16x64xf32>
    %178 = arith.mulf %177, %177 : vector<16x64xf32>
    %cst_100 = arith.constant dense<0.000000e+00> : vector<16xf32>
    %179 = vector.multi_reduction <add>, %178, %cst_100 [1] : vector<16x64xf32> to vector<16xf32>
    %180 = vector.shape_cast %179 : vector<16xf32> to vector<16x1xf32>
    %cst_101 = arith.constant 6.400000e+01 : f32
    %181 = vector.broadcast %cst_101 : f32 to vector<16x1xf32>
    %182 = arith.divf %180, %181 : vector<16x1xf32>
    %cst_102 = arith.constant 9.99999974E-6 : f32
    %183 = vector.broadcast %cst_102 : f32 to vector<16x1xf32>
    %184 = arith.addf %182, %183 : vector<16x1xf32>
    %185 = math.rsqrt %184 : vector<16x1xf32>
    %186 = vector.broadcast %185 : vector<16x1xf32> to vector<16x64xf32>
    %187 = arith.mulf %177, %186 : vector<16x64xf32>
    %188 = vector.broadcast %169 : vector<1x64xf32> to vector<16x64xf32>
    %189 = arith.mulf %187, %188 : vector<16x64xf32>
    %190 = vector.broadcast %171 : vector<1x64xf32> to vector<16x64xf32>
    %191 = arith.addf %189, %190 : vector<16x64xf32>
    %c1_103 = arith.constant 1 : index
    %c0_104 = arith.constant 0 : index
    %c0_105 = arith.constant 0 : index
    %192 = vector.load %arg6[%c1_103, %c0_104, %c0_105] : memref<2x64x64xf32, #tpu.memory_space<vmem>>, vector<1x64x64xf32>
    %193 = vector.shape_cast %192 : vector<1x64x64xf32> to vector<64x64xf32>
    %cst_106 = arith.constant dense<0.000000e+00> : vector<16x64xf32>
    %194 = tpu.matmul %191, %193, %cst_106 {dimension_numbers = #tpu.dot_dimension_numbers<[1], [0], [0], [1], [0, 0, 1, 1], [], []>} : vector<16x64xf32>, vector<64x64xf32>, vector<16x64xf32> -> vector<16x64xf32>
    %c1_107 = arith.constant 1 : index
    %c0_108 = arith.constant 0 : index
    %c0_109 = arith.constant 0 : index
    %195 = vector.load %arg7[%c1_107, %c0_108, %c0_109] : memref<2x1x64xf32, #tpu.memory_space<vmem>>, vector<1x1x64xf32>
    %196 = vector.shape_cast %195 : vector<1x1x64xf32> to vector<1x64xf32>
    %197 = vector.broadcast %196 : vector<1x64xf32> to vector<16x64xf32>
    %198 = arith.addf %194, %197 : vector<16x64xf32>
    %c1_110 = arith.constant 1 : index
    %c0_111 = arith.constant 0 : index
    %c0_112 = arith.constant 0 : index
    %199 = vector.load %arg8[%c1_110, %c0_111, %c0_112] : memref<2x64x64xf32, #tpu.memory_space<vmem>>, vector<1x64x64xf32>
    %200 = vector.shape_cast %199 : vector<1x64x64xf32> to vector<64x64xf32>
    %cst_113 = arith.constant dense<0.000000e+00> : vector<16x64xf32>
    %201 = tpu.matmul %191, %200, %cst_113 {dimension_numbers = #tpu.dot_dimension_numbers<[1], [0], [0], [1], [0, 0, 1, 1], [], []>} : vector<16x64xf32>, vector<64x64xf32>, vector<16x64xf32> -> vector<16x64xf32>
    %c1_114 = arith.constant 1 : index
    %c0_115 = arith.constant 0 : index
    %c0_116 = arith.constant 0 : index
    %202 = vector.load %arg9[%c1_114, %c0_115, %c0_116] : memref<2x1x64xf32, #tpu.memory_space<vmem>>, vector<1x1x64xf32>
    %203 = vector.shape_cast %202 : vector<1x1x64xf32> to vector<1x64xf32>
    %204 = vector.broadcast %203 : vector<1x64xf32> to vector<16x64xf32>
    %205 = arith.addf %201, %204 : vector<16x64xf32>
    %c1_117 = arith.constant 1 : index
    %c0_118 = arith.constant 0 : index
    %c0_119 = arith.constant 0 : index
    %206 = vector.load %arg10[%c1_117, %c0_118, %c0_119] : memref<2x64x64xf32, #tpu.memory_space<vmem>>, vector<1x64x64xf32>
    %207 = vector.shape_cast %206 : vector<1x64x64xf32> to vector<64x64xf32>
    %cst_120 = arith.constant dense<0.000000e+00> : vector<16x64xf32>
    %208 = tpu.matmul %191, %207, %cst_120 {dimension_numbers = #tpu.dot_dimension_numbers<[1], [0], [0], [1], [0, 0, 1, 1], [], []>} : vector<16x64xf32>, vector<64x64xf32>, vector<16x64xf32> -> vector<16x64xf32>
    %c1_121 = arith.constant 1 : index
    %c0_122 = arith.constant 0 : index
    %c0_123 = arith.constant 0 : index
    %209 = vector.load %arg11[%c1_121, %c0_122, %c0_123] : memref<2x1x64xf32, #tpu.memory_space<vmem>>, vector<1x1x64xf32>
    %210 = vector.shape_cast %209 : vector<1x1x64xf32> to vector<1x64xf32>
    %211 = vector.broadcast %210 : vector<1x64xf32> to vector<16x64xf32>
    %212 = arith.addf %208, %211 : vector<16x64xf32>
    %213 = vector.extract_strided_slice %198 {offsets = [0, 0], sizes = [16, 16], strides = [1, 1]} : vector<16x64xf32> to vector<16x16xf32>
    %214 = vector.extract_strided_slice %205 {offsets = [0, 0], sizes = [16, 16], strides = [1, 1]} : vector<16x64xf32> to vector<16x16xf32>
    %cst_124 = arith.constant dense<0.000000e+00> : vector<16x16xf32>
    %215 = tpu.matmul %213, %214, %cst_124 {dimension_numbers = #tpu.dot_dimension_numbers<[1], [1], [0], [0], [0, 0, 1, 0], [], []>} : vector<16x16xf32>, vector<16x16xf32>, vector<16x16xf32> -> vector<16x16xf32>
    %cst_125 = arith.constant 2.500000e-01 : f32
    %216 = vector.broadcast %cst_125 : f32 to vector<16x16xf32>
    %217 = arith.mulf %215, %216 : vector<16x16xf32>
    %218 = arith.addf %217, %1 : vector<16x16xf32>
    %cst_126 = arith.constant dense<0xFF800000> : vector<16xf32>
    %219 = vector.multi_reduction <maximumf>, %218, %cst_126 [1] : vector<16x16xf32> to vector<16xf32>
    %220 = vector.shape_cast %219 : vector<16xf32> to vector<16x1xf32>
    %221 = vector.broadcast %220 : vector<16x1xf32> to vector<16x16xf32>
    %222 = arith.subf %218, %221 : vector<16x16xf32>
    %223 = math.exp %222 : vector<16x16xf32>
    %cst_127 = arith.constant dense<0.000000e+00> : vector<16xf32>
    %224 = vector.multi_reduction <add>, %223, %cst_127 [1] : vector<16x16xf32> to vector<16xf32>
    %225 = vector.shape_cast %224 : vector<16xf32> to vector<16x1xf32>
    %226 = vector.broadcast %225 : vector<16x1xf32> to vector<16x16xf32>
    %227 = arith.divf %223, %226 : vector<16x16xf32>
    %228 = vector.extract_strided_slice %212 {offsets = [0, 0], sizes = [16, 16], strides = [1, 1]} : vector<16x64xf32> to vector<16x16xf32>
    %cst_128 = arith.constant dense<0.000000e+00> : vector<16x16xf32>
    %229 = tpu.matmul %227, %228, %cst_128 {dimension_numbers = #tpu.dot_dimension_numbers<[1], [0], [0], [1], [0, 0, 1, 1], [], []>} : vector<16x16xf32>, vector<16x16xf32>, vector<16x16xf32> -> vector<16x16xf32>
    %230 = vector.extract_strided_slice %198 {offsets = [0, 16], sizes = [16, 16], strides = [1, 1]} : vector<16x64xf32> to vector<16x16xf32>
    %231 = vector.extract_strided_slice %205 {offsets = [0, 16], sizes = [16, 16], strides = [1, 1]} : vector<16x64xf32> to vector<16x16xf32>
    %cst_129 = arith.constant dense<0.000000e+00> : vector<16x16xf32>
    %232 = tpu.matmul %230, %231, %cst_129 {dimension_numbers = #tpu.dot_dimension_numbers<[1], [1], [0], [0], [0, 0, 1, 0], [], []>} : vector<16x16xf32>, vector<16x16xf32>, vector<16x16xf32> -> vector<16x16xf32>
    %cst_130 = arith.constant 2.500000e-01 : f32
    %233 = vector.broadcast %cst_130 : f32 to vector<16x16xf32>
    %234 = arith.mulf %232, %233 : vector<16x16xf32>
    %235 = arith.addf %234, %1 : vector<16x16xf32>
    %cst_131 = arith.constant dense<0xFF800000> : vector<16xf32>
    %236 = vector.multi_reduction <maximumf>, %235, %cst_131 [1] : vector<16x16xf32> to vector<16xf32>
    %237 = vector.shape_cast %236 : vector<16xf32> to vector<16x1xf32>
    %238 = vector.broadcast %237 : vector<16x1xf32> to vector<16x16xf32>
    %239 = arith.subf %235, %238 : vector<16x16xf32>
    %240 = math.exp %239 : vector<16x16xf32>
    %cst_132 = arith.constant dense<0.000000e+00> : vector<16xf32>
    %241 = vector.multi_reduction <add>, %240, %cst_132 [1] : vector<16x16xf32> to vector<16xf32>
    %242 = vector.shape_cast %241 : vector<16xf32> to vector<16x1xf32>
    %243 = vector.broadcast %242 : vector<16x1xf32> to vector<16x16xf32>
    %244 = arith.divf %240, %243 : vector<16x16xf32>
    %245 = vector.extract_strided_slice %212 {offsets = [0, 16], sizes = [16, 16], strides = [1, 1]} : vector<16x64xf32> to vector<16x16xf32>
    %cst_133 = arith.constant dense<0.000000e+00> : vector<16x16xf32>
    %246 = tpu.matmul %244, %245, %cst_133 {dimension_numbers = #tpu.dot_dimension_numbers<[1], [0], [0], [1], [0, 0, 1, 1], [], []>} : vector<16x16xf32>, vector<16x16xf32>, vector<16x16xf32> -> vector<16x16xf32>
    %247 = vector.extract_strided_slice %198 {offsets = [0, 32], sizes = [16, 16], strides = [1, 1]} : vector<16x64xf32> to vector<16x16xf32>
    %248 = vector.extract_strided_slice %205 {offsets = [0, 32], sizes = [16, 16], strides = [1, 1]} : vector<16x64xf32> to vector<16x16xf32>
    %cst_134 = arith.constant dense<0.000000e+00> : vector<16x16xf32>
    %249 = tpu.matmul %247, %248, %cst_134 {dimension_numbers = #tpu.dot_dimension_numbers<[1], [1], [0], [0], [0, 0, 1, 0], [], []>} : vector<16x16xf32>, vector<16x16xf32>, vector<16x16xf32> -> vector<16x16xf32>
    %cst_135 = arith.constant 2.500000e-01 : f32
    %250 = vector.broadcast %cst_135 : f32 to vector<16x16xf32>
    %251 = arith.mulf %249, %250 : vector<16x16xf32>
    %252 = arith.addf %251, %1 : vector<16x16xf32>
    %cst_136 = arith.constant dense<0xFF800000> : vector<16xf32>
    %253 = vector.multi_reduction <maximumf>, %252, %cst_136 [1] : vector<16x16xf32> to vector<16xf32>
    %254 = vector.shape_cast %253 : vector<16xf32> to vector<16x1xf32>
    %255 = vector.broadcast %254 : vector<16x1xf32> to vector<16x16xf32>
    %256 = arith.subf %252, %255 : vector<16x16xf32>
    %257 = math.exp %256 : vector<16x16xf32>
    %cst_137 = arith.constant dense<0.000000e+00> : vector<16xf32>
    %258 = vector.multi_reduction <add>, %257, %cst_137 [1] : vector<16x16xf32> to vector<16xf32>
    %259 = vector.shape_cast %258 : vector<16xf32> to vector<16x1xf32>
    %260 = vector.broadcast %259 : vector<16x1xf32> to vector<16x16xf32>
    %261 = arith.divf %257, %260 : vector<16x16xf32>
    %262 = vector.extract_strided_slice %212 {offsets = [0, 32], sizes = [16, 16], strides = [1, 1]} : vector<16x64xf32> to vector<16x16xf32>
    %cst_138 = arith.constant dense<0.000000e+00> : vector<16x16xf32>
    %263 = tpu.matmul %261, %262, %cst_138 {dimension_numbers = #tpu.dot_dimension_numbers<[1], [0], [0], [1], [0, 0, 1, 1], [], []>} : vector<16x16xf32>, vector<16x16xf32>, vector<16x16xf32> -> vector<16x16xf32>
    %264 = vector.extract_strided_slice %198 {offsets = [0, 48], sizes = [16, 16], strides = [1, 1]} : vector<16x64xf32> to vector<16x16xf32>
    %265 = vector.extract_strided_slice %205 {offsets = [0, 48], sizes = [16, 16], strides = [1, 1]} : vector<16x64xf32> to vector<16x16xf32>
    %cst_139 = arith.constant dense<0.000000e+00> : vector<16x16xf32>
    %266 = tpu.matmul %264, %265, %cst_139 {dimension_numbers = #tpu.dot_dimension_numbers<[1], [1], [0], [0], [0, 0, 1, 0], [], []>} : vector<16x16xf32>, vector<16x16xf32>, vector<16x16xf32> -> vector<16x16xf32>
    %cst_140 = arith.constant 2.500000e-01 : f32
    %267 = vector.broadcast %cst_140 : f32 to vector<16x16xf32>
    %268 = arith.mulf %266, %267 : vector<16x16xf32>
    %269 = arith.addf %268, %1 : vector<16x16xf32>
    %cst_141 = arith.constant dense<0xFF800000> : vector<16xf32>
    %270 = vector.multi_reduction <maximumf>, %269, %cst_141 [1] : vector<16x16xf32> to vector<16xf32>
    %271 = vector.shape_cast %270 : vector<16xf32> to vector<16x1xf32>
    %272 = vector.broadcast %271 : vector<16x1xf32> to vector<16x16xf32>
    %273 = arith.subf %269, %272 : vector<16x16xf32>
    %274 = math.exp %273 : vector<16x16xf32>
    %cst_142 = arith.constant dense<0.000000e+00> : vector<16xf32>
    %275 = vector.multi_reduction <add>, %274, %cst_142 [1] : vector<16x16xf32> to vector<16xf32>
    %276 = vector.shape_cast %275 : vector<16xf32> to vector<16x1xf32>
    %277 = vector.broadcast %276 : vector<16x1xf32> to vector<16x16xf32>
    %278 = arith.divf %274, %277 : vector<16x16xf32>
    %279 = vector.extract_strided_slice %212 {offsets = [0, 48], sizes = [16, 16], strides = [1, 1]} : vector<16x64xf32> to vector<16x16xf32>
    %cst_143 = arith.constant dense<0.000000e+00> : vector<16x16xf32>
    %280 = tpu.matmul %278, %279, %cst_143 {dimension_numbers = #tpu.dot_dimension_numbers<[1], [0], [0], [1], [0, 0, 1, 1], [], []>} : vector<16x16xf32>, vector<16x16xf32>, vector<16x16xf32> -> vector<16x16xf32>
    %281 = tpu.concatenate %229, %246, %263, %280 in 1 : vector<16x16xf32>, vector<16x16xf32>, vector<16x16xf32>, vector<16x16xf32> -> vector<16x64xf32>
    %c1_144 = arith.constant 1 : index
    %c0_145 = arith.constant 0 : index
    %c0_146 = arith.constant 0 : index
    %282 = vector.load %arg12[%c1_144, %c0_145, %c0_146] : memref<2x64x64xf32, #tpu.memory_space<vmem>>, vector<1x64x64xf32>
    %283 = vector.shape_cast %282 : vector<1x64x64xf32> to vector<64x64xf32>
    %cst_147 = arith.constant dense<0.000000e+00> : vector<16x64xf32>
    %284 = tpu.matmul %281, %283, %cst_147 {dimension_numbers = #tpu.dot_dimension_numbers<[1], [0], [0], [1], [0, 0, 1, 1], [], []>} : vector<16x64xf32>, vector<64x64xf32>, vector<16x64xf32> -> vector<16x64xf32>
    %285 = arith.addf %167, %284 : vector<16x64xf32>
    %c1_148 = arith.constant 1 : index
    %c0_149 = arith.constant 0 : index
    %c0_150 = arith.constant 0 : index
    %286 = vector.load %arg13[%c1_148, %c0_149, %c0_150] : memref<2x1x64xf32, #tpu.memory_space<vmem>>, vector<1x1x64xf32>
    %287 = vector.shape_cast %286 : vector<1x1x64xf32> to vector<1x64xf32>
    %288 = vector.broadcast %287 : vector<1x64xf32> to vector<16x64xf32>
    %289 = arith.addf %285, %288 : vector<16x64xf32>
    %c1_151 = arith.constant 1 : index
    %c0_152 = arith.constant 0 : index
    %c0_153 = arith.constant 0 : index
    %290 = vector.load %arg14[%c1_151, %c0_152, %c0_153] : memref<2x1x64xf32, #tpu.memory_space<vmem>>, vector<1x1x64xf32>
    %291 = vector.shape_cast %290 : vector<1x1x64xf32> to vector<1x64xf32>
    %c1_154 = arith.constant 1 : index
    %c0_155 = arith.constant 0 : index
    %c0_156 = arith.constant 0 : index
    %292 = vector.load %arg15[%c1_154, %c0_155, %c0_156] : memref<2x1x64xf32, #tpu.memory_space<vmem>>, vector<1x1x64xf32>
    %293 = vector.shape_cast %292 : vector<1x1x64xf32> to vector<1x64xf32>
    %cst_157 = arith.constant dense<0.000000e+00> : vector<16xf32>
    %294 = vector.multi_reduction <add>, %289, %cst_157 [1] : vector<16x64xf32> to vector<16xf32>
    %295 = vector.shape_cast %294 : vector<16xf32> to vector<16x1xf32>
    %cst_158 = arith.constant 6.400000e+01 : f32
    %296 = vector.broadcast %cst_158 : f32 to vector<16x1xf32>
    %297 = arith.divf %295, %296 : vector<16x1xf32>
    %298 = vector.broadcast %297 : vector<16x1xf32> to vector<16x64xf32>
    %299 = arith.subf %289, %298 : vector<16x64xf32>
    %300 = arith.mulf %299, %299 : vector<16x64xf32>
    %cst_159 = arith.constant dense<0.000000e+00> : vector<16xf32>
    %301 = vector.multi_reduction <add>, %300, %cst_159 [1] : vector<16x64xf32> to vector<16xf32>
    %302 = vector.shape_cast %301 : vector<16xf32> to vector<16x1xf32>
    %cst_160 = arith.constant 6.400000e+01 : f32
    %303 = vector.broadcast %cst_160 : f32 to vector<16x1xf32>
    %304 = arith.divf %302, %303 : vector<16x1xf32>
    %cst_161 = arith.constant 9.99999974E-6 : f32
    %305 = vector.broadcast %cst_161 : f32 to vector<16x1xf32>
    %306 = arith.addf %304, %305 : vector<16x1xf32>
    %307 = math.rsqrt %306 : vector<16x1xf32>
    %308 = vector.broadcast %307 : vector<16x1xf32> to vector<16x64xf32>
    %309 = arith.mulf %299, %308 : vector<16x64xf32>
    %310 = vector.broadcast %291 : vector<1x64xf32> to vector<16x64xf32>
    %311 = arith.mulf %309, %310 : vector<16x64xf32>
    %312 = vector.broadcast %293 : vector<1x64xf32> to vector<16x64xf32>
    %313 = arith.addf %311, %312 : vector<16x64xf32>
    %c1_162 = arith.constant 1 : index
    %c0_163 = arith.constant 0 : index
    %c0_164 = arith.constant 0 : index
    %314 = vector.load %arg16[%c1_162, %c0_163, %c0_164] : memref<2x64x128xf32, #tpu.memory_space<vmem>>, vector<1x64x128xf32>
    %315 = vector.shape_cast %314 : vector<1x64x128xf32> to vector<64x128xf32>
    %cst_165 = arith.constant dense<0.000000e+00> : vector<16x128xf32>
    %316 = tpu.matmul %313, %315, %cst_165 {dimension_numbers = #tpu.dot_dimension_numbers<[1], [0], [0], [1], [0, 0, 1, 1], [], []>} : vector<16x64xf32>, vector<64x128xf32>, vector<16x128xf32> -> vector<16x128xf32>
    %c1_166 = arith.constant 1 : index
    %c0_167 = arith.constant 0 : index
    %c0_168 = arith.constant 0 : index
    %317 = vector.load %arg17[%c1_166, %c0_167, %c0_168] : memref<2x1x128xf32, #tpu.memory_space<vmem>>, vector<1x1x128xf32>
    %318 = vector.shape_cast %317 : vector<1x1x128xf32> to vector<1x128xf32>
    %319 = vector.broadcast %318 : vector<1x128xf32> to vector<16x128xf32>
    %320 = arith.addf %316, %319 : vector<16x128xf32>
    %cst_169 = arith.constant 0.000000e+00 : f32
    %321 = vector.broadcast %cst_169 : f32 to vector<16x128xf32>
    %322 = arith.maximumf %320, %321 : vector<16x128xf32>
    %c1_170 = arith.constant 1 : index
    %c0_171 = arith.constant 0 : index
    %c0_172 = arith.constant 0 : index
    %323 = vector.load %arg18[%c1_170, %c0_171, %c0_172] : memref<2x128x64xf32, #tpu.memory_space<vmem>>, vector<1x128x64xf32>
    %324 = vector.shape_cast %323 : vector<1x128x64xf32> to vector<128x64xf32>
    %cst_173 = arith.constant dense<0.000000e+00> : vector<16x64xf32>
    %325 = tpu.matmul %322, %324, %cst_173 {dimension_numbers = #tpu.dot_dimension_numbers<[1], [0], [0], [1], [0, 0, 1, 1], [], []>} : vector<16x128xf32>, vector<128x64xf32>, vector<16x64xf32> -> vector<16x64xf32>
    %326 = arith.addf %289, %325 : vector<16x64xf32>
    %c1_174 = arith.constant 1 : index
    %c0_175 = arith.constant 0 : index
    %c0_176 = arith.constant 0 : index
    %327 = vector.load %arg19[%c1_174, %c0_175, %c0_176] : memref<2x1x64xf32, #tpu.memory_space<vmem>>, vector<1x1x64xf32>
    %328 = vector.shape_cast %327 : vector<1x1x64xf32> to vector<1x64xf32>
    %329 = vector.broadcast %328 : vector<1x64xf32> to vector<16x64xf32>
    %330 = arith.addf %326, %329 : vector<16x64xf32>
    %cst_177 = arith.constant dense<0.000000e+00> : vector<16xf32>
    %331 = vector.multi_reduction <add>, %330, %cst_177 [1] : vector<16x64xf32> to vector<16xf32>
    %332 = vector.shape_cast %331 : vector<16xf32> to vector<16x1xf32>
    %cst_178 = arith.constant 6.400000e+01 : f32
    %333 = vector.broadcast %cst_178 : f32 to vector<16x1xf32>
    %334 = arith.divf %332, %333 : vector<16x1xf32>
    %335 = vector.broadcast %334 : vector<16x1xf32> to vector<16x64xf32>
    %336 = arith.subf %330, %335 : vector<16x64xf32>
    %337 = arith.mulf %336, %336 : vector<16x64xf32>
    %cst_179 = arith.constant dense<0.000000e+00> : vector<16xf32>
    %338 = vector.multi_reduction <add>, %337, %cst_179 [1] : vector<16x64xf32> to vector<16xf32>
    %339 = vector.shape_cast %338 : vector<16xf32> to vector<16x1xf32>
    %cst_180 = arith.constant 6.400000e+01 : f32
    %340 = vector.broadcast %cst_180 : f32 to vector<16x1xf32>
    %341 = arith.divf %339, %340 : vector<16x1xf32>
    %cst_181 = arith.constant 9.99999974E-6 : f32
    %342 = vector.broadcast %cst_181 : f32 to vector<16x1xf32>
    %343 = arith.addf %341, %342 : vector<16x1xf32>
    %344 = math.rsqrt %343 : vector<16x1xf32>
    %345 = vector.broadcast %344 : vector<16x1xf32> to vector<16x64xf32>
    %346 = arith.mulf %336, %345 : vector<16x64xf32>
    %347 = vector.broadcast %3 : vector<1x64xf32> to vector<16x64xf32>
    %348 = arith.mulf %346, %347 : vector<16x64xf32>
    %349 = vector.broadcast %4 : vector<1x64xf32> to vector<16x64xf32>
    %350 = arith.addf %348, %349 : vector<16x64xf32>
    %cst_182 = arith.constant dense<0.000000e+00> : vector<2x64xf32>
    %351 = tpu.matmul %2, %350, %cst_182 {dimension_numbers = #tpu.dot_dimension_numbers<[1], [0], [0], [1], [0, 0, 1, 1], [], []>} : vector<2x16xf32>, vector<16x64xf32>, vector<2x64xf32> -> vector<2x64xf32>
    %c0_183 = arith.constant 0 : index
    %c0_184 = arith.constant 0 : index
    %352 = vector.load %arg22[%c0_183, %c0_184] : memref<32x32xf32, #tpu.memory_space<vmem>>, vector<32x32xf32>
    %c0_185 = arith.constant 0 : index
    %c0_186 = arith.constant 0 : index
    %353 = vector.load %arg23[%c0_185, %c0_186] : memref<32x32xf32, #tpu.memory_space<vmem>>, vector<32x32xf32>
    %c0_187 = arith.constant 0 : index
    %c0_188 = arith.constant 0 : index
    %354 = vector.load %arg24[%c0_187, %c0_188] : memref<2x32xf32, #tpu.memory_space<vmem>>, vector<2x32xf32>
    %c0_189 = arith.constant 0 : index
    %c0_190 = arith.constant 0 : index
    %355 = vector.load %arg41[%c0_189, %c0_190] : memref<1x32xf32, #tpu.memory_space<vmem>>, vector<1x32xf32>
    %c0_191 = arith.constant 0 : index
    %c0_192 = arith.constant 0 : index
    %356 = vector.load %arg42[%c0_191, %c0_192] : memref<1x32xf32, #tpu.memory_space<vmem>>, vector<1x32xf32>
    %c0_193 = arith.constant 0 : index
    %c0_194 = arith.constant 0 : index
    %c0_195 = arith.constant 0 : index
    %357 = vector.load %arg25[%c0_193, %c0_194, %c0_195] : memref<2x1x32xf32, #tpu.memory_space<vmem>>, vector<1x1x32xf32>
    %358 = vector.shape_cast %357 : vector<1x1x32xf32> to vector<1x32xf32>
    %c0_196 = arith.constant 0 : index
    %c0_197 = arith.constant 0 : index
    %c0_198 = arith.constant 0 : index
    %359 = vector.load %arg26[%c0_196, %c0_197, %c0_198] : memref<2x1x32xf32, #tpu.memory_space<vmem>>, vector<1x1x32xf32>
    %360 = vector.shape_cast %359 : vector<1x1x32xf32> to vector<1x32xf32>
    %cst_199 = arith.constant dense<0.000000e+00> : vector<32xf32>
    %361 = vector.multi_reduction <add>, %352, %cst_199 [1] : vector<32x32xf32> to vector<32xf32>
    %362 = vector.shape_cast %361 : vector<32xf32> to vector<32x1xf32>
    %cst_200 = arith.constant 3.200000e+01 : f32
    %363 = vector.broadcast %cst_200 : f32 to vector<32x1xf32>
    %364 = arith.divf %362, %363 : vector<32x1xf32>
    %365 = vector.broadcast %364 : vector<32x1xf32> to vector<32x32xf32>
    %366 = arith.subf %352, %365 : vector<32x32xf32>
    %367 = arith.mulf %366, %366 : vector<32x32xf32>
    %cst_201 = arith.constant dense<0.000000e+00> : vector<32xf32>
    %368 = vector.multi_reduction <add>, %367, %cst_201 [1] : vector<32x32xf32> to vector<32xf32>
    %369 = vector.shape_cast %368 : vector<32xf32> to vector<32x1xf32>
    %cst_202 = arith.constant 3.200000e+01 : f32
    %370 = vector.broadcast %cst_202 : f32 to vector<32x1xf32>
    %371 = arith.divf %369, %370 : vector<32x1xf32>
    %cst_203 = arith.constant 9.99999974E-6 : f32
    %372 = vector.broadcast %cst_203 : f32 to vector<32x1xf32>
    %373 = arith.addf %371, %372 : vector<32x1xf32>
    %374 = math.rsqrt %373 : vector<32x1xf32>
    %375 = vector.broadcast %374 : vector<32x1xf32> to vector<32x32xf32>
    %376 = arith.mulf %366, %375 : vector<32x32xf32>
    %377 = vector.broadcast %358 : vector<1x32xf32> to vector<32x32xf32>
    %378 = arith.mulf %376, %377 : vector<32x32xf32>
    %379 = vector.broadcast %360 : vector<1x32xf32> to vector<32x32xf32>
    %380 = arith.addf %378, %379 : vector<32x32xf32>
    %c0_204 = arith.constant 0 : index
    %c0_205 = arith.constant 0 : index
    %c0_206 = arith.constant 0 : index
    %381 = vector.load %arg27[%c0_204, %c0_205, %c0_206] : memref<2x32x32xf32, #tpu.memory_space<vmem>>, vector<1x32x32xf32>
    %382 = vector.shape_cast %381 : vector<1x32x32xf32> to vector<32x32xf32>
    %cst_207 = arith.constant dense<0.000000e+00> : vector<32x32xf32>
    %383 = tpu.matmul %380, %382, %cst_207 {dimension_numbers = #tpu.dot_dimension_numbers<[1], [0], [0], [1], [0, 0, 1, 1], [], []>} : vector<32x32xf32>, vector<32x32xf32>, vector<32x32xf32> -> vector<32x32xf32>
    %c0_208 = arith.constant 0 : index
    %c0_209 = arith.constant 0 : index
    %c0_210 = arith.constant 0 : index
    %384 = vector.load %arg28[%c0_208, %c0_209, %c0_210] : memref<2x1x32xf32, #tpu.memory_space<vmem>>, vector<1x1x32xf32>
    %385 = vector.shape_cast %384 : vector<1x1x32xf32> to vector<1x32xf32>
    %386 = vector.broadcast %385 : vector<1x32xf32> to vector<32x32xf32>
    %387 = arith.addf %383, %386 : vector<32x32xf32>
    %c0_211 = arith.constant 0 : index
    %c0_212 = arith.constant 0 : index
    %c0_213 = arith.constant 0 : index
    %388 = vector.load %arg29[%c0_211, %c0_212, %c0_213] : memref<2x32x32xf32, #tpu.memory_space<vmem>>, vector<1x32x32xf32>
    %389 = vector.shape_cast %388 : vector<1x32x32xf32> to vector<32x32xf32>
    %cst_214 = arith.constant dense<0.000000e+00> : vector<32x32xf32>
    %390 = tpu.matmul %380, %389, %cst_214 {dimension_numbers = #tpu.dot_dimension_numbers<[1], [0], [0], [1], [0, 0, 1, 1], [], []>} : vector<32x32xf32>, vector<32x32xf32>, vector<32x32xf32> -> vector<32x32xf32>
    %c0_215 = arith.constant 0 : index
    %c0_216 = arith.constant 0 : index
    %c0_217 = arith.constant 0 : index
    %391 = vector.load %arg30[%c0_215, %c0_216, %c0_217] : memref<2x1x32xf32, #tpu.memory_space<vmem>>, vector<1x1x32xf32>
    %392 = vector.shape_cast %391 : vector<1x1x32xf32> to vector<1x32xf32>
    %393 = vector.broadcast %392 : vector<1x32xf32> to vector<32x32xf32>
    %394 = arith.addf %390, %393 : vector<32x32xf32>
    %c0_218 = arith.constant 0 : index
    %c0_219 = arith.constant 0 : index
    %c0_220 = arith.constant 0 : index
    %395 = vector.load %arg31[%c0_218, %c0_219, %c0_220] : memref<2x32x32xf32, #tpu.memory_space<vmem>>, vector<1x32x32xf32>
    %396 = vector.shape_cast %395 : vector<1x32x32xf32> to vector<32x32xf32>
    %cst_221 = arith.constant dense<0.000000e+00> : vector<32x32xf32>
    %397 = tpu.matmul %380, %396, %cst_221 {dimension_numbers = #tpu.dot_dimension_numbers<[1], [0], [0], [1], [0, 0, 1, 1], [], []>} : vector<32x32xf32>, vector<32x32xf32>, vector<32x32xf32> -> vector<32x32xf32>
    %c0_222 = arith.constant 0 : index
    %c0_223 = arith.constant 0 : index
    %c0_224 = arith.constant 0 : index
    %398 = vector.load %arg32[%c0_222, %c0_223, %c0_224] : memref<2x1x32xf32, #tpu.memory_space<vmem>>, vector<1x1x32xf32>
    %399 = vector.shape_cast %398 : vector<1x1x32xf32> to vector<1x32xf32>
    %400 = vector.broadcast %399 : vector<1x32xf32> to vector<32x32xf32>
    %401 = arith.addf %397, %400 : vector<32x32xf32>
    %402 = vector.extract_strided_slice %387 {offsets = [0, 0], sizes = [32, 8], strides = [1, 1]} : vector<32x32xf32> to vector<32x8xf32>
    %403 = vector.extract_strided_slice %394 {offsets = [0, 0], sizes = [32, 8], strides = [1, 1]} : vector<32x32xf32> to vector<32x8xf32>
    %cst_225 = arith.constant dense<0.000000e+00> : vector<32x32xf32>
    %404 = tpu.matmul %402, %403, %cst_225 {dimension_numbers = #tpu.dot_dimension_numbers<[1], [1], [0], [0], [0, 0, 1, 0], [], []>} : vector<32x8xf32>, vector<32x8xf32>, vector<32x32xf32> -> vector<32x32xf32>
    %cst_226 = arith.constant 0.353553385 : f32
    %405 = vector.broadcast %cst_226 : f32 to vector<32x32xf32>
    %406 = arith.mulf %404, %405 : vector<32x32xf32>
    %407 = arith.addf %406, %353 : vector<32x32xf32>
    %cst_227 = arith.constant dense<0xFF800000> : vector<32xf32>
    %408 = vector.multi_reduction <maximumf>, %407, %cst_227 [1] : vector<32x32xf32> to vector<32xf32>
    %409 = vector.shape_cast %408 : vector<32xf32> to vector<32x1xf32>
    %410 = vector.broadcast %409 : vector<32x1xf32> to vector<32x32xf32>
    %411 = arith.subf %407, %410 : vector<32x32xf32>
    %412 = math.exp %411 : vector<32x32xf32>
    %cst_228 = arith.constant dense<0.000000e+00> : vector<32xf32>
    %413 = vector.multi_reduction <add>, %412, %cst_228 [1] : vector<32x32xf32> to vector<32xf32>
    %414 = vector.shape_cast %413 : vector<32xf32> to vector<32x1xf32>
    %415 = vector.broadcast %414 : vector<32x1xf32> to vector<32x32xf32>
    %416 = arith.divf %412, %415 : vector<32x32xf32>
    %417 = vector.extract_strided_slice %401 {offsets = [0, 0], sizes = [32, 8], strides = [1, 1]} : vector<32x32xf32> to vector<32x8xf32>
    %cst_229 = arith.constant dense<0.000000e+00> : vector<32x8xf32>
    %418 = tpu.matmul %416, %417, %cst_229 {dimension_numbers = #tpu.dot_dimension_numbers<[1], [0], [0], [1], [0, 0, 1, 1], [], []>} : vector<32x32xf32>, vector<32x8xf32>, vector<32x8xf32> -> vector<32x8xf32>
    %419 = vector.extract_strided_slice %387 {offsets = [0, 8], sizes = [32, 8], strides = [1, 1]} : vector<32x32xf32> to vector<32x8xf32>
    %420 = vector.extract_strided_slice %394 {offsets = [0, 8], sizes = [32, 8], strides = [1, 1]} : vector<32x32xf32> to vector<32x8xf32>
    %cst_230 = arith.constant dense<0.000000e+00> : vector<32x32xf32>
    %421 = tpu.matmul %419, %420, %cst_230 {dimension_numbers = #tpu.dot_dimension_numbers<[1], [1], [0], [0], [0, 0, 1, 0], [], []>} : vector<32x8xf32>, vector<32x8xf32>, vector<32x32xf32> -> vector<32x32xf32>
    %cst_231 = arith.constant 0.353553385 : f32
    %422 = vector.broadcast %cst_231 : f32 to vector<32x32xf32>
    %423 = arith.mulf %421, %422 : vector<32x32xf32>
    %424 = arith.addf %423, %353 : vector<32x32xf32>
    %cst_232 = arith.constant dense<0xFF800000> : vector<32xf32>
    %425 = vector.multi_reduction <maximumf>, %424, %cst_232 [1] : vector<32x32xf32> to vector<32xf32>
    %426 = vector.shape_cast %425 : vector<32xf32> to vector<32x1xf32>
    %427 = vector.broadcast %426 : vector<32x1xf32> to vector<32x32xf32>
    %428 = arith.subf %424, %427 : vector<32x32xf32>
    %429 = math.exp %428 : vector<32x32xf32>
    %cst_233 = arith.constant dense<0.000000e+00> : vector<32xf32>
    %430 = vector.multi_reduction <add>, %429, %cst_233 [1] : vector<32x32xf32> to vector<32xf32>
    %431 = vector.shape_cast %430 : vector<32xf32> to vector<32x1xf32>
    %432 = vector.broadcast %431 : vector<32x1xf32> to vector<32x32xf32>
    %433 = arith.divf %429, %432 : vector<32x32xf32>
    %434 = vector.extract_strided_slice %401 {offsets = [0, 8], sizes = [32, 8], strides = [1, 1]} : vector<32x32xf32> to vector<32x8xf32>
    %cst_234 = arith.constant dense<0.000000e+00> : vector<32x8xf32>
    %435 = tpu.matmul %433, %434, %cst_234 {dimension_numbers = #tpu.dot_dimension_numbers<[1], [0], [0], [1], [0, 0, 1, 1], [], []>} : vector<32x32xf32>, vector<32x8xf32>, vector<32x8xf32> -> vector<32x8xf32>
    %436 = vector.extract_strided_slice %387 {offsets = [0, 16], sizes = [32, 8], strides = [1, 1]} : vector<32x32xf32> to vector<32x8xf32>
    %437 = vector.extract_strided_slice %394 {offsets = [0, 16], sizes = [32, 8], strides = [1, 1]} : vector<32x32xf32> to vector<32x8xf32>
    %cst_235 = arith.constant dense<0.000000e+00> : vector<32x32xf32>
    %438 = tpu.matmul %436, %437, %cst_235 {dimension_numbers = #tpu.dot_dimension_numbers<[1], [1], [0], [0], [0, 0, 1, 0], [], []>} : vector<32x8xf32>, vector<32x8xf32>, vector<32x32xf32> -> vector<32x32xf32>
    %cst_236 = arith.constant 0.353553385 : f32
    %439 = vector.broadcast %cst_236 : f32 to vector<32x32xf32>
    %440 = arith.mulf %438, %439 : vector<32x32xf32>
    %441 = arith.addf %440, %353 : vector<32x32xf32>
    %cst_237 = arith.constant dense<0xFF800000> : vector<32xf32>
    %442 = vector.multi_reduction <maximumf>, %441, %cst_237 [1] : vector<32x32xf32> to vector<32xf32>
    %443 = vector.shape_cast %442 : vector<32xf32> to vector<32x1xf32>
    %444 = vector.broadcast %443 : vector<32x1xf32> to vector<32x32xf32>
    %445 = arith.subf %441, %444 : vector<32x32xf32>
    %446 = math.exp %445 : vector<32x32xf32>
    %cst_238 = arith.constant dense<0.000000e+00> : vector<32xf32>
    %447 = vector.multi_reduction <add>, %446, %cst_238 [1] : vector<32x32xf32> to vector<32xf32>
    %448 = vector.shape_cast %447 : vector<32xf32> to vector<32x1xf32>
    %449 = vector.broadcast %448 : vector<32x1xf32> to vector<32x32xf32>
    %450 = arith.divf %446, %449 : vector<32x32xf32>
    %451 = vector.extract_strided_slice %401 {offsets = [0, 16], sizes = [32, 8], strides = [1, 1]} : vector<32x32xf32> to vector<32x8xf32>
    %cst_239 = arith.constant dense<0.000000e+00> : vector<32x8xf32>
    %452 = tpu.matmul %450, %451, %cst_239 {dimension_numbers = #tpu.dot_dimension_numbers<[1], [0], [0], [1], [0, 0, 1, 1], [], []>} : vector<32x32xf32>, vector<32x8xf32>, vector<32x8xf32> -> vector<32x8xf32>
    %453 = vector.extract_strided_slice %387 {offsets = [0, 24], sizes = [32, 8], strides = [1, 1]} : vector<32x32xf32> to vector<32x8xf32>
    %454 = vector.extract_strided_slice %394 {offsets = [0, 24], sizes = [32, 8], strides = [1, 1]} : vector<32x32xf32> to vector<32x8xf32>
    %cst_240 = arith.constant dense<0.000000e+00> : vector<32x32xf32>
    %455 = tpu.matmul %453, %454, %cst_240 {dimension_numbers = #tpu.dot_dimension_numbers<[1], [1], [0], [0], [0, 0, 1, 0], [], []>} : vector<32x8xf32>, vector<32x8xf32>, vector<32x32xf32> -> vector<32x32xf32>
    %cst_241 = arith.constant 0.353553385 : f32
    %456 = vector.broadcast %cst_241 : f32 to vector<32x32xf32>
    %457 = arith.mulf %455, %456 : vector<32x32xf32>
    %458 = arith.addf %457, %353 : vector<32x32xf32>
    %cst_242 = arith.constant dense<0xFF800000> : vector<32xf32>
    %459 = vector.multi_reduction <maximumf>, %458, %cst_242 [1] : vector<32x32xf32> to vector<32xf32>
    %460 = vector.shape_cast %459 : vector<32xf32> to vector<32x1xf32>
    %461 = vector.broadcast %460 : vector<32x1xf32> to vector<32x32xf32>
    %462 = arith.subf %458, %461 : vector<32x32xf32>
    %463 = math.exp %462 : vector<32x32xf32>
    %cst_243 = arith.constant dense<0.000000e+00> : vector<32xf32>
    %464 = vector.multi_reduction <add>, %463, %cst_243 [1] : vector<32x32xf32> to vector<32xf32>
    %465 = vector.shape_cast %464 : vector<32xf32> to vector<32x1xf32>
    %466 = vector.broadcast %465 : vector<32x1xf32> to vector<32x32xf32>
    %467 = arith.divf %463, %466 : vector<32x32xf32>
    %468 = vector.extract_strided_slice %401 {offsets = [0, 24], sizes = [32, 8], strides = [1, 1]} : vector<32x32xf32> to vector<32x8xf32>
    %cst_244 = arith.constant dense<0.000000e+00> : vector<32x8xf32>
    %469 = tpu.matmul %467, %468, %cst_244 {dimension_numbers = #tpu.dot_dimension_numbers<[1], [0], [0], [1], [0, 0, 1, 1], [], []>} : vector<32x32xf32>, vector<32x8xf32>, vector<32x8xf32> -> vector<32x8xf32>
    %470 = tpu.concatenate %418, %435, %452, %469 in 1 : vector<32x8xf32>, vector<32x8xf32>, vector<32x8xf32>, vector<32x8xf32> -> vector<32x32xf32>
    %c0_245 = arith.constant 0 : index
    %c0_246 = arith.constant 0 : index
    %c0_247 = arith.constant 0 : index
    %471 = vector.load %arg33[%c0_245, %c0_246, %c0_247] : memref<2x32x32xf32, #tpu.memory_space<vmem>>, vector<1x32x32xf32>
    %472 = vector.shape_cast %471 : vector<1x32x32xf32> to vector<32x32xf32>
    %cst_248 = arith.constant dense<0.000000e+00> : vector<32x32xf32>
    %473 = tpu.matmul %470, %472, %cst_248 {dimension_numbers = #tpu.dot_dimension_numbers<[1], [0], [0], [1], [0, 0, 1, 1], [], []>} : vector<32x32xf32>, vector<32x32xf32>, vector<32x32xf32> -> vector<32x32xf32>
    %474 = arith.addf %352, %473 : vector<32x32xf32>
    %c0_249 = arith.constant 0 : index
    %c0_250 = arith.constant 0 : index
    %c0_251 = arith.constant 0 : index
    %475 = vector.load %arg34[%c0_249, %c0_250, %c0_251] : memref<2x1x32xf32, #tpu.memory_space<vmem>>, vector<1x1x32xf32>
    %476 = vector.shape_cast %475 : vector<1x1x32xf32> to vector<1x32xf32>
    %477 = vector.broadcast %476 : vector<1x32xf32> to vector<32x32xf32>
    %478 = arith.addf %474, %477 : vector<32x32xf32>
    %c0_252 = arith.constant 0 : index
    %c0_253 = arith.constant 0 : index
    %c0_254 = arith.constant 0 : index
    %479 = vector.load %arg35[%c0_252, %c0_253, %c0_254] : memref<2x1x32xf32, #tpu.memory_space<vmem>>, vector<1x1x32xf32>
    %480 = vector.shape_cast %479 : vector<1x1x32xf32> to vector<1x32xf32>
    %c0_255 = arith.constant 0 : index
    %c0_256 = arith.constant 0 : index
    %c0_257 = arith.constant 0 : index
    %481 = vector.load %arg36[%c0_255, %c0_256, %c0_257] : memref<2x1x32xf32, #tpu.memory_space<vmem>>, vector<1x1x32xf32>
    %482 = vector.shape_cast %481 : vector<1x1x32xf32> to vector<1x32xf32>
    %cst_258 = arith.constant dense<0.000000e+00> : vector<32xf32>
    %483 = vector.multi_reduction <add>, %478, %cst_258 [1] : vector<32x32xf32> to vector<32xf32>
    %484 = vector.shape_cast %483 : vector<32xf32> to vector<32x1xf32>
    %cst_259 = arith.constant 3.200000e+01 : f32
    %485 = vector.broadcast %cst_259 : f32 to vector<32x1xf32>
    %486 = arith.divf %484, %485 : vector<32x1xf32>
    %487 = vector.broadcast %486 : vector<32x1xf32> to vector<32x32xf32>
    %488 = arith.subf %478, %487 : vector<32x32xf32>
    %489 = arith.mulf %488, %488 : vector<32x32xf32>
    %cst_260 = arith.constant dense<0.000000e+00> : vector<32xf32>
    %490 = vector.multi_reduction <add>, %489, %cst_260 [1] : vector<32x32xf32> to vector<32xf32>
    %491 = vector.shape_cast %490 : vector<32xf32> to vector<32x1xf32>
    %cst_261 = arith.constant 3.200000e+01 : f32
    %492 = vector.broadcast %cst_261 : f32 to vector<32x1xf32>
    %493 = arith.divf %491, %492 : vector<32x1xf32>
    %cst_262 = arith.constant 9.99999974E-6 : f32
    %494 = vector.broadcast %cst_262 : f32 to vector<32x1xf32>
    %495 = arith.addf %493, %494 : vector<32x1xf32>
    %496 = math.rsqrt %495 : vector<32x1xf32>
    %497 = vector.broadcast %496 : vector<32x1xf32> to vector<32x32xf32>
    %498 = arith.mulf %488, %497 : vector<32x32xf32>
    %499 = vector.broadcast %480 : vector<1x32xf32> to vector<32x32xf32>
    %500 = arith.mulf %498, %499 : vector<32x32xf32>
    %501 = vector.broadcast %482 : vector<1x32xf32> to vector<32x32xf32>
    %502 = arith.addf %500, %501 : vector<32x32xf32>
    %c0_263 = arith.constant 0 : index
    %c0_264 = arith.constant 0 : index
    %c0_265 = arith.constant 0 : index
    %503 = vector.load %arg37[%c0_263, %c0_264, %c0_265] : memref<2x32x128xf32, #tpu.memory_space<vmem>>, vector<1x32x128xf32>
    %504 = vector.shape_cast %503 : vector<1x32x128xf32> to vector<32x128xf32>
    %cst_266 = arith.constant dense<0.000000e+00> : vector<32x128xf32>
    %505 = tpu.matmul %502, %504, %cst_266 {dimension_numbers = #tpu.dot_dimension_numbers<[1], [0], [0], [1], [0, 0, 1, 1], [], []>} : vector<32x32xf32>, vector<32x128xf32>, vector<32x128xf32> -> vector<32x128xf32>
    %c0_267 = arith.constant 0 : index
    %c0_268 = arith.constant 0 : index
    %c0_269 = arith.constant 0 : index
    %506 = vector.load %arg38[%c0_267, %c0_268, %c0_269] : memref<2x1x128xf32, #tpu.memory_space<vmem>>, vector<1x1x128xf32>
    %507 = vector.shape_cast %506 : vector<1x1x128xf32> to vector<1x128xf32>
    %508 = vector.broadcast %507 : vector<1x128xf32> to vector<32x128xf32>
    %509 = arith.addf %505, %508 : vector<32x128xf32>
    %cst_270 = arith.constant 0.000000e+00 : f32
    %510 = vector.broadcast %cst_270 : f32 to vector<32x128xf32>
    %511 = arith.maximumf %509, %510 : vector<32x128xf32>
    %c0_271 = arith.constant 0 : index
    %c0_272 = arith.constant 0 : index
    %c0_273 = arith.constant 0 : index
    %512 = vector.load %arg39[%c0_271, %c0_272, %c0_273] : memref<2x128x32xf32, #tpu.memory_space<vmem>>, vector<1x128x32xf32>
    %513 = vector.shape_cast %512 : vector<1x128x32xf32> to vector<128x32xf32>
    %cst_274 = arith.constant dense<0.000000e+00> : vector<32x32xf32>
    %514 = tpu.matmul %511, %513, %cst_274 {dimension_numbers = #tpu.dot_dimension_numbers<[1], [0], [0], [1], [0, 0, 1, 1], [], []>} : vector<32x128xf32>, vector<128x32xf32>, vector<32x32xf32> -> vector<32x32xf32>
    %515 = arith.addf %478, %514 : vector<32x32xf32>
    %c0_275 = arith.constant 0 : index
    %c0_276 = arith.constant 0 : index
    %c0_277 = arith.constant 0 : index
    %516 = vector.load %arg40[%c0_275, %c0_276, %c0_277] : memref<2x1x32xf32, #tpu.memory_space<vmem>>, vector<1x1x32xf32>
    %517 = vector.shape_cast %516 : vector<1x1x32xf32> to vector<1x32xf32>
    %518 = vector.broadcast %517 : vector<1x32xf32> to vector<32x32xf32>
    %519 = arith.addf %515, %518 : vector<32x32xf32>
    %c1_278 = arith.constant 1 : index
    %c0_279 = arith.constant 0 : index
    %c0_280 = arith.constant 0 : index
    %520 = vector.load %arg25[%c1_278, %c0_279, %c0_280] : memref<2x1x32xf32, #tpu.memory_space<vmem>>, vector<1x1x32xf32>
    %521 = vector.shape_cast %520 : vector<1x1x32xf32> to vector<1x32xf32>
    %c1_281 = arith.constant 1 : index
    %c0_282 = arith.constant 0 : index
    %c0_283 = arith.constant 0 : index
    %522 = vector.load %arg26[%c1_281, %c0_282, %c0_283] : memref<2x1x32xf32, #tpu.memory_space<vmem>>, vector<1x1x32xf32>
    %523 = vector.shape_cast %522 : vector<1x1x32xf32> to vector<1x32xf32>
    %cst_284 = arith.constant dense<0.000000e+00> : vector<32xf32>
    %524 = vector.multi_reduction <add>, %519, %cst_284 [1] : vector<32x32xf32> to vector<32xf32>
    %525 = vector.shape_cast %524 : vector<32xf32> to vector<32x1xf32>
    %cst_285 = arith.constant 3.200000e+01 : f32
    %526 = vector.broadcast %cst_285 : f32 to vector<32x1xf32>
    %527 = arith.divf %525, %526 : vector<32x1xf32>
    %528 = vector.broadcast %527 : vector<32x1xf32> to vector<32x32xf32>
    %529 = arith.subf %519, %528 : vector<32x32xf32>
    %530 = arith.mulf %529, %529 : vector<32x32xf32>
    %cst_286 = arith.constant dense<0.000000e+00> : vector<32xf32>
    %531 = vector.multi_reduction <add>, %530, %cst_286 [1] : vector<32x32xf32> to vector<32xf32>
    %532 = vector.shape_cast %531 : vector<32xf32> to vector<32x1xf32>
    %cst_287 = arith.constant 3.200000e+01 : f32
    %533 = vector.broadcast %cst_287 : f32 to vector<32x1xf32>
    %534 = arith.divf %532, %533 : vector<32x1xf32>
    %cst_288 = arith.constant 9.99999974E-6 : f32
    %535 = vector.broadcast %cst_288 : f32 to vector<32x1xf32>
    %536 = arith.addf %534, %535 : vector<32x1xf32>
    %537 = math.rsqrt %536 : vector<32x1xf32>
    %538 = vector.broadcast %537 : vector<32x1xf32> to vector<32x32xf32>
    %539 = arith.mulf %529, %538 : vector<32x32xf32>
    %540 = vector.broadcast %521 : vector<1x32xf32> to vector<32x32xf32>
    %541 = arith.mulf %539, %540 : vector<32x32xf32>
    %542 = vector.broadcast %523 : vector<1x32xf32> to vector<32x32xf32>
    %543 = arith.addf %541, %542 : vector<32x32xf32>
    %c1_289 = arith.constant 1 : index
    %c0_290 = arith.constant 0 : index
    %c0_291 = arith.constant 0 : index
    %544 = vector.load %arg27[%c1_289, %c0_290, %c0_291] : memref<2x32x32xf32, #tpu.memory_space<vmem>>, vector<1x32x32xf32>
    %545 = vector.shape_cast %544 : vector<1x32x32xf32> to vector<32x32xf32>
    %cst_292 = arith.constant dense<0.000000e+00> : vector<32x32xf32>
    %546 = tpu.matmul %543, %545, %cst_292 {dimension_numbers = #tpu.dot_dimension_numbers<[1], [0], [0], [1], [0, 0, 1, 1], [], []>} : vector<32x32xf32>, vector<32x32xf32>, vector<32x32xf32> -> vector<32x32xf32>
    %c1_293 = arith.constant 1 : index
    %c0_294 = arith.constant 0 : index
    %c0_295 = arith.constant 0 : index
    %547 = vector.load %arg28[%c1_293, %c0_294, %c0_295] : memref<2x1x32xf32, #tpu.memory_space<vmem>>, vector<1x1x32xf32>
    %548 = vector.shape_cast %547 : vector<1x1x32xf32> to vector<1x32xf32>
    %549 = vector.broadcast %548 : vector<1x32xf32> to vector<32x32xf32>
    %550 = arith.addf %546, %549 : vector<32x32xf32>
    %c1_296 = arith.constant 1 : index
    %c0_297 = arith.constant 0 : index
    %c0_298 = arith.constant 0 : index
    %551 = vector.load %arg29[%c1_296, %c0_297, %c0_298] : memref<2x32x32xf32, #tpu.memory_space<vmem>>, vector<1x32x32xf32>
    %552 = vector.shape_cast %551 : vector<1x32x32xf32> to vector<32x32xf32>
    %cst_299 = arith.constant dense<0.000000e+00> : vector<32x32xf32>
    %553 = tpu.matmul %543, %552, %cst_299 {dimension_numbers = #tpu.dot_dimension_numbers<[1], [0], [0], [1], [0, 0, 1, 1], [], []>} : vector<32x32xf32>, vector<32x32xf32>, vector<32x32xf32> -> vector<32x32xf32>
    %c1_300 = arith.constant 1 : index
    %c0_301 = arith.constant 0 : index
    %c0_302 = arith.constant 0 : index
    %554 = vector.load %arg30[%c1_300, %c0_301, %c0_302] : memref<2x1x32xf32, #tpu.memory_space<vmem>>, vector<1x1x32xf32>
    %555 = vector.shape_cast %554 : vector<1x1x32xf32> to vector<1x32xf32>
    %556 = vector.broadcast %555 : vector<1x32xf32> to vector<32x32xf32>
    %557 = arith.addf %553, %556 : vector<32x32xf32>
    %c1_303 = arith.constant 1 : index
    %c0_304 = arith.constant 0 : index
    %c0_305 = arith.constant 0 : index
    %558 = vector.load %arg31[%c1_303, %c0_304, %c0_305] : memref<2x32x32xf32, #tpu.memory_space<vmem>>, vector<1x32x32xf32>
    %559 = vector.shape_cast %558 : vector<1x32x32xf32> to vector<32x32xf32>
    %cst_306 = arith.constant dense<0.000000e+00> : vector<32x32xf32>
    %560 = tpu.matmul %543, %559, %cst_306 {dimension_numbers = #tpu.dot_dimension_numbers<[1], [0], [0], [1], [0, 0, 1, 1], [], []>} : vector<32x32xf32>, vector<32x32xf32>, vector<32x32xf32> -> vector<32x32xf32>
    %c1_307 = arith.constant 1 : index
    %c0_308 = arith.constant 0 : index
    %c0_309 = arith.constant 0 : index
    %561 = vector.load %arg32[%c1_307, %c0_308, %c0_309] : memref<2x1x32xf32, #tpu.memory_space<vmem>>, vector<1x1x32xf32>
    %562 = vector.shape_cast %561 : vector<1x1x32xf32> to vector<1x32xf32>
    %563 = vector.broadcast %562 : vector<1x32xf32> to vector<32x32xf32>
    %564 = arith.addf %560, %563 : vector<32x32xf32>
    %565 = vector.extract_strided_slice %550 {offsets = [0, 0], sizes = [32, 8], strides = [1, 1]} : vector<32x32xf32> to vector<32x8xf32>
    %566 = vector.extract_strided_slice %557 {offsets = [0, 0], sizes = [32, 8], strides = [1, 1]} : vector<32x32xf32> to vector<32x8xf32>
    %cst_310 = arith.constant dense<0.000000e+00> : vector<32x32xf32>
    %567 = tpu.matmul %565, %566, %cst_310 {dimension_numbers = #tpu.dot_dimension_numbers<[1], [1], [0], [0], [0, 0, 1, 0], [], []>} : vector<32x8xf32>, vector<32x8xf32>, vector<32x32xf32> -> vector<32x32xf32>
    %cst_311 = arith.constant 0.353553385 : f32
    %568 = vector.broadcast %cst_311 : f32 to vector<32x32xf32>
    %569 = arith.mulf %567, %568 : vector<32x32xf32>
    %570 = arith.addf %569, %353 : vector<32x32xf32>
    %cst_312 = arith.constant dense<0xFF800000> : vector<32xf32>
    %571 = vector.multi_reduction <maximumf>, %570, %cst_312 [1] : vector<32x32xf32> to vector<32xf32>
    %572 = vector.shape_cast %571 : vector<32xf32> to vector<32x1xf32>
    %573 = vector.broadcast %572 : vector<32x1xf32> to vector<32x32xf32>
    %574 = arith.subf %570, %573 : vector<32x32xf32>
    %575 = math.exp %574 : vector<32x32xf32>
    %cst_313 = arith.constant dense<0.000000e+00> : vector<32xf32>
    %576 = vector.multi_reduction <add>, %575, %cst_313 [1] : vector<32x32xf32> to vector<32xf32>
    %577 = vector.shape_cast %576 : vector<32xf32> to vector<32x1xf32>
    %578 = vector.broadcast %577 : vector<32x1xf32> to vector<32x32xf32>
    %579 = arith.divf %575, %578 : vector<32x32xf32>
    %580 = vector.extract_strided_slice %564 {offsets = [0, 0], sizes = [32, 8], strides = [1, 1]} : vector<32x32xf32> to vector<32x8xf32>
    %cst_314 = arith.constant dense<0.000000e+00> : vector<32x8xf32>
    %581 = tpu.matmul %579, %580, %cst_314 {dimension_numbers = #tpu.dot_dimension_numbers<[1], [0], [0], [1], [0, 0, 1, 1], [], []>} : vector<32x32xf32>, vector<32x8xf32>, vector<32x8xf32> -> vector<32x8xf32>
    %582 = vector.extract_strided_slice %550 {offsets = [0, 8], sizes = [32, 8], strides = [1, 1]} : vector<32x32xf32> to vector<32x8xf32>
    %583 = vector.extract_strided_slice %557 {offsets = [0, 8], sizes = [32, 8], strides = [1, 1]} : vector<32x32xf32> to vector<32x8xf32>
    %cst_315 = arith.constant dense<0.000000e+00> : vector<32x32xf32>
    %584 = tpu.matmul %582, %583, %cst_315 {dimension_numbers = #tpu.dot_dimension_numbers<[1], [1], [0], [0], [0, 0, 1, 0], [], []>} : vector<32x8xf32>, vector<32x8xf32>, vector<32x32xf32> -> vector<32x32xf32>
    %cst_316 = arith.constant 0.353553385 : f32
    %585 = vector.broadcast %cst_316 : f32 to vector<32x32xf32>
    %586 = arith.mulf %584, %585 : vector<32x32xf32>
    %587 = arith.addf %586, %353 : vector<32x32xf32>
    %cst_317 = arith.constant dense<0xFF800000> : vector<32xf32>
    %588 = vector.multi_reduction <maximumf>, %587, %cst_317 [1] : vector<32x32xf32> to vector<32xf32>
    %589 = vector.shape_cast %588 : vector<32xf32> to vector<32x1xf32>
    %590 = vector.broadcast %589 : vector<32x1xf32> to vector<32x32xf32>
    %591 = arith.subf %587, %590 : vector<32x32xf32>
    %592 = math.exp %591 : vector<32x32xf32>
    %cst_318 = arith.constant dense<0.000000e+00> : vector<32xf32>
    %593 = vector.multi_reduction <add>, %592, %cst_318 [1] : vector<32x32xf32> to vector<32xf32>
    %594 = vector.shape_cast %593 : vector<32xf32> to vector<32x1xf32>
    %595 = vector.broadcast %594 : vector<32x1xf32> to vector<32x32xf32>
    %596 = arith.divf %592, %595 : vector<32x32xf32>
    %597 = vector.extract_strided_slice %564 {offsets = [0, 8], sizes = [32, 8], strides = [1, 1]} : vector<32x32xf32> to vector<32x8xf32>
    %cst_319 = arith.constant dense<0.000000e+00> : vector<32x8xf32>
    %598 = tpu.matmul %596, %597, %cst_319 {dimension_numbers = #tpu.dot_dimension_numbers<[1], [0], [0], [1], [0, 0, 1, 1], [], []>} : vector<32x32xf32>, vector<32x8xf32>, vector<32x8xf32> -> vector<32x8xf32>
    %599 = vector.extract_strided_slice %550 {offsets = [0, 16], sizes = [32, 8], strides = [1, 1]} : vector<32x32xf32> to vector<32x8xf32>
    %600 = vector.extract_strided_slice %557 {offsets = [0, 16], sizes = [32, 8], strides = [1, 1]} : vector<32x32xf32> to vector<32x8xf32>
    %cst_320 = arith.constant dense<0.000000e+00> : vector<32x32xf32>
    %601 = tpu.matmul %599, %600, %cst_320 {dimension_numbers = #tpu.dot_dimension_numbers<[1], [1], [0], [0], [0, 0, 1, 0], [], []>} : vector<32x8xf32>, vector<32x8xf32>, vector<32x32xf32> -> vector<32x32xf32>
    %cst_321 = arith.constant 0.353553385 : f32
    %602 = vector.broadcast %cst_321 : f32 to vector<32x32xf32>
    %603 = arith.mulf %601, %602 : vector<32x32xf32>
    %604 = arith.addf %603, %353 : vector<32x32xf32>
    %cst_322 = arith.constant dense<0xFF800000> : vector<32xf32>
    %605 = vector.multi_reduction <maximumf>, %604, %cst_322 [1] : vector<32x32xf32> to vector<32xf32>
    %606 = vector.shape_cast %605 : vector<32xf32> to vector<32x1xf32>
    %607 = vector.broadcast %606 : vector<32x1xf32> to vector<32x32xf32>
    %608 = arith.subf %604, %607 : vector<32x32xf32>
    %609 = math.exp %608 : vector<32x32xf32>
    %cst_323 = arith.constant dense<0.000000e+00> : vector<32xf32>
    %610 = vector.multi_reduction <add>, %609, %cst_323 [1] : vector<32x32xf32> to vector<32xf32>
    %611 = vector.shape_cast %610 : vector<32xf32> to vector<32x1xf32>
    %612 = vector.broadcast %611 : vector<32x1xf32> to vector<32x32xf32>
    %613 = arith.divf %609, %612 : vector<32x32xf32>
    %614 = vector.extract_strided_slice %564 {offsets = [0, 16], sizes = [32, 8], strides = [1, 1]} : vector<32x32xf32> to vector<32x8xf32>
    %cst_324 = arith.constant dense<0.000000e+00> : vector<32x8xf32>
    %615 = tpu.matmul %613, %614, %cst_324 {dimension_numbers = #tpu.dot_dimension_numbers<[1], [0], [0], [1], [0, 0, 1, 1], [], []>} : vector<32x32xf32>, vector<32x8xf32>, vector<32x8xf32> -> vector<32x8xf32>
    %616 = vector.extract_strided_slice %550 {offsets = [0, 24], sizes = [32, 8], strides = [1, 1]} : vector<32x32xf32> to vector<32x8xf32>
    %617 = vector.extract_strided_slice %557 {offsets = [0, 24], sizes = [32, 8], strides = [1, 1]} : vector<32x32xf32> to vector<32x8xf32>
    %cst_325 = arith.constant dense<0.000000e+00> : vector<32x32xf32>
    %618 = tpu.matmul %616, %617, %cst_325 {dimension_numbers = #tpu.dot_dimension_numbers<[1], [1], [0], [0], [0, 0, 1, 0], [], []>} : vector<32x8xf32>, vector<32x8xf32>, vector<32x32xf32> -> vector<32x32xf32>
    %cst_326 = arith.constant 0.353553385 : f32
    %619 = vector.broadcast %cst_326 : f32 to vector<32x32xf32>
    %620 = arith.mulf %618, %619 : vector<32x32xf32>
    %621 = arith.addf %620, %353 : vector<32x32xf32>
    %cst_327 = arith.constant dense<0xFF800000> : vector<32xf32>
    %622 = vector.multi_reduction <maximumf>, %621, %cst_327 [1] : vector<32x32xf32> to vector<32xf32>
    %623 = vector.shape_cast %622 : vector<32xf32> to vector<32x1xf32>
    %624 = vector.broadcast %623 : vector<32x1xf32> to vector<32x32xf32>
    %625 = arith.subf %621, %624 : vector<32x32xf32>
    %626 = math.exp %625 : vector<32x32xf32>
    %cst_328 = arith.constant dense<0.000000e+00> : vector<32xf32>
    %627 = vector.multi_reduction <add>, %626, %cst_328 [1] : vector<32x32xf32> to vector<32xf32>
    %628 = vector.shape_cast %627 : vector<32xf32> to vector<32x1xf32>
    %629 = vector.broadcast %628 : vector<32x1xf32> to vector<32x32xf32>
    %630 = arith.divf %626, %629 : vector<32x32xf32>
    %631 = vector.extract_strided_slice %564 {offsets = [0, 24], sizes = [32, 8], strides = [1, 1]} : vector<32x32xf32> to vector<32x8xf32>
    %cst_329 = arith.constant dense<0.000000e+00> : vector<32x8xf32>
    %632 = tpu.matmul %630, %631, %cst_329 {dimension_numbers = #tpu.dot_dimension_numbers<[1], [0], [0], [1], [0, 0, 1, 1], [], []>} : vector<32x32xf32>, vector<32x8xf32>, vector<32x8xf32> -> vector<32x8xf32>
    %633 = tpu.concatenate %581, %598, %615, %632 in 1 : vector<32x8xf32>, vector<32x8xf32>, vector<32x8xf32>, vector<32x8xf32> -> vector<32x32xf32>
    %c1_330 = arith.constant 1 : index
    %c0_331 = arith.constant 0 : index
    %c0_332 = arith.constant 0 : index
    %634 = vector.load %arg33[%c1_330, %c0_331, %c0_332] : memref<2x32x32xf32, #tpu.memory_space<vmem>>, vector<1x32x32xf32>
    %635 = vector.shape_cast %634 : vector<1x32x32xf32> to vector<32x32xf32>
    %cst_333 = arith.constant dense<0.000000e+00> : vector<32x32xf32>
    %636 = tpu.matmul %633, %635, %cst_333 {dimension_numbers = #tpu.dot_dimension_numbers<[1], [0], [0], [1], [0, 0, 1, 1], [], []>} : vector<32x32xf32>, vector<32x32xf32>, vector<32x32xf32> -> vector<32x32xf32>
    %637 = arith.addf %519, %636 : vector<32x32xf32>
    %c1_334 = arith.constant 1 : index
    %c0_335 = arith.constant 0 : index
    %c0_336 = arith.constant 0 : index
    %638 = vector.load %arg34[%c1_334, %c0_335, %c0_336] : memref<2x1x32xf32, #tpu.memory_space<vmem>>, vector<1x1x32xf32>
    %639 = vector.shape_cast %638 : vector<1x1x32xf32> to vector<1x32xf32>
    %640 = vector.broadcast %639 : vector<1x32xf32> to vector<32x32xf32>
    %641 = arith.addf %637, %640 : vector<32x32xf32>
    %c1_337 = arith.constant 1 : index
    %c0_338 = arith.constant 0 : index
    %c0_339 = arith.constant 0 : index
    %642 = vector.load %arg35[%c1_337, %c0_338, %c0_339] : memref<2x1x32xf32, #tpu.memory_space<vmem>>, vector<1x1x32xf32>
    %643 = vector.shape_cast %642 : vector<1x1x32xf32> to vector<1x32xf32>
    %c1_340 = arith.constant 1 : index
    %c0_341 = arith.constant 0 : index
    %c0_342 = arith.constant 0 : index
    %644 = vector.load %arg36[%c1_340, %c0_341, %c0_342] : memref<2x1x32xf32, #tpu.memory_space<vmem>>, vector<1x1x32xf32>
    %645 = vector.shape_cast %644 : vector<1x1x32xf32> to vector<1x32xf32>
    %cst_343 = arith.constant dense<0.000000e+00> : vector<32xf32>
    %646 = vector.multi_reduction <add>, %641, %cst_343 [1] : vector<32x32xf32> to vector<32xf32>
    %647 = vector.shape_cast %646 : vector<32xf32> to vector<32x1xf32>
    %cst_344 = arith.constant 3.200000e+01 : f32
    %648 = vector.broadcast %cst_344 : f32 to vector<32x1xf32>
    %649 = arith.divf %647, %648 : vector<32x1xf32>
    %650 = vector.broadcast %649 : vector<32x1xf32> to vector<32x32xf32>
    %651 = arith.subf %641, %650 : vector<32x32xf32>
    %652 = arith.mulf %651, %651 : vector<32x32xf32>
    %cst_345 = arith.constant dense<0.000000e+00> : vector<32xf32>
    %653 = vector.multi_reduction <add>, %652, %cst_345 [1] : vector<32x32xf32> to vector<32xf32>
    %654 = vector.shape_cast %653 : vector<32xf32> to vector<32x1xf32>
    %cst_346 = arith.constant 3.200000e+01 : f32
    %655 = vector.broadcast %cst_346 : f32 to vector<32x1xf32>
    %656 = arith.divf %654, %655 : vector<32x1xf32>
    %cst_347 = arith.constant 9.99999974E-6 : f32
    %657 = vector.broadcast %cst_347 : f32 to vector<32x1xf32>
    %658 = arith.addf %656, %657 : vector<32x1xf32>
    %659 = math.rsqrt %658 : vector<32x1xf32>
    %660 = vector.broadcast %659 : vector<32x1xf32> to vector<32x32xf32>
    %661 = arith.mulf %651, %660 : vector<32x32xf32>
    %662 = vector.broadcast %643 : vector<1x32xf32> to vector<32x32xf32>
    %663 = arith.mulf %661, %662 : vector<32x32xf32>
    %664 = vector.broadcast %645 : vector<1x32xf32> to vector<32x32xf32>
    %665 = arith.addf %663, %664 : vector<32x32xf32>
    %c1_348 = arith.constant 1 : index
    %c0_349 = arith.constant 0 : index
    %c0_350 = arith.constant 0 : index
    %666 = vector.load %arg37[%c1_348, %c0_349, %c0_350] : memref<2x32x128xf32, #tpu.memory_space<vmem>>, vector<1x32x128xf32>
    %667 = vector.shape_cast %666 : vector<1x32x128xf32> to vector<32x128xf32>
    %cst_351 = arith.constant dense<0.000000e+00> : vector<32x128xf32>
    %668 = tpu.matmul %665, %667, %cst_351 {dimension_numbers = #tpu.dot_dimension_numbers<[1], [0], [0], [1], [0, 0, 1, 1], [], []>} : vector<32x32xf32>, vector<32x128xf32>, vector<32x128xf32> -> vector<32x128xf32>
    %c1_352 = arith.constant 1 : index
    %c0_353 = arith.constant 0 : index
    %c0_354 = arith.constant 0 : index
    %669 = vector.load %arg38[%c1_352, %c0_353, %c0_354] : memref<2x1x128xf32, #tpu.memory_space<vmem>>, vector<1x1x128xf32>
    %670 = vector.shape_cast %669 : vector<1x1x128xf32> to vector<1x128xf32>
    %671 = vector.broadcast %670 : vector<1x128xf32> to vector<32x128xf32>
    %672 = arith.addf %668, %671 : vector<32x128xf32>
    %cst_355 = arith.constant 0.000000e+00 : f32
    %673 = vector.broadcast %cst_355 : f32 to vector<32x128xf32>
    %674 = arith.maximumf %672, %673 : vector<32x128xf32>
    %c1_356 = arith.constant 1 : index
    %c0_357 = arith.constant 0 : index
    %c0_358 = arith.constant 0 : index
    %675 = vector.load %arg39[%c1_356, %c0_357, %c0_358] : memref<2x128x32xf32, #tpu.memory_space<vmem>>, vector<1x128x32xf32>
    %676 = vector.shape_cast %675 : vector<1x128x32xf32> to vector<128x32xf32>
    %cst_359 = arith.constant dense<0.000000e+00> : vector<32x32xf32>
    %677 = tpu.matmul %674, %676, %cst_359 {dimension_numbers = #tpu.dot_dimension_numbers<[1], [0], [0], [1], [0, 0, 1, 1], [], []>} : vector<32x128xf32>, vector<128x32xf32>, vector<32x32xf32> -> vector<32x32xf32>
    %678 = arith.addf %641, %677 : vector<32x32xf32>
    %c1_360 = arith.constant 1 : index
    %c0_361 = arith.constant 0 : index
    %c0_362 = arith.constant 0 : index
    %679 = vector.load %arg40[%c1_360, %c0_361, %c0_362] : memref<2x1x32xf32, #tpu.memory_space<vmem>>, vector<1x1x32xf32>
    %680 = vector.shape_cast %679 : vector<1x1x32xf32> to vector<1x32xf32>
    %681 = vector.broadcast %680 : vector<1x32xf32> to vector<32x32xf32>
    %682 = arith.addf %678, %681 : vector<32x32xf32>
    %cst_363 = arith.constant dense<0.000000e+00> : vector<32xf32>
    %683 = vector.multi_reduction <add>, %682, %cst_363 [1] : vector<32x32xf32> to vector<32xf32>
    %684 = vector.shape_cast %683 : vector<32xf32> to vector<32x1xf32>
    %cst_364 = arith.constant 3.200000e+01 : f32
    %685 = vector.broadcast %cst_364 : f32 to vector<32x1xf32>
    %686 = arith.divf %684, %685 : vector<32x1xf32>
    %687 = vector.broadcast %686 : vector<32x1xf32> to vector<32x32xf32>
    %688 = arith.subf %682, %687 : vector<32x32xf32>
    %689 = arith.mulf %688, %688 : vector<32x32xf32>
    %cst_365 = arith.constant dense<0.000000e+00> : vector<32xf32>
    %690 = vector.multi_reduction <add>, %689, %cst_365 [1] : vector<32x32xf32> to vector<32xf32>
    %691 = vector.shape_cast %690 : vector<32xf32> to vector<32x1xf32>
    %cst_366 = arith.constant 3.200000e+01 : f32
    %692 = vector.broadcast %cst_366 : f32 to vector<32x1xf32>
    %693 = arith.divf %691, %692 : vector<32x1xf32>
    %cst_367 = arith.constant 9.99999974E-6 : f32
    %694 = vector.broadcast %cst_367 : f32 to vector<32x1xf32>
    %695 = arith.addf %693, %694 : vector<32x1xf32>
    %696 = math.rsqrt %695 : vector<32x1xf32>
    %697 = vector.broadcast %696 : vector<32x1xf32> to vector<32x32xf32>
    %698 = arith.mulf %688, %697 : vector<32x32xf32>
    %699 = vector.broadcast %355 : vector<1x32xf32> to vector<32x32xf32>
    %700 = arith.mulf %698, %699 : vector<32x32xf32>
    %701 = vector.broadcast %356 : vector<1x32xf32> to vector<32x32xf32>
    %702 = arith.addf %700, %701 : vector<32x32xf32>
    %cst_368 = arith.constant dense<0.000000e+00> : vector<2x32xf32>
    %703 = tpu.matmul %354, %702, %cst_368 {dimension_numbers = #tpu.dot_dimension_numbers<[1], [0], [0], [1], [0, 0, 1, 1], [], []>} : vector<2x32xf32>, vector<32x32xf32>, vector<2x32xf32> -> vector<2x32xf32>
    %c0_369 = arith.constant 0 : index
    %c0_370 = arith.constant 0 : index
    %704 = vector.load %arg43[%c0_369, %c0_370] : memref<64x96xf32, #tpu.memory_space<vmem>>, vector<64x96xf32>
    %cst_371 = arith.constant dense<0.000000e+00> : vector<2x96xf32>
    %705 = tpu.matmul %351, %704, %cst_371 {dimension_numbers = #tpu.dot_dimension_numbers<[1], [0], [0], [1], [0, 0, 1, 1], [], []>} : vector<2x64xf32>, vector<64x96xf32>, vector<2x96xf32> -> vector<2x96xf32>
    %c0_372 = arith.constant 0 : index
    %c0_373 = arith.constant 0 : index
    %706 = vector.load %arg44[%c0_372, %c0_373] : memref<32x96xf32, #tpu.memory_space<vmem>>, vector<32x96xf32>
    %cst_374 = arith.constant dense<0.000000e+00> : vector<2x96xf32>
    %707 = tpu.matmul %703, %706, %cst_374 {dimension_numbers = #tpu.dot_dimension_numbers<[1], [0], [0], [1], [0, 0, 1, 1], [], []>} : vector<2x32xf32>, vector<32x96xf32>, vector<2x96xf32> -> vector<2x96xf32>
    %708 = arith.addf %705, %707 : vector<2x96xf32>
    %c0_375 = arith.constant 0 : index
    %c0_376 = arith.constant 0 : index
    %709 = vector.load %arg45[%c0_375, %c0_376] : memref<1x96xf32, #tpu.memory_space<vmem>>, vector<1x96xf32>
    %710 = vector.broadcast %709 : vector<1x96xf32> to vector<2x96xf32>
    %711 = arith.addf %708, %710 : vector<2x96xf32>
    %c0_377 = arith.constant 0 : index
    %c0_378 = arith.constant 0 : index
    %712 = vector.load %arg46[%c0_377, %c0_378] : memref<96x96xf32, #tpu.memory_space<vmem>>, vector<96x96xf32>
    %cst_379 = arith.constant dense<0.000000e+00> : vector<2x96xf32>
    %713 = tpu.matmul %711, %712, %cst_379 {dimension_numbers = #tpu.dot_dimension_numbers<[1], [0], [0], [1], [0, 0, 1, 1], [], []>} : vector<2x96xf32>, vector<96x96xf32>, vector<2x96xf32> -> vector<2x96xf32>
    %c0_380 = arith.constant 0 : index
    %c0_381 = arith.constant 0 : index
    %714 = vector.load %arg47[%c0_380, %c0_381] : memref<1x96xf32, #tpu.memory_space<vmem>>, vector<1x96xf32>
    %715 = vector.broadcast %714 : vector<1x96xf32> to vector<2x96xf32>
    %716 = arith.addf %713, %715 : vector<2x96xf32>
    %c0_382 = arith.constant 0 : index
    %c0_383 = arith.constant 0 : index
    %717 = vector.load %arg48[%c0_382, %c0_383] : memref<1x96xf32, #tpu.memory_space<vmem>>, vector<1x96xf32>
    %c0_384 = arith.constant 0 : index
    %c0_385 = arith.constant 0 : index
    %718 = vector.load %arg49[%c0_384, %c0_385] : memref<1x96xf32, #tpu.memory_space<vmem>>, vector<1x96xf32>
    %cst_386 = arith.constant dense<0.000000e+00> : vector<2xf32>
    %719 = vector.multi_reduction <add>, %716, %cst_386 [1] : vector<2x96xf32> to vector<2xf32>
    %720 = vector.shape_cast %719 : vector<2xf32> to vector<2x1xf32>
    %cst_387 = arith.constant 9.600000e+01 : f32
    %721 = vector.broadcast %cst_387 : f32 to vector<2x1xf32>
    %722 = arith.divf %720, %721 : vector<2x1xf32>
    %723 = vector.broadcast %722 : vector<2x1xf32> to vector<2x96xf32>
    %724 = arith.subf %716, %723 : vector<2x96xf32>
    %725 = arith.mulf %724, %724 : vector<2x96xf32>
    %cst_388 = arith.constant dense<0.000000e+00> : vector<2xf32>
    %726 = vector.multi_reduction <add>, %725, %cst_388 [1] : vector<2x96xf32> to vector<2xf32>
    %727 = vector.shape_cast %726 : vector<2xf32> to vector<2x1xf32>
    %cst_389 = arith.constant 9.600000e+01 : f32
    %728 = vector.broadcast %cst_389 : f32 to vector<2x1xf32>
    %729 = arith.divf %727, %728 : vector<2x1xf32>
    %cst_390 = arith.constant 9.99999974E-6 : f32
    %730 = vector.broadcast %cst_390 : f32 to vector<2x1xf32>
    %731 = arith.addf %729, %730 : vector<2x1xf32>
    %732 = math.rsqrt %731 : vector<2x1xf32>
    %733 = vector.broadcast %732 : vector<2x1xf32> to vector<2x96xf32>
    %734 = arith.mulf %724, %733 : vector<2x96xf32>
    %735 = vector.broadcast %717 : vector<1x96xf32> to vector<2x96xf32>
    %736 = arith.mulf %734, %735 : vector<2x96xf32>
    %737 = vector.broadcast %718 : vector<1x96xf32> to vector<2x96xf32>
    %738 = arith.addf %736, %737 : vector<2x96xf32>
    %c0_391 = arith.constant 0 : index
    %c0_392 = arith.constant 0 : index
    %739 = vector.load %arg50[%c0_391, %c0_392] : memref<96x64xf32, #tpu.memory_space<vmem>>, vector<96x64xf32>
    %cst_393 = arith.constant dense<0.000000e+00> : vector<2x64xf32>
    %740 = tpu.matmul %738, %739, %cst_393 {dimension_numbers = #tpu.dot_dimension_numbers<[1], [0], [0], [1], [0, 0, 1, 1], [], []>} : vector<2x96xf32>, vector<96x64xf32>, vector<2x64xf32> -> vector<2x64xf32>
    %c0_394 = arith.constant 0 : index
    %c0_395 = arith.constant 0 : index
    %741 = vector.load %arg51[%c0_394, %c0_395] : memref<1x64xf32, #tpu.memory_space<vmem>>, vector<1x64xf32>
    %742 = vector.broadcast %741 : vector<1x64xf32> to vector<2x64xf32>
    %743 = arith.addf %740, %742 : vector<2x64xf32>
    %cst_396 = arith.constant 0.000000e+00 : f32
    %744 = vector.broadcast %cst_396 : f32 to vector<2x64xf32>
    %745 = arith.maximumf %743, %744 : vector<2x64xf32>
    %c0_397 = arith.constant 0 : index
    %c0_398 = arith.constant 0 : index
    %746 = vector.load %arg52[%c0_397, %c0_398] : memref<64x3xf32, #tpu.memory_space<vmem>>, vector<64x3xf32>
    %cst_399 = arith.constant dense<0.000000e+00> : vector<2x3xf32>
    %747 = tpu.matmul %745, %746, %cst_399 {dimension_numbers = #tpu.dot_dimension_numbers<[1], [0], [0], [1], [0, 0, 1, 1], [], []>} : vector<2x64xf32>, vector<64x3xf32>, vector<2x3xf32> -> vector<2x3xf32>
    %c0_400 = arith.constant 0 : index
    %c0_401 = arith.constant 0 : index
    %748 = vector.load %arg53[%c0_400, %c0_401] : memref<1x3xf32, #tpu.memory_space<vmem>>, vector<1x3xf32>
    %749 = vector.broadcast %748 : vector<1x3xf32> to vector<2x3xf32>
    %750 = arith.addf %747, %749 : vector<2x3xf32>
    %c0_402 = arith.constant 0 : index
    %c0_403 = arith.constant 0 : index
    %751 = vector.load %arg54[%c0_402, %c0_403] : memref<2x3xf32, #tpu.memory_space<vmem>>, vector<2x3xf32>
    tpu.vector_store %arg54[%c0_402, %c0_403], %750 {strides = array<i32>} : memref<2x3xf32, #tpu.memory_space<vmem>>, vector<2x3xf32>,
    return
  }
  func.func @transform_0(%arg0: i32) -> (i32, i32) {
    %c0_i32 = arith.constant 0 : i32
    %c0_i32_0 = arith.constant 0 : i32
    %c0_i32_1 = arith.constant 0 : i32
    return %c0_i32, %c0_i32_0 : i32, i32
  }
  func.func @transform_1(%arg0: i32) -> (i32, i32) {
    %c0_i32 = arith.constant 0 : i32
    %c0_i32_0 = arith.constant 0 : i32
    %c0_i32_1 = arith.constant 0 : i32
    return %c0_i32, %c0_i32_0 : i32, i32
  }
  func.func @transform_2(%arg0: i32) -> (i32, i32) {
    %c0_i32 = arith.constant 0 : i32
    %c0_i32_0 = arith.constant 0 : i32
    %c0_i32_1 = arith.constant 0 : i32
    return %c0_i32, %c0_i32_0 : i32, i32
  }
  func.func @transform_3(%arg0: i32) -> (i32, i32, i32) {
    %c0_i32 = arith.constant 0 : i32
    %c0_i32_0 = arith.constant 0 : i32
    %c0_i32_1 = arith.constant 0 : i32
    %c0_i32_2 = arith.constant 0 : i32
    return %c0_i32, %c0_i32_0, %c0_i32_1 : i32, i32, i32
  }
  func.func @transform_4(%arg0: i32) -> (i32, i32, i32) {
    %c0_i32 = arith.constant 0 : i32
    %c0_i32_0 = arith.constant 0 : i32
    %c0_i32_1 = arith.constant 0 : i32
    %c0_i32_2 = arith.constant 0 : i32
    return %c0_i32, %c0_i32_0, %c0_i32_1 : i32, i32, i32
  }
  func.func @transform_5(%arg0: i32) -> (i32, i32, i32) {
    %c0_i32 = arith.constant 0 : i32
    %c0_i32_0 = arith.constant 0 : i32
    %c0_i32_1 = arith.constant 0 : i32
    %c0_i32_2 = arith.constant 0 : i32
    return %c0_i32, %c0_i32_0, %c0_i32_1 : i32, i32, i32
  }
  func.func @transform_6(%arg0: i32) -> (i32, i32, i32) {
    %c0_i32 = arith.constant 0 : i32
    %c0_i32_0 = arith.constant 0 : i32
    %c0_i32_1 = arith.constant 0 : i32
    %c0_i32_2 = arith.constant 0 : i32
    return %c0_i32, %c0_i32_0, %c0_i32_1 : i32, i32, i32
  }
  func.func @transform_7(%arg0: i32) -> (i32, i32, i32) {
    %c0_i32 = arith.constant 0 : i32
    %c0_i32_0 = arith.constant 0 : i32
    %c0_i32_1 = arith.constant 0 : i32
    %c0_i32_2 = arith.constant 0 : i32
    return %c0_i32, %c0_i32_0, %c0_i32_1 : i32, i32, i32
  }
  func.func @transform_8(%arg0: i32) -> (i32, i32, i32) {
    %c0_i32 = arith.constant 0 : i32
    %c0_i32_0 = arith.constant 0 : i32
    %c0_i32_1 = arith.constant 0 : i32
    %c0_i32_2 = arith.constant 0 : i32
    return %c0_i32, %c0_i32_0, %c0_i32_1 : i32, i32, i32
  }
  func.func @transform_9(%arg0: i32) -> (i32, i32, i32) {
    %c0_i32 = arith.constant 0 : i32
    %c0_i32_0 = arith.constant 0 : i32
    %c0_i32_1 = arith.constant 0 : i32
    %c0_i32_2 = arith.constant 0 : i32
    return %c0_i32, %c0_i32_0, %c0_i32_1 : i32, i32, i32
  }
  func.func @transform_10(%arg0: i32) -> (i32, i32, i32) {
    %c0_i32 = arith.constant 0 : i32
    %c0_i32_0 = arith.constant 0 : i32
    %c0_i32_1 = arith.constant 0 : i32
    %c0_i32_2 = arith.constant 0 : i32
    return %c0_i32, %c0_i32_0, %c0_i32_1 : i32, i32, i32
  }
  func.func @transform_11(%arg0: i32) -> (i32, i32, i32) {
    %c0_i32 = arith.constant 0 : i32
    %c0_i32_0 = arith.constant 0 : i32
    %c0_i32_1 = arith.constant 0 : i32
    %c0_i32_2 = arith.constant 0 : i32
    return %c0_i32, %c0_i32_0, %c0_i32_1 : i32, i32, i32
  }
  func.func @transform_12(%arg0: i32) -> (i32, i32, i32) {
    %c0_i32 = arith.constant 0 : i32
    %c0_i32_0 = arith.constant 0 : i32
    %c0_i32_1 = arith.constant 0 : i32
    %c0_i32_2 = arith.constant 0 : i32
    return %c0_i32, %c0_i32_0, %c0_i32_1 : i32, i32, i32
  }
  func.func @transform_13(%arg0: i32) -> (i32, i32, i32) {
    %c0_i32 = arith.constant 0 : i32
    %c0_i32_0 = arith.constant 0 : i32
    %c0_i32_1 = arith.constant 0 : i32
    %c0_i32_2 = arith.constant 0 : i32
    return %c0_i32, %c0_i32_0, %c0_i32_1 : i32, i32, i32
  }
  func.func @transform_14(%arg0: i32) -> (i32, i32, i32) {
    %c0_i32 = arith.constant 0 : i32
    %c0_i32_0 = arith.constant 0 : i32
    %c0_i32_1 = arith.constant 0 : i32
    %c0_i32_2 = arith.constant 0 : i32
    return %c0_i32, %c0_i32_0, %c0_i32_1 : i32, i32, i32
  }
  func.func @transform_15(%arg0: i32) -> (i32, i32, i32) {
    %c0_i32 = arith.constant 0 : i32
    %c0_i32_0 = arith.constant 0 : i32
    %c0_i32_1 = arith.constant 0 : i32
    %c0_i32_2 = arith.constant 0 : i32
    return %c0_i32, %c0_i32_0, %c0_i32_1 : i32, i32, i32
  }
  func.func @transform_16(%arg0: i32) -> (i32, i32, i32) {
    %c0_i32 = arith.constant 0 : i32
    %c0_i32_0 = arith.constant 0 : i32
    %c0_i32_1 = arith.constant 0 : i32
    %c0_i32_2 = arith.constant 0 : i32
    return %c0_i32, %c0_i32_0, %c0_i32_1 : i32, i32, i32
  }
  func.func @transform_17(%arg0: i32) -> (i32, i32, i32) {
    %c0_i32 = arith.constant 0 : i32
    %c0_i32_0 = arith.constant 0 : i32
    %c0_i32_1 = arith.constant 0 : i32
    %c0_i32_2 = arith.constant 0 : i32
    return %c0_i32, %c0_i32_0, %c0_i32_1 : i32, i32, i32
  }
  func.func @transform_18(%arg0: i32) -> (i32, i32, i32) {
    %c0_i32 = arith.constant 0 : i32
    %c0_i32_0 = arith.constant 0 : i32
    %c0_i32_1 = arith.constant 0 : i32
    %c0_i32_2 = arith.constant 0 : i32
    return %c0_i32, %c0_i32_0, %c0_i32_1 : i32, i32, i32
  }
  func.func @transform_19(%arg0: i32) -> (i32, i32) {
    %c0_i32 = arith.constant 0 : i32
    %c0_i32_0 = arith.constant 0 : i32
    %c0_i32_1 = arith.constant 0 : i32
    return %c0_i32, %c0_i32_0 : i32, i32
  }
  func.func @transform_20(%arg0: i32) -> (i32, i32) {
    %c0_i32 = arith.constant 0 : i32
    %c0_i32_0 = arith.constant 0 : i32
    %c0_i32_1 = arith.constant 0 : i32
    return %c0_i32, %c0_i32_0 : i32, i32
  }
  func.func @transform_21(%arg0: i32) -> (i32, i32) {
    %c0_i32 = arith.constant 0 : i32
    %c0_i32_0 = arith.constant 0 : i32
    %c0_i32_1 = arith.constant 0 : i32
    return %c0_i32, %c0_i32_0 : i32, i32
  }
  func.func @transform_22(%arg0: i32) -> (i32, i32) {
    %c0_i32 = arith.constant 0 : i32
    %c0_i32_0 = arith.constant 0 : i32
    %c0_i32_1 = arith.constant 0 : i32
    return %c0_i32, %c0_i32_0 : i32, i32
  }
  func.func @transform_23(%arg0: i32) -> (i32, i32) {
    %c0_i32 = arith.constant 0 : i32
    %c0_i32_0 = arith.constant 0 : i32
    %c0_i32_1 = arith.constant 0 : i32
    return %c0_i32, %c0_i32_0 : i32, i32
  }
  func.func @transform_24(%arg0: i32) -> (i32, i32, i32) {
    %c0_i32 = arith.constant 0 : i32
    %c0_i32_0 = arith.constant 0 : i32
    %c0_i32_1 = arith.constant 0 : i32
    %c0_i32_2 = arith.constant 0 : i32
    return %c0_i32, %c0_i32_0, %c0_i32_1 : i32, i32, i32
  }
  func.func @transform_25(%arg0: i32) -> (i32, i32, i32) {
    %c0_i32 = arith.constant 0 : i32
    %c0_i32_0 = arith.constant 0 : i32
    %c0_i32_1 = arith.constant 0 : i32
    %c0_i32_2 = arith.constant 0 : i32
    return %c0_i32, %c0_i32_0, %c0_i32_1 : i32, i32, i32
  }
  func.func @transform_26(%arg0: i32) -> (i32, i32, i32) {
    %c0_i32 = arith.constant 0 : i32
    %c0_i32_0 = arith.constant 0 : i32
    %c0_i32_1 = arith.constant 0 : i32
    %c0_i32_2 = arith.constant 0 : i32
    return %c0_i32, %c0_i32_0, %c0_i32_1 : i32, i32, i32
  }
  func.func @transform_27(%arg0: i32) -> (i32, i32, i32) {
    %c0_i32 = arith.constant 0 : i32
    %c0_i32_0 = arith.constant 0 : i32
    %c0_i32_1 = arith.constant 0 : i32
    %c0_i32_2 = arith.constant 0 : i32
    return %c0_i32, %c0_i32_0, %c0_i32_1 : i32, i32, i32
  }
  func.func @transform_28(%arg0: i32) -> (i32, i32, i32) {
    %c0_i32 = arith.constant 0 : i32
    %c0_i32_0 = arith.constant 0 : i32
    %c0_i32_1 = arith.constant 0 : i32
    %c0_i32_2 = arith.constant 0 : i32
    return %c0_i32, %c0_i32_0, %c0_i32_1 : i32, i32, i32
  }
  func.func @transform_29(%arg0: i32) -> (i32, i32, i32) {
    %c0_i32 = arith.constant 0 : i32
    %c0_i32_0 = arith.constant 0 : i32
    %c0_i32_1 = arith.constant 0 : i32
    %c0_i32_2 = arith.constant 0 : i32
    return %c0_i32, %c0_i32_0, %c0_i32_1 : i32, i32, i32
  }
  func.func @transform_30(%arg0: i32) -> (i32, i32, i32) {
    %c0_i32 = arith.constant 0 : i32
    %c0_i32_0 = arith.constant 0 : i32
    %c0_i32_1 = arith.constant 0 : i32
    %c0_i32_2 = arith.constant 0 : i32
    return %c0_i32, %c0_i32_0, %c0_i32_1 : i32, i32, i32
  }
  func.func @transform_31(%arg0: i32) -> (i32, i32, i32) {
    %c0_i32 = arith.constant 0 : i32
    %c0_i32_0 = arith.constant 0 : i32
    %c0_i32_1 = arith.constant 0 : i32
    %c0_i32_2 = arith.constant 0 : i32
    return %c0_i32, %c0_i32_0, %c0_i32_1 : i32, i32, i32
  }
  func.func @transform_32(%arg0: i32) -> (i32, i32, i32) {
    %c0_i32 = arith.constant 0 : i32
    %c0_i32_0 = arith.constant 0 : i32
    %c0_i32_1 = arith.constant 0 : i32
    %c0_i32_2 = arith.constant 0 : i32
    return %c0_i32, %c0_i32_0, %c0_i32_1 : i32, i32, i32
  }
  func.func @transform_33(%arg0: i32) -> (i32, i32, i32) {
    %c0_i32 = arith.constant 0 : i32
    %c0_i32_0 = arith.constant 0 : i32
    %c0_i32_1 = arith.constant 0 : i32
    %c0_i32_2 = arith.constant 0 : i32
    return %c0_i32, %c0_i32_0, %c0_i32_1 : i32, i32, i32
  }
  func.func @transform_34(%arg0: i32) -> (i32, i32, i32) {
    %c0_i32 = arith.constant 0 : i32
    %c0_i32_0 = arith.constant 0 : i32
    %c0_i32_1 = arith.constant 0 : i32
    %c0_i32_2 = arith.constant 0 : i32
    return %c0_i32, %c0_i32_0, %c0_i32_1 : i32, i32, i32
  }
  func.func @transform_35(%arg0: i32) -> (i32, i32, i32) {
    %c0_i32 = arith.constant 0 : i32
    %c0_i32_0 = arith.constant 0 : i32
    %c0_i32_1 = arith.constant 0 : i32
    %c0_i32_2 = arith.constant 0 : i32
    return %c0_i32, %c0_i32_0, %c0_i32_1 : i32, i32, i32
  }
  func.func @transform_36(%arg0: i32) -> (i32, i32, i32) {
    %c0_i32 = arith.constant 0 : i32
    %c0_i32_0 = arith.constant 0 : i32
    %c0_i32_1 = arith.constant 0 : i32
    %c0_i32_2 = arith.constant 0 : i32
    return %c0_i32, %c0_i32_0, %c0_i32_1 : i32, i32, i32
  }
  func.func @transform_37(%arg0: i32) -> (i32, i32, i32) {
    %c0_i32 = arith.constant 0 : i32
    %c0_i32_0 = arith.constant 0 : i32
    %c0_i32_1 = arith.constant 0 : i32
    %c0_i32_2 = arith.constant 0 : i32
    return %c0_i32, %c0_i32_0, %c0_i32_1 : i32, i32, i32
  }
  func.func @transform_38(%arg0: i32) -> (i32, i32, i32) {
    %c0_i32 = arith.constant 0 : i32
    %c0_i32_0 = arith.constant 0 : i32
    %c0_i32_1 = arith.constant 0 : i32
    %c0_i32_2 = arith.constant 0 : i32
    return %c0_i32, %c0_i32_0, %c0_i32_1 : i32, i32, i32
  }
  func.func @transform_39(%arg0: i32) -> (i32, i32, i32) {
    %c0_i32 = arith.constant 0 : i32
    %c0_i32_0 = arith.constant 0 : i32
    %c0_i32_1 = arith.constant 0 : i32
    %c0_i32_2 = arith.constant 0 : i32
    return %c0_i32, %c0_i32_0, %c0_i32_1 : i32, i32, i32
  }
  func.func @transform_40(%arg0: i32) -> (i32, i32) {
    %c0_i32 = arith.constant 0 : i32
    %c0_i32_0 = arith.constant 0 : i32
    %c0_i32_1 = arith.constant 0 : i32
    return %c0_i32, %c0_i32_0 : i32, i32
  }
  func.func @transform_41(%arg0: i32) -> (i32, i32) {
    %c0_i32 = arith.constant 0 : i32
    %c0_i32_0 = arith.constant 0 : i32
    %c0_i32_1 = arith.constant 0 : i32
    return %c0_i32, %c0_i32_0 : i32, i32
  }
  func.func @transform_42(%arg0: i32) -> (i32, i32) {
    %c0_i32 = arith.constant 0 : i32
    %c0_i32_0 = arith.constant 0 : i32
    %c0_i32_1 = arith.constant 0 : i32
    return %c0_i32, %c0_i32_0 : i32, i32
  }
  func.func @transform_43(%arg0: i32) -> (i32, i32) {
    %c0_i32 = arith.constant 0 : i32
    %c0_i32_0 = arith.constant 0 : i32
    %c0_i32_1 = arith.constant 0 : i32
    return %c0_i32, %c0_i32_0 : i32, i32
  }
  func.func @transform_44(%arg0: i32) -> (i32, i32) {
    %c0_i32 = arith.constant 0 : i32
    %c0_i32_0 = arith.constant 0 : i32
    %c0_i32_1 = arith.constant 0 : i32
    return %c0_i32, %c0_i32_0 : i32, i32
  }
  func.func @transform_45(%arg0: i32) -> (i32, i32) {
    %c0_i32 = arith.constant 0 : i32
    %c0_i32_0 = arith.constant 0 : i32
    %c0_i32_1 = arith.constant 0 : i32
    return %c0_i32, %c0_i32_0 : i32, i32
  }
  func.func @transform_46(%arg0: i32) -> (i32, i32) {
    %c0_i32 = arith.constant 0 : i32
    %c0_i32_0 = arith.constant 0 : i32
    %c0_i32_1 = arith.constant 0 : i32
    return %c0_i32, %c0_i32_0 : i32, i32
  }
  func.func @transform_47(%arg0: i32) -> (i32, i32) {
    %c0_i32 = arith.constant 0 : i32
    %c0_i32_0 = arith.constant 0 : i32
    %c0_i32_1 = arith.constant 0 : i32
    return %c0_i32, %c0_i32_0 : i32, i32
  }
  func.func @transform_48(%arg0: i32) -> (i32, i32) {
    %c0_i32 = arith.constant 0 : i32
    %c0_i32_0 = arith.constant 0 : i32
    %c0_i32_1 = arith.constant 0 : i32
    return %c0_i32, %c0_i32_0 : i32, i32
  }
  func.func @transform_49(%arg0: i32) -> (i32, i32) {
    %c0_i32 = arith.constant 0 : i32
    %c0_i32_0 = arith.constant 0 : i32
    %c0_i32_1 = arith.constant 0 : i32
    return %c0_i32, %c0_i32_0 : i32, i32
  }
  func.func @transform_50(%arg0: i32) -> (i32, i32) {
    %c0_i32 = arith.constant 0 : i32
    %c0_i32_0 = arith.constant 0 : i32
    %c0_i32_1 = arith.constant 0 : i32
    return %c0_i32, %c0_i32_0 : i32, i32
  }
  func.func @transform_51(%arg0: i32) -> (i32, i32) {
    %c0_i32 = arith.constant 0 : i32
    %c0_i32_0 = arith.constant 0 : i32
    %c0_i32_1 = arith.constant 0 : i32
    return %c0_i32, %c0_i32_0 : i32, i32
  }
  func.func @transform_52(%arg0: i32) -> (i32, i32) {
    %c0_i32 = arith.constant 0 : i32
    %c0_i32_0 = arith.constant 0 : i32
    %c0_i32_1 = arith.constant 0 : i32
    return %c0_i32, %c0_i32_0 : i32, i32
  }
  func.func @transform_53(%arg0: i32) -> (i32, i32) {
    %c0_i32 = arith.constant 0 : i32
    %c0_i32_0 = arith.constant 0 : i32
    %c0_i32_1 = arith.constant 0 : i32
    return %c0_i32, %c0_i32_0 : i32, i32
  }
}

</mosaic_0001>

<bundles_post_ra>
// kernel: dual_attention_encoder.1
= control target key start
LH: loop header
LB: loop body
LE: loop exit
PB: predicated region body
PF: predicated region fallthrough
CT: control target
= control target key end

     0   :  { %s10212_s6 = smov 1   ;;  %s10213_s10 = smov 2   ;;  %s12105_s0 = inlined_call_operand.smem [shape: u32[54], index: -1, kind: input, shape index: {}] }
   0x1   :  { %s10288_s5 = sld [smem:[%s12105_s0]]   ;;  %s10214_s14 = smov 3  }
   0x2   :  { %s10293_s9 = sld [smem:[%s12105_s0 + %s10212_s6]]   ;;  %s10215_s18 = smov 4  }
   0x3   :  { %s10298_s13 = sld [smem:[%s12105_s0 + %s10213_s10]]   ;;  %s10216_s22 = smov 5  }
   0x4   :  { %s10303_s17 = sld [smem:[%s12105_s0 + %s10214_s14]]   ;;  %s10217_s26 = smov 6  }
   0x5   :  { %s10308_s21 = sld [smem:[%s12105_s0 + %s10215_s18]]   ;;  %s10218_s30 = smov 7  }
   0x6   :  { %s10313_s25 = sld [smem:[%s12105_s0 + %s10216_s22]]   ;;  %s10219_s4 = smov 8  }
   0x7   :  { %s10318_s29 = sld [smem:[%s12105_s0 + %s10217_s26]]   ;;  %s10220_s10 = smov 9  }
   0x8   :  { %s10323_s3 = sld [smem:[%s12105_s0 + %s10218_s30]]   ;;  %s10221_s15 = smov 10  }
   0x9   :  { %12132 = sst [smem:[#allocation11_spill]] %s10298_s13  ;;  %s10222_s20 = smov 11  }
   0xa   :  { %s10328_s8 = sld [smem:[%s12105_s0 + %s10219_s4]]   ;;  %s10223_s26 = smov 12  }
   0xb   :  { %s10333_s14 = sld [smem:[%s12105_s0 + %s10220_s10]]   ;;  %s10224_s1 = smov 13  }
   0xc   :  { %s10338_s19 = sld [smem:[%s12105_s0 + %s10221_s15]]   ;;  %s10225_s7 = smov 14  }
   0xd   :  { %s10343_s24 = sld [smem:[%s12105_s0 + %s10222_s20]]   ;;  %s10226_s15 = smov 15  }
   0xe   :  { %s10348_s30 = sld [smem:[%s12105_s0 + %s10223_s26]]   ;;  %s10227_s22 = smov 16  }
   0xf   :  { %s10353_s6 = sld [smem:[%s12105_s0 + %s10224_s1]]   ;;  %s10228_s28 = smov 17  }
  0x10   :  { %s10358_s12 = sld [smem:[%s12105_s0 + %s10225_s7]]   ;;  %s10229_s7 = smov 18  }
  0x11   :  { %s10363_s20 = sld [smem:[%s12105_s0 + %s10226_s15]]   ;;  %s10230_s15 = smov 19  }
  0x12   :  { %s10368_s27 = sld [smem:[%s12105_s0 + %s10227_s22]]   ;;  %s10231_s22 = smov 20  }
  0x13   :  { %s10373_s4 = sld [smem:[%s12105_s0 + %s10228_s28]]   ;;  %s10232_s28 = smov 21  }
  0x14   :  { %s10378_s13 = sld [smem:[%s12105_s0 + %s10229_s7]]   ;;  %s10233_s7 = smov 22  }
  0x15   :  { %12133 = sst [smem:[#allocation12_spill]] %s10353_s6  ;;  %s10262_s16 = smov 51  }
  0x16   :  { %12134 = sst [smem:[#allocation13_spill]] %s10358_s12  ;;  %s10263_s23 = smov 52  }
  0x17   :  { %s10383_s12 = sld [smem:[%s12105_s0 + %s10230_s15]]   ;;  %s10234_s15 = smov 23  }
  0x18   :  { %12135 = sst [smem:[#allocation14_spill]] %s10368_s27  ;;  %s10264_s1 = smov 53  }
  0x19   :  { %s10388_s27 = sld [smem:[%s12105_s0 + %s10231_s22]]   ;;  %s10235_s22 = smov 24  }
  0x1a   :  { %12136 = sst [smem:[#allocation15_spill]] %s10378_s13 }
  0x1b   :  { %s10393_s6 = sld [smem:[%s12105_s0 + %s10232_s28]]   ;;  %s10236_s28 = smov 25  }
  0x1c   :  { %s10398_s13 = sld [smem:[%s12105_s0 + %s10233_s7]]   ;;  %s10237_s7 = smov 26  }
  0x1d   :  { %12137 = sst [smem:[#allocation16_spill]] %s10383_s12 }
  0x1e   :  { %s10403_s12 = sld [smem:[%s12105_s0 + %s10234_s15]]   ;;  %s10238_s15 = smov 27  }
  0x1f   :  { %12138 = sst [smem:[#allocation17_spill]] %s10388_s27 }
  0x20   :  { %s10408_s27 = sld [smem:[%s12105_s0 + %s10235_s22]]   ;;  %s10239_s22 = smov 28  }
  0x21   :  { %12139 = sst [smem:[#allocation18_spill]] %s10393_s6 }
  0x22   :  { %12140 = sst [smem:[#allocation19_spill]] %s10398_s13 }
  0x23   :  { %s10413_s6 = sld [smem:[%s12105_s0 + %s10236_s28]]   ;;  %s10240_s28 = smov 29  }
  0x24   :  { %12141 = sst [smem:[#allocation20_spill]] %s10403_s12 }
  0x25   :  { %s10418_s13 = sld [smem:[%s12105_s0 + %s10237_s7]]   ;;  %s10241_s7 = smov 30  }
  0x26   :  { %12142 = sst [smem:[#allocation21_spill]] %s10408_s27 }
  0x27   :  { %s10423_s12 = sld [smem:[%s12105_s0 + %s10238_s15]]   ;;  %s10242_s15 = smov 31  }
  0x28   :  { %s10428_s27 = sld [smem:[%s12105_s0 + %s10239_s22]]   ;;  %s10243_s22 = smov 32  }
  0x29   :  { %12143 = sst [smem:[#allocation22_spill]] %s10413_s6 }
  0x2a   :  { %s10433_s6 = sld [smem:[%s12105_s0 + %s10240_s28]]   ;;  %s10244_s28 = smov 33  }
  0x2b   :  { %12144 = sst [smem:[#allocation23_spill]] %s10418_s13 }
  0x2c   :  { %s10438_s13 = sld [smem:[%s12105_s0 + %s10241_s7]]   ;;  %s10245_s7 = smov 34  }
  0x2d   :  { %12145 = sst [smem:[#allocation24_spill]] %s10423_s12 }
  0x2e   :  { %12146 = sst [smem:[#allocation25_spill]] %s10428_s27 }
  0x2f   :  { %s10443_s12 = sld [smem:[%s12105_s0 + %s10242_s15]]   ;;  %s10246_s15 = smov 35  }
  0x30   :  { %12147 = sst [smem:[#allocation26_spill]] %s10433_s6 }
  0x31   :  { %s10448_s27 = sld [smem:[%s12105_s0 + %s10243_s22]]   ;;  %s10247_s22 = smov 36  }
  0x32   :  { %12148 = sst [smem:[#allocation27_spill]] %s10438_s13 }
  0x33   :  { %s10453_s6 = sld [smem:[%s12105_s0 + %s10244_s28]]   ;;  %s10248_s28 = smov 37  }
  0x34   :  { %s10458_s13 = sld [smem:[%s12105_s0 + %s10245_s7]]   ;;  %s10249_s7 = smov 38  }
  0x35   :  { %12149 = sst [smem:[#allocation28_spill]] %s10443_s12 }
  0x36   :  { %s10463_s12 = sld [smem:[%s12105_s0 + %s10246_s15]]   ;;  %s10250_s15 = smov 39  }
  0x37   :  { %12150 = sst [smem:[#allocation29_spill]] %s10448_s27 }
  0x38   :  { %s10468_s27 = sld [smem:[%s12105_s0 + %s10247_s22]]   ;;  %s10251_s22 = smov 40  }
  0x39   :  { %12151 = sst [smem:[#allocation30_spill]] %s10453_s6 }
  0x3a   :  { %12152 = sst [smem:[#allocation31_spill]] %s10458_s13 }
  0x3b   :  { %s10473_s6 = sld [smem:[%s12105_s0 + %s10248_s28]]   ;;  %s10252_s28 = smov 41  }
  0x3c   :  { %12153 = sst [smem:[#allocation32_spill]] %s10463_s12 }
  0x3d   :  { %s10478_s13 = sld [smem:[%s12105_s0 + %s10249_s7]]   ;;  %s10253_s7 = smov 42  }
  0x3e   :  { %12154 = sst [smem:[#allocation33_spill]] %s10468_s27 }
  0x3f   :  { %s10483_s12 = sld [smem:[%s12105_s0 + %s10250_s15]]   ;;  %s10254_s15 = smov 43  }
  0x40   :  { %s10488_s27 = sld [smem:[%s12105_s0 + %s10251_s22]]   ;;  %s10255_s22 = smov 44  }
  0x41   :  { %12155 = sst [smem:[#allocation34_spill]] %s10473_s6 }
  0x42   :  { %s10493_s6 = sld [smem:[%s12105_s0 + %s10252_s28]]   ;;  %s10256_s28 = smov 45  }
  0x43   :  { %12156 = sst [smem:[#allocation35_spill]] %s10478_s13 }
  0x44   :  { %s10498_s13 = sld [smem:[%s12105_s0 + %s10253_s7]]   ;;  %s10257_s7 = smov 46  }
  0x45   :  { %12157 = sst [smem:[#allocation36_spill]] %s10483_s12 }
  0x46   :  { %12158 = sst [smem:[#allocation37_spill]] %s10488_s27 }
  0x47   :  { %s10503_s12 = sld [smem:[%s12105_s0 + %s10254_s15]]   ;;  %s10258_s15 = smov 47  }
  0x48   :  { %12159 = sst [smem:[#allocation38_spill]] %s10493_s6 }
  0x49   :  { %s10508_s27 = sld [smem:[%s12105_s0 + %s10255_s22]]   ;;  %s10259_s22 = smov 48  }
  0x4a   :  { %12160 = sst [smem:[#allocation39_spill]] %s10498_s13 }
  0x4b   :  { %s10513_s6 = sld [smem:[%s12105_s0 + %s10256_s28]]   ;;  %s10260_s28 = smov 49  }
  0x4c   :  { %s10518_s13 = sld [smem:[%s12105_s0 + %s10257_s7]]   ;;  %s10261_s7 = smov 50  }
  0x4d   :  { %12161 = sst [smem:[#allocation40_spill]] %s10503_s12 }
  0x4e   :  { %s10523_s12 = sld [smem:[%s12105_s0 + %s10258_s15]]  }
  0x4f   :  { %12162 = sst [smem:[#allocation41_spill]] %s10508_s27 }
  0x50   :  { %s10528_s27 = sld [smem:[%s12105_s0 + %s10259_s22]]  }
  0x51   :  { %12163 = sst [smem:[#allocation42_spill]] %s10513_s6 }
  0x52   :  { %12164 = sst [smem:[#allocation43_spill]] %s10518_s13 }
  0x53   :  { %s10533_s6 = sld [smem:[%s12105_s0 + %s10260_s28]]  }
  0x54   :  { %12165 = sst [smem:[#allocation44_spill]] %s10523_s12 }
  0x55   :  { %s7999_s13 = sld [smem:[%s12105_s0 + %s10261_s7]]  }
  0x56   :  { %12166 = sst [smem:[#allocation45_spill]] %s10528_s27 }
  0x57   :  { %s10541_s12 = sld [smem:[%s12105_s0 + %s10262_s16]]  }
  0x58   :  { %s10546_s27 = sld [smem:[%s12105_s0 + %s10263_s23]]  }
  0x59   :  { %12167 = sst [smem:[#allocation46_spill]] %s10533_s6 }
  0x5a   :  { %s10551_s6 = sld [smem:[%s12105_s0 + %s10264_s1]]  }
  0x5b   :  { %112 = vsyncpa [#allocation3], 0 }
  0x5c   :  { %113 = vsyncpa [#allocation6], 0 }
  0x5d   :  { %114 = vsyncpa [#allocation4], 0  ;;  %s10265_s7 = smov [#allocation2]   ;;  %s10266_s11 = smov [#allocation5]  }
  0x5e   :  { %s221_s10 = sshll.u32 %s10265_s7, 4  ;;  %s233_s16 = sshll.u32 %s10266_s11, 4  ;;  %s222_s10 = int_to_ptr.vmem [resolvable:$true] %s221_s10  ;;  %s234_s16 = int_to_ptr.vmem [resolvable:$true] %s233_s16 }
  0x5f   :  { %s10154_s15 = scalar_lea.vmem %s222_s10, 16  ;;  %s10158_s18 = scalar_lea.vmem %s222_s10, 32 }
  0x60   :  { %p10155_p0 = scmp.ne.s32.totalorder %s222_s10, %s10154_s15  ;;  %p10159_p1 = scmp.lt.s32.totalorder %s222_s10, %s222_s10 }
  0x61   :  { %p10160_p2 = scmp.lt.s32.totalorder %s10158_s18, %s10154_s15 }
  0x63   :  { %p10161_p3 = por %p10160_p2, %p10159_p1 }
  0x65   :  { %p10162_p4 = pnand %p10161_p3, %p10155_p0 }
  0x67   :  { %10165 = shalt.err (!%p10162_p4)
}
  0x68   :  { %224 = dma.hbm_to_vmem [thread:$0]  %s7999_s13, 16, %s222_s10, [#allocation3]  }
  0x69   :  { %s10174_s0 = scalar_lea.vmem %s234_s16, 16  ;;  %s10178_s23 = scalar_lea.vmem %s234_s16, 32 }
  0x6a   :  { %p10175_p5 = scmp.ne.s32.totalorder %s234_s16, %s10174_s0  ;;  %p10179_p6 = scmp.lt.s32.totalorder %s234_s16, %s234_s16 }
  0x6b   :  { %p10180_p7 = scmp.lt.s32.totalorder %s10178_s23, %s10174_s0 }
  0x6d   :  { %p10181_p8 = por %p10180_p7, %p10179_p6 }
  0x6f   :  { %p10182_p9 = pnand %p10181_p8, %p10175_p5 }
  0x71   :  { %10185 = shalt.err (!%p10182_p9)
}
  0x72   :  { %236 = dma.hbm_to_vmem [thread:$0]  %s10546_s27, 16, %s234_s16, [#allocation6]  }
  0x73   :  { %10206 = dma.done.wait [#allocation3], 16  }
  0x74   :  { %10207 = vsyncadd [#allocation3], 4294967280 }
  0x75   :  { %10208 = dma.done.wait [#allocation6], 16  }
  0x76   :  { %10209 = vsyncadd [#allocation6], 4294967280  ;;  %vm252_vm0 = vcmask 523264   ;;  %v10555_v0 = vld [vmem:[%s10288_s5] sm:$0xff]  ;;  %v10558_v1 = vld [vmem:[%s10288_s5 + $0x8] sm:$0xff]  ;;  %vm572_vm1 = vcmask 130048  }
  0x77   :  { %v253_v2 = vsel %vm252_vm0, %v10555_v0, 0.0  ;;  %v256_v3 = vsel %vm252_vm0, %v10558_v1, 0.0  ;;  %v303_v14 = vld [vmem:[%s10313_s25 + $0x38] sm:$0xff]  ;;  %v302_v16 = vld [vmem:[%s10313_s25 + $0x30] sm:$0xff]  ;;  %v301_v18 = vld [vmem:[%s10313_s25 + $0x28] sm:$0xff]  ;;  %s10267_s5 = smov 112  }
  0x78   :  { %254 = vadd.xlane.f32.xlu0 %v253_v2  ;;  %v399_v15 = vld [vmem:[%s10323_s3 + $0x38] sm:$0xff]  ;;  %8881 = vmatprep.subr.mxu0 %v303_v14  ;;  %v398_v17 = vld [vmem:[%s10323_s3 + $0x30] sm:$0xff]  ;;  %v397_v19 = vld [vmem:[%s10323_s3 + $0x28] sm:$0xff]  ;;  %s10268_s13 = smov 96   ;;  %s10269_s27 = smov 80   ;;  %vm1407_vm2 = vcmask 261120  }
  0x79   :  { %8900 = vmatprep.subr.mxu1 %v399_v15  ;;  %8882 = vmatpush3.msra.mxu0 %v303_v14  ;;  %v300_v20 = vld [vmem:[%s10313_s25 + $0x20] sm:$0xff]  ;;  %v299_v22 = vld [vmem:[%s10313_s25 + $0x18] sm:$0xff]  ;;  %v298_v24 = vld [vmem:[%s10313_s25 + $0x10] sm:$0xff]  ;;  %s10270_s22 = smov 16   ;;  %s10271_s26 = smov 32   ;;  %vm1410_vm3 = vcmask 392192  }
  0x7a   :  { %8901 = vmatpush3.msra.mxu1 %v399_v15  ;;  %8883 = vmatprep.subr.mxu0 %v302_v16  ;;  %v396_v21 = vld [vmem:[%s10323_s3 + $0x20] sm:$0xff]  ;;  %v395_v23 = vld [vmem:[%s10323_s3 + $0x18] sm:$0xff]  ;;  %v394_v25 = vld [vmem:[%s10323_s3 + $0x10] sm:$0xff]  ;;  %s10272_s1 = smov 48   ;;  %s12168_s28 = sld [smem:[#allocation12_spill]]  ;;  %vm10274_vm4 = vmmov 0  }
  0x7b   :  { %8902 = vmatprep.subr.mxu1 %v398_v17  ;;  %8884 = vmatpush3.msra.mxu0 %v302_v16  ;;  %v297_v26 = vld [vmem:[%s10313_s25 + $0x8] sm:$0xff]  ;;  %v296_v28 = vld [vmem:[%s10313_s25] sm:$0xff]  ;;  %v489_v30 = vld [vmem:[%s10333_s14 + $0x38] sm:$0xff]  ;;  %s12169_s2 = sld [smem:[#allocation13_spill]]  ;;  %vm3776_vm5 = vcmask 64512   ;;  %s10275_s11 = smov 120  }
  0x7c   :  { %257 = vadd.xlane.f32.xlu0 %v256_v3  ;;  %8903 = vmatpush3.msra.mxu1 %v398_v17  ;;  %v393_v27 = vld [vmem:[%s10323_s3 + $0x8] sm:$0xff]  ;;  %v392_v29 = vld [vmem:[%s10323_s3] sm:$0xff]  ;;  %v488_v47 = vld [vmem:[%s10333_s14 + $0x30] sm:$0xff]  ;;  %s12170_s7 = sld [smem:[#allocation14_spill]]  ;;  %s10276_s16 = smov 104   ;;  %vm4929_vm6 = vcmask 195584  }
  0x7d   :  { %8885 = vmatprep.subr.mxu0 %v301_v18  ;;  %8904 = vmatprep.subr.mxu1 %v397_v19  ;;  %v8003_v38 = vld [vmem:[%s10303_s17] ss:$0 sm:$0xff]  ;;  %v487_v48 = vld [vmem:[%s10333_s14 + $0x28] sm:$0xff]  ;;  %v485_v50 = vld [vmem:[%s10333_s14 + $0x18] sm:$0xff]  ;;  %s12171_s10 = sld [smem:[#allocation15_spill]]  ;;  %s10277_s15 = smov 8  }
  0x7e   :  { %8886 = vmatpush3.msra.mxu0 %v301_v18  ;;  %8905 = vmatpush3.msra.mxu1 %v397_v19  ;;  %v8004_v40 = vld [vmem:[%s10308_s21] ss:$0 sm:$0xff]  ;;  %v484_v51 = vld [vmem:[%s10333_s14 + $0x10] sm:$0xff]  ;;  %v483_v52 = vld [vmem:[%s10333_s14 + $0x8] sm:$0xff]  ;;  %s12185_s18 = sld [smem:[#allocation29_spill]]  ;;  %s10278_s0 = smov 24  }
  0x7f   :  { %8887 = vmatprep.subr.mxu0 %v300_v20  ;;  %8906 = vmatprep.subr.mxu1 %v396_v21  ;;  %v486_v49 = vld [vmem:[%s10333_s14 + $0x20] sm:$0xff]  ;;  %s12186_s23 = sld [smem:[#allocation30_spill]]  ;;  %vm7646_vm7 = vcmask 785408   ;;  %vm7722_vm8 = vcmask 779264   ;;  %vm7932_vm9 = vcmask 17408  }
  0x80   :  { %8888 = vmatpush3.msra.mxu0 %v300_v20  ;;  %8907 = vmatpush3.msra.mxu1 %v396_v21  ;;  %v482_v53 = vld [vmem:[%s10333_s14] sm:$0xff] }
  0x81   :  { %8889 = vmatprep.subr.mxu0 %v299_v22  ;;  %8908 = vmatprep.subr.mxu1 %v395_v23  ;;  %v8008_v54 = vld [vmem:[%s10328_s8] ss:$0 sm:$0xff] }
  0x82   :  { %8890 = vmatpush3.msra.mxu0 %v299_v22  ;;  %8909 = vmatpush3.msra.mxu1 %v395_v23  ;;  %v8005_v58 = vld [vmem:[%s10318_s29] ss:$0 sm:$0xff] }
  0x83   :  { %8891 = vmatprep.subr.mxu0 %v298_v24  ;;  %8910 = vmatprep.subr.mxu1 %v394_v25  ;;  %v8011_v2 = vld [vmem:[%s10338_s19] ss:$0 sm:$0xff] }
  0x84   :  { %8892 = vmatpush3.msra.mxu0 %v298_v24  ;;  %8911 = vmatpush3.msra.mxu1 %v394_v25 }
  0x85   :  { %8893 = vmatprep.subr.mxu0 %v297_v26  ;;  %8912 = vmatprep.subr.mxu1 %v393_v27 }
  0x86   :  { %8894 = vmatpush3.msra.mxu0 %v297_v26  ;;  %8913 = vmatpush3.msra.mxu1 %v393_v27 }
  0x87   :  { %8895 = vmatprep.subr.mxu0 %v296_v28  ;;  %8914 = vmatprep.subr.mxu1 %v392_v29 }
  0x88   :  { %8896 = vmatpush3.msra.mxu0 %v296_v28  ;;  %8915 = vmatpush3.msra.mxu1 %v392_v29 }
  0x89   :  { %8919 = vmatprep.subr.mxu0 %v489_v30 }
 0x101   :  { %v255_v4 = vpop.xlane.xlu0 %254 }
 0x102   :  { %v260_v5 = vmul.f32 0.015625, %v255_v4 }
 0x104   :  { %v10565_v6 = vsub.f32 %v10555_v0, %v260_v5 }
 0x105   :  { %v258_v7 = vpop.xlane.xlu0 %257 }
 0x106   :  { %v261_v8 = vmul.f32 0.015625, %v258_v7  ;;  %v264_v9 = vmul.f32 %v10565_v6, %v10565_v6 }
 0x108   :  { %v10570_v10 = vsub.f32 %v10558_v1, %v261_v8  ;;  %v266_v11 = vsel %vm252_vm0, %v264_v9, 0.0  ;;  %v10642_v8 = vld [vmem:[%s10293_s9 + $0x8] sm:$0xff] }
 0x109   :  { %267 = vadd.xlane.f32.xlu1 %v266_v11  ;;  %v10645_v11 = vld [vmem:[%s10293_s9] sm:$0xff] }
 0x10a   :  { %v265_v12 = vmul.f32 %v10570_v10, %v10570_v10 }
 0x10c   :  { %v269_v13 = vsel %vm252_vm0, %v265_v12, 0.0 }
 0x10d   :  { %270 = vadd.xlane.f32.xlu1 %v269_v13 }
 0x192   :  { %v268_v31 = vpop.xlane.xlu1 %267 }
 0x193   :  { %v272_v32 = vmul.f32 0.015625, %v268_v31 }
 0x195   :  { %v274_v33 = vadd.f32 1e-05, %v272_v32 }
 0x196   :  { %v271_v34 = vpop.xlane.xlu1 %270 }
 0x197   :  { %9882 = vrsqrt.f32 %v274_v33  ;;  %v273_v35 = vmul.f32 0.015625, %v271_v34 }
 0x199   :  { %v275_v36 = vadd.f32 1e-05, %v273_v35 }
 0x19b   :  { %9884 = vrsqrt.f32 %v275_v36 }
 0x1a4   :  { %v9883_v37 = vpop.eup %9882 }
 0x1a5   :  { %v278_v39 = vmul.f32 %v9883_v37, %v10565_v6 }
 0x1a7   :  { %v286_v41 = vmul.f32 %v8003_v38, %v278_v39 }
 0x1a8   :  { %v9885_v42 = vpop.eup %9884 }
 0x1a9   :  { %v279_v43 = vmul.f32 %v9885_v42, %v10570_v10  ;;  %v294_v44 = vadd.f32 %v8004_v40, %v286_v41 }
 0x1ab   :  { %v287_v45 = vmul.f32 %v8003_v38, %v279_v43  ;;  %8897 = vmatprep.mubr.msk.f32.mxu0 %vm252_vm0, %v294_v44  ;;  %8916 = vmatprep.mubr.msk.f32.mxu1 %vm252_vm0, %v294_v44 }
 0x1ad   :  { %v295_v46 = vadd.f32 %v8004_v40, %v287_v45 }
 0x1af   :  { %8898 = vmatmul.mubr.msk.f32.vlgmr.msra.gmra.mxu0 %vm252_vm0, %v295_v46  ;;  %8917 = vmatmul.mubr.msk.f32.vlgmr.msra.gmra.mxu1 %vm252_vm0, %v295_v46 }
 0x1b0   :  { %8920 = vmatpush3.msra.mxu0 %v489_v30  ;;  %8935 = vmatprep.mubr.msk.f32.mxu0 %vm252_vm0, %v294_v44 }
 0x1b1   :  { %8921 = vmatprep.subr.mxu0 %v488_v47 }
 0x1b2   :  { %8922 = vmatpush3.msra.mxu0 %v488_v47 }
 0x1b3   :  { %8923 = vmatprep.subr.mxu0 %v487_v48 }
 0x1b4   :  { %8924 = vmatpush3.msra.mxu0 %v487_v48 }
 0x1b5   :  { %8925 = vmatprep.subr.mxu0 %v486_v49 }
 0x1b6   :  { %8926 = vmatpush3.msra.mxu0 %v486_v49 }
 0x1b7   :  { %8927 = vmatprep.subr.mxu0 %v485_v50 }
 0x1b8   :  { %8928 = vmatpush3.msra.mxu0 %v485_v50 }
 0x1b9   :  { %8929 = vmatprep.subr.mxu0 %v484_v51 }
 0x1ba   :  { %8930 = vmatpush3.msra.mxu0 %v484_v51 }
 0x1bb   :  { %8931 = vmatprep.subr.mxu0 %v483_v52 }
 0x1bc   :  { %8932 = vmatpush3.msra.mxu0 %v483_v52 }
 0x1bd   :  { %8933 = vmatprep.subr.mxu0 %v482_v53 }
 0x1be   :  { %8934 = vmatpush3.msra.mxu0 %v482_v53 }
 0x1bf   :  { %8936 = vmatmul.mubr.msk.f32.vlgmr.msra.gmra.mxu0 %vm252_vm0, %v295_v46 }
 0x26f   :  { %v8899_v55 = vpop.f32.mrf.mxu0  ;;  %v8918_v56 = vpop.f32.mrf.mxu1 }
 0x270   :  { %v10611_v57 = vadd.f32 %v8918_v56, %v8008_v54  ;;  %v10628_v63 = vadd.f32 %v8899_v55, %v8005_v58 }
 0x271   :  { %v383_v59 = vpop.f32.mrf.mxu0  ;;  %v473_v60 = vpop.f32.mrf.mxu1 }
 0x272   :  { %v10614_v61 = vadd.f32 %v8005_v58, %v383_v59  ;;  %v10616_v62 = vadd.f32 %v8008_v54, %v473_v60  ;;  %8938 = vmatprep.subr.msk.mxu1 %vm572_vm1, %v10611_v57 }
 0x273   :  { %8939 = vmatpush3.xpose.msk.msra.mxu1 %vm572_vm1, %v10611_v57 }
 0x274   :  { %8940 = vmatprep.subr.msk.mxu1 %vm572_vm1, %v10616_v62  ;;  %8942 = vmatprep.mubr.msk.f32.mxu1 %vm572_vm1, %v10614_v61 }
 0x277   :  { %8941 = vmatpush3.xpose.msk.msra.mxu1 %vm572_vm1, %v10616_v62 }
 0x27a   :  { %8943 = vmatmul.mubr.msk.f32.vlgmr.msra.gmra.mxu1 %vm572_vm1, %v10628_v63 }
 0x27f   :  { %v8937_v3 = vpop.f32.mrf.mxu0 }
 0x280   :  { %v10633_v4 = vadd.f32 %v8937_v3, %v8011_v2 }
 0x281   :  { %v563_v5 = vpop.f32.mrf.mxu0 }
 0x282   :  { %v10635_v6 = vadd.f32 %v8011_v2, %v563_v5  ;;  %8945 = vmatprep.subr.mxu1 %v10633_v4 }
 0x283   :  { %8946 = vmatpush3.msra.mxu1 %v10633_v4 }
 0x284   :  { %8947 = vmatprep.subr.mxu1 %v10635_v6 }
 0x285   :  { %8948 = vmatpush3.msra.mxu1 %v10635_v6 }
 0x33a   :  { %v8944_v7 = vpop.f32.mrf.mxu1 }
 0x33b   :  { %v661_v9 = vmul.f32 0.25, %v8944_v7 }
 0x33c   :  { %v651_v10 = vpop.f32.mrf.mxu1 }
 0x33d   :  { %v660_v12 = vmul.f32 0.25, %v651_v10  ;;  %v663_v13 = vadd.f32 %v661_v9, %v10642_v8 }
 0x33f   :  { %v667_v14 = vsel %vm572_vm1, %v663_v13, -inf  ;;  %v662_v15 = vadd.f32 %v660_v12, %v10645_v11 }
 0x340   :  { %668 = vmax.xlane.f32.xlu1 %v667_v14 }
 0x341   :  { %v664_v16 = vsel %vm572_vm1, %v662_v15, -inf }
 0x342   :  { %665 = vmax.xlane.f32.xlu0 %v664_v16 }
 0x3c9   :  { %v669_v17 = vpop.xlane.xlu1 %668 }
 0x3ca   :  { %v671_v18 = vsub.f32 %v663_v13, %v669_v17 }
 0x3cb   :  { %v666_v19 = vpop.xlane.xlu0 %665 }
 0x3cc   :  { %v674_v20 = vmul.f32 1.442695, %v671_v18  ;;  %v670_v21 = vsub.f32 %v662_v15, %v666_v19 }
 0x3ce   :  { %9886 = vpow2.f32 %v674_v20  ;;  %v672_v22 = vmul.f32 1.442695, %v670_v21 }
 0x3d0   :  { %9888 = vpow2.f32 %v672_v22 }
 0x3db   :  { %v9887_v23 = vpop.eup %9886 }
 0x3dc   :  { %v679_v24 = vsel %vm572_vm1, %v9887_v23, 0.0 }
 0x3dd   :  { %v9889_v25 = vpop.eup %9888  ;;  %680 = vadd.xlane.f32.xlu1 %v679_v24 }
 0x3de   :  { %v676_v26 = vsel %vm572_vm1, %v9889_v25, 0.0 }
 0x3df   :  { %677 = vadd.xlane.f32.xlu0 %v676_v26 }
 0x3ee   :  { %771 = vrot.lane.b32.xlu1 %v10616_v62, %s10267_s5 }
 0x3f2   :  { %979 = vrot.lane.b32.xlu1 %v10611_v57, %s10268_s13 }
 0x3f5   :  { %773 = vrot.lane.b32.xlu0 %v10611_v57, %s10267_s5 }
 0x3f6   :  { %767 = vrot.lane.b32.xlu1 %v10614_v61, %s10267_s5 }
 0x3f9   :  { %769 = vrot.lane.b32.xlu0 %v10628_v63, %s10267_s5 }
 0x3fa   :  { %977 = vrot.lane.b32.xlu1 %v10616_v62, %s10268_s13 }
 0x3fd   :  { %973 = vrot.lane.b32.xlu0 %v10614_v61, %s10268_s13 }
 0x3fe   :  { %975 = vrot.lane.b32.xlu1 %v10628_v63, %s10268_s13 }
 0x466   :  { %v681_v27 = vpop.xlane.xlu1 %680 }
 0x467   :  { %9890 = vrcp.f32 %v681_v27 }
 0x468   :  { %v678_v28 = vpop.xlane.xlu0 %677 }
 0x469   :  { %9892 = vrcp.f32 %v678_v28 }
 0x46a   :  { %v772_v29 = vpop.permute.xlu1 %771 }
 0x46c   :  { %v774_v30 = vpop.permute.xlu0 %773 }
 0x46d   :  { %8952 = vmatprep.subr.msk.mxu1 %vm572_vm1, %v774_v30 }
 0x46e   :  { %v980_v31 = vpop.permute.xlu1 %979 }
 0x46f   :  { %8966 = vmatprep.subr.msk.mxu0 %vm572_vm1, %v980_v31 }
 0x470   :  { %8967 = vmatpush3.xpose.msk.msra.mxu0 %vm572_vm1, %v980_v31  ;;  %v770_v32 = vpop.permute.xlu0 %769 }
 0x472   :  { %v768_v33 = vpop.permute.xlu1 %767 }
 0x474   :  { %v974_v34 = vpop.permute.xlu0 %973  ;;  %v9891_v35 = vpop.eup %9890 }
 0x475   :  { %8970 = vmatprep.mubr.msk.f32.mxu0 %vm572_vm1, %v974_v34  ;;  %v685_v39 = vmul.f32 %v9891_v35, %v9887_v23 }
 0x476   :  { %v9893_v36 = vpop.eup %9892  ;;  %v978_v37 = vpop.permute.xlu1 %977 }
 0x477   :  { %8968 = vmatprep.subr.msk.mxu0 %vm572_vm1, %v978_v37  ;;  %v683_v38 = vmul.f32 %v9893_v36, %v9889_v25 }
 0x478   :  { %8969 = vmatpush3.xpose.msk.msra.mxu0 %vm572_vm1, %v978_v37 }
 0x479   :  { %8949 = vmatprep.mubr.msk.f32.mxu1 %vm572_vm1, %v683_v38 }
 0x47a   :  { %v976_v40 = vpop.permute.xlu1 %975  ;;  %8950 = vmatmul.mubr.msk.f32.vlgmr.msra.gmra.mxu1 %vm572_vm1, %v685_v39 }
 0x47b   :  { %8953 = vmatpush3.xpose.msk.msra.mxu1 %vm572_vm1, %v774_v30  ;;  %8956 = vmatprep.mubr.msk.f32.mxu1 %vm572_vm1, %v768_v33 }
 0x47c   :  { %8954 = vmatprep.subr.msk.mxu1 %vm572_vm1, %v772_v29  ;;  %8971 = vmatmul.mubr.msk.f32.vlgmr.msra.gmra.mxu0 %vm572_vm1, %v976_v40 }
 0x47f   :  { %8955 = vmatpush3.xpose.msk.msra.mxu1 %vm572_vm1, %v772_v29 }
 0x482   :  { %8957 = vmatmul.mubr.msk.f32.vlgmr.msra.gmra.mxu1 %vm572_vm1, %v770_v32 }
 0x53a   :  { %v10683_v41 = vpop.f32.mrf.mxu1 }
 0x53c   :  { %v8972_v42 = vpop.f32.mrf.mxu0  ;;  %v10685_v43 = vpop.f32.mrf.mxu1 }
 0x53d   :  { %v1065_v53 = vmul.f32 0.25, %v8972_v42 }
 0x53e   :  { %v1055_v44 = vpop.f32.mrf.mxu0 }
 0x53f   :  { %v1064_v48 = vmul.f32 0.25, %v1055_v44  ;;  %v1067_v58 = vadd.f32 %v1065_v53, %v10642_v8 }
 0x541   :  { %v1066_v55 = vadd.f32 %v1064_v48, %v10645_v11  ;;  %v1071_v59 = vsel %vm572_vm1, %v1067_v58, -inf }
 0x542   :  { %v8958_v45 = vpop.f32.mrf.mxu1 }
 0x543   :  { %v859_v46 = vmul.f32 0.25, %v8958_v45  ;;  %v1068_v56 = vsel %vm572_vm1, %v1066_v55, -inf }
 0x544   :  { %v849_v47 = vpop.f32.mrf.mxu1 }
 0x545   :  { %v858_v49 = vmul.f32 0.25, %v849_v47  ;;  %v861_v50 = vadd.f32 %v859_v46, %v10642_v8 }
 0x547   :  { %v865_v51 = vsel %vm572_vm1, %v861_v50, -inf  ;;  %v860_v52 = vadd.f32 %v858_v49, %v10645_v11 }
 0x548   :  { %866 = vmax.xlane.f32.xlu1 %v865_v51 }
 0x549   :  { %v862_v54 = vsel %vm572_vm1, %v860_v52, -inf }
 0x54a   :  { %863 = vmax.xlane.f32.xlu0 %v862_v54 }
 0x54e   :  { %1069 = vmax.xlane.f32.xlu0 %v1068_v56 }
 0x552   :  { %1072 = vmax.xlane.f32.xlu0 %v1071_v59 }
 0x5d1   :  { %v867_v3 = vpop.xlane.xlu1 %866 }
 0x5d2   :  { %v869_v9 = vsub.f32 %v861_v50, %v867_v3 }
 0x5d3   :  { %v864_v60 = vpop.xlane.xlu0 %863 }
 0x5d4   :  { %v868_v2 = vsub.f32 %v860_v52, %v864_v60  ;;  %v872_v15 = vmul.f32 1.442695, %v869_v9 }
 0x5d6   :  { %v870_v10 = vmul.f32 1.442695, %v868_v2 }
 0x5d7   :  { %v1070_v5 = vpop.xlane.xlu0 %1069 }
 0x5d8   :  { %v1074_v7 = vsub.f32 %v1066_v55, %v1070_v5 }
 0x5da   :  { %v1076_v12 = vmul.f32 1.442695, %v1074_v7 }
 0x5db   :  { %v1073_v13 = vpop.xlane.xlu0 %1072 }
 0x5dc   :  { %9894 = vpow2.f32 %v1076_v12  ;;  %v1075_v14 = vsub.f32 %v1067_v58, %v1073_v13 }
 0x5dd   :  { %9896 = vpow2.f32 %v870_v10 }
 0x5de   :  { %v1078_v16 = vmul.f32 1.442695, %v1075_v14 }
 0x5e0   :  { %9898 = vpow2.f32 %v1078_v16  ;;  %v1419_v16 = vld [vmem:[%s10343_s24 + $0x30] sm:$0xff] }
 0x5e1   :  { %9900 = vpow2.f32 %v872_v15  ;;  %v1420_v15 = vld [vmem:[%s10343_s24 + $0x38] sm:$0xff] }
 0x5e9   :  { %v9895_v17 = vpop.eup %9894 }
 0x5ea   :  { %v1080_v18 = vsel %vm572_vm1, %v9895_v17, 0.0  ;;  %v9897_v19 = vpop.eup %9896 }
 0x5eb   :  { %1081 = vadd.xlane.f32.xlu0 %v1080_v18  ;;  %v874_v21 = vsel %vm572_vm1, %v9897_v19, 0.0  ;;  %v1417_v18 = vld [vmem:[%s10343_s24 + $0x20] sm:$0xff] }
 0x5ed   :  { %v9899_v20 = vpop.eup %9898 }
 0x5ee   :  { %v1083_v22 = vsel %vm572_vm1, %v9899_v20, 0.0  ;;  %v9901_v23 = vpop.eup %9900 }
 0x5ef   :  { %875 = vadd.xlane.f32.xlu0 %v874_v21  ;;  %1084 = vadd.xlane.f32.xlu1 %v1083_v22  ;;  %v877_v24 = vsel %vm572_vm1, %v9901_v23, 0.0  ;;  %v1414_v21 = vld [vmem:[%s10343_s24 + $0x8] sm:$0xff]  ;;  %v1413_v22 = vld [vmem:[%s10343_s24] sm:$0xff] }
 0x5f3   :  { %878 = vadd.xlane.f32.xlu1 %v877_v24 }
 0x604   :  { %886 = vrot.lane.b32.xlu1 %v10635_v6, %s10267_s5 }
 0x605   :  { %888 = vrot.lane.b32.xlu0 %v10633_v4, %s10267_s5 }
 0x608   :  { %1092 = vrot.lane.b32.xlu1 %v10633_v4, %s10268_s13 }
 0x609   :  { %1183 = vrot.lane.b32.xlu0 %v10611_v57, %s10269_s27 }
 0x60c   :  { %1090 = vrot.lane.b32.xlu1 %v10635_v6, %s10268_s13 }
 0x60d   :  { %1177 = vrot.lane.b32.xlu0 %v10614_v61, %s10269_s27 }
 0x610   :  { %1181 = vrot.lane.b32.xlu1 %v10616_v62, %s10269_s27 }
 0x614   :  { %1179 = vrot.lane.b32.xlu1 %v10628_v63, %s10269_s27 }
 0x674   :  { %v1082_v25 = vpop.xlane.xlu0 %1081 }
 0x678   :  { %v1085_v26 = vpop.xlane.xlu1 %1084  ;;  %v876_v27 = vpop.xlane.xlu0 %875 }
 0x679   :  { %9902 = vrcp.f32 %v876_v27 }
 0x67a   :  { %9904 = vrcp.f32 %v1082_v25 }
 0x67c   :  { %v879_v28 = vpop.xlane.xlu1 %878  ;;  %v889_v29 = vpop.permute.xlu0 %888 }
 0x67d   :  { %9906 = vrcp.f32 %v879_v28  ;;  %8959 = vmatprep.subr.mxu1 %v889_v29 }
 0x67e   :  { %8960 = vmatpush3.msra.mxu1 %v889_v29  ;;  %9908 = vrcp.f32 %v1085_v26 }
 0x680   :  { %v887_v57 = vpop.permute.xlu1 %886  ;;  %v1184_v32 = vpop.permute.xlu0 %1183 }
 0x681   :  { %8961 = vmatprep.subr.mxu1 %v887_v57 }
 0x682   :  { %8962 = vmatpush3.msra.mxu1 %v887_v57 }
 0x684   :  { %v1093_v61 = vpop.permute.xlu1 %1092  ;;  %v1178_v38 = vpop.permute.xlu0 %1177 }
 0x685   :  { %8973 = vmatprep.subr.mxu1 %v1093_v61 }
 0x686   :  { %v9903_v62 = vpop.eup %9902 }
 0x687   :  { %v881_v30 = vmul.f32 %v9903_v62, %v9897_v19  ;;  %v9905_v31 = vpop.eup %9904  ;;  %v1416_v19 = vld [vmem:[%s10343_s24 + $0x18] sm:$0xff] }
 0x688   :  { %v1091_v35 = vpop.permute.xlu1 %1090  ;;  %v1087_v36 = vmul.f32 %v9905_v31, %v9895_v17  ;;  %v1418_v17 = vld [vmem:[%s10343_s24 + $0x28] sm:$0xff] }
 0x689   :  { %8963 = vmatprep.mubr.msk.f32.mxu1 %vm572_vm1, %v881_v30 }
 0x68a   :  { %v9907_v63 = vpop.eup %9906 }
 0x68b   :  { %v883_v33 = vmul.f32 %v9907_v63, %v9901_v23  ;;  %v9909_v34 = vpop.eup %9908 }
 0x68c   :  { %v1089_v37 = vmul.f32 %v9909_v34, %v9899_v20  ;;  %v1182_v39 = vpop.permute.xlu1 %1181  ;;  %v1415_v20 = vld [vmem:[%s10343_s24 + $0x10] sm:$0xff] }
 0x68d   :  { %8964 = vmatmul.mubr.msk.f32.vlgmr.msra.gmra.mxu1 %vm572_vm1, %v883_v33 }
 0x68e   :  { %8974 = vmatpush3.msra.mxu1 %v1093_v61  ;;  %8977 = vmatprep.mubr.msk.f32.mxu1 %vm572_vm1, %v1087_v36 }
 0x68f   :  { %8975 = vmatprep.subr.mxu1 %v1091_v35 }
 0x690   :  { %8976 = vmatpush3.msra.mxu1 %v1091_v35  ;;  %v1180_v40 = vpop.permute.xlu1 %1179 }
 0x691   :  { %8980 = vmatprep.subr.msk.mxu1 %vm572_vm1, %v1184_v32  ;;  %8978 = vmatmul.mubr.msk.f32.vlgmr.msra.gmra.mxu1 %vm572_vm1, %v1089_v37 }
 0x692   :  { %8981 = vmatpush3.xpose.msk.msra.mxu1 %vm572_vm1, %v1184_v32  ;;  %8984 = vmatprep.mubr.msk.f32.mxu1 %vm572_vm1, %v1178_v38 }
 0x693   :  { %8982 = vmatprep.subr.msk.mxu1 %vm572_vm1, %v1182_v39 }
 0x696   :  { %8983 = vmatpush3.xpose.msk.msra.mxu1 %vm572_vm1, %v1182_v39 }
 0x699   :  { %8985 = vmatmul.mubr.msk.f32.vlgmr.msra.gmra.mxu1 %vm572_vm1, %v1180_v40 }
 0x74d   :  { %v8965_v42 = vpop.f32.mrf.mxu1 }
 0x74f   :  { %v964_v44 = vpop.f32.mrf.mxu1 }
 0x751   :  { %v8979_v45 = vpop.f32.mrf.mxu1 }
 0x753   :  { %v1168_v46 = vpop.f32.mrf.mxu1 }
 0x759   :  { %v8986_v47 = vpop.f32.mrf.mxu1 }
 0x75a   :  { %v1269_v48 = vmul.f32 0.25, %v8986_v47 }
 0x75b   :  { %v1259_v49 = vpop.f32.mrf.mxu1 }
 0x75c   :  { %v1268_v50 = vmul.f32 0.25, %v1259_v49  ;;  %v1271_v51 = vadd.f32 %v1269_v48, %v10642_v8 }
 0x75e   :  { %v1275_v52 = vsel %vm572_vm1, %v1271_v51, -inf  ;;  %v1270_v53 = vadd.f32 %v1268_v50, %v10645_v11  ;;  %v1564_v50 = vld [vmem:[%s10363_s20 + $0x38] sm:$0xff] }
 0x75f   :  { %1276 = vmax.xlane.f32.xlu1 %v1275_v52  ;;  %9013 = vmatprep.subr.mxu1 %v1564_v50  ;;  %v1562_v52 = vld [vmem:[%s10363_s20 + $0x28] sm:$0xff] }
 0x760   :  { %v1272_v54 = vsel %vm572_vm1, %v1270_v53, -inf  ;;  %9014 = vmatpush3.msra.mxu1 %v1564_v50 }
 0x761   :  { %1273 = vmax.xlane.f32.xlu0 %v1272_v54  ;;  %v1560_v54 = vld [vmem:[%s10363_s20 + $0x18] sm:$0xff] }
 0x770   :  { %1294 = vrot.lane.b32.xlu1 %v10635_v6, %s10269_s27 }
 0x774   :  { %1383 = vrot.lane.b32.xlu1 %v964_v44, %s10270_s22 }
 0x778   :  { %1385 = vrot.lane.b32.xlu1 %v8965_v42, %s10270_s22 }
 0x77c   :  { %1393 = vrot.lane.b32.xlu1 %v8979_v45, %s10271_s26 }
 0x7e8   :  { %v1277_v8 = vpop.xlane.xlu1 %1276 }
 0x7e9   :  { %v1279_v55 = vsub.f32 %v1271_v51, %v1277_v8  ;;  %v1563_v51 = vld [vmem:[%s10363_s20 + $0x30] sm:$0xff] }
 0x7ea   :  { %v1274_v56 = vpop.xlane.xlu0 %1273  ;;  %9015 = vmatprep.subr.mxu1 %v1563_v51  ;;  %v1559_v8 = vld [vmem:[%s10363_s20 + $0x10] sm:$0xff] }
 0x7eb   :  { %v1282_v58 = vmul.f32 1.442695, %v1279_v55  ;;  %v1278_v11 = vsub.f32 %v1270_v53, %v1274_v56  ;;  %9016 = vmatpush3.msra.mxu1 %v1563_v51  ;;  %v1561_v53 = vld [vmem:[%s10363_s20 + $0x20] sm:$0xff]  ;;  %v1558_v55 = vld [vmem:[%s10363_s20 + $0x8] sm:$0xff] }
 0x7ec   :  { %v1295_v10 = vpop.permute.xlu1 %1294  ;;  %9017 = vmatprep.subr.mxu1 %v1562_v52  ;;  %v1557_v56 = vld [vmem:[%s10363_s20] sm:$0xff] }
 0x7ed   :  { %9910 = vpow2.f32 %v1282_v58  ;;  %v1280_v59 = vmul.f32 1.442695, %v1278_v11  ;;  %9018 = vmatpush3.msra.mxu1 %v1562_v52  ;;  %v1670_v58 = vld [vmem:[%s10373_s4 + $0x78] sm:$0xff]  ;;  %v1669_v11 = vld [vmem:[%s10373_s4 + $0x70] sm:$0xff] }
 0x7ee   :  { %9019 = vmatprep.subr.mxu1 %v1561_v53  ;;  %v8058_v52 = vld [vmem:[%s10313_s25 + $0x78] sm:$0xff] }
 0x7ef   :  { %9912 = vpow2.f32 %v1280_v59  ;;  %9020 = vmatpush3.msra.mxu1 %v1561_v53  ;;  %v1668_v59 = vld [vmem:[%s10373_s4 + $0x68] sm:$0xff]  ;;  %v8082_v53 = vld [vmem:[%s10333_s14 + $0x78] sm:$0xff] }
 0x7f0   :  { %v1384_v25 = vpop.permute.xlu1 %1383  ;;  %9021 = vmatprep.subr.mxu1 %v1560_v54 }
 0x7f1   :  { %v1405_v29 = vsel %vm572_vm1, %v10685_v43, %v1384_v25  ;;  %v8040_v43 = vld [vmem:[%s10348_s30] ss:$0 sm:$0xff]  ;;  %9022 = vmatpush3.msra.mxu1 %v1560_v54  ;;  %v8057_v54 = vld [vmem:[%s10313_s25 + $0x70] sm:$0xff] }
 0x7f2   :  { %9023 = vmatprep.subr.mxu1 %v1559_v8 }
 0x7f3   :  { %9024 = vmatpush3.msra.mxu1 %v1559_v8  ;;  %v8081_v8 = vld [vmem:[%s10333_s14 + $0x70] sm:$0xff] }
 0x7f4   :  { %v1386_v26 = vpop.permute.xlu1 %1385  ;;  %9025 = vmatprep.subr.mxu1 %v1558_v55 }
 0x7f5   :  { %v1406_v61 = vsel %vm572_vm1, %v10683_v41, %v1386_v26  ;;  %9026 = vmatpush3.msra.mxu1 %v1558_v55  ;;  %v8056_v55 = vld [vmem:[%s10313_s25 + $0x68] sm:$0xff] }
 0x7f6   :  { %9027 = vmatprep.subr.mxu1 %v1557_v56 }
 0x7f7   :  { %9028 = vmatpush3.msra.mxu1 %v1557_v56  ;;  %v8080_v56 = vld [vmem:[%s10333_s14 + $0x68] sm:$0xff] }
 0x7f8   :  { %v1394_v27 = vpop.permute.xlu1 %1393  ;;  %9067 = vmatprep.subr.mxu1 %v8058_v52 }
 0x7f9   :  { %v1409_v31 = vsel %vm1407_vm2, %v1406_v61, %v1394_v27  ;;  %v1655_v61 = vld [vmem:[%s10373_s4] sm:$0xff] }
 0x7fa   :  { %v9911_v60 = vpop.eup %9910 }
 0x7fb   :  { %v1287_v2 = vsel %vm572_vm1, %v9911_v60, 0.0 }
 0x7fc   :  { %v9913_v6 = vpop.eup %9912  ;;  %1288 = vadd.xlane.f32.xlu0 %v1287_v2  ;;  %v1666_v2 = vld [vmem:[%s10373_s4 + $0x58] sm:$0xff] }
 0x7fd   :  { %v1284_v3 = vsel %vm572_vm1, %v9913_v6, 0.0 }
 0x800   :  { %1285 = vadd.xlane.f32.xlu0 %v1284_v3  ;;  %v1664_v3 = vld [vmem:[%s10373_s4 + $0x48] sm:$0xff] }
 0x816   :  { %1296 = vrot.lane.b32.xlu0 %v10633_v4, %s10269_s27 }
 0x81a   :  { %1391 = vrot.lane.b32.xlu0 %v1168_v46, %s10271_s26 }
 0x885   :  { %v1289_v5 = vpop.xlane.xlu0 %1288 }
 0x886   :  { %9914 = vrcp.f32 %v1289_v5  ;;  %v1663_v5 = vld [vmem:[%s10373_s4 + $0x40] sm:$0xff] }
 0x889   :  { %v1286_v7 = vpop.xlane.xlu0 %1285 }
 0x88a   :  { %9916 = vrcp.f32 %v1286_v7  ;;  %v1662_v7 = vld [vmem:[%s10373_s4 + $0x38] sm:$0xff] }
 0x88d   :  { %v1297_v9 = vpop.permute.xlu0 %1296 }
 0x88e   :  { %8987 = vmatprep.subr.mxu0 %v1297_v9 }
 0x88f   :  { %8988 = vmatpush3.msra.mxu0 %v1297_v9  ;;  %v1661_v9 = vld [vmem:[%s10373_s4 + $0x30] sm:$0xff] }
 0x890   :  { %8989 = vmatprep.subr.mxu0 %v1295_v10 }
 0x891   :  { %8990 = vmatpush3.msra.mxu0 %v1295_v10  ;;  %v1392_v28 = vpop.permute.xlu0 %1391  ;;  %v1660_v10 = vld [vmem:[%s10373_s4 + $0x28] sm:$0xff] }
 0x892   :  { %8994 = vmatprep.subr.mxu0 %v1420_v15  ;;  %v1408_v62 = vsel %vm1407_vm2, %v1405_v29, %v1392_v28  ;;  %v1658_v28 = vld [vmem:[%s10373_s4 + $0x18] sm:$0xff]  ;;  %v1657_v29 = vld [vmem:[%s10373_s4 + $0x10] sm:$0xff] }
 0x893   :  { %v9915_v12 = vpop.eup %9914 }
 0x894   :  { %v1293_v14 = vmul.f32 %v9915_v12, %v9911_v60  ;;  %v1667_v60 = vld [vmem:[%s10373_s4 + $0x60] sm:$0xff] }
 0x895   :  { %v1659_v12 = vld [vmem:[%s10373_s4 + $0x20] sm:$0xff] }
 0x897   :  { %v9917_v13 = vpop.eup %9916 }
 0x898   :  { %v1291_v4 = vmul.f32 %v9917_v13, %v9913_v6  ;;  %v1665_v6 = vld [vmem:[%s10373_s4 + $0x50] sm:$0xff] }
 0x89a   :  { %8991 = vmatprep.mubr.msk.f32.mxu0 %vm572_vm1, %v1291_v4 }
 0x89b   :  { %8992 = vmatmul.mubr.msk.f32.vlgmr.msra.gmra.mxu0 %vm572_vm1, %v1293_v14 }
 0x89c   :  { %8995 = vmatpush3.msra.mxu0 %v1420_v15 }
 0x89d   :  { %8996 = vmatprep.subr.mxu0 %v1419_v16 }
 0x89e   :  { %8997 = vmatpush3.msra.mxu0 %v1419_v16 }
 0x89f   :  { %8998 = vmatprep.subr.mxu0 %v1418_v17 }
 0x8a0   :  { %8999 = vmatpush3.msra.mxu0 %v1418_v17 }
 0x8a1   :  { %9000 = vmatprep.subr.mxu0 %v1417_v18 }
 0x8a2   :  { %9001 = vmatpush3.msra.mxu0 %v1417_v18 }
 0x8a3   :  { %9002 = vmatprep.subr.mxu0 %v1416_v19 }
 0x8a4   :  { %9003 = vmatpush3.msra.mxu0 %v1416_v19  ;;  %v8041_v19 = vld [vmem:[%s12168_s28] ss:$0 sm:$0xff] }
 0x8a5   :  { %9004 = vmatprep.subr.mxu0 %v1415_v20 }
 0x8a6   :  { %9005 = vmatpush3.msra.mxu0 %v1415_v20 }
 0x8a7   :  { %9006 = vmatprep.subr.mxu0 %v1414_v21 }
 0x8a8   :  { %9007 = vmatpush3.msra.mxu0 %v1414_v21  ;;  %v8042_v21 = vld [vmem:[%s12169_s2] ss:$0 sm:$0xff] }
 0x8a9   :  { %9008 = vmatprep.subr.mxu0 %v1413_v22 }
 0x8aa   :  { %9009 = vmatpush3.msra.mxu0 %v1413_v22 }
 0x8ab   :  { %9032 = vmatprep.subr.mxu0 %v1670_v58 }
 0x95b   :  { %v8993_v23 = vpop.f32.mrf.mxu0 }
 0x95c   :  { %1401 = vrot.lane.b32.xlu1 %v8993_v23, %s10272_s1 }
 0x95d   :  { %v1372_v24 = vpop.f32.mrf.mxu0 }
 0x95e   :  { %1399 = vrot.lane.b32.xlu0 %v1372_v24, %s10272_s1 }
 0x9ce   :  { %v1402_v57 = vpop.permute.xlu1 %1401 }
 0x9cf   :  { %v1412_v32 = vsel %vm1410_vm3, %v1409_v31, %v1402_v57  ;;  %v1656_v57 = vld [vmem:[%s10373_s4 + $0x8] sm:$0xff] }
 0x9d0   :  { %v1400_v30 = vpop.permute.xlu0 %1399 }
 0x9d1   :  { %v1411_v63 = vsel %vm1410_vm3, %v1408_v62, %v1400_v30  ;;  %v8043_v62 = vld [vmem:[%s12170_s7] ss:$0 sm:$0xff] }
 0x9d2   :  { %9010 = vmatprep.mubr.msk.f32.mxu0 %vm252_vm0, %v1411_v63 }
 0x9d3   :  { %9011 = vmatmul.mubr.msk.f32.vlgmr.msra.gmra.mxu0 %vm252_vm0, %v1412_v32 }
 0x9d4   :  { %9033 = vmatpush3.msra.mxu0 %v1670_v58  ;;  %v8055_v58 = vld [vmem:[%s10313_s25 + $0x60] sm:$0xff] }
 0x9d5   :  { %9034 = vmatprep.subr.mxu0 %v1669_v11 }
 0x9d6   :  { %9035 = vmatpush3.msra.mxu0 %v1669_v11  ;;  %v8079_v11 = vld [vmem:[%s10333_s14 + $0x60] sm:$0xff] }
 0x9d7   :  { %9036 = vmatprep.subr.mxu0 %v1668_v59 }
 0x9d8   :  { %9037 = vmatpush3.msra.mxu0 %v1668_v59  ;;  %v8054_v59 = vld [vmem:[%s10313_s25 + $0x58] sm:$0xff] }
 0x9d9   :  { %9038 = vmatprep.subr.mxu0 %v1667_v60 }
 0x9da   :  { %9039 = vmatpush3.msra.mxu0 %v1667_v60  ;;  %v8078_v60 = vld [vmem:[%s10333_s14 + $0x58] sm:$0xff] }
 0x9db   :  { %9040 = vmatprep.subr.mxu0 %v1666_v2 }
 0x9dc   :  { %9041 = vmatpush3.msra.mxu0 %v1666_v2  ;;  %v8053_v2 = vld [vmem:[%s10313_s25 + $0x50] sm:$0xff] }
 0x9dd   :  { %9042 = vmatprep.subr.mxu0 %v1665_v6 }
 0x9de   :  { %9043 = vmatpush3.msra.mxu0 %v1665_v6  ;;  %v8077_v6 = vld [vmem:[%s10333_s14 + $0x50] sm:$0xff] }
 0x9df   :  { %9044 = vmatprep.subr.mxu0 %v1664_v3 }
 0x9e0   :  { %9045 = vmatpush3.msra.mxu0 %v1664_v3  ;;  %v8052_v3 = vld [vmem:[%s10313_s25 + $0x48] sm:$0xff] }
 0x9e1   :  { %9046 = vmatprep.subr.mxu0 %v1663_v5 }
 0x9e2   :  { %9047 = vmatpush3.msra.mxu0 %v1663_v5  ;;  %v8076_v5 = vld [vmem:[%s10333_s14 + $0x48] sm:$0xff] }
 0x9e3   :  { %9048 = vmatprep.subr.mxu0 %v1662_v7 }
 0x9e4   :  { %9049 = vmatpush3.msra.mxu0 %v1662_v7  ;;  %v8051_v7 = vld [vmem:[%s10313_s25 + $0x40] sm:$0xff]  ;;  %s12175_s25 = sld [smem:[#allocation21_spill]] }
 0x9e5   :  { %9050 = vmatprep.subr.mxu0 %v1661_v9 }
 0x9e6   :  { %9051 = vmatpush3.msra.mxu0 %v1661_v9  ;;  %v8075_v9 = vld [vmem:[%s10333_s14 + $0x40] sm:$0xff]  ;;  %s12179_s14 = sld [smem:[#allocation25_spill]] }
 0x9e7   :  { %9052 = vmatprep.subr.mxu0 %v1660_v10 }
 0x9e8   :  { %9053 = vmatpush3.msra.mxu0 %v1660_v10  ;;  %v8070_v10 = vld [vmem:[%s10323_s3 + $0x78] sm:$0xff] }
 0x9e9   :  { %9054 = vmatprep.subr.mxu0 %v1659_v12 }
 0x9ea   :  { %9055 = vmatpush3.msra.mxu0 %v1659_v12 }
 0x9eb   :  { %9056 = vmatprep.subr.mxu0 %v1658_v28 }
 0x9ec   :  { %9057 = vmatpush3.msra.mxu0 %v1658_v28  ;;  %v8068_v28 = vld [vmem:[%s10323_s3 + $0x68] sm:$0xff] }
 0x9ed   :  { %9058 = vmatprep.subr.mxu0 %v1657_v29 }
 0x9ee   :  { %9059 = vmatpush3.msra.mxu0 %v1657_v29  ;;  %v8067_v29 = vld [vmem:[%s10323_s3 + $0x60] sm:$0xff] }
 0x9ef   :  { %9060 = vmatprep.subr.mxu0 %v1656_v57 }
 0x9f0   :  { %9061 = vmatpush3.msra.mxu0 %v1656_v57  ;;  %v8066_v57 = vld [vmem:[%s10323_s3 + $0x58] sm:$0xff] }
 0x9f1   :  { %9062 = vmatprep.subr.mxu0 %v1655_v61 }
 0x9f2   :  { %9063 = vmatpush3.msra.mxu0 %v1655_v61  ;;  %v8065_v61 = vld [vmem:[%s10323_s3 + $0x50] sm:$0xff] }
 0x9f3   :  { %9105 = vmatprep.subr.mxu0 %v8082_v53 }
 0xa93   :  { %v9012_v33 = vpop.f32.mrf.mxu0 }
 0xa94   :  { %v1503_v34 = vadd.f32 %v9012_v33, %v10558_v1 }
 0xa95   :  { %v1493_v35 = vpop.f32.mrf.mxu0 }
 0xa96   :  { %v10763_v36 = vadd.f32 %v8040_v43, %v1503_v34  ;;  %v1502_v41 = vadd.f32 %v1493_v35, %v10555_v0  ;;  %v8046_v35 = vld [vmem:[%s12171_s10] ss:$0 sm:$0xff] }
 0xa98   :  { %v10766_v37 = vadd.f32 %v8040_v43, %v1502_v41  ;;  %v1518_v38 = vsel %vm252_vm0, %v10763_v36, 0.0 }
 0xa99   :  { %1519 = vadd.xlane.f32.xlu1 %v1518_v38 }
 0xa9a   :  { %v1515_v39 = vsel %vm252_vm0, %v10766_v37, 0.0 }
 0xa9b   :  { %1516 = vadd.xlane.f32.xlu0 %v1515_v39 }
 0xb22   :  { %v1520_v40 = vpop.xlane.xlu1 %1519 }
 0xb23   :  { %v1522_v1 = vmul.f32 0.015625, %v1520_v40 }
 0xb24   :  { %v1517_v42 = vpop.xlane.xlu0 %1516 }
 0xb25   :  { %v1521_v44 = vmul.f32 0.015625, %v1517_v42  ;;  %v10773_v0 = vsub.f32 %v10763_v36, %v1522_v1 }
 0xb27   :  { %v10776_v45 = vsub.f32 %v10766_v37, %v1521_v44  ;;  %v1526_v48 = vmul.f32 %v10773_v0, %v10773_v0 }
 0xb29   :  { %v1525_v46 = vmul.f32 %v10776_v45, %v10776_v45  ;;  %v1530_v49 = vsel %vm252_vm0, %v1526_v48, 0.0 }
 0xb2b   :  { %v1527_v47 = vsel %vm252_vm0, %v1525_v46, 0.0 }
 0xb2c   :  { %1528 = vadd.xlane.f32.xlu0 %v1527_v47 }
 0xb30   :  { %1531 = vadd.xlane.f32.xlu0 %v1530_v49 }
 0xbb5   :  { %v1529_v13 = vpop.xlane.xlu0 %1528 }
 0xbb6   :  { %v1533_v4 = vmul.f32 0.015625, %v1529_v13 }
 0xbb8   :  { %v1535_v14 = vadd.f32 1e-05, %v1533_v4 }
 0xbb9   :  { %v1532_v15 = vpop.xlane.xlu0 %1531 }
 0xbba   :  { %9918 = vrsqrt.f32 %v1535_v14  ;;  %v1534_v16 = vmul.f32 0.015625, %v1532_v15 }
 0xbbc   :  { %v1536_v17 = vadd.f32 1e-05, %v1534_v16 }
 0xbbe   :  { %9920 = vrsqrt.f32 %v1536_v17 }
 0xbc7   :  { %v9919_v18 = vpop.eup %9918 }
 0xbc8   :  { %v1539_v20 = vmul.f32 %v9919_v18, %v10776_v45  ;;  %v8049_v18 = vld [vmem:[%s10303_s17 + $0x1] ss:$0 sm:$0xff]  ;;  %s12173_s17 = sld [smem:[#allocation16_spill]] }
 0xbca   :  { %v1547_v22 = vmul.f32 %v8041_v19, %v1539_v20 }
 0xbcb   :  { %v9921_v23 = vpop.eup %9920 }
 0xbcc   :  { %v1540_v24 = vmul.f32 %v9921_v23, %v10773_v0  ;;  %v1555_v25 = vadd.f32 %v8042_v21, %v1547_v22  ;;  %v8050_v23 = vld [vmem:[%s10308_s21 + $0x1] ss:$0 sm:$0xff]  ;;  %s12174_s21 = sld [smem:[#allocation17_spill]] }
 0xbce   :  { %v1548_v26 = vmul.f32 %v8041_v19, %v1540_v24  ;;  %9029 = vmatprep.mubr.msk.f32.mxu1 %vm252_vm0, %v1555_v25 }
 0xbd0   :  { %v1556_v27 = vadd.f32 %v8042_v21, %v1548_v26 }
 0xbd2   :  { %9030 = vmatmul.mubr.msk.f32.vlgmr.msra.gmra.mxu1 %vm252_vm0, %v1556_v27  ;;  %v8069_v27 = vld [vmem:[%s10323_s3 + $0x70] sm:$0xff] }
 0xbd3   :  { %9068 = vmatpush3.msra.mxu1 %v8058_v52  ;;  %v10909_v52 = vld [vmem:[%s10293_s9] sm:$0xff] }
 0xbd4   :  { %9069 = vmatprep.subr.mxu1 %v8057_v54 }
 0xbd5   :  { %9070 = vmatpush3.msra.mxu1 %v8057_v54 }
 0xbd6   :  { %9071 = vmatprep.subr.mxu1 %v8056_v55 }
 0xbd7   :  { %9072 = vmatpush3.msra.mxu1 %v8056_v55 }
 0xbd8   :  { %9073 = vmatprep.subr.mxu1 %v8055_v58 }
 0xbd9   :  { %9074 = vmatpush3.msra.mxu1 %v8055_v58 }
 0xbda   :  { %9075 = vmatprep.subr.mxu1 %v8054_v59 }
 0xbdb   :  { %9076 = vmatpush3.msra.mxu1 %v8054_v59 }
 0xbdc   :  { %9077 = vmatprep.subr.mxu1 %v8053_v2 }
 0xbdd   :  { %9078 = vmatpush3.msra.mxu1 %v8053_v2 }
 0xbde   :  { %9079 = vmatprep.subr.mxu1 %v8052_v3 }
 0xbdf   :  { %9080 = vmatpush3.msra.mxu1 %v8052_v3 }
 0xbe0   :  { %9081 = vmatprep.subr.mxu1 %v8051_v7 }
 0xbe1   :  { %9082 = vmatpush3.msra.mxu1 %v8051_v7 }
 0xbe2   :  { %9086 = vmatprep.subr.mxu1 %v8070_v10 }
 0xc92   :  { %v9031_v30 = vpop.f32.mrf.mxu1 }
 0xc93   :  { %v1650_v31 = vadd.f32 %v9031_v30, %v8043_v62  ;;  %v8063_v30 = vld [vmem:[%s10323_s3 + $0x40] sm:$0xff] }
 0xc94   :  { %v1644_v63 = vpop.f32.mrf.mxu1 }
 0xc95   :  { %v1645_v32 = vadd.f32 %v8043_v62, %v1644_v63  ;;  %v1654_v43 = vmax.f32 %v1650_v31, 0.0  ;;  %v8064_v62 = vld [vmem:[%s10323_s3 + $0x48] sm:$0xff]  ;;  %v8060_v63 = vld [vmem:[%s10318_s29 + $0x1] ss:$0 sm:$0xff]  ;;  %s12176_s29 = sld [smem:[#allocation22_spill]] }
 0xc96   :  { %s12177_s3 = sld [smem:[#allocation11_spill]] }
 0xc97   :  { %v1653_v33 = vmax.f32 %v1645_v32, 0.0 }
 0xc99   :  { %9064 = vmatprep.mubr.f32.mxu0 %v1653_v33 }
 0xc9a   :  { %9065 = vmatmul.mubr.f32.vlgmr.msra.gmra.mxu0 %v1654_v43  ;;  %v8072_v43 = vld [vmem:[%s10328_s8 + $0x1] ss:$0 sm:$0xff]  ;;  %s12178_s8 = sld [smem:[#allocation23_spill]] }
 0xc9b   :  { %9106 = vmatpush3.msra.mxu0 %v8082_v53 }
 0xc9c   :  { %9107 = vmatprep.subr.mxu0 %v8081_v8 }
 0xc9d   :  { %9108 = vmatpush3.msra.mxu0 %v8081_v8 }
 0xc9e   :  { %9109 = vmatprep.subr.mxu0 %v8080_v56 }
 0xc9f   :  { %9110 = vmatpush3.msra.mxu0 %v8080_v56 }
 0xca0   :  { %9111 = vmatprep.subr.mxu0 %v8079_v11 }
 0xca1   :  { %9112 = vmatpush3.msra.mxu0 %v8079_v11 }
 0xca2   :  { %9113 = vmatprep.subr.mxu0 %v8078_v60 }
 0xca3   :  { %9114 = vmatpush3.msra.mxu0 %v8078_v60 }
 0xca4   :  { %9115 = vmatprep.subr.mxu0 %v8077_v6 }
 0xca5   :  { %9116 = vmatpush3.msra.mxu0 %v8077_v6 }
 0xca6   :  { %9117 = vmatprep.subr.mxu0 %v8076_v5 }
 0xca7   :  { %9118 = vmatpush3.msra.mxu0 %v8076_v5 }
 0xca8   :  { %9119 = vmatprep.subr.mxu0 %v8075_v9 }
 0xca9   :  { %9120 = vmatpush3.msra.mxu0 %v8075_v9 }
 0xd5a   :  { %v9066_v34 = vpop.f32.mrf.mxu0 }
 0xd5b   :  { %v1747_v41 = vadd.f32 %v9066_v34, %v10763_v36 }
 0xd5c   :  { %v1737_v38 = vpop.f32.mrf.mxu0 }
 0xd5d   :  { %v10817_v39 = vadd.f32 %v8046_v35, %v1747_v41  ;;  %v1746_v40 = vadd.f32 %v1737_v38, %v10766_v37 }
 0xd5f   :  { %v10820_v1 = vadd.f32 %v8046_v35, %v1746_v40  ;;  %v1764_v42 = vsel %vm252_vm0, %v10817_v39, 0.0 }
 0xd60   :  { %1765 = vadd.xlane.f32.xlu1 %v1764_v42  ;;  %v8084_v42 = vld [vmem:[%s10338_s19 + $0x1] ss:$0 sm:$0xff]  ;;  %s12180_s19 = sld [smem:[#allocation27_spill]] }
 0xd61   :  { %v1761_v44 = vsel %vm252_vm0, %v10820_v1, 0.0 }
 0xd62   :  { %1762 = vadd.xlane.f32.xlu0 %v1761_v44 }
 0xde9   :  { %v1766_v0 = vpop.xlane.xlu1 %1765 }
 0xdea   :  { %v1768_v36 = vmul.f32 0.015625, %v1766_v0 }
 0xdeb   :  { %v1763_v45 = vpop.xlane.xlu0 %1762 }
 0xdec   :  { %v10827_v46 = vsub.f32 %v10817_v39, %v1768_v36  ;;  %v1767_v37 = vmul.f32 0.015625, %v1763_v45 }
 0xdee   :  { %v10830_v47 = vsub.f32 %v10820_v1, %v1767_v37  ;;  %v1772_v48 = vmul.f32 %v10827_v46, %v10827_v46 }
 0xdf0   :  { %v1776_v49 = vsel %vm252_vm0, %v1772_v48, 0.0  ;;  %v1771_v50 = vmul.f32 %v10830_v47, %v10830_v47 }
 0xdf1   :  { %1777 = vadd.xlane.f32.xlu1 %v1776_v49  ;;  %v10904_v49 = vld [vmem:[%s10293_s9 + $0x8] sm:$0xff]  ;;  %s12172_s9 = sld [smem:[#allocation18_spill]] }
 0xdf2   :  { %v1773_v51 = vsel %vm252_vm0, %v1771_v50, 0.0 }
 0xdf3   :  { %1774 = vadd.xlane.f32.xlu0 %v1773_v51 }
 0xe7a   :  { %v1778_v12 = vpop.xlane.xlu1 %1777 }
 0xe7b   :  { %v1780_v13 = vmul.f32 0.015625, %v1778_v12 }
 0xe7c   :  { %v1775_v4 = vpop.xlane.xlu0 %1774 }
 0xe7d   :  { %v1782_v14 = vadd.f32 1e-05, %v1780_v13  ;;  %v1779_v15 = vmul.f32 0.015625, %v1775_v4 }
 0xe7f   :  { %9922 = vrsqrt.f32 %v1782_v14  ;;  %v1781_v16 = vadd.f32 1e-05, %v1779_v15 }
 0xe81   :  { %9924 = vrsqrt.f32 %v1781_v16 }
 0xe8c   :  { %v9923_v17 = vpop.eup %9922 }
 0xe8d   :  { %v1786_v19 = vmul.f32 %v9923_v17, %v10827_v46 }
 0xe8e   :  { %v9925_v20 = vpop.eup %9924 }
 0xe8f   :  { %v1785_v21 = vmul.f32 %v9925_v20, %v10830_v47  ;;  %v1794_v22 = vmul.f32 %v8049_v18, %v1786_v19 }
 0xe91   :  { %v1793_v24 = vmul.f32 %v8049_v18, %v1785_v21  ;;  %v1802_v26 = vadd.f32 %v8050_v23, %v1794_v22 }
 0xe93   :  { %v1801_v25 = vadd.f32 %v8050_v23, %v1793_v24 }
 0xe95   :  { %9083 = vmatprep.mubr.msk.f32.mxu1 %vm252_vm0, %v1801_v25  ;;  %9121 = vmatprep.mubr.msk.f32.mxu0 %vm252_vm0, %v1801_v25 }
 0xe96   :  { %9084 = vmatmul.mubr.msk.f32.vlgmr.msra.gmra.mxu1 %vm252_vm0, %v1802_v26  ;;  %9122 = vmatmul.mubr.msk.f32.vlgmr.msra.gmra.mxu0 %vm252_vm0, %v1802_v26 }
 0xe97   :  { %9087 = vmatpush3.msra.mxu1 %v8070_v10  ;;  %9102 = vmatprep.mubr.msk.f32.mxu1 %vm252_vm0, %v1801_v25 }
 0xe98   :  { %9088 = vmatprep.subr.mxu1 %v8069_v27 }
 0xe99   :  { %9089 = vmatpush3.msra.mxu1 %v8069_v27 }
 0xe9a   :  { %9090 = vmatprep.subr.mxu1 %v8068_v28 }
 0xe9b   :  { %9091 = vmatpush3.msra.mxu1 %v8068_v28 }
 0xe9c   :  { %9092 = vmatprep.subr.mxu1 %v8067_v29 }
 0xe9d   :  { %9093 = vmatpush3.msra.mxu1 %v8067_v29 }
 0xe9e   :  { %9094 = vmatprep.subr.mxu1 %v8066_v57 }
 0xe9f   :  { %9095 = vmatpush3.msra.mxu1 %v8066_v57 }
 0xea0   :  { %9096 = vmatprep.subr.mxu1 %v8065_v61 }
 0xea1   :  { %9097 = vmatpush3.msra.mxu1 %v8065_v61 }
 0xea2   :  { %9098 = vmatprep.subr.mxu1 %v8064_v62 }
 0xea3   :  { %9099 = vmatpush3.msra.mxu1 %v8064_v62 }
 0xea4   :  { %9100 = vmatprep.subr.mxu1 %v8063_v30 }
 0xea5   :  { %9101 = vmatpush3.msra.mxu1 %v8063_v30 }
 0xea6   :  { %9103 = vmatmul.mubr.msk.f32.vlgmr.msra.gmra.mxu1 %vm252_vm0, %v1802_v26 }
 0xf56   :  { %v9085_v31 = vpop.f32.mrf.mxu1  ;;  %v9123_v40 = vpop.f32.mrf.mxu0 }
 0xf57   :  { %v10889_v44 = vadd.f32 %v9123_v40, %v8084_v42  ;;  %v10893_v36 = vadd.f32 %v9085_v31, %v8060_v63 }
 0xf58   :  { %v1892_v32 = vpop.f32.mrf.mxu1  ;;  %v2076_v0 = vpop.f32.mrf.mxu0 }
 0xf59   :  { %v10873_v33 = vadd.f32 %v8060_v63, %v1892_v32  ;;  %v10896_v45 = vadd.f32 %v8084_v42, %v2076_v0 }
 0xf5b   :  { %9128 = vmatprep.mubr.msk.f32.mxu1 %vm572_vm1, %v10873_v33 }
 0xf66   :  { %v9104_v34 = vpop.f32.mrf.mxu1 }
 0xf67   :  { %v10878_v35 = vadd.f32 %v9104_v34, %v8072_v43 }
 0xf68   :  { %v1984_v41 = vpop.f32.mrf.mxu1 }
 0xf69   :  { %v10880_v38 = vadd.f32 %v8072_v43, %v1984_v41  ;;  %9124 = vmatprep.subr.msk.mxu1 %vm572_vm1, %v10878_v35 }
 0xf6a   :  { %9125 = vmatpush3.xpose.msk.msra.mxu1 %vm572_vm1, %v10878_v35 }
 0xf6b   :  { %9126 = vmatprep.subr.msk.mxu1 %vm572_vm1, %v10880_v38 }
 0xf6e   :  { %9127 = vmatpush3.xpose.msk.msra.mxu1 %vm572_vm1, %v10880_v38 }
 0xf6f   :  { %9131 = vmatprep.subr.mxu1 %v10889_v44 }
 0xf71   :  { %9129 = vmatmul.mubr.msk.f32.vlgmr.msra.gmra.mxu1 %vm572_vm1, %v10893_v36 }
 0xf72   :  { %9132 = vmatpush3.msra.mxu1 %v10889_v44 }
 0xf73   :  { %9133 = vmatprep.subr.mxu1 %v10896_v45 }
 0xf74   :  { %9134 = vmatpush3.msra.mxu1 %v10896_v45 }
0x1031   :  { %v9130_v46 = vpop.f32.mrf.mxu1 }
0x1032   :  { %v2173_v37 = vmul.f32 0.25, %v9130_v46 }
0x1033   :  { %v2163_v47 = vpop.f32.mrf.mxu1 }
0x1034   :  { %v2172_v48 = vmul.f32 0.25, %v2163_v47  ;;  %v2175_v50 = vadd.f32 %v10904_v49, %v2173_v37 }
0x1036   :  { %v2179_v51 = vsel %vm572_vm1, %v2175_v50, -inf  ;;  %v2174_v53 = vadd.f32 %v10909_v52, %v2172_v48 }
0x1037   :  { %2180 = vmax.xlane.f32.xlu1 %v2179_v51 }
0x1038   :  { %v2176_v54 = vsel %vm572_vm1, %v2174_v53, -inf }
0x1039   :  { %2177 = vmax.xlane.f32.xlu0 %v2176_v54 }
0x10c0   :  { %v2181_v8 = vpop.xlane.xlu1 %2180 }
0x10c1   :  { %v2183_v55 = vsub.f32 %v2175_v50, %v2181_v8 }
0x10c2   :  { %v2178_v56 = vpop.xlane.xlu0 %2177 }
0x10c3   :  { %v2186_v58 = vmul.f32 1.442695, %v2183_v55  ;;  %v2182_v11 = vsub.f32 %v2174_v53, %v2178_v56 }
0x10c5   :  { %9926 = vpow2.f32 %v2186_v58  ;;  %v2184_v59 = vmul.f32 1.442695, %v2182_v11 }
0x10c7   :  { %9928 = vpow2.f32 %v2184_v59 }
0x10d2   :  { %v9927_v60 = vpop.eup %9926 }
0x10d3   :  { %v2191_v2 = vsel %vm572_vm1, %v9927_v60, 0.0 }
0x10d4   :  { %v9929_v6 = vpop.eup %9928  ;;  %2192 = vadd.xlane.f32.xlu1 %v2191_v2 }
0x10d5   :  { %v2188_v3 = vsel %vm572_vm1, %v9929_v6, 0.0 }
0x10d6   :  { %2189 = vadd.xlane.f32.xlu0 %v2188_v3 }
0x10e5   :  { %2283 = vrot.lane.b32.xlu1 %v10880_v38, %s10267_s5 }
0x10e9   :  { %2279 = vrot.lane.b32.xlu1 %v10873_v33, %s10267_s5 }
0x10ec   :  { %2285 = vrot.lane.b32.xlu0 %v10878_v35, %s10267_s5 }
0x10ed   :  { %2281 = vrot.lane.b32.xlu1 %v10893_v36, %s10267_s5 }
0x115d   :  { %v2193_v5 = vpop.xlane.xlu1 %2192 }
0x115e   :  { %9930 = vrcp.f32 %v2193_v5 }
0x115f   :  { %v2190_v7 = vpop.xlane.xlu0 %2189 }
0x1160   :  { %9932 = vrcp.f32 %v2190_v7 }
0x1161   :  { %v2284_v10 = vpop.permute.xlu1 %2283 }
0x1163   :  { %v2286_v9 = vpop.permute.xlu0 %2285 }
0x1164   :  { %9138 = vmatprep.subr.msk.mxu1 %vm572_vm1, %v2286_v9 }
0x1165   :  { %v2280_v15 = vpop.permute.xlu1 %2279 }
0x1169   :  { %v2282_v16 = vpop.permute.xlu1 %2281 }
0x116b   :  { %v9931_v12 = vpop.eup %9930 }
0x116c   :  { %v2197_v14 = vmul.f32 %v9931_v12, %v9927_v60 }
0x116d   :  { %v9933_v13 = vpop.eup %9932 }
0x116e   :  { %v2195_v4 = vmul.f32 %v9933_v13, %v9929_v6 }
0x1170   :  { %9135 = vmatprep.mubr.msk.f32.mxu1 %vm572_vm1, %v2195_v4 }
0x1171   :  { %9136 = vmatmul.mubr.msk.f32.vlgmr.msra.gmra.mxu1 %vm572_vm1, %v2197_v14 }
0x1172   :  { %9139 = vmatpush3.xpose.msk.msra.mxu1 %vm572_vm1, %v2286_v9  ;;  %9142 = vmatprep.mubr.msk.f32.mxu1 %vm572_vm1, %v2280_v15 }
0x1173   :  { %9140 = vmatprep.subr.msk.mxu1 %vm572_vm1, %v2284_v10 }
0x1176   :  { %9141 = vmatpush3.xpose.msk.msra.mxu1 %vm572_vm1, %v2284_v10 }
0x1179   :  { %9143 = vmatmul.mubr.msk.f32.vlgmr.msra.gmra.mxu1 %vm572_vm1, %v2282_v16 }
0x1231   :  { %v10931_v17 = vpop.f32.mrf.mxu1 }
0x1233   :  { %v10933_v18 = vpop.f32.mrf.mxu1 }
0x1239   :  { %v9144_v19 = vpop.f32.mrf.mxu1 }
0x123a   :  { %v2371_v20 = vmul.f32 0.25, %v9144_v19 }
0x123b   :  { %v2361_v21 = vpop.f32.mrf.mxu1 }
0x123c   :  { %v2370_v22 = vmul.f32 0.25, %v2361_v21  ;;  %v2373_v23 = vadd.f32 %v10904_v49, %v2371_v20 }
0x123e   :  { %v2377_v24 = vsel %vm572_vm1, %v2373_v23, -inf  ;;  %v2372_v25 = vadd.f32 %v10909_v52, %v2370_v22 }
0x123f   :  { %2378 = vmax.xlane.f32.xlu1 %v2377_v24 }
0x1240   :  { %v2374_v26 = vsel %vm572_vm1, %v2372_v25, -inf }
0x1241   :  { %2375 = vmax.xlane.f32.xlu0 %v2374_v26 }
0x1250   :  { %2398 = vrot.lane.b32.xlu1 %v10896_v45, %s10267_s5 }
0x1254   :  { %2491 = vrot.lane.b32.xlu1 %v10878_v35, %s10268_s13 }
0x1258   :  { %2489 = vrot.lane.b32.xlu1 %v10880_v38, %s10268_s13 }
0x125c   :  { %2487 = vrot.lane.b32.xlu1 %v10893_v36, %s10268_s13 }
0x12c8   :  { %v2379_v27 = vpop.xlane.xlu1 %2378 }
0x12c9   :  { %v2381_v28 = vsub.f32 %v2373_v23, %v2379_v27 }
0x12ca   :  { %v2376_v29 = vpop.xlane.xlu0 %2375 }
0x12cb   :  { %v2384_v57 = vmul.f32 1.442695, %v2381_v28  ;;  %v2380_v61 = vsub.f32 %v2372_v25, %v2376_v29 }
0x12cc   :  { %v2399_v41 = vpop.permute.xlu1 %2398 }
0x12cd   :  { %9934 = vpow2.f32 %v2384_v57  ;;  %v2382_v62 = vmul.f32 1.442695, %v2380_v61 }
0x12cf   :  { %9936 = vpow2.f32 %v2382_v62 }
0x12d0   :  { %v2492_v42 = vpop.permute.xlu1 %2491 }
0x12d4   :  { %v2490_v50 = vpop.permute.xlu1 %2489 }
0x12d8   :  { %v2488_v51 = vpop.permute.xlu1 %2487 }
0x12da   :  { %v9935_v30 = vpop.eup %9934 }
0x12db   :  { %v2389_v31 = vsel %vm572_vm1, %v9935_v30, 0.0 }
0x12dc   :  { %v9937_v63 = vpop.eup %9936  ;;  %2390 = vadd.xlane.f32.xlu0 %v2389_v31 }
0x12dd   :  { %v2386_v32 = vsel %vm572_vm1, %v9937_v63, 0.0 }
0x12e0   :  { %2387 = vadd.xlane.f32.xlu0 %v2386_v32 }
0x12f6   :  { %2400 = vrot.lane.b32.xlu0 %v10889_v44, %s10267_s5 }
0x12fa   :  { %2485 = vrot.lane.b32.xlu0 %v10873_v33, %s10268_s13 }
0x1365   :  { %v2391_v43 = vpop.xlane.xlu0 %2390 }
0x1366   :  { %9938 = vrcp.f32 %v2391_v43 }
0x1369   :  { %v2388_v34 = vpop.xlane.xlu0 %2387 }
0x136a   :  { %9940 = vrcp.f32 %v2388_v34 }
0x136d   :  { %v2401_v40 = vpop.permute.xlu0 %2400 }
0x136e   :  { %9145 = vmatprep.subr.mxu0 %v2401_v40 }
0x136f   :  { %9146 = vmatpush3.msra.mxu0 %v2401_v40 }
0x1370   :  { %9147 = vmatprep.subr.mxu0 %v2399_v41 }
0x1371   :  { %9148 = vmatpush3.msra.mxu0 %v2399_v41  ;;  %v2486_v48 = vpop.permute.xlu0 %2485 }
0x1372   :  { %9152 = vmatprep.subr.msk.mxu0 %vm572_vm1, %v2492_v42 }
0x1373   :  { %v9939_v0 = vpop.eup %9938 }
0x1374   :  { %v2395_v47 = vmul.f32 %v9939_v0, %v9935_v30 }
0x1377   :  { %v9941_v46 = vpop.eup %9940 }
0x1378   :  { %v2393_v37 = vmul.f32 %v9941_v46, %v9937_v63 }
0x137a   :  { %9149 = vmatprep.mubr.msk.f32.mxu0 %vm572_vm1, %v2393_v37 }
0x137b   :  { %9150 = vmatmul.mubr.msk.f32.vlgmr.msra.gmra.mxu0 %vm572_vm1, %v2395_v47 }
0x137c   :  { %9153 = vmatpush3.xpose.msk.msra.mxu0 %vm572_vm1, %v2492_v42  ;;  %9156 = vmatprep.mubr.msk.f32.mxu0 %vm572_vm1, %v2486_v48 }
0x137d   :  { %9154 = vmatprep.subr.msk.mxu0 %vm572_vm1, %v2490_v50 }
0x1380   :  { %9155 = vmatpush3.xpose.msk.msra.mxu0 %vm572_vm1, %v2490_v50 }
0x1383   :  { %9157 = vmatmul.mubr.msk.f32.vlgmr.msra.gmra.mxu0 %vm572_vm1, %v2488_v51 }
0x143b   :  { %v10961_v53 = vpop.f32.mrf.mxu0 }
0x143d   :  { %v10963_v54 = vpop.f32.mrf.mxu0 }
0x1443   :  { %v9158_v8 = vpop.f32.mrf.mxu0 }
0x1444   :  { %v2577_v55 = vmul.f32 0.25, %v9158_v8  ;;  %v8116_v8 = vld [vmem:[%s10343_s24 + $0x68] sm:$0xff] }
0x1445   :  { %v2567_v56 = vpop.f32.mrf.mxu0 }
0x1446   :  { %v2576_v58 = vmul.f32 0.25, %v2567_v56  ;;  %v2579_v11 = vadd.f32 %v10904_v49, %v2577_v55  ;;  %v8115_v55 = vld [vmem:[%s10343_s24 + $0x60] sm:$0xff]  ;;  %v8114_v56 = vld [vmem:[%s10343_s24 + $0x58] sm:$0xff] }
0x1448   :  { %v2583_v59 = vsel %vm572_vm1, %v2579_v11, -inf  ;;  %v2578_v60 = vadd.f32 %v10909_v52, %v2576_v58  ;;  %v8113_v58 = vld [vmem:[%s10343_s24 + $0x50] sm:$0xff] }
0x1449   :  { %2584 = vmax.xlane.f32.xlu1 %v2583_v59  ;;  %v8111_v59 = vld [vmem:[%s10343_s24 + $0x40] sm:$0xff] }
0x144a   :  { %v2580_v2 = vsel %vm572_vm1, %v2578_v60, -inf }
0x144b   :  { %2581 = vmax.xlane.f32.xlu0 %v2580_v2 }
0x145a   :  { %2602 = vrot.lane.b32.xlu1 %v10896_v45, %s10268_s13 }
0x145e   :  { %2695 = vrot.lane.b32.xlu1 %v10878_v35, %s10269_s27 }
0x1462   :  { %2693 = vrot.lane.b32.xlu1 %v10880_v38, %s10269_s27 }
0x1466   :  { %2691 = vrot.lane.b32.xlu1 %v10893_v36, %s10269_s27 }
0x14d2   :  { %v2585_v6 = vpop.xlane.xlu1 %2584 }
0x14d3   :  { %v2587_v3 = vsub.f32 %v2579_v11, %v2585_v6  ;;  %v8112_v11 = vld [vmem:[%s10343_s24 + $0x48] sm:$0xff] }
0x14d4   :  { %v2582_v5 = vpop.xlane.xlu0 %2581 }
0x14d5   :  { %v2590_v7 = vmul.f32 1.442695, %v2587_v3  ;;  %v2586_v9 = vsub.f32 %v2578_v60, %v2582_v5 }
0x14d6   :  { %v2603_v14 = vpop.permute.xlu1 %2602 }
0x14d7   :  { %9942 = vpow2.f32 %v2590_v7  ;;  %v2588_v10 = vmul.f32 1.442695, %v2586_v9 }
0x14d9   :  { %9944 = vpow2.f32 %v2588_v10 }
0x14da   :  { %v2696_v16 = vpop.permute.xlu1 %2695 }
0x14de   :  { %v2694_v23 = vpop.permute.xlu1 %2693 }
0x14e2   :  { %v2692_v24 = vpop.permute.xlu1 %2691 }
0x14e4   :  { %v9943_v12 = vpop.eup %9942 }
0x14e5   :  { %v2595_v13 = vsel %vm572_vm1, %v9943_v12, 0.0 }
0x14e6   :  { %v9945_v4 = vpop.eup %9944  ;;  %2596 = vadd.xlane.f32.xlu0 %v2595_v13 }
0x14e7   :  { %v2592_v35 = vsel %vm572_vm1, %v9945_v4, 0.0 }
0x14ea   :  { %2593 = vadd.xlane.f32.xlu0 %v2592_v35 }
0x1500   :  { %2604 = vrot.lane.b32.xlu0 %v10889_v44, %s10268_s13  ;;  %s12187_s13 = sld [smem:[#allocation33_spill]] }
0x1504   :  { %2689 = vrot.lane.b32.xlu0 %v10873_v33, %s10269_s27 }
0x156f   :  { %v2597_v38 = vpop.xlane.xlu0 %2596 }
0x1570   :  { %9946 = vrcp.f32 %v2597_v38 }
0x1573   :  { %v2594_v36 = vpop.xlane.xlu0 %2593 }
0x1574   :  { %9948 = vrcp.f32 %v2594_v36 }
0x1577   :  { %v2605_v15 = vpop.permute.xlu0 %2604 }
0x1578   :  { %9159 = vmatprep.subr.mxu1 %v2605_v15 }
0x1579   :  { %9160 = vmatpush3.msra.mxu1 %v2605_v15  ;;  %v8122_v15 = vld [vmem:[%s10348_s30 + $0x1] ss:$0 sm:$0xff]  ;;  %s12182_s30 = sld [smem:[#allocation26_spill]] }
0x157a   :  { %9161 = vmatprep.subr.mxu1 %v2603_v14 }
0x157b   :  { %9162 = vmatpush3.msra.mxu1 %v2603_v14  ;;  %v2690_v33 = vpop.permute.xlu0 %2689 }
0x157c   :  { %9166 = vmatprep.subr.msk.mxu1 %vm572_vm1, %v2696_v16 }
0x157d   :  { %v9947_v19 = vpop.eup %9946 }
0x157e   :  { %v2601_v22 = vmul.f32 %v9947_v19, %v9943_v12 }
0x1581   :  { %v9949_v20 = vpop.eup %9948 }
0x1582   :  { %v2599_v21 = vmul.f32 %v9949_v20, %v9945_v4 }
0x1584   :  { %9163 = vmatprep.mubr.msk.f32.mxu1 %vm572_vm1, %v2599_v21 }
0x1585   :  { %9164 = vmatmul.mubr.msk.f32.vlgmr.msra.gmra.mxu1 %vm572_vm1, %v2601_v22 }
0x1586   :  { %9167 = vmatpush3.xpose.msk.msra.mxu1 %vm572_vm1, %v2696_v16  ;;  %9170 = vmatprep.mubr.msk.f32.mxu1 %vm572_vm1, %v2690_v33 }
0x1587   :  { %9168 = vmatprep.subr.msk.mxu1 %vm572_vm1, %v2694_v23 }
0x158a   :  { %9169 = vmatpush3.xpose.msk.msra.mxu1 %vm572_vm1, %v2694_v23 }
0x158d   :  { %9171 = vmatmul.mubr.msk.f32.vlgmr.msra.gmra.mxu1 %vm572_vm1, %v2692_v24 }
0x1645   :  { %v9165_v25 = vpop.f32.mrf.mxu1 }
0x1647   :  { %v2680_v26 = vpop.f32.mrf.mxu1 }
0x164d   :  { %v9172_v27 = vpop.f32.mrf.mxu1 }
0x164e   :  { %v2781_v28 = vmul.f32 0.25, %v9172_v27 }
0x164f   :  { %v2771_v29 = vpop.f32.mrf.mxu1 }
0x1650   :  { %v2780_v57 = vmul.f32 0.25, %v2771_v29  ;;  %v2783_v61 = vadd.f32 %v10904_v49, %v2781_v28 }
0x1652   :  { %v2787_v62 = vsel %vm572_vm1, %v2783_v61, -inf  ;;  %v2782_v30 = vadd.f32 %v10909_v52, %v2780_v57  ;;  %v8134_v57 = vld [vmem:[%s10363_s20 + $0x78] sm:$0xff] }
0x1653   :  { %2788 = vmax.xlane.f32.xlu1 %v2787_v62  ;;  %9199 = vmatprep.subr.mxu1 %v8134_v57  ;;  %v8132_v62 = vld [vmem:[%s10363_s20 + $0x68] sm:$0xff] }
0x1654   :  { %v2784_v31 = vsel %vm572_vm1, %v2782_v30, -inf  ;;  %9200 = vmatpush3.msra.mxu1 %v8134_v57 }
0x1655   :  { %2785 = vmax.xlane.f32.xlu0 %v2784_v31  ;;  %v8130_v31 = vld [vmem:[%s10363_s20 + $0x58] sm:$0xff] }
0x1664   :  { %2806 = vrot.lane.b32.xlu1 %v10896_v45, %s10269_s27 }
0x1668   :  { %2895 = vrot.lane.b32.xlu1 %v10963_v54, %s10270_s22  ;;  %v8117_v54 = vld [vmem:[%s10343_s24 + $0x70] sm:$0xff] }
0x166c   :  { %2897 = vrot.lane.b32.xlu1 %v10961_v53, %s10270_s22  ;;  %v8118_v53 = vld [vmem:[%s10343_s24 + $0x78] sm:$0xff]  ;;  %s12181_s24 = sld [smem:[#allocation24_spill]] }
0x1670   :  { %2905 = vrot.lane.b32.xlu1 %v9165_v25, %s10271_s26 }
0x16dc   :  { %v2789_v49 = vpop.xlane.xlu1 %2788 }
0x16dd   :  { %v2791_v63 = vsub.f32 %v2783_v61, %v2789_v49  ;;  %v8133_v61 = vld [vmem:[%s10363_s20 + $0x70] sm:$0xff] }
0x16de   :  { %v2786_v32 = vpop.xlane.xlu0 %2785  ;;  %9201 = vmatprep.subr.mxu1 %v8133_v61  ;;  %v8129_v49 = vld [vmem:[%s10363_s20 + $0x50] sm:$0xff] }
0x16df   :  { %v2794_v43 = vmul.f32 1.442695, %v2791_v63  ;;  %v2790_v52 = vsub.f32 %v2782_v30, %v2786_v32  ;;  %9202 = vmatpush3.msra.mxu1 %v8133_v61  ;;  %v8131_v30 = vld [vmem:[%s10363_s20 + $0x60] sm:$0xff]  ;;  %v8128_v63 = vld [vmem:[%s10363_s20 + $0x48] sm:$0xff] }
0x16e0   :  { %v2807_v47 = vpop.permute.xlu1 %2806  ;;  %9203 = vmatprep.subr.mxu1 %v8132_v62  ;;  %v8127_v32 = vld [vmem:[%s10363_s20 + $0x40] sm:$0xff]  ;;  %s12183_s20 = sld [smem:[#allocation28_spill]] }
0x16e1   :  { %9950 = vpow2.f32 %v2794_v43  ;;  %v2792_v34 = vmul.f32 1.442695, %v2790_v52  ;;  %9204 = vmatpush3.msra.mxu1 %v8132_v62  ;;  %v8154_v43 = vld [vmem:[%s10373_s4 + $0xf8] sm:$0xff]  ;;  %v8153_v52 = vld [vmem:[%s10373_s4 + $0xf0] sm:$0xff] }
0x16e2   :  { %9205 = vmatprep.subr.mxu1 %v8131_v30 }
0x16e3   :  { %9952 = vpow2.f32 %v2792_v34  ;;  %9206 = vmatpush3.msra.mxu1 %v8131_v30  ;;  %v8152_v34 = vld [vmem:[%s10373_s4 + $0xe8] sm:$0xff] }
0x16e4   :  { %v2896_v6 = vpop.permute.xlu1 %2895  ;;  %9207 = vmatprep.subr.mxu1 %v8130_v31 }
0x16e5   :  { %v2917_v9 = vsel %vm572_vm1, %v10933_v18, %v2896_v6  ;;  %9208 = vmatpush3.msra.mxu1 %v8130_v31 }
0x16e6   :  { %9209 = vmatprep.subr.mxu1 %v8129_v49 }
0x16e7   :  { %9210 = vmatpush3.msra.mxu1 %v8129_v49 }
0x16e8   :  { %v2898_v3 = vpop.permute.xlu1 %2897  ;;  %9211 = vmatprep.subr.mxu1 %v8128_v63 }
0x16e9   :  { %v2918_v12 = vsel %vm572_vm1, %v10931_v17, %v2898_v3  ;;  %9212 = vmatpush3.msra.mxu1 %v8128_v63 }
0x16ea   :  { %9213 = vmatprep.subr.mxu1 %v8127_v32 }
0x16eb   :  { %9214 = vmatpush3.msra.mxu1 %v8127_v32 }
0x16ec   :  { %v2906_v5 = vpop.permute.xlu1 %2905 }
0x16ed   :  { %v2920_v35 = vsel %vm1407_vm2, %v2918_v12, %v2906_v5  ;;  %v8139_v12 = vld [vmem:[%s10373_s4 + $0x80] sm:$0xff] }
0x16ee   :  { %v9951_v41 = vpop.eup %9950 }
0x16ef   :  { %v2799_v40 = vsel %vm572_vm1, %v9951_v41, 0.0 }
0x16f0   :  { %v9953_v45 = vpop.eup %9952  ;;  %2800 = vadd.xlane.f32.xlu0 %v2799_v40  ;;  %v8150_v40 = vld [vmem:[%s10373_s4 + $0xd8] sm:$0xff] }
0x16f1   :  { %v2796_v42 = vsel %vm572_vm1, %v9953_v45, 0.0 }
0x16f4   :  { %2797 = vadd.xlane.f32.xlu0 %v2796_v42  ;;  %v8148_v42 = vld [vmem:[%s10373_s4 + $0xc8] sm:$0xff] }
0x170a   :  { %2808 = vrot.lane.b32.xlu0 %v10889_v44, %s10269_s27  ;;  %s12188_s27 = sld [smem:[#allocation35_spill]] }
0x170e   :  { %2903 = vrot.lane.b32.xlu0 %v2680_v26, %s10271_s26  ;;  %s12189_s26 = sld [smem:[#allocation31_spill]] }
0x1779   :  { %v2801_v0 = vpop.xlane.xlu0 %2800 }
0x177a   :  { %9954 = vrcp.f32 %v2801_v0  ;;  %v8147_v0 = vld [vmem:[%s10373_s4 + $0xc0] sm:$0xff] }
0x177d   :  { %v2798_v46 = vpop.xlane.xlu0 %2797 }
0x177e   :  { %9956 = vrcp.f32 %v2798_v46  ;;  %v8146_v46 = vld [vmem:[%s10373_s4 + $0xb8] sm:$0xff] }
0x1781   :  { %v2809_v37 = vpop.permute.xlu0 %2808 }
0x1782   :  { %9173 = vmatprep.subr.mxu0 %v2809_v37 }
0x1783   :  { %9174 = vmatpush3.msra.mxu0 %v2809_v37  ;;  %v8145_v37 = vld [vmem:[%s10373_s4 + $0xb0] sm:$0xff] }
0x1784   :  { %9175 = vmatprep.subr.mxu0 %v2807_v47 }
0x1785   :  { %9176 = vmatpush3.msra.mxu0 %v2807_v47  ;;  %v2904_v7 = vpop.permute.xlu0 %2903  ;;  %v8144_v47 = vld [vmem:[%s10373_s4 + $0xa8] sm:$0xff] }
0x1786   :  { %9180 = vmatprep.subr.mxu0 %v8118_v53  ;;  %v2919_v13 = vsel %vm1407_vm2, %v2917_v9, %v2904_v7  ;;  %v8142_v7 = vld [vmem:[%s10373_s4 + $0x98] sm:$0xff]  ;;  %v8141_v9 = vld [vmem:[%s10373_s4 + $0x90] sm:$0xff] }
0x1787   :  { %v9955_v48 = vpop.eup %9954 }
0x1788   :  { %v2805_v51 = vmul.f32 %v9955_v48, %v9951_v41  ;;  %v8151_v41 = vld [vmem:[%s10373_s4 + $0xe0] sm:$0xff] }
0x1789   :  { %v8143_v48 = vld [vmem:[%s10373_s4 + $0xa0] sm:$0xff] }
0x178b   :  { %v9957_v50 = vpop.eup %9956 }
0x178c   :  { %v2803_v44 = vmul.f32 %v9957_v50, %v9953_v45  ;;  %v8149_v45 = vld [vmem:[%s10373_s4 + $0xd0] sm:$0xff] }
0x178e   :  { %9177 = vmatprep.mubr.msk.f32.mxu0 %vm572_vm1, %v2803_v44 }
0x178f   :  { %9178 = vmatmul.mubr.msk.f32.vlgmr.msra.gmra.mxu0 %vm572_vm1, %v2805_v51 }
0x1790   :  { %9181 = vmatpush3.msra.mxu0 %v8118_v53 }
0x1791   :  { %9182 = vmatprep.subr.mxu0 %v8117_v54 }
0x1792   :  { %9183 = vmatpush3.msra.mxu0 %v8117_v54 }
0x1793   :  { %9184 = vmatprep.subr.mxu0 %v8116_v8 }
0x1794   :  { %9185 = vmatpush3.msra.mxu0 %v8116_v8 }
0x1795   :  { %9186 = vmatprep.subr.mxu0 %v8115_v55 }
0x1796   :  { %9187 = vmatpush3.msra.mxu0 %v8115_v55 }
0x1797   :  { %9188 = vmatprep.subr.mxu0 %v8114_v56 }
0x1798   :  { %9189 = vmatpush3.msra.mxu0 %v8114_v56  ;;  %v8125_v56 = vld [vmem:[%s12168_s28 + $0x1] ss:$0 sm:$0xff]  ;;  %s12191_s28 = sld [smem:[#allocation34_spill]] }
0x1799   :  { %9190 = vmatprep.subr.mxu0 %v8113_v58 }
0x179a   :  { %9191 = vmatpush3.msra.mxu0 %v8113_v58 }
0x179b   :  { %9192 = vmatprep.subr.mxu0 %v8112_v11 }
0x179c   :  { %9193 = vmatpush3.msra.mxu0 %v8112_v11  ;;  %v8126_v11 = vld [vmem:[%s12169_s2 + $0x1] ss:$0 sm:$0xff]  ;;  %s12192_s2 = sld [smem:[#allocation36_spill]] }
0x179d   :  { %9194 = vmatprep.subr.mxu0 %v8111_v59 }
0x179e   :  { %9195 = vmatpush3.msra.mxu0 %v8111_v59 }
0x179f   :  { %9218 = vmatprep.subr.mxu0 %v8154_v43 }
0x184f   :  { %v9179_v60 = vpop.f32.mrf.mxu0 }
0x1850   :  { %2913 = vrot.lane.b32.xlu1 %v9179_v60, %s10272_s1 }
0x1851   :  { %v2884_v2 = vpop.f32.mrf.mxu0 }
0x1852   :  { %2911 = vrot.lane.b32.xlu0 %v2884_v2, %s10272_s1  ;;  %s12190_s1 = sld [smem:[#allocation32_spill]] }
0x18c2   :  { %v2914_v10 = vpop.permute.xlu1 %2913 }
0x18c3   :  { %v2922_v36 = vsel %vm1410_vm3, %v2920_v35, %v2914_v10  ;;  %v8140_v10 = vld [vmem:[%s10373_s4 + $0x88] sm:$0xff]  ;;  %s12184_s4 = sld [smem:[#allocation19_spill]] }
0x18c4   :  { %v2912_v4 = vpop.permute.xlu0 %2911 }
0x18c5   :  { %v2921_v38 = vsel %vm1410_vm3, %v2919_v13, %v2912_v4  ;;  %v8136_v13 = vld [vmem:[%s12170_s7 + $0x1] ss:$0 sm:$0xff]  ;;  %s12195_s7 = sld [smem:[#allocation20_spill]] }
0x18c6   :  { %9196 = vmatprep.mubr.msk.f32.mxu0 %vm252_vm0, %v2921_v38 }
0x18c7   :  { %9197 = vmatmul.mubr.msk.f32.vlgmr.msra.gmra.mxu0 %vm252_vm0, %v2922_v36 }
0x18c8   :  { %9219 = vmatpush3.msra.mxu0 %v8154_v43 }
0x18c9   :  { %9220 = vmatprep.subr.mxu0 %v8153_v52 }
0x18ca   :  { %9221 = vmatpush3.msra.mxu0 %v8153_v52 }
0x18cb   :  { %9222 = vmatprep.subr.mxu0 %v8152_v34 }
0x18cc   :  { %9223 = vmatpush3.msra.mxu0 %v8152_v34 }
0x18cd   :  { %9224 = vmatprep.subr.mxu0 %v8151_v41 }
0x18ce   :  { %9225 = vmatpush3.msra.mxu0 %v8151_v41 }
0x18cf   :  { %9226 = vmatprep.subr.mxu0 %v8150_v40 }
0x18d0   :  { %9227 = vmatpush3.msra.mxu0 %v8150_v40 }
0x18d1   :  { %9228 = vmatprep.subr.mxu0 %v8149_v45 }
0x18d2   :  { %9229 = vmatpush3.msra.mxu0 %v8149_v45 }
0x18d3   :  { %9230 = vmatprep.subr.mxu0 %v8148_v42 }
0x18d4   :  { %9231 = vmatpush3.msra.mxu0 %v8148_v42 }
0x18d5   :  { %9232 = vmatprep.subr.mxu0 %v8147_v0 }
0x18d6   :  { %9233 = vmatpush3.msra.mxu0 %v8147_v0 }
0x18d7   :  { %9234 = vmatprep.subr.mxu0 %v8146_v46 }
0x18d8   :  { %9235 = vmatpush3.msra.mxu0 %v8146_v46 }
0x18d9   :  { %9236 = vmatprep.subr.mxu0 %v8145_v37 }
0x18da   :  { %9237 = vmatpush3.msra.mxu0 %v8145_v37 }
0x18db   :  { %9238 = vmatprep.subr.mxu0 %v8144_v47 }
0x18dc   :  { %9239 = vmatpush3.msra.mxu0 %v8144_v47 }
0x18dd   :  { %9240 = vmatprep.subr.mxu0 %v8143_v48 }
0x18de   :  { %9241 = vmatpush3.msra.mxu0 %v8143_v48 }
0x18df   :  { %9242 = vmatprep.subr.mxu0 %v8142_v7 }
0x18e0   :  { %9243 = vmatpush3.msra.mxu0 %v8142_v7 }
0x18e1   :  { %9244 = vmatprep.subr.mxu0 %v8141_v9 }
0x18e2   :  { %9245 = vmatpush3.msra.mxu0 %v8141_v9 }
0x18e3   :  { %9246 = vmatprep.subr.mxu0 %v8140_v10 }
0x18e4   :  { %9247 = vmatpush3.msra.mxu0 %v8140_v10 }
0x18e5   :  { %9248 = vmatprep.subr.mxu0 %v8139_v12 }
0x18e6   :  { %9249 = vmatpush3.msra.mxu0 %v8139_v12 }
0x1987   :  { %v9198_v14 = vpop.f32.mrf.mxu0 }
0x1988   :  { %v3014_v18 = vadd.f32 %v9198_v14, %v10817_v39 }
0x1989   :  { %v3004_v16 = vpop.f32.mrf.mxu0 }
0x198a   :  { %v11031_v19 = vadd.f32 %v8122_v15, %v3014_v18  ;;  %v3013_v17 = vadd.f32 %v3004_v16, %v10820_v1  ;;  %v8156_v16 = vld [vmem:[%s12171_s10 + $0x1] ss:$0 sm:$0xff]  ;;  %s12196_s10 = sld [smem:[#allocation40_spill]] }
0x198c   :  { %v11034_v20 = vadd.f32 %v8122_v15, %v3013_v17  ;;  %v3032_v21 = vsel %vm252_vm0, %v11031_v19, 0.0 }
0x198d   :  { %3033 = vadd.xlane.f32.xlu1 %v3032_v21 }
0x198e   :  { %v3029_v22 = vsel %vm252_vm0, %v11034_v20, 0.0 }
0x198f   :  { %3030 = vadd.xlane.f32.xlu0 %v3029_v22 }
0x1a16   :  { %v3034_v33 = vpop.xlane.xlu1 %3033 }
0x1a17   :  { %v3036_v39 = vmul.f32 0.015625, %v3034_v33 }
0x1a18   :  { %v3031_v23 = vpop.xlane.xlu0 %3030 }
0x1a19   :  { %v3035_v24 = vmul.f32 0.015625, %v3031_v23  ;;  %v11041_v1 = vsub.f32 %v11031_v19, %v3036_v39  ;;  %v3390_v39 = vld [vmem:[%s12172_s9] sm:$0xff] }
0x1a1b   :  { %v11044_v25 = vsub.f32 %v11034_v20, %v3035_v24  ;;  %v3040_v28 = vmul.f32 %v11041_v1, %v11041_v1 }
0x1a1d   :  { %v3039_v26 = vmul.f32 %v11044_v25, %v11044_v25  ;;  %v3044_v29 = vsel %vm252_vm0, %v3040_v28, 0.0 }
0x1a1f   :  { %v3041_v27 = vsel %vm252_vm0, %v3039_v26, 0.0  ;;  %v3403_v26 = vsel %vm1407_vm2, %v3390_v39, 0.0 }
0x1a20   :  { %3042 = vadd.xlane.f32.xlu0 %v3041_v27  ;;  %v3392_v27 = vld [vmem:[%s12172_s9 + $0x10] sm:$0xff] }
0x1a24   :  { %3045 = vadd.xlane.f32.xlu0 %v3044_v29  ;;  %v3409_v29 = vsel %vm1407_vm2, %v3392_v27, 0.0 }
0x1aa9   :  { %v3043_v50 = vpop.xlane.xlu0 %3042 }
0x1aaa   :  { %v3047_v44 = vmul.f32 0.015625, %v3043_v50 }
0x1aac   :  { %v3049_v51 = vadd.f32 1e-05, %v3047_v44 }
0x1aad   :  { %v3046_v53 = vpop.xlane.xlu0 %3045 }
0x1aae   :  { %9958 = vrsqrt.f32 %v3049_v51  ;;  %v3048_v54 = vmul.f32 0.015625, %v3046_v53 }
0x1ab0   :  { %v3050_v8 = vadd.f32 1e-05, %v3048_v54 }
0x1ab2   :  { %9960 = vrsqrt.f32 %v3050_v8 }
0x1abb   :  { %v9959_v55 = vpop.eup %9958 }
0x1abc   :  { %v3053_v58 = vmul.f32 %v9959_v55, %v11044_v25 }
0x1abe   :  { %v3061_v59 = vmul.f32 %v8125_v56, %v3053_v58 }
0x1abf   :  { %v9961_v60 = vpop.eup %9960 }
0x1ac0   :  { %v3054_v2 = vmul.f32 %v9961_v60, %v11041_v1  ;;  %v3069_v6 = vadd.f32 %v8126_v11, %v3061_v59  ;;  %v3391_v1 = vld [vmem:[%s12172_s9 + $0x8] sm:$0xff]  ;;  %v10273_v59 = vmov 0.0  }
0x1ac1   :  { %v3406_v28 = vsel %vm1407_vm2, %v3391_v1, 0.0  ;;  %9253 = vmatprep.subr.mxu1 %v10273_v59 }
0x1ac2   :  { %v3062_v3 = vmul.f32 %v8125_v56, %v3054_v2  ;;  %9215 = vmatprep.mubr.msk.f32.mxu1 %vm252_vm0, %v3069_v6 }
0x1ac4   :  { %v3070_v5 = vadd.f32 %v8126_v11, %v3062_v3 }
0x1ac6   :  { %9216 = vmatmul.mubr.msk.f32.vlgmr.msra.gmra.mxu1 %vm252_vm0, %v3070_v5 }
0x1ac7   :  { %9257 = vmatprep.mubr.msk.f32.mxu1 %vm10274_vm4, %v10273_v59 }
0x1b86   :  { %v9217_v4 = vpop.f32.mrf.mxu1 }
0x1b87   :  { %v3166_v35 = vadd.f32 %v9217_v4, %v8136_v13 }
0x1b88   :  { %v3160_v38 = vpop.f32.mrf.mxu1 }
0x1b89   :  { %v3161_v36 = vadd.f32 %v8136_v13, %v3160_v38  ;;  %v3170_v15 = vmax.f32 %v3166_v35, 0.0 }
0x1b8b   :  { %v3169_v14 = vmax.f32 %v3161_v36, 0.0 }
0x1b8d   :  { %9250 = vmatprep.mubr.f32.mxu0 %v3169_v14 }
0x1b8e   :  { %9251 = vmatmul.mubr.f32.vlgmr.msra.gmra.mxu0 %v3170_v15 }
0x1c4e   :  { %v9252_v18 = vpop.f32.mrf.mxu0 }
0x1c4f   :  { %v3264_v17 = vadd.f32 %v9252_v18, %v11031_v19  ;;  %v3393_v19 = vld [vmem:[%s12172_s9 + $0x18] sm:$0xff] }
0x1c50   :  { %v3254_v21 = vpop.f32.mrf.mxu0 }
0x1c51   :  { %v3263_v22 = vadd.f32 %v3254_v21, %v11034_v20  ;;  %v3274_v33 = vadd.f32 %v8156_v16, %v3264_v17  ;;  %v3412_v20 = vsel %vm1407_vm2, %v3393_v19, 0.0  ;;  %v8157_v21 = vld [vmem:[%s12173_s17] ss:$0 sm:$0xff]  ;;  %s12198_s17 = sld [smem:[#allocation39_spill]] }
0x1c53   :  { %v3278_v23 = vsel %vm252_vm0, %v3274_v33, 0.0  ;;  %v3273_v24 = vadd.f32 %v8156_v16, %v3263_v22 }
0x1c54   :  { %3279 = vadd.xlane.f32.xlu0 %v3278_v23 }
0x1c55   :  { %v3275_v25 = vsel %vm252_vm0, %v3273_v24, 0.0 }
0x1c56   :  { %3276 = vadd.xlane.f32.xlu1 %v3275_v25  ;;  %v8160_v25 = vld [vmem:[%s12175_s25] ss:$0 sm:$0xff] }
0x1c58   :  { %3404 = vadd.xlane.f32.xlu0 %v3403_v26 }
0x1c5a   :  { %3407 = vadd.xlane.f32.xlu1 %v3406_v28 }
0x1c5c   :  { %3410 = vadd.xlane.f32.xlu0 %v3409_v29  ;;  %v8161_v29 = vld [vmem:[%s12176_s29] ss:$0 sm:$0xff] }
0x1c5e   :  { %3413 = vadd.xlane.f32.xlu1 %v3412_v20 }
0x1cdd   :  { %v3280_v57 = vpop.xlane.xlu0 %3279 }
0x1cde   :  { %v3282_v61 = vmul.f32 0.015625, %v3280_v57  ;;  %v247_v57 = vld [vmem:[%s12177_s3] sm:$0x3]  ;;  %s12202_s3 = sld [smem:[#allocation44_spill]] }
0x1cdf   :  { %v3277_v62 = vpop.xlane.xlu1 %3276 }
0x1ce0   :  { %v11096_v30 = vsub.f32 %v3274_v33, %v3282_v61  ;;  %v3281_v31 = vmul.f32 0.015625, %v3277_v62  ;;  %v3479_v61 = vld [vmem:[%s12178_s8 + $0x18] sm:$0xff] }
0x1ce1   :  { %v3405_v49 = vpop.xlane.xlu0 %3404 }
0x1ce2   :  { %v11098_v63 = vsub.f32 %v3273_v24, %v3281_v31  ;;  %v3416_v32 = vmul.f32 0.03125, %v3405_v49  ;;  %v3286_v43 = vmul.f32 %v11096_v30, %v11096_v30 }
0x1ce3   :  { %v3408_v52 = vpop.xlane.xlu1 %3407 }
0x1ce4   :  { %v11102_v34 = vsub.f32 %v3390_v39, %v3416_v32  ;;  %v3417_v41 = vmul.f32 0.03125, %v3408_v52  ;;  %v3290_v40 = vsel %vm252_vm0, %v3286_v43, 0.0  ;;  %v3285_v45 = vmul.f32 %v11098_v63, %v11098_v63  ;;  %v8158_v39 = vld [vmem:[%s12174_s21] ss:$0 sm:$0xff]  ;;  %v3477_v52 = vld [vmem:[%s12178_s8 + $0x8] sm:$0xff]  ;;  %s12199_s21 = sld [smem:[#allocation41_spill]] }
0x1ce5   :  { %3291 = vadd.xlane.f32.xlu0 %v3290_v40  ;;  %v3411_v42 = vpop.xlane.xlu0 %3410  ;;  %v3476_v40 = vld [vmem:[%s12178_s8] sm:$0xff] }
0x1ce6   :  { %v11107_v0 = vsub.f32 %v3391_v1, %v3417_v41  ;;  %v3418_v46 = vmul.f32 0.03125, %v3411_v42  ;;  %v3287_v37 = vsel %vm252_vm0, %v3285_v45, 0.0  ;;  %v3424_v47 = vmul.f32 %v11102_v34, %v11102_v34  ;;  %v3587_v42 = vld [vmem:[%s12179_s14 + $0x18] sm:$0xff] }
0x1ce7   :  { %3288 = vadd.xlane.f32.xlu1 %v3287_v37  ;;  %v3414_v48 = vpop.xlane.xlu1 %3413 }
0x1ce8   :  { %v11112_v50 = vsub.f32 %v3392_v27, %v3418_v46  ;;  %v3419_v44 = vmul.f32 0.03125, %v3414_v48  ;;  %v3428_v51 = vsel %vm1407_vm2, %v3424_v47, 0.0  ;;  %v3425_v53 = vmul.f32 %v11107_v0, %v11107_v0  ;;  %v3586_v47 = vld [vmem:[%s12179_s14 + $0x10] sm:$0xff]  ;;  %v3585_v48 = vld [vmem:[%s12179_s14 + $0x8] sm:$0xff] }
0x1ce9   :  { %3429 = vadd.xlane.f32.xlu0 %v3428_v51  ;;  %v3683_v51 = vld [vmem:[%s12180_s19 + $0x18] sm:$0xff] }
0x1cea   :  { %v11117_v54 = vsub.f32 %v3393_v19, %v3419_v44  ;;  %v3431_v8 = vsel %vm1407_vm2, %v3425_v53, 0.0  ;;  %v3426_v55 = vmul.f32 %v11112_v50, %v11112_v50  ;;  %v3584_v44 = vld [vmem:[%s12179_s14] sm:$0xff]  ;;  %v3682_v53 = vld [vmem:[%s12180_s19 + $0x10] sm:$0xff] }
0x1ceb   :  { %3432 = vadd.xlane.f32.xlu1 %v3431_v8  ;;  %v3680_v8 = vld [vmem:[%s12180_s19] sm:$0xff] }
0x1cec   :  { %v3434_v56 = vsel %vm1407_vm2, %v3426_v55, 0.0  ;;  %v3427_v58 = vmul.f32 %v11117_v54, %v11117_v54 }
0x1ced   :  { %3435 = vadd.xlane.f32.xlu0 %v3434_v56 }
0x1cee   :  { %v3437_v11 = vsel %vm1407_vm2, %v3427_v58, 0.0 }
0x1cef   :  { %3438 = vadd.xlane.f32.xlu1 %v3437_v11  ;;  %v8162_v11 = vld [vmem:[%s12181_s24] ss:$0 sm:$0xff] }
0x1d6e   :  { %v3292_v60 = vpop.xlane.xlu0 %3291 }
0x1d6f   :  { %v3294_v2 = vmul.f32 0.015625, %v3292_v60 }
0x1d70   :  { %v3289_v6 = vpop.xlane.xlu1 %3288 }
0x1d71   :  { %v3296_v3 = vadd.f32 1e-05, %v3294_v2  ;;  %v3293_v5 = vmul.f32 0.015625, %v3289_v6 }
0x1d72   :  { %v3430_v7 = vpop.xlane.xlu0 %3429 }
0x1d73   :  { %9962 = vrsqrt.f32 %v3296_v3  ;;  %v3295_v9 = vadd.f32 1e-05, %v3293_v5  ;;  %v3440_v10 = vmul.f32 0.03125, %v3430_v7 }
0x1d74   :  { %v3433_v12 = vpop.xlane.xlu1 %3432 }
0x1d75   :  { %9964 = vrsqrt.f32 %v3295_v9  ;;  %v3444_v13 = vadd.f32 1e-05, %v3440_v10  ;;  %v3441_v4 = vmul.f32 0.03125, %v3433_v12  ;;  %v8167_v9 = vld [vmem:[%s12182_s30] ss:$0 sm:$0xff] }
0x1d76   :  { %v3436_v35 = vpop.xlane.xlu0 %3435 }
0x1d77   :  { %9966 = vrsqrt.f32 %v3444_v13  ;;  %v3445_v38 = vadd.f32 1e-05, %v3441_v4  ;;  %v3442_v36 = vmul.f32 0.03125, %v3436_v35 }
0x1d78   :  { %v3439_v14 = vpop.xlane.xlu1 %3438 }
0x1d79   :  { %9968 = vrsqrt.f32 %v3445_v38  ;;  %v3446_v15 = vadd.f32 1e-05, %v3442_v36  ;;  %v3443_v18 = vmul.f32 0.03125, %v3439_v14  ;;  %v8172_v14 = vld [vmem:[%s12183_s20] ss:$0 sm:$0xff] }
0x1d7b   :  { %9970 = vrsqrt.f32 %v3446_v15  ;;  %v3447_v16 = vadd.f32 1e-05, %v3443_v18 }
0x1d7d   :  { %9972 = vrsqrt.f32 %v3447_v16 }
0x1d80   :  { %v9963_v17 = vpop.eup %9962 }
0x1d81   :  { %v3300_v22 = vmul.f32 %v9963_v17, %v11096_v30 }
0x1d82   :  { %v9965_v33 = vpop.eup %9964 }
0x1d83   :  { %v3308_v23 = vmul.f32 %v8157_v21, %v3300_v22  ;;  %v3299_v24 = vmul.f32 %v9965_v33, %v11098_v63  ;;  %v3478_v63 = vld [vmem:[%s12178_s8 + $0x10] sm:$0xff] }
0x1d84   :  { %v9967_v1 = vpop.eup %9966 }
0x1d85   :  { %v3316_v26 = vadd.f32 %v8158_v39, %v3308_v23  ;;  %v3307_v27 = vmul.f32 %v8157_v21, %v3299_v24  ;;  %v3452_v28 = vmul.f32 %v9967_v1, %v11102_v34  ;;  %v11228_v1 = vld [vmem:[%s12184_s4 + $0x8] sm:$0xff] }
0x1d86   :  { %v9969_v19 = vpop.eup %9968 }
0x1d87   :  { %9254 = vmatpush3.msra.mxu1 %v3316_v26  ;;  %v3315_v20 = vadd.f32 %v8158_v39, %v3307_v27  ;;  %v3462_v62 = vmul.f32 %v8160_v25, %v3452_v28  ;;  %v3453_v31 = vmul.f32 %v9969_v19, %v11107_v0  ;;  %v11231_v27 = vld [vmem:[%s12184_s4] sm:$0xff] }
0x1d88   :  { %v9971_v30 = vpop.eup %9970  ;;  %9255 = vmatprep.subr.mxu1 %v10273_v59 }
0x1d89   :  { %9256 = vmatpush3.msra.mxu1 %v3315_v20  ;;  %v3472_v49 = vadd.f32 %v8161_v29, %v3462_v62  ;;  %v3454_v32 = vmul.f32 %v9971_v30, %v11112_v50  ;;  %v3463_v34 = vmul.f32 %v8160_v25, %v3453_v31  ;;  %v11235_v20 = vld [vmem:[%s12184_s4 + $0x18] sm:$0xff]  ;;  %v11240_v31 = vld [vmem:[%s12184_s4 + $0x10] sm:$0xff] }
0x1d8a   :  { %v9973_v43 = vpop.eup %9972  ;;  %9258 = vmatmul.mubr.msk.f32.vlgmr.msra.gmra.mxu1 %vm572_vm1, %v247_v57  ;;  %9260 = vmatprep.subr.mxu1 %v3479_v61 }
0x1d8b   :  { %9261 = vmatpush3.msra.mxu1 %v3479_v61  ;;  %9268 = vmatprep.mubr.msk.f32.mxu1 %vm1407_vm2, %v3472_v49  ;;  %v3455_v41 = vmul.f32 %v9973_v43, %v11117_v54  ;;  %v3464_v45 = vmul.f32 %v8160_v25, %v3454_v32  ;;  %v3473_v0 = vadd.f32 %v8161_v29, %v3463_v34  ;;  %v3681_v54 = vld [vmem:[%s12180_s19 + $0x8] sm:$0xff] }
0x1d8c   :  { %9262 = vmatprep.subr.mxu1 %v3478_v63 }
0x1d8d   :  { %9263 = vmatpush3.msra.mxu1 %v3478_v63  ;;  %v3465_v46 = vmul.f32 %v8160_v25, %v3455_v41  ;;  %v3474_v37 = vadd.f32 %v8161_v29, %v3464_v45 }
0x1d8e   :  { %9264 = vmatprep.subr.mxu1 %v3477_v52 }
0x1d8f   :  { %9265 = vmatpush3.msra.mxu1 %v3477_v52  ;;  %v3475_v50 = vadd.f32 %v8161_v29, %v3465_v46 }
0x1d90   :  { %9266 = vmatprep.subr.mxu1 %v3476_v40 }
0x1d91   :  { %9267 = vmatpush3.msra.mxu1 %v3476_v40 }
0x1d92   :  { %9269 = vmatmul.mubr.msk.f32.vlgmr.msra.gmra.mxu1 %vm1407_vm2, %v3473_v0  ;;  %9274 = vmatprep.subr.mxu1 %v3587_v42 }
0x1d93   :  { %9271 = vmatprep.mubr.msk.f32.mxu1 %vm1407_vm2, %v3474_v37  ;;  %9275 = vmatpush3.msra.mxu1 %v3587_v42 }
0x1d94   :  { %9276 = vmatprep.subr.mxu1 %v3586_v47 }
0x1d95   :  { %9277 = vmatpush3.msra.mxu1 %v3586_v47 }
0x1d96   :  { %9272 = vmatmul.mubr.msk.f32.gmra.mxu1 %vm1407_vm2, %v3475_v50  ;;  %9278 = vmatprep.subr.mxu1 %v3585_v48 }
0x1d97   :  { %9279 = vmatpush3.msra.mxu1 %v3585_v48  ;;  %9282 = vmatprep.mubr.msk.f32.mxu1 %vm1407_vm2, %v3472_v49 }
0x1d98   :  { %9280 = vmatprep.subr.mxu1 %v3584_v44 }
0x1d99   :  { %9281 = vmatpush3.msra.mxu1 %v3584_v44 }
0x1d9a   :  { %9283 = vmatmul.mubr.msk.f32.vlgmr.msra.gmra.mxu1 %vm1407_vm2, %v3473_v0  ;;  %9288 = vmatprep.subr.mxu1 %v3683_v51 }
0x1d9b   :  { %9285 = vmatprep.mubr.msk.f32.mxu1 %vm1407_vm2, %v3474_v37  ;;  %9289 = vmatpush3.msra.mxu1 %v3683_v51 }
0x1d9c   :  { %9290 = vmatprep.subr.mxu1 %v3682_v53 }
0x1d9d   :  { %9291 = vmatpush3.msra.mxu1 %v3682_v53 }
0x1d9e   :  { %9286 = vmatmul.mubr.msk.f32.gmra.mxu1 %vm1407_vm2, %v3475_v50  ;;  %9292 = vmatprep.subr.mxu1 %v3681_v54 }
0x1d9f   :  { %9293 = vmatpush3.msra.mxu1 %v3681_v54  ;;  %9296 = vmatprep.mubr.msk.f32.mxu1 %vm1407_vm2, %v3472_v49 }
0x1da0   :  { %9294 = vmatprep.subr.mxu1 %v3680_v8 }
0x1da1   :  { %9295 = vmatpush3.msra.mxu1 %v3680_v8 }
0x1da2   :  { %9297 = vmatmul.mubr.msk.f32.vlgmr.msra.gmra.mxu1 %vm1407_vm2, %v3473_v0 }
0x1da3   :  { %9299 = vmatprep.mubr.msk.f32.mxu1 %vm1407_vm2, %v3474_v37 }
0x1da6   :  { %9300 = vmatmul.mubr.msk.f32.gmra.mxu1 %vm1407_vm2, %v3475_v50 }
0x1e4a   :  { %v11166_v55 = vpop.f32.mrf.mxu1 }
0x1e4c   :  { %v9259_v56 = vpop.f32.mrf.mxu1 }
0x1e52   :  { %v9270_v58 = vpop.f32.mrf.mxu1 }
0x1e53   :  { %v11213_v39 = vadd.f32 %v9270_v58, %v8162_v11 }
0x1e54   :  { %v3565_v60 = vpop.f32.mrf.mxu1 }
0x1e55   :  { %v11169_v2 = vadd.f32 %v8162_v11, %v3565_v60 }
0x1e56   :  { %v9273_v6 = vpop.f32.mrf.mxu1 }
0x1e57   :  { %9310 = vmatprep.mubr.msk.f32.mxu1 %vm3776_vm5, %v11169_v2  ;;  %v11223_v24 = vadd.f32 %v9273_v6, %v8162_v11 }
0x1e58   :  { %v3575_v3 = vpop.f32.mrf.mxu1 }
0x1e59   :  { %v11216_v23 = vadd.f32 %v8162_v11, %v3575_v3 }
0x1e5a   :  { %v9284_v5 = vpop.f32.mrf.mxu1 }
0x1e5b   :  { %v11184_v36 = vadd.f32 %v9284_v5, %v8167_v9 }
0x1e5c   :  { %v3661_v7 = vpop.f32.mrf.mxu1 }
0x1e5d   :  { %v11193_v17 = vadd.f32 %v8167_v9, %v3661_v7 }
0x1e5e   :  { %v9287_v10 = vpop.f32.mrf.mxu1 }
0x1e5f   :  { %v11174_v12 = vadd.f32 %v9287_v10, %v8167_v9 }
0x1e60   :  { %v3671_v13 = vpop.f32.mrf.mxu1 }
0x1e61   :  { %v11176_v4 = vadd.f32 %v8167_v9, %v3671_v13  ;;  %9302 = vmatprep.subr.msk.mxu1 %vm3776_vm5, %v11174_v12 }
0x1e62   :  { %v9298_v35 = vpop.f32.mrf.mxu1  ;;  %9303 = vmatpush3.xpose.msk.msra.mxu1 %vm3776_vm5, %v11174_v12 }
0x1e63   :  { %9304 = vmatprep.subr.msk.mxu1 %vm3776_vm5, %v11176_v4  ;;  %v11201_v22 = vadd.f32 %v9298_v35, %v8172_v14 }
0x1e64   :  { %v3757_v38 = vpop.f32.mrf.mxu1 }
0x1e65   :  { %v11207_v33 = vadd.f32 %v8172_v14, %v3757_v38 }
0x1e66   :  { %v9301_v15 = vpop.f32.mrf.mxu1  ;;  %9305 = vmatpush3.xpose.msk.msra.mxu1 %vm3776_vm5, %v11176_v4 }
0x1e67   :  { %v11189_v18 = vadd.f32 %v9301_v15, %v8172_v14  ;;  %9306 = vmatprep.subr.msk.mxu1 %vm3776_vm5, %v11184_v36 }
0x1e68   :  { %v3767_v16 = vpop.f32.mrf.mxu1 }
0x1e69   :  { %v11195_v21 = vadd.f32 %v8172_v14, %v3767_v16  ;;  %9316 = vmatprep.subr.mxu0 %v11189_v18 }
0x1e6a   :  { %9307 = vmatpush3.xpose.msk.msra.mxu1 %vm3776_vm5, %v11184_v36  ;;  %9317 = vmatpush3.msra.mxu0 %v11189_v18 }
0x1e6b   :  { %9308 = vmatprep.subr.msk.mxu1 %vm3776_vm5, %v11193_v17  ;;  %9318 = vmatprep.subr.mxu0 %v11195_v21 }
0x1e6c   :  { %9319 = vmatpush3.msra.mxu0 %v11195_v21 }
0x1e6d   :  { %9320 = vmatprep.subr.mxu0 %v11201_v22 }
0x1e6e   :  { %9309 = vmatpush3.xpose.msk.msra.mxu1 %vm3776_vm5, %v11193_v17  ;;  %9321 = vmatpush3.msra.mxu0 %v11201_v22 }
0x1e6f   :  { %9322 = vmatprep.subr.mxu0 %v11207_v33 }
0x1e70   :  { %9323 = vmatpush3.msra.mxu0 %v11207_v33 }
0x1e71   :  { %9311 = vmatmul.mubr.msk.f32.vlgmr.msra.gmra.mxu1 %vm3776_vm5, %v11213_v39 }
0x1e72   :  { %9313 = vmatprep.mubr.msk.f32.mxu1 %vm3776_vm5, %v11216_v23 }
0x1e75   :  { %9314 = vmatmul.mubr.msk.f32.gmra.mxu1 %vm3776_vm5, %v11223_v24 }
0x1f31   :  { %v9312_v25 = vpop.f32.mrf.mxu1 }
0x1f32   :  { %v3887_v26 = vmul.f32 0.35355338, %v9312_v25 }
0x1f33   :  { %v3867_v28 = vpop.f32.mrf.mxu1 }
0x1f34   :  { %v3891_v19 = vadd.f32 %v3887_v26, %v11228_v1  ;;  %v3886_v29 = vmul.f32 0.35355338, %v3867_v28 }
0x1f35   :  { %v9315_v57 = vpop.f32.mrf.mxu1 }
0x1f36   :  { %v3890_v61 = vadd.f32 %v3886_v29, %v11231_v27  ;;  %v3889_v62 = vmul.f32 0.35355338, %v9315_v57  ;;  %v3897_v30 = vsel %vm1407_vm2, %v3891_v19, -inf }
0x1f37   :  { %3898 = vmax.xlane.f32.xlu1 %v3897_v30  ;;  %v3877_v49 = vpop.f32.mrf.mxu1 }
0x1f38   :  { %v3893_v63 = vadd.f32 %v3889_v62, %v11235_v20  ;;  %v3888_v32 = vmul.f32 0.35355338, %v3877_v49  ;;  %v3894_v43 = vsel %vm1407_vm2, %v3890_v61, -inf }
0x1f39   :  { %3895 = vmax.xlane.f32.xlu0 %v3894_v43 }
0x1f3a   :  { %v3892_v52 = vadd.f32 %v3888_v32, %v11240_v31  ;;  %v3903_v34 = vsel %vm1407_vm2, %v3893_v63, -inf }
0x1f3b   :  { %3904 = vmax.xlane.f32.xlu1 %v3903_v34 }
0x1f3c   :  { %v3900_v41 = vsel %vm1407_vm2, %v3892_v52, -inf }
0x1f3d   :  { %3901 = vmax.xlane.f32.xlu0 %v3900_v41 }
0x1fc0   :  { %v3899_v40 = vpop.xlane.xlu1 %3898 }
0x1fc1   :  { %v3907_v45 = vsub.f32 %v3891_v19, %v3899_v40 }
0x1fc2   :  { %v3896_v42 = vpop.xlane.xlu0 %3895 }
0x1fc3   :  { %v3912_v0 = vmul.f32 1.442695, %v3907_v45  ;;  %v3906_v46 = vsub.f32 %v3890_v61, %v3896_v42 }
0x1fc4   :  { %v3905_v37 = vpop.xlane.xlu1 %3904 }
0x1fc5   :  { %9974 = vpow2.f32 %v3912_v0  ;;  %v3910_v47 = vmul.f32 1.442695, %v3906_v46  ;;  %v3909_v48 = vsub.f32 %v3893_v63, %v3905_v37 }
0x1fc6   :  { %v3902_v50 = vpop.xlane.xlu0 %3901 }
0x1fc7   :  { %9976 = vpow2.f32 %v3910_v47  ;;  %v3916_v44 = vmul.f32 1.442695, %v3909_v48  ;;  %v3908_v51 = vsub.f32 %v3892_v52, %v3902_v50 }
0x1fc9   :  { %9978 = vpow2.f32 %v3916_v44  ;;  %v3914_v53 = vmul.f32 1.442695, %v3908_v51 }
0x1fcb   :  { %9980 = vpow2.f32 %v3914_v53 }
0x1fd2   :  { %v9975_v54 = vpop.eup %9974 }
0x1fd3   :  { %v3921_v8 = vsel %vm1407_vm2, %v9975_v54, 0.0 }
0x1fd4   :  { %v9977_v56 = vpop.eup %9976  ;;  %3922 = vadd.xlane.f32.xlu1 %v3921_v8 }
0x1fd5   :  { %v3918_v58 = vsel %vm1407_vm2, %v9977_v56, 0.0 }
0x1fd6   :  { %v9979_v11 = vpop.eup %9978  ;;  %3919 = vadd.xlane.f32.xlu0 %v3918_v58 }
0x1fd7   :  { %v3927_v60 = vsel %vm1407_vm2, %v9979_v11, 0.0 }
0x1fd8   :  { %v9981_v6 = vpop.eup %9980  ;;  %3928 = vadd.xlane.f32.xlu1 %v3927_v60 }
0x1fd9   :  { %v3924_v3 = vsel %vm1407_vm2, %v9981_v6, 0.0 }
0x1fda   :  { %3925 = vadd.xlane.f32.xlu0 %v3924_v3 }
0x1fe9   :  { %4047 = vrot.lane.b32.xlu1 %v11176_v4, %s10275_s11 }
0x1fed   :  { %4045 = vrot.lane.b32.xlu1 %v11184_v36, %s10275_s11 }
0x1ff0   :  { %4049 = vrot.lane.b32.xlu0 %v11174_v12, %s10275_s11 }
0x1ff1   :  { %4043 = vrot.lane.b32.xlu1 %v11193_v17, %s10275_s11 }
0x1ff4   :  { %4035 = vrot.lane.b32.xlu0 %v11169_v2, %s10275_s11 }
0x1ff5   :  { %4037 = vrot.lane.b32.xlu1 %v11213_v39, %s10275_s11 }
0x1ff8   :  { %4039 = vrot.lane.b32.xlu0 %v11216_v23, %s10275_s11 }
0x1ff9   :  { %4041 = vrot.lane.b32.xlu1 %v11223_v24, %s10275_s11 }
0x205d   :  { %v3923_v5 = vpop.xlane.xlu1 %3922 }
0x205e   :  { %9982 = vrcp.f32 %v3923_v5 }
0x205f   :  { %v3920_v7 = vpop.xlane.xlu0 %3919 }
0x2060   :  { %9984 = vrcp.f32 %v3920_v7 }
0x2061   :  { %v3929_v9 = vpop.xlane.xlu1 %3928 }
0x2062   :  { %9986 = vrcp.f32 %v3929_v9 }
0x2063   :  { %v3926_v10 = vpop.xlane.xlu0 %3925 }
0x2064   :  { %9988 = vrcp.f32 %v3926_v10 }
0x2065   :  { %v4048_v38 = vpop.permute.xlu1 %4047 }
0x2067   :  { %v4050_v13 = vpop.permute.xlu0 %4049 }
0x2068   :  { %9330 = vmatprep.subr.msk.mxu0 %vm3776_vm5, %v4050_v13 }
0x2069   :  { %v4046_v28 = vpop.permute.xlu1 %4045 }
0x206b   :  { %v9983_v35 = vpop.eup %9982  ;;  %v4036_v57 = vpop.permute.xlu0 %4035 }
0x206c   :  { %v3933_v16 = vmul.f32 %v9983_v35, %v9975_v54 }
0x206d   :  { %v9985_v14 = vpop.eup %9984  ;;  %v4044_v61 = vpop.permute.xlu1 %4043 }
0x206e   :  { %v3931_v15 = vmul.f32 %v9985_v14, %v9977_v56 }
0x206f   :  { %v9987_v25 = vpop.eup %9986  ;;  %v4040_v30 = vpop.permute.xlu0 %4039 }
0x2070   :  { %9324 = vmatprep.mubr.msk.f32.mxu0 %vm1407_vm2, %v3931_v15  ;;  %v3937_v29 = vmul.f32 %v9987_v25, %v9979_v11 }
0x2071   :  { %v9989_v26 = vpop.eup %9988  ;;  %9325 = vmatmul.mubr.msk.f32.vlgmr.msra.gmra.mxu0 %vm1407_vm2, %v3933_v16  ;;  %v4038_v62 = vpop.permute.xlu1 %4037 }
0x2072   :  { %9331 = vmatpush3.xpose.msk.msra.mxu0 %vm3776_vm5, %v4050_v13  ;;  %v3935_v19 = vmul.f32 %v9989_v26, %v9981_v6 }
0x2073   :  { %9332 = vmatprep.subr.msk.mxu0 %vm3776_vm5, %v4048_v38 }
0x2074   :  { %9327 = vmatprep.mubr.msk.f32.mxu0 %vm1407_vm2, %v3935_v19 }
0x2075   :  { %9328 = vmatmul.mubr.msk.f32.gmra.mxu0 %vm1407_vm2, %v3937_v29  ;;  %v4042_v49 = vpop.permute.xlu1 %4041 }
0x2076   :  { %9333 = vmatpush3.xpose.msk.msra.mxu0 %vm3776_vm5, %v4048_v38  ;;  %9338 = vmatprep.mubr.msk.f32.mxu0 %vm3776_vm5, %v4036_v57 }
0x2077   :  { %9334 = vmatprep.subr.msk.mxu0 %vm3776_vm5, %v4046_v28 }
0x207a   :  { %9335 = vmatpush3.xpose.msk.msra.mxu0 %vm3776_vm5, %v4046_v28 }
0x207b   :  { %9336 = vmatprep.subr.msk.mxu0 %vm3776_vm5, %v4044_v61 }
0x207e   :  { %9337 = vmatpush3.xpose.msk.msra.mxu0 %vm3776_vm5, %v4044_v61 }
0x2081   :  { %9339 = vmatmul.mubr.msk.f32.vlgmr.msra.gmra.mxu0 %vm3776_vm5, %v4038_v62 }
0x2082   :  { %9341 = vmatprep.mubr.msk.f32.mxu0 %vm3776_vm5, %v4040_v30 }
0x2085   :  { %9342 = vmatmul.mubr.msk.f32.gmra.mxu0 %vm3776_vm5, %v4042_v49 }
0x2131   :  { %v11283_v63 = vpop.f32.mrf.mxu0 }
0x2133   :  { %v11285_v32 = vpop.f32.mrf.mxu0 }
0x2135   :  { %v11287_v43 = vpop.f32.mrf.mxu0 }
0x2137   :  { %v11289_v52 = vpop.f32.mrf.mxu0 }
0x2141   :  { %v9340_v34 = vpop.f32.mrf.mxu0 }
0x2142   :  { %v4153_v41 = vmul.f32 0.35355338, %v9340_v34 }
0x2143   :  { %v4133_v40 = vpop.f32.mrf.mxu0 }
0x2144   :  { %v4157_v45 = vadd.f32 %v4153_v41, %v11228_v1  ;;  %v4152_v42 = vmul.f32 0.35355338, %v4133_v40 }
0x2145   :  { %v9343_v0 = vpop.f32.mrf.mxu0 }
0x2146   :  { %v4156_v46 = vadd.f32 %v4152_v42, %v11231_v27  ;;  %v4155_v37 = vmul.f32 0.35355338, %v9343_v0  ;;  %v4163_v47 = vsel %vm1407_vm2, %v4157_v45, -inf }
0x2147   :  { %4164 = vmax.xlane.f32.xlu1 %v4163_v47  ;;  %v4143_v48 = vpop.f32.mrf.mxu0 }
0x2148   :  { %v4159_v50 = vadd.f32 %v4155_v37, %v11235_v20  ;;  %v4154_v44 = vmul.f32 0.35355338, %v4143_v48  ;;  %v4160_v51 = vsel %vm1407_vm2, %v4156_v46, -inf }
0x2149   :  { %4161 = vmax.xlane.f32.xlu0 %v4160_v51 }
0x214a   :  { %v4158_v53 = vadd.f32 %v4154_v44, %v11240_v31  ;;  %v4169_v54 = vsel %vm1407_vm2, %v4159_v50, -inf }
0x214c   :  { %v4166_v8 = vsel %vm1407_vm2, %v4158_v53, -inf }
0x214d   :  { %4170 = vmax.xlane.f32.xlu0 %v4169_v54 }
0x2151   :  { %4167 = vmax.xlane.f32.xlu0 %v4166_v8 }
0x2158   :  { %4212 = vrot.lane.b32.xlu1 %v11195_v21, %s10275_s11 }
0x215c   :  { %4210 = vrot.lane.b32.xlu1 %v11201_v22, %s10275_s11 }
0x2160   :  { %4208 = vrot.lane.b32.xlu1 %v11207_v33, %s10275_s11 }
0x2167   :  { %4214 = vrot.lane.b32.xlu0 %v11189_v18, %s10275_s11 }
0x21d0   :  { %v4165_v56 = vpop.xlane.xlu1 %4164 }
0x21d1   :  { %v4173_v58 = vsub.f32 %v4157_v45, %v4165_v56 }
0x21d2   :  { %v4162_v11 = vpop.xlane.xlu0 %4161 }
0x21d3   :  { %v4178_v60 = vmul.f32 1.442695, %v4173_v58  ;;  %v4172_v6 = vsub.f32 %v4156_v46, %v4162_v11 }
0x21d4   :  { %v4213_v7 = vpop.permute.xlu1 %4212 }
0x21d5   :  { %9990 = vpow2.f32 %v4178_v60  ;;  %v4176_v3 = vmul.f32 1.442695, %v4172_v6 }
0x21d6   :  { %v4171_v5 = vpop.xlane.xlu0 %4170 }
0x21d7   :  { %9992 = vpow2.f32 %v4176_v3  ;;  %v4175_v25 = vsub.f32 %v4159_v50, %v4171_v5 }
0x21d8   :  { %v4211_v10 = vpop.permute.xlu1 %4210 }
0x21d9   :  { %v4182_v28 = vmul.f32 1.442695, %v4175_v25 }
0x21da   :  { %v4168_v9 = vpop.xlane.xlu0 %4167 }
0x21db   :  { %v4174_v26 = vsub.f32 %v4158_v53, %v4168_v9  ;;  %9994 = vpow2.f32 %v4182_v28 }
0x21dc   :  { %v4209_v15 = vpop.permute.xlu1 %4208 }
0x21dd   :  { %v4180_v19 = vmul.f32 1.442695, %v4174_v26 }
0x21de   :  { %v4215_v13 = vpop.permute.xlu0 %4214 }
0x21df   :  { %9344 = vmatprep.subr.mxu1 %v4215_v13  ;;  %9996 = vpow2.f32 %v4180_v19 }
0x21e0   :  { %9345 = vmatpush3.msra.mxu1 %v4215_v13 }
0x21e1   :  { %9346 = vmatprep.subr.mxu1 %v4213_v7 }
0x21e2   :  { %v9991_v35 = vpop.eup %9990  ;;  %9347 = vmatpush3.msra.mxu1 %v4213_v7 }
0x21e3   :  { %9348 = vmatprep.subr.mxu1 %v4211_v10  ;;  %v4187_v38 = vsel %vm1407_vm2, %v9991_v35, 0.0 }
0x21e4   :  { %v9993_v14 = vpop.eup %9992  ;;  %4188 = vadd.xlane.f32.xlu1 %v4187_v38  ;;  %9349 = vmatpush3.msra.mxu1 %v4211_v10 }
0x21e5   :  { %9350 = vmatprep.subr.mxu1 %v4209_v15  ;;  %v4184_v16 = vsel %vm1407_vm2, %v9993_v14, 0.0 }
0x21e6   :  { %4185 = vadd.xlane.f32.xlu0 %v4184_v16  ;;  %9351 = vmatpush3.msra.mxu1 %v4209_v15 }
0x21e8   :  { %v9995_v29 = vpop.eup %9994 }
0x21e9   :  { %v4193_v61 = vsel %vm1407_vm2, %v9995_v29, 0.0 }
0x21ec   :  { %v9997_v57 = vpop.eup %9996 }
0x21ed   :  { %v4190_v62 = vsel %vm1407_vm2, %v9997_v57, 0.0 }
0x21f5   :  { %4329 = vrot.lane.b32.xlu1 %v11176_v4, %s10267_s5 }
0x21fc   :  { %4331 = vrot.lane.b32.xlu0 %v11174_v12, %s10267_s5 }
0x2219   :  { %4194 = vadd.xlane.f32.xlu1 %v4193_v61 }
0x221b   :  { %4191 = vadd.xlane.f32.xlu0 %v4190_v62 }
0x222a   :  { %4325 = vrot.lane.b32.xlu1 %v11193_v17, %s10267_s5 }
0x222e   :  { %4319 = vrot.lane.b32.xlu1 %v11213_v39, %s10267_s5 }
0x2231   :  { %4327 = vrot.lane.b32.xlu0 %v11184_v36, %s10267_s5 }
0x2232   :  { %4323 = vrot.lane.b32.xlu1 %v11223_v24, %s10267_s5 }
0x2235   :  { %4317 = vrot.lane.b32.xlu0 %v11169_v2, %s10267_s5 }
0x2239   :  { %4321 = vrot.lane.b32.xlu0 %v11216_v23, %s10267_s5 }
0x226d   :  { %v4189_v30 = vpop.xlane.xlu1 %4188 }
0x226e   :  { %9998 = vrcp.f32 %v4189_v30 }
0x226f   :  { %v4186_v49 = vpop.xlane.xlu0 %4185 }
0x2270   :  { %10000 = vrcp.f32 %v4186_v49 }
0x2271   :  { %v4330_v0 = vpop.permute.xlu1 %4329 }
0x2273   :  { %v4332_v34 = vpop.permute.xlu0 %4331 }
0x2274   :  { %9358 = vmatprep.subr.msk.mxu1 %vm3776_vm5, %v4332_v34 }
0x227b   :  { %v9999_v41 = vpop.eup %9998 }
0x227c   :  { %v4199_v42 = vmul.f32 %v9999_v41, %v9991_v35 }
0x227d   :  { %v10001_v40 = vpop.eup %10000 }
0x227e   :  { %v4197_v45 = vmul.f32 %v10001_v40, %v9993_v14 }
0x2280   :  { %9352 = vmatprep.mubr.msk.f32.mxu1 %vm1407_vm2, %v4197_v45 }
0x2281   :  { %9353 = vmatmul.mubr.msk.f32.vlgmr.msra.gmra.mxu1 %vm1407_vm2, %v4199_v42 }
0x2282   :  { %9359 = vmatpush3.xpose.msk.msra.mxu1 %vm3776_vm5, %v4332_v34 }
0x2283   :  { %9360 = vmatprep.subr.msk.mxu1 %vm3776_vm5, %v4330_v0 }
0x2286   :  { %9361 = vmatpush3.xpose.msk.msra.mxu1 %vm3776_vm5, %v4330_v0 }
0x22a2   :  { %v4195_v46 = vpop.xlane.xlu1 %4194 }
0x22a3   :  { %10002 = vrcp.f32 %v4195_v46 }
0x22a4   :  { %v4192_v37 = vpop.xlane.xlu0 %4191 }
0x22a5   :  { %10004 = vrcp.f32 %v4192_v37 }
0x22a6   :  { %v4326_v48 = vpop.permute.xlu1 %4325 }
0x22a8   :  { %v4328_v47 = vpop.permute.xlu0 %4327 }
0x22a9   :  { %9362 = vmatprep.subr.msk.mxu1 %vm3776_vm5, %v4328_v47 }
0x22aa   :  { %9363 = vmatpush3.xpose.msk.msra.mxu1 %vm3776_vm5, %v4328_v47  ;;  %v4320_v8 = vpop.permute.xlu1 %4319 }
0x22ab   :  { %9364 = vmatprep.subr.msk.mxu1 %vm3776_vm5, %v4326_v48 }
0x22ac   :  { %v4318_v53 = vpop.permute.xlu0 %4317 }
0x22ae   :  { %9365 = vmatpush3.xpose.msk.msra.mxu1 %vm3776_vm5, %v4326_v48  ;;  %v4324_v58 = vpop.permute.xlu1 %4323 }
0x22b0   :  { %v10003_v50 = vpop.eup %10002  ;;  %v4322_v56 = vpop.permute.xlu0 %4321 }
0x22b1   :  { %v4203_v54 = vmul.f32 %v10003_v50, %v9995_v29 }
0x22b2   :  { %v10005_v44 = vpop.eup %10004 }
0x22b3   :  { %v4201_v51 = vmul.f32 %v10005_v44, %v9997_v57 }
0x22b5   :  { %9355 = vmatprep.mubr.msk.f32.mxu1 %vm1407_vm2, %v4201_v51 }
0x22b6   :  { %9356 = vmatmul.mubr.msk.f32.gmra.mxu1 %vm1407_vm2, %v4203_v54 }
0x22b7   :  { %9366 = vmatprep.mubr.msk.f32.mxu1 %vm3776_vm5, %v4318_v53 }
0x22ba   :  { %9367 = vmatmul.mubr.msk.f32.vlgmr.msra.gmra.mxu1 %vm3776_vm5, %v4320_v8 }
0x22bb   :  { %9369 = vmatprep.mubr.msk.f32.mxu1 %vm3776_vm5, %v4322_v56 }
0x22be   :  { %9370 = vmatmul.mubr.msk.f32.gmra.mxu1 %vm3776_vm5, %v4324_v58 }
0x2341   :  { %v11343_v11 = vpop.f32.mrf.mxu1 }
0x2343   :  { %v11345_v60 = vpop.f32.mrf.mxu1 }
0x2376   :  { %v11347_v6 = vpop.f32.mrf.mxu1 }
0x2378   :  { %v11349_v3 = vpop.f32.mrf.mxu1 }
0x237a   :  { %v9368_v5 = vpop.f32.mrf.mxu1 }
0x237b   :  { %v4435_v7 = vmul.f32 0.35355338, %v9368_v5 }
0x237c   :  { %v4415_v9 = vpop.f32.mrf.mxu1 }
0x237d   :  { %v4439_v10 = vadd.f32 %v4435_v7, %v11228_v1  ;;  %v4434_v13 = vmul.f32 0.35355338, %v4415_v9 }
0x237e   :  { %v9371_v35 = vpop.f32.mrf.mxu1 }
0x237f   :  { %v4438_v38 = vadd.f32 %v4434_v13, %v11231_v27  ;;  %v4437_v14 = vmul.f32 0.35355338, %v9371_v35  ;;  %v4445_v15 = vsel %vm1407_vm2, %v4439_v10, -inf }
0x2380   :  { %4446 = vmax.xlane.f32.xlu1 %v4445_v15  ;;  %v4425_v16 = vpop.f32.mrf.mxu1 }
0x2381   :  { %v4441_v25 = vadd.f32 %v4437_v14, %v11235_v20  ;;  %v4436_v26 = vmul.f32 0.35355338, %v4425_v16  ;;  %v4442_v28 = vsel %vm1407_vm2, %v4438_v38, -inf }
0x2382   :  { %4443 = vmax.xlane.f32.xlu0 %v4442_v28 }
0x2383   :  { %v4440_v19 = vadd.f32 %v4436_v26, %v11240_v31  ;;  %v4451_v29 = vsel %vm1407_vm2, %v4441_v25, -inf }
0x2385   :  { %v4448_v57 = vsel %vm1407_vm2, %v4440_v19, -inf }
0x2386   :  { %4452 = vmax.xlane.f32.xlu0 %v4451_v29 }
0x238a   :  { %4449 = vmax.xlane.f32.xlu0 %v4448_v57 }
0x2391   :  { %4490 = vrot.lane.b32.xlu1 %v11195_v21, %s10267_s5 }
0x2395   :  { %4488 = vrot.lane.b32.xlu1 %v11201_v22, %s10267_s5 }
0x2399   :  { %4486 = vrot.lane.b32.xlu1 %v11207_v33, %s10267_s5 }
0x23a0   :  { %4492 = vrot.lane.b32.xlu0 %v11189_v18, %s10267_s5 }
0x2409   :  { %v4447_v61 = vpop.xlane.xlu1 %4446 }
0x240a   :  { %v4455_v62 = vsub.f32 %v4439_v10, %v4447_v61 }
0x240b   :  { %v4444_v30 = vpop.xlane.xlu0 %4443 }
0x240c   :  { %v4460_v49 = vmul.f32 1.442695, %v4455_v62  ;;  %v4454_v34 = vsub.f32 %v4438_v38, %v4444_v30 }
0x240d   :  { %v4491_v45 = vpop.permute.xlu1 %4490 }
0x240e   :  { %10006 = vpow2.f32 %v4460_v49  ;;  %v4458_v41 = vmul.f32 1.442695, %v4454_v34 }
0x240f   :  { %v4453_v40 = vpop.xlane.xlu0 %4452 }
0x2410   :  { %10008 = vpow2.f32 %v4458_v41  ;;  %v4457_v51 = vsub.f32 %v4441_v25, %v4453_v40 }
0x2411   :  { %v4489_v0 = vpop.permute.xlu1 %4488 }
0x2412   :  { %v4464_v54 = vmul.f32 1.442695, %v4457_v51 }
0x2413   :  { %v4450_v42 = vpop.xlane.xlu0 %4449 }
0x2414   :  { %v4456_v53 = vsub.f32 %v4440_v19, %v4450_v42  ;;  %10010 = vpow2.f32 %v4464_v54 }
0x2415   :  { %v4487_v50 = vpop.permute.xlu1 %4486 }
0x2416   :  { %v4462_v8 = vmul.f32 1.442695, %v4456_v53 }
0x2417   :  { %v4493_v46 = vpop.permute.xlu0 %4492 }
0x2418   :  { %9372 = vmatprep.subr.mxu0 %v4493_v46  ;;  %10012 = vpow2.f32 %v4462_v8 }
0x2419   :  { %9373 = vmatpush3.msra.mxu0 %v4493_v46 }
0x241a   :  { %9374 = vmatprep.subr.mxu0 %v4491_v45 }
0x241b   :  { %v10007_v37 = vpop.eup %10006  ;;  %9375 = vmatpush3.msra.mxu0 %v4491_v45 }
0x241c   :  { %9376 = vmatprep.subr.mxu0 %v4489_v0  ;;  %v4469_v47 = vsel %vm1407_vm2, %v10007_v37, 0.0 }
0x241d   :  { %v10009_v48 = vpop.eup %10008  ;;  %4470 = vadd.xlane.f32.xlu1 %v4469_v47  ;;  %9377 = vmatpush3.msra.mxu0 %v4489_v0 }
0x241e   :  { %9378 = vmatprep.subr.mxu0 %v4487_v50  ;;  %v4466_v44 = vsel %vm1407_vm2, %v10009_v48, 0.0 }
0x241f   :  { %4467 = vadd.xlane.f32.xlu0 %v4466_v44  ;;  %9379 = vmatpush3.msra.mxu0 %v4487_v50 }
0x2421   :  { %v10011_v56 = vpop.eup %10010 }
0x2422   :  { %v4475_v5 = vsel %vm1407_vm2, %v10011_v56, 0.0 }
0x2425   :  { %v10013_v58 = vpop.eup %10012 }
0x2426   :  { %v4472_v7 = vsel %vm1407_vm2, %v10013_v58, 0.0 }
0x242e   :  { %4607 = vrot.lane.b32.xlu1 %v11176_v4, %s10276_s16 }
0x2435   :  { %4609 = vrot.lane.b32.xlu0 %v11174_v12, %s10276_s16 }
0x2452   :  { %4476 = vadd.xlane.f32.xlu1 %v4475_v5 }
0x2454   :  { %4473 = vadd.xlane.f32.xlu0 %v4472_v7 }
0x2463   :  { %4603 = vrot.lane.b32.xlu1 %v11193_v17, %s10276_s16 }
0x2467   :  { %4597 = vrot.lane.b32.xlu1 %v11213_v39, %s10276_s16 }
0x246a   :  { %4605 = vrot.lane.b32.xlu0 %v11184_v36, %s10276_s16 }
0x246b   :  { %4601 = vrot.lane.b32.xlu1 %v11223_v24, %s10276_s16 }
0x246e   :  { %4595 = vrot.lane.b32.xlu0 %v11169_v2, %s10276_s16 }
0x2472   :  { %4599 = vrot.lane.b32.xlu0 %v11216_v23, %s10276_s16 }
0x24a6   :  { %v4471_v12 = vpop.xlane.xlu1 %4470 }
0x24a7   :  { %10014 = vrcp.f32 %v4471_v12 }
0x24a8   :  { %v4468_v4 = vpop.xlane.xlu0 %4467 }
0x24a9   :  { %10016 = vrcp.f32 %v4468_v4 }
0x24aa   :  { %v4608_v24 = vpop.permute.xlu1 %4607 }
0x24ac   :  { %v4610_v17 = vpop.permute.xlu0 %4609 }
0x24ad   :  { %9386 = vmatprep.subr.msk.mxu0 %vm3776_vm5, %v4610_v17 }
0x24b4   :  { %v10015_v39 = vpop.eup %10014 }
0x24b5   :  { %v4481_v36 = vmul.f32 %v10015_v39, %v10007_v37 }
0x24b6   :  { %v10017_v9 = vpop.eup %10016 }
0x24b7   :  { %v4479_v10 = vmul.f32 %v10017_v9, %v10009_v48 }
0x24b9   :  { %9380 = vmatprep.mubr.msk.f32.mxu0 %vm1407_vm2, %v4479_v10 }
0x24ba   :  { %9381 = vmatmul.mubr.msk.f32.vlgmr.msra.gmra.mxu0 %vm1407_vm2, %v4481_v36 }
0x24bb   :  { %9387 = vmatpush3.xpose.msk.msra.mxu0 %vm3776_vm5, %v4610_v17 }
0x24bc   :  { %9388 = vmatprep.subr.msk.mxu0 %vm3776_vm5, %v4608_v24 }
0x24bf   :  { %9389 = vmatpush3.xpose.msk.msra.mxu0 %vm3776_vm5, %v4608_v24 }
0x24db   :  { %v4477_v2 = vpop.xlane.xlu1 %4476 }
0x24dc   :  { %10018 = vrcp.f32 %v4477_v2 }
0x24dd   :  { %v4474_v23 = vpop.xlane.xlu0 %4473 }
0x24de   :  { %10020 = vrcp.f32 %v4474_v23 }
0x24df   :  { %v4604_v35 = vpop.permute.xlu1 %4603 }
0x24e1   :  { %v4606_v13 = vpop.permute.xlu0 %4605 }
0x24e2   :  { %9390 = vmatprep.subr.msk.mxu0 %vm3776_vm5, %v4606_v13 }
0x24e3   :  { %9391 = vmatpush3.xpose.msk.msra.mxu0 %vm3776_vm5, %v4606_v13  ;;  %v4598_v26 = vpop.permute.xlu1 %4597 }
0x24e4   :  { %9392 = vmatprep.subr.msk.mxu0 %vm3776_vm5, %v4604_v35 }
0x24e5   :  { %v4596_v16 = vpop.permute.xlu0 %4595 }
0x24e7   :  { %9393 = vmatpush3.xpose.msk.msra.mxu0 %vm3776_vm5, %v4604_v35  ;;  %v4602_v19 = vpop.permute.xlu1 %4601 }
0x24e9   :  { %v10019_v38 = vpop.eup %10018  ;;  %v4600_v28 = vpop.permute.xlu0 %4599 }
0x24ea   :  { %v4485_v25 = vmul.f32 %v10019_v38, %v10011_v56 }
0x24eb   :  { %v10021_v14 = vpop.eup %10020 }
0x24ec   :  { %v4483_v15 = vmul.f32 %v10021_v14, %v10013_v58 }
0x24ee   :  { %9383 = vmatprep.mubr.msk.f32.mxu0 %vm1407_vm2, %v4483_v15 }
0x24ef   :  { %9384 = vmatmul.mubr.msk.f32.gmra.mxu0 %vm1407_vm2, %v4485_v25 }
0x24f0   :  { %9394 = vmatprep.mubr.msk.f32.mxu0 %vm3776_vm5, %v4596_v16 }
0x24f3   :  { %9395 = vmatmul.mubr.msk.f32.vlgmr.msra.gmra.mxu0 %vm3776_vm5, %v4598_v26 }
0x24f4   :  { %9397 = vmatprep.mubr.msk.f32.mxu0 %vm3776_vm5, %v4600_v28  ;;  %v4937_v28 = vld [vmem:[%s12185_s18 + $0x18] sm:$0xff] }
0x24f7   :  { %9398 = vmatmul.mubr.msk.f32.gmra.mxu0 %vm3776_vm5, %v4602_v19  ;;  %v4936_v19 = vld [vmem:[%s12185_s18 + $0x10] sm:$0xff] }
0x257a   :  { %v9382_v29 = vpop.f32.mrf.mxu0 }
0x257c   :  { %v4576_v57 = vpop.f32.mrf.mxu0 }
0x25af   :  { %v9385_v61 = vpop.f32.mrf.mxu0 }
0x25b1   :  { %v4586_v62 = vpop.f32.mrf.mxu0 }
0x25b3   :  { %v9396_v30 = vpop.f32.mrf.mxu0 }
0x25b4   :  { %v4713_v49 = vmul.f32 0.35355338, %v9396_v30 }
0x25b5   :  { %v4693_v34 = vpop.f32.mrf.mxu0 }
0x25b6   :  { %v4717_v41 = vadd.f32 %v4713_v49, %v11228_v1  ;;  %v4712_v40 = vmul.f32 0.35355338, %v4693_v34 }
0x25b7   :  { %v9399_v45 = vpop.f32.mrf.mxu0 }
0x25b8   :  { %v4716_v42 = vadd.f32 %v4712_v40, %v11231_v27  ;;  %v4723_v0 = vsel %vm1407_vm2, %v4717_v41, -inf  ;;  %v4715_v37 = vmul.f32 0.35355338, %v9399_v45 }
0x25b9   :  { %4724 = vmax.xlane.f32.xlu1 %v4723_v0  ;;  %v4703_v46 = vpop.f32.mrf.mxu0 }
0x25ba   :  { %v4714_v47 = vmul.f32 0.35355338, %v4703_v46  ;;  %v4720_v48 = vsel %vm1407_vm2, %v4716_v42, -inf  ;;  %v4719_v44 = vadd.f32 %v4715_v37, %v11235_v20 }
0x25bb   :  { %4721 = vmax.xlane.f32.xlu0 %v4720_v48 }
0x25bc   :  { %v4718_v50 = vadd.f32 %v4714_v47, %v11240_v31  ;;  %v4729_v1 = vsel %vm1407_vm2, %v4719_v44, -inf }
0x25be   :  { %v4726_v51 = vsel %vm1407_vm2, %v4718_v50, -inf }
0x25bf   :  { %4727 = vmax.xlane.f32.xlu0 %v4726_v51 }
0x25c3   :  { %4730 = vmax.xlane.f32.xlu0 %v4729_v1 }
0x2642   :  { %v4725_v27 = vpop.xlane.xlu1 %4724 }
0x2643   :  { %v4733_v53 = vsub.f32 %v4717_v41, %v4725_v27 }
0x2644   :  { %v4722_v54 = vpop.xlane.xlu0 %4721 }
0x2645   :  { %v4738_v8 = vmul.f32 1.442695, %v4733_v53  ;;  %v4732_v56 = vsub.f32 %v4716_v42, %v4722_v54 }
0x2647   :  { %10022 = vpow2.f32 %v4738_v8  ;;  %v4736_v58 = vmul.f32 1.442695, %v4732_v56 }
0x2648   :  { %v4728_v5 = vpop.xlane.xlu0 %4727 }
0x2649   :  { %10024 = vpow2.f32 %v4736_v58  ;;  %v4734_v7 = vsub.f32 %v4718_v50, %v4728_v5 }
0x264b   :  { %v4740_v12 = vmul.f32 1.442695, %v4734_v7 }
0x264c   :  { %v4731_v31 = vpop.xlane.xlu0 %4730 }
0x264d   :  { %10026 = vpow2.f32 %v4740_v12  ;;  %v4735_v20 = vsub.f32 %v4719_v44, %v4731_v31  ;;  %v8229_v12 = vld [vmem:[%s12186_s23] ss:$0 sm:$0xff]  ;;  %v10138_v31 = vld [vmem:[%s12172_s9 + $0x8] sm:$0xff] }
0x264f   :  { %v4742_v4 = vmul.f32 1.442695, %v4735_v20 }
0x2651   :  { %10028 = vpow2.f32 %v4742_v4 }
0x2654   :  { %v10023_v17 = vpop.eup %10022 }
0x2655   :  { %v4747_v39 = vsel %vm1407_vm2, %v10023_v17, 0.0 }
0x2656   :  { %v10025_v9 = vpop.eup %10024  ;;  %4748 = vadd.xlane.f32.xlu1 %v4747_v39 }
0x2657   :  { %v4744_v10 = vsel %vm1407_vm2, %v10025_v9, 0.0 }
0x2658   :  { %4745 = vadd.xlane.f32.xlu0 %v4744_v10 }
0x265a   :  { %v10027_v36 = vpop.eup %10026 }
0x265b   :  { %v4750_v24 = vsel %vm1407_vm2, %v10027_v36, 0.0 }
0x265c   :  { %4751 = vadd.xlane.f32.xlu0 %v4750_v24 }
0x265e   :  { %v10029_v2 = vpop.eup %10028 }
0x265f   :  { %v4753_v23 = vsel %vm1407_vm2, %v10029_v2, 0.0 }
0x2660   :  { %4754 = vadd.xlane.f32.xlu1 %v4753_v23 }
0x2671   :  { %4768 = vrot.lane.b32.xlu1 %v11195_v21, %s10276_s16 }
0x2672   :  { %4770 = vrot.lane.b32.xlu0 %v11189_v18, %s10276_s16 }
0x2675   :  { %4766 = vrot.lane.b32.xlu1 %v11201_v22, %s10276_s16 }
0x2676   :  { %4877 = vrot.lane.b32.xlu0 %v11345_v60, %s10277_s15 }
0x2679   :  { %4764 = vrot.lane.b32.xlu1 %v11207_v33, %s10276_s16 }
0x267a   :  { %4893 = vrot.lane.b32.xlu0 %v4576_v57, %s10270_s22  ;;  %v4934_v57 = vld [vmem:[%s12185_s18] sm:$0xff] }
0x267d   :  { %4879 = vrot.lane.b32.xlu1 %v11343_v11, %s10277_s15 }
0x267e   :  { %4881 = vrot.lane.b32.xlu0 %v11349_v3, %s10277_s15 }
0x2681   :  { %4895 = vrot.lane.b32.xlu1 %v9382_v29, %s10270_s22  ;;  %v4935_v29 = vld [vmem:[%s12185_s18 + $0x8] sm:$0xff] }
0x2682   :  { %4897 = vrot.lane.b32.xlu0 %v4586_v62, %s10270_s22 }
0x2685   :  { %4883 = vrot.lane.b32.xlu1 %v11347_v6, %s10277_s15 }
0x2689   :  { %4899 = vrot.lane.b32.xlu1 %v9385_v61, %s10270_s22 }
0x26df   :  { %v4749_v21 = vpop.xlane.xlu1 %4748 }
0x26e1   :  { %v4746_v18 = vpop.xlane.xlu0 %4745 }
0x26e2   :  { %10030 = vrcp.f32 %v4746_v18  ;;  %v10141_v18 = vld [vmem:[%s12172_s9 + $0x10] sm:$0xff] }
0x26e3   :  { %10032 = vrcp.f32 %v4749_v21 }
0x26e5   :  { %v4752_v22 = vpop.xlane.xlu0 %4751 }
0x26e6   :  { %10034 = vrcp.f32 %v4752_v22 }
0x26e9   :  { %v4755_v33 = vpop.xlane.xlu1 %4754  ;;  %v4771_v11 = vpop.permute.xlu0 %4770 }
0x26ea   :  { %10036 = vrcp.f32 %v4755_v33  ;;  %9400 = vmatprep.subr.mxu1 %v4771_v11 }
0x26eb   :  { %9401 = vmatpush3.msra.mxu1 %v4771_v11 }
0x26ed   :  { %v4769_v60 = vpop.permute.xlu1 %4768  ;;  %v4878_v41 = vpop.permute.xlu0 %4877 }
0x26ee   :  { %9402 = vmatprep.subr.mxu1 %v4769_v60  ;;  %v4921_v48 = vsel %vm3776_vm5, %v11285_v32, %v4878_v41 }
0x26ef   :  { %v10031_v3 = vpop.eup %10030  ;;  %9403 = vmatpush3.msra.mxu1 %v4769_v60 }
0x26f0   :  { %v4757_v13 = vmul.f32 %v10031_v3, %v10025_v9  ;;  %v10033_v6 = vpop.eup %10032 }
0x26f1   :  { %v4767_v35 = vpop.permute.xlu1 %4766  ;;  %v4759_v15 = vmul.f32 %v10033_v6, %v10023_v17  ;;  %v4894_v45 = vpop.permute.xlu0 %4893 }
0x26f2   :  { %9404 = vmatprep.subr.mxu1 %v4767_v35  ;;  %9408 = vmatprep.mubr.msk.f32.mxu1 %vm1407_vm2, %v4757_v13  ;;  %v4925_v50 = vsel %vm572_vm1, %v4921_v48, %v4894_v45  ;;  %v5127_v45 = vld [vmem:[%s12187_s13 + $0x18] sm:$0xff]  ;;  %v5249_v48 = vld [vmem:[%s12188_s27 + $0x68] sm:$0xff] }
0x26f3   :  { %9405 = vmatpush3.msra.mxu1 %v4767_v35  ;;  %v10035_v38 = vpop.eup %10034  ;;  %9428 = vmatprep.subr.mxu0 %v5127_v45 }
0x26f4   :  { %v4761_v25 = vmul.f32 %v10035_v38, %v10027_v36  ;;  %9429 = vmatpush3.msra.mxu0 %v5127_v45 }
0x26f5   :  { %v4765_v14 = vpop.permute.xlu1 %4764  ;;  %v4882_v0 = vpop.permute.xlu0 %4881 }
0x26f6   :  { %9406 = vmatprep.subr.mxu1 %v4765_v14  ;;  %v4923_v32 = vsel %vm3776_vm5, %v11289_v52, %v4882_v0  ;;  %v5125_v0 = vld [vmem:[%s12187_s13 + $0x8] sm:$0xff] }
0x26f7   :  { %v10037_v16 = vpop.eup %10036  ;;  %9407 = vmatpush3.msra.mxu1 %v4765_v14 }
0x26f8   :  { %9409 = vmatmul.mubr.msk.f32.vlgmr.msra.gmra.mxu1 %vm1407_vm2, %v4759_v15  ;;  %v4763_v26 = vmul.f32 %v10037_v16, %v10029_v2  ;;  %9414 = vmatprep.subr.mxu1 %v4937_v28  ;;  %v10140_v2 = vld [vmem:[%s12172_s9 + $0x18] sm:$0xff] }
0x26f9   :  { %9411 = vmatprep.mubr.msk.f32.mxu1 %vm1407_vm2, %v4761_v25  ;;  %9415 = vmatpush3.msra.mxu1 %v4937_v28  ;;  %v4880_v34 = vpop.permute.xlu1 %4879  ;;  %v4898_v37 = vpop.permute.xlu0 %4897 }
0x26fa   :  { %9416 = vmatprep.subr.mxu1 %v4936_v19  ;;  %v4922_v44 = vsel %vm3776_vm5, %v11283_v63, %v4880_v34  ;;  %v4927_v63 = vsel %vm572_vm1, %v4923_v32, %v4898_v37  ;;  %v5251_v37 = vld [vmem:[%s12188_s27 + $0x78] sm:$0xff]  ;;  %v5242_v32 = vld [vmem:[%s12188_s27 + $0x30] sm:$0xff] }
0x26fb   :  { %9417 = vmatpush3.msra.mxu1 %v4936_v19 }
0x26fc   :  { %9412 = vmatmul.mubr.msk.f32.gmra.mxu1 %vm1407_vm2, %v4763_v26  ;;  %9418 = vmatprep.subr.mxu1 %v4935_v29 }
0x26fd   :  { %9419 = vmatpush3.msra.mxu1 %v4935_v29  ;;  %v4896_v40 = vpop.permute.xlu1 %4895 }
0x26fe   :  { %9420 = vmatprep.subr.mxu1 %v4934_v57  ;;  %v4926_v1 = vsel %vm572_vm1, %v4922_v44, %v4896_v40  ;;  %v5247_v44 = vld [vmem:[%s12188_s27 + $0x58] sm:$0xff] }
0x26ff   :  { %9421 = vmatpush3.msra.mxu1 %v4934_v57 }
0x2700   :  { %9442 = vmatprep.subr.mxu1 %v5251_v37 }
0x2701   :  { %v4884_v42 = vpop.permute.xlu1 %4883 }
0x2702   :  { %v4924_v8 = vsel %vm3776_vm5, %v11287_v43, %v4884_v42  ;;  %v10139_v43 = vld [vmem:[%s12172_s9] sm:$0xff]  ;;  %v5126_v42 = vld [vmem:[%s12187_s13 + $0x10] sm:$0xff]  ;;  %s12197_s9 = sld [smem:[#allocation42_spill]] }
0x2703   :  { %9430 = vmatprep.subr.mxu0 %v5126_v42 }
0x2704   :  { %9431 = vmatpush3.msra.mxu0 %v5126_v42 }
0x2705   :  { %v4900_v46 = vpop.permute.xlu1 %4899  ;;  %9432 = vmatprep.subr.mxu0 %v5125_v0 }
0x2706   :  { %v4928_v58 = vsel %vm572_vm1, %v4924_v8, %v4900_v46  ;;  %v5124_v46 = vld [vmem:[%s12187_s13] sm:$0xff]  ;;  %9433 = vmatpush3.msra.mxu0 %v5125_v0 }
0x2707   :  { %9434 = vmatprep.subr.mxu0 %v5124_v46 }
0x2708   :  { %9435 = vmatpush3.msra.mxu0 %v5124_v46 }
0x27b8   :  { %v9410_v61 = vpop.f32.mrf.mxu1 }
0x27b9   :  { %4911 = vrot.lane.b32.xlu1 %v9410_v61, %s10278_s0 }
0x27ba   :  { %v4854_v62 = vpop.f32.mrf.mxu1 }
0x27bb   :  { %4909 = vrot.lane.b32.xlu0 %v4854_v62, %s10278_s0 }
0x27bc   :  { %v9413_v30 = vpop.f32.mrf.mxu1 }
0x27bd   :  { %4915 = vrot.lane.b32.xlu1 %v9413_v30, %s10278_s0 }
0x27be   :  { %v4864_v49 = vpop.f32.mrf.mxu1 }
0x27bf   :  { %4913 = vrot.lane.b32.xlu0 %v4864_v49, %s10278_s0 }
0x282b   :  { %v4912_v47 = vpop.permute.xlu1 %4911 }
0x282c   :  { %v4931_v53 = vsel %vm4929_vm6, %v4926_v1, %v4912_v47  ;;  %v5250_v47 = vld [vmem:[%s12188_s27 + $0x70] sm:$0xff]  ;;  %v5245_v1 = vld [vmem:[%s12188_s27 + $0x48] sm:$0xff] }
0x282d   :  { %v4910_v51 = vpop.permute.xlu0 %4909 }
0x282e   :  { %v4930_v27 = vsel %vm4929_vm6, %v4925_v50, %v4910_v51  ;;  %v5248_v50 = vld [vmem:[%s12188_s27 + $0x60] sm:$0xff]  ;;  %v5246_v51 = vld [vmem:[%s12188_s27 + $0x50] sm:$0xff] }
0x282f   :  { %9422 = vmatprep.mubr.msk.f32.mxu1 %vm1407_vm2, %v4930_v27  ;;  %v4916_v54 = vpop.permute.xlu1 %4915  ;;  %v5244_v27 = vld [vmem:[%s12188_s27 + $0x40] sm:$0xff] }
0x2830   :  { %9423 = vmatmul.mubr.msk.f32.vlgmr.msra.gmra.mxu1 %vm1407_vm2, %v4931_v53  ;;  %v4933_v7 = vsel %vm4929_vm6, %v4928_v58, %v4916_v54  ;;  %v5243_v53 = vld [vmem:[%s12188_s27 + $0x38] sm:$0xff]  ;;  %v5241_v54 = vld [vmem:[%s12188_s27 + $0x28] sm:$0xff] }
0x2831   :  { %v4914_v56 = vpop.permute.xlu0 %4913  ;;  %9443 = vmatpush3.msra.mxu1 %v5251_v37 }
0x2832   :  { %v4932_v5 = vsel %vm4929_vm6, %v4927_v63, %v4914_v56  ;;  %9444 = vmatprep.subr.mxu1 %v5250_v47  ;;  %v5240_v63 = vld [vmem:[%s12188_s27 + $0x20] sm:$0xff] }
0x2833   :  { %9425 = vmatprep.mubr.msk.f32.mxu1 %vm1407_vm2, %v4932_v5  ;;  %9445 = vmatpush3.msra.mxu1 %v5250_v47 }
0x2834   :  { %9426 = vmatmul.mubr.msk.f32.gmra.mxu1 %vm1407_vm2, %v4933_v7  ;;  %9446 = vmatprep.subr.mxu1 %v5249_v48 }
0x2835   :  { %9447 = vmatpush3.msra.mxu1 %v5249_v48  ;;  %v8237_v48 = vld [vmem:[%s12192_s2] ss:$0 sm:$0xff] }
0x2836   :  { %9448 = vmatprep.subr.mxu1 %v5248_v50 }
0x2837   :  { %9449 = vmatpush3.msra.mxu1 %v5248_v50 }
0x2838   :  { %9450 = vmatprep.subr.mxu1 %v5247_v44 }
0x2839   :  { %9451 = vmatpush3.msra.mxu1 %v5247_v44 }
0x283a   :  { %9452 = vmatprep.subr.mxu1 %v5246_v51 }
0x283b   :  { %9453 = vmatpush3.msra.mxu1 %v5246_v51 }
0x283c   :  { %9454 = vmatprep.subr.mxu1 %v5245_v1 }
0x283d   :  { %9455 = vmatpush3.msra.mxu1 %v5245_v1 }
0x283e   :  { %9456 = vmatprep.subr.mxu1 %v5244_v27 }
0x283f   :  { %9457 = vmatpush3.msra.mxu1 %v5244_v27 }
0x2840   :  { %9458 = vmatprep.subr.mxu1 %v5243_v53 }
0x2841   :  { %9459 = vmatpush3.msra.mxu1 %v5243_v53 }
0x2842   :  { %9460 = vmatprep.subr.mxu1 %v5242_v32 }
0x2843   :  { %9461 = vmatpush3.msra.mxu1 %v5242_v32 }
0x2844   :  { %9462 = vmatprep.subr.mxu1 %v5241_v54 }
0x2845   :  { %9463 = vmatpush3.msra.mxu1 %v5241_v54 }
0x2846   :  { %9464 = vmatprep.subr.mxu1 %v5240_v63 }
0x2847   :  { %9465 = vmatpush3.msra.mxu1 %v5240_v63 }
0x28f0   :  { %v9424_v52 = vpop.f32.mrf.mxu1 }
0x28f1   :  { %v5036_v20 = vadd.f32 %v10138_v31, %v9424_v52 }
0x28f2   :  { %v5016_v4 = vpop.f32.mrf.mxu1 }
0x28f3   :  { %v11469_v17 = vadd.f32 %v8229_v12, %v5036_v20  ;;  %v5035_v39 = vadd.f32 %v10139_v43, %v5016_v4 }
0x28f4   :  { %v9427_v9 = vpop.f32.mrf.mxu1 }
0x28f5   :  { %v11472_v10 = vadd.f32 %v8229_v12, %v5035_v39  ;;  %v5055_v36 = vsel %vm1407_vm2, %v11469_v17, 0.0  ;;  %v5038_v23 = vadd.f32 %v10140_v2, %v9427_v9 }
0x28f6   :  { %5056 = vadd.xlane.f32.xlu1 %v5055_v36  ;;  %v5026_v24 = vpop.f32.mrf.mxu1 }
0x28f7   :  { %v5037_v21 = vadd.f32 %v10141_v18, %v5026_v24  ;;  %v5052_v22 = vsel %vm1407_vm2, %v11472_v10, 0.0  ;;  %v11482_v11 = vadd.f32 %v8229_v12, %v5038_v23  ;;  %v8230_v24 = vld [vmem:[%s12189_s26] ss:$0 sm:$0xff] }
0x28f8   :  { %5053 = vadd.xlane.f32.xlu0 %v5052_v22 }
0x28f9   :  { %v11480_v33 = vadd.f32 %v8229_v12, %v5037_v21  ;;  %v5061_v3 = vsel %vm1407_vm2, %v11482_v11, 0.0  ;;  %v8231_v21 = vld [vmem:[%s12190_s1] ss:$0 sm:$0xff] }
0x28fb   :  { %v5058_v60 = vsel %vm1407_vm2, %v11480_v33, 0.0 }
0x28fc   :  { %5059 = vadd.xlane.f32.xlu0 %v5058_v60 }
0x2900   :  { %5062 = vadd.xlane.f32.xlu0 %v5061_v3 }
0x297f   :  { %v5057_v13 = vpop.xlane.xlu1 %5056 }
0x2980   :  { %v5065_v35 = vmul.f32 0.03125, %v5057_v13 }
0x2981   :  { %v5054_v6 = vpop.xlane.xlu0 %5053 }
0x2982   :  { %v11489_v38 = vsub.f32 %v11469_v17, %v5065_v35  ;;  %v5064_v14 = vmul.f32 0.03125, %v5054_v6 }
0x2984   :  { %v11492_v15 = vsub.f32 %v11472_v10, %v5064_v14  ;;  %v5073_v16 = vmul.f32 %v11489_v38, %v11489_v38 }
0x2985   :  { %v5060_v25 = vpop.xlane.xlu0 %5059 }
0x2986   :  { %v5066_v26 = vmul.f32 0.03125, %v5060_v25  ;;  %v5079_v28 = vsel %vm1407_vm2, %v5073_v16, 0.0  ;;  %v5072_v19 = vmul.f32 %v11492_v15, %v11492_v15 }
0x2987   :  { %5080 = vadd.xlane.f32.xlu1 %v5079_v28  ;;  %v5238_v28 = vld [vmem:[%s12188_s27 + $0x10] sm:$0xff] }
0x2988   :  { %v11500_v29 = vsub.f32 %v11480_v33, %v5066_v26  ;;  %v5076_v57 = vsel %vm1407_vm2, %v5072_v19, 0.0  ;;  %v5239_v26 = vld [vmem:[%s12188_s27 + $0x18] sm:$0xff]  ;;  %v5237_v19 = vld [vmem:[%s12188_s27 + $0x8] sm:$0xff] }
0x2989   :  { %5077 = vadd.xlane.f32.xlu0 %v5076_v57  ;;  %v5063_v61 = vpop.xlane.xlu0 %5062  ;;  %9466 = vmatprep.subr.mxu1 %v5239_v26  ;;  %v8232_v57 = vld [vmem:[%s12191_s28] ss:$0 sm:$0xff] }
0x298a   :  { %v5067_v62 = vmul.f32 0.03125, %v5063_v61  ;;  %v5074_v30 = vmul.f32 %v11500_v29, %v11500_v29  ;;  %9467 = vmatpush3.msra.mxu1 %v5239_v26 }
0x298b   :  { %9468 = vmatprep.subr.mxu1 %v5238_v28 }
0x298c   :  { %v11506_v49 = vsub.f32 %v11482_v11, %v5067_v62  ;;  %v5082_v34 = vsel %vm1407_vm2, %v5074_v30, 0.0  ;;  %9469 = vmatpush3.msra.mxu1 %v5238_v28 }
0x298d   :  { %5083 = vadd.xlane.f32.xlu0 %v5082_v34  ;;  %9470 = vmatprep.subr.mxu1 %v5237_v19 }
0x298e   :  { %v5075_v41 = vmul.f32 %v11506_v49, %v11506_v49  ;;  %9471 = vmatpush3.msra.mxu1 %v5237_v19 }
0x2990   :  { %v5085_v40 = vsel %vm1407_vm2, %v5075_v41, 0.0 }
0x2991   :  { %5086 = vadd.xlane.f32.xlu1 %v5085_v40 }
0x2a10   :  { %v5081_v8 = vpop.xlane.xlu1 %5080 }
0x2a11   :  { %v5089_v56 = vmul.f32 0.03125, %v5081_v8 }
0x2a12   :  { %v5078_v58 = vpop.xlane.xlu0 %5077 }
0x2a13   :  { %v5093_v5 = vadd.f32 1e-05, %v5089_v56  ;;  %v5088_v7 = vmul.f32 0.03125, %v5078_v58 }
0x2a15   :  { %10038 = vrsqrt.f32 %v5093_v5  ;;  %v5092_v52 = vadd.f32 1e-05, %v5088_v7 }
0x2a16   :  { %v5084_v12 = vpop.xlane.xlu0 %5083 }
0x2a17   :  { %10040 = vrsqrt.f32 %v5092_v52  ;;  %v5090_v31 = vmul.f32 0.03125, %v5084_v12 }
0x2a19   :  { %v5094_v20 = vadd.f32 1e-05, %v5090_v31 }
0x2a1a   :  { %v5087_v4 = vpop.xlane.xlu1 %5086 }
0x2a1b   :  { %10042 = vrsqrt.f32 %v5094_v20  ;;  %v5091_v43 = vmul.f32 0.03125, %v5087_v4 }
0x2a1d   :  { %v5095_v39 = vadd.f32 1e-05, %v5091_v43 }
0x2a1f   :  { %10044 = vrsqrt.f32 %v5095_v39 }
0x2a22   :  { %v10039_v9 = vpop.eup %10038 }
0x2a23   :  { %v5101_v36 = vmul.f32 %v10039_v9, %v11489_v38 }
0x2a24   :  { %v10041_v2 = vpop.eup %10040 }
0x2a25   :  { %v5100_v23 = vmul.f32 %v10041_v2, %v11492_v15  ;;  %v5111_v18 = vmul.f32 %v8230_v24, %v5101_v36 }
0x2a27   :  { %v5110_v22 = vmul.f32 %v8230_v24, %v5100_v23  ;;  %v5121_v35 = vadd.f32 %v8231_v21, %v5111_v18 }
0x2a28   :  { %v10043_v60 = vpop.eup %10042 }
0x2a29   :  { %v5120_v3 = vadd.f32 %v8231_v21, %v5110_v22  ;;  %v5102_v13 = vmul.f32 %v10043_v60, %v11500_v29  ;;  %v5236_v29 = vld [vmem:[%s12188_s27] sm:$0xff] }
0x2a2a   :  { %9472 = vmatprep.subr.mxu1 %v5236_v29 }
0x2a2b   :  { %9436 = vmatprep.mubr.msk.f32.mxu0 %vm1407_vm2, %v5120_v3  ;;  %v5112_v6 = vmul.f32 %v8230_v24, %v5102_v13  ;;  %9473 = vmatpush3.msra.mxu1 %v5236_v29  ;;  %v8245_v13 = vld [vmem:[%s12178_s8 + $0x38] sm:$0xff] }
0x2a2c   :  { %v10045_v14 = vpop.eup %10044  ;;  %9437 = vmatmul.mubr.msk.f32.vlgmr.msra.gmra.mxu0 %vm1407_vm2, %v5121_v35  ;;  %v8244_v35 = vld [vmem:[%s12178_s8 + $0x30] sm:$0xff]  ;;  %9480 = vmatprep.subr.mxu0 %v8245_v13 }
0x2a2d   :  { %v5122_v38 = vadd.f32 %v8231_v21, %v5112_v6  ;;  %v5103_v15 = vmul.f32 %v10045_v14, %v11506_v49  ;;  %9481 = vmatpush3.msra.mxu0 %v8245_v13  ;;  %v8243_v6 = vld [vmem:[%s12178_s8 + $0x28] sm:$0xff]  ;;  %v8242_v14 = vld [vmem:[%s12178_s8 + $0x20] sm:$0xff]  ;;  %s12203_s8 = sld [smem:[#allocation45_spill]] }
0x2a2e   :  { %9482 = vmatprep.subr.mxu0 %v8244_v35  ;;  %v8267_v13 = vld [vmem:[%s12183_s20 + $0x1] ss:$0 sm:$0xff] }
0x2a2f   :  { %9439 = vmatprep.mubr.msk.f32.mxu0 %vm1407_vm2, %v5122_v38  ;;  %v5113_v16 = vmul.f32 %v8230_v24, %v5103_v15  ;;  %9483 = vmatpush3.msra.mxu0 %v8244_v35  ;;  %v8255_v38 = vld [vmem:[%s12179_s14 + $0x38] sm:$0xff] }
0x2a30   :  { %9484 = vmatprep.subr.mxu0 %v8243_v6 }
0x2a31   :  { %v5123_v25 = vadd.f32 %v8231_v21, %v5113_v16  ;;  %9485 = vmatpush3.msra.mxu0 %v8243_v6 }
0x2a32   :  { %9486 = vmatprep.subr.mxu0 %v8242_v14 }
0x2a33   :  { %9440 = vmatmul.mubr.msk.f32.gmra.mxu0 %vm1407_vm2, %v5123_v25 }
0x2a34   :  { %9487 = vmatpush3.msra.mxu0 %v8242_v14 }
0x2a35   :  { %9494 = vmatprep.subr.mxu0 %v8255_v38 }
0x2aec   :  { %v9438_v61 = vpop.f32.mrf.mxu0 }
0x2aed   :  { %v5219_v62 = vadd.f32 %v9438_v61, %v8232_v57 }
0x2aee   :  { %v5213_v30 = vpop.f32.mrf.mxu0 }
0x2aef   :  { %v5214_v49 = vadd.f32 %v8232_v57, %v5213_v30  ;;  %v5233_v41 = vmax.f32 %v5219_v62, 0.0 }
0x2af1   :  { %v5232_v34 = vmax.f32 %v5214_v49, 0.0 }
0x2af3   :  { %v9441_v40 = vpop.f32.mrf.mxu0  ;;  %9474 = vmatprep.mubr.f32.mxu1 %v5232_v34 }
0x2af4   :  { %9475 = vmatmul.mubr.f32.vlgmr.msra.gmra.mxu1 %v5233_v41  ;;  %v5229_v45 = vadd.f32 %v9441_v40, %v8232_v57  ;;  %v8240_v40 = vld [vmem:[%s12175_s25 + $0x1] ss:$0 sm:$0xff]  ;;  %s12200_s25 = sld [smem:[#allocation43_spill]] }
0x2af5   :  { %v5223_v42 = vpop.f32.mrf.mxu0 }
0x2af6   :  { %v5224_v0 = vadd.f32 %v8232_v57, %v5223_v42  ;;  %v5235_v37 = vmax.f32 %v5229_v45, 0.0 }
0x2af8   :  { %v5234_v46 = vmax.f32 %v5224_v0, 0.0 }
0x2afa   :  { %9477 = vmatprep.mubr.f32.mxu1 %v5234_v46  ;;  %v8241_v46 = vld [vmem:[%s12176_s29 + $0x1] ss:$0 sm:$0xff]  ;;  %s12201_s29 = sld [smem:[#allocation46_spill]] }
0x2afb   :  { %9478 = vmatmul.mubr.f32.gmra.mxu1 %v5235_v37 }
0x2bb4   :  { %v9476_v47 = vpop.f32.mrf.mxu1 }
0x2bb5   :  { %v5338_v50 = vadd.f32 %v9476_v47, %v11469_v17 }
0x2bb6   :  { %v5318_v44 = vpop.f32.mrf.mxu1 }
0x2bb7   :  { %v11545_v51 = vadd.f32 %v8237_v48, %v5338_v50  ;;  %v5337_v1 = vadd.f32 %v5318_v44, %v11472_v10 }
0x2bb9   :  { %v11548_v27 = vadd.f32 %v8237_v48, %v5337_v1  ;;  %v5359_v53 = vsel %vm1407_vm2, %v11545_v51, 0.0 }
0x2bba   :  { %5360 = vadd.xlane.f32.xlu1 %v5359_v53  ;;  %v8254_v53 = vld [vmem:[%s12179_s14 + $0x30] sm:$0xff] }
0x2bbb   :  { %v9479_v32 = vpop.f32.mrf.mxu1  ;;  %v5356_v54 = vsel %vm1407_vm2, %v11548_v27, 0.0 }
0x2bbc   :  { %v5340_v63 = vadd.f32 %v9479_v32, %v11482_v11  ;;  %5357 = vadd.xlane.f32.xlu0 %v5356_v54 }
0x2bbd   :  { %v5328_v8 = vpop.f32.mrf.mxu1 }
0x2bbe   :  { %v11555_v17 = vadd.f32 %v8237_v48, %v5340_v63  ;;  %v5339_v56 = vadd.f32 %v5328_v8, %v11480_v33  ;;  %v8253_v63 = vld [vmem:[%s12179_s14 + $0x28] sm:$0xff] }
0x2bc0   :  { %v11558_v58 = vadd.f32 %v8237_v48, %v5339_v56  ;;  %v5365_v10 = vsel %vm1407_vm2, %v11555_v17, 0.0  ;;  %v8252_v56 = vld [vmem:[%s12179_s14 + $0x20] sm:$0xff]  ;;  %s10279_s14 = smov [#allocation7]  }
0x2bc1   :  { %5366 = vadd.xlane.f32.xlu1 %v5365_v10 }
0x2bc2   :  { %v5362_v5 = vsel %vm1407_vm2, %v11558_v58, 0.0 }
0x2bc3   :  { %5363 = vadd.xlane.f32.xlu0 %v5362_v5 }
0x2c43   :  { %v5361_v7 = vpop.xlane.xlu1 %5360 }
0x2c44   :  { %v5369_v52 = vmul.f32 0.03125, %v5361_v7  ;;  %v8265_v7 = vld [vmem:[%s12180_s19 + $0x38] sm:$0xff] }
0x2c45   :  { %v5358_v12 = vpop.xlane.xlu0 %5357 }
0x2c46   :  { %v5373_v11 = vsub.f32 %v11545_v51, %v5369_v52  ;;  %v5368_v31 = vmul.f32 0.03125, %v5358_v12  ;;  %v8264_v52 = vld [vmem:[%s12180_s19 + $0x30] sm:$0xff]  ;;  %v8263_v12 = vld [vmem:[%s12180_s19 + $0x28] sm:$0xff] }
0x2c48   :  { %v5372_v20 = vsub.f32 %v11548_v27, %v5368_v31  ;;  %v5377_v4 = vmul.f32 %v5373_v11, %v5373_v11 }
0x2c4a   :  { %v5367_v33 = vpop.xlane.xlu1 %5366  ;;  %v5383_v43 = vsel %vm1407_vm2, %v5377_v4, 0.0  ;;  %v5376_v39 = vmul.f32 %v5372_v20, %v5372_v20 }
0x2c4b   :  { %v5371_v9 = vmul.f32 0.03125, %v5367_v33  ;;  %5384 = vadd.xlane.f32.xlu1 %v5383_v43 }
0x2c4c   :  { %v5364_v36 = vpop.xlane.xlu0 %5363  ;;  %v5380_v24 = vsel %vm1407_vm2, %v5376_v39, 0.0 }
0x2c4d   :  { %v5375_v2 = vsub.f32 %v11555_v17, %v5371_v9  ;;  %v5370_v23 = vmul.f32 0.03125, %v5364_v36  ;;  %5381 = vadd.xlane.f32.xlu0 %v5380_v24  ;;  %v8257_v24 = vld [vmem:[%s12182_s30 + $0x1] ss:$0 sm:$0xff] }
0x2c4f   :  { %v5374_v18 = vsub.f32 %v11558_v58, %v5370_v23  ;;  %v5379_v21 = vmul.f32 %v5375_v2, %v5375_v2 }
0x2c51   :  { %v5389_v22 = vsel %vm1407_vm2, %v5379_v21, 0.0  ;;  %v5378_v60 = vmul.f32 %v5374_v18, %v5374_v18 }
0x2c52   :  { %5390 = vadd.xlane.f32.xlu1 %v5389_v22 }
0x2c53   :  { %v5386_v3 = vsel %vm1407_vm2, %v5378_v60, 0.0 }
0x2c54   :  { %5387 = vadd.xlane.f32.xlu0 %v5386_v3 }
0x2cd4   :  { %v5385_v15 = vpop.xlane.xlu1 %5384 }
0x2cd5   :  { %v5393_v16 = vmul.f32 0.03125, %v5385_v15 }
0x2cd6   :  { %v5382_v25 = vpop.xlane.xlu0 %5381 }
0x2cd7   :  { %v5397_v26 = vadd.f32 1e-05, %v5393_v16  ;;  %v5392_v28 = vmul.f32 0.03125, %v5382_v25 }
0x2cd9   :  { %10046 = vrsqrt.f32 %v5397_v26  ;;  %v5396_v19 = vadd.f32 1e-05, %v5392_v28 }
0x2cdb   :  { %10048 = vrsqrt.f32 %v5396_v19  ;;  %v5391_v29 = vpop.xlane.xlu1 %5390 }
0x2cdc   :  { %v5395_v57 = vmul.f32 0.03125, %v5391_v29 }
0x2cdd   :  { %v5388_v61 = vpop.xlane.xlu0 %5387 }
0x2cde   :  { %v5399_v62 = vadd.f32 1e-05, %v5395_v57  ;;  %v5394_v30 = vmul.f32 0.03125, %v5388_v61 }
0x2ce0   :  { %10050 = vrsqrt.f32 %v5399_v62  ;;  %v5398_v49 = vadd.f32 1e-05, %v5394_v30  ;;  %v11658_v62 = vld [vmem:[%s12184_s4 + $0x8] sm:$0xff] }
0x2ce2   :  { %10052 = vrsqrt.f32 %v5398_v49 }
0x2ce6   :  { %v10047_v34 = vpop.eup %10046 }
0x2ce7   :  { %v5405_v41 = vmul.f32 %v10047_v34, %v5373_v11  ;;  %v8262_v11 = vld [vmem:[%s12180_s19 + $0x20] sm:$0xff]  ;;  %s7940_s19 = sshll.u32 %s10279_s14, 4  ;;  %s7941_s19 = int_to_ptr.vmem [resolvable:$true] %s7940_s19 }
0x2ce8   :  { %v10049_v45 = vpop.eup %10048  ;;  %p10191_p11 = scmp.lt.s32.totalorder %s7941_s19, %s7941_s19 }
0x2ce9   :  { %v5404_v42 = vmul.f32 %v10049_v45, %v5372_v20  ;;  %v5415_v0 = vmul.f32 %v8240_v40, %v5405_v41  ;;  %v8247_v20 = vld [vmem:[%s12181_s24 + $0x1] ss:$0 sm:$0xff]  ;;  %s10186_s24 = scalar_lea.vmem %s7941_s19, 32 }
0x2cea   :  { %v11662_v41 = vld [vmem:[%s12184_s4] sm:$0xff]  ;;  %p10187_p10 = scmp.ne.s32.totalorder %s7941_s19, %s10186_s24  ;;  %p10192_p12 = scmp.lt.s32.totalorder %s10186_s24, %s10186_s24 }
0x2ceb   :  { %v5414_v37 = vmul.f32 %v8240_v40, %v5404_v42  ;;  %v5425_v50 = vadd.f32 %v8241_v46, %v5415_v0 }
0x2cec   :  { %p10193_p13 = por %p10192_p12, %p10191_p11 }
0x2ced   :  { %v10051_v47 = vpop.eup %10050  ;;  %v5424_v48 = vadd.f32 %v8241_v46, %v5414_v37 }
0x2cee   :  { %v5407_v44 = vmul.f32 %v10051_v47, %v5375_v2  ;;  %p10194_p0 = pnand %p10193_p13, %p10187_p10 }
0x2cef   :  { %v10053_v1 = vpop.eup %10052  ;;  %9488 = vmatprep.mubr.msk.f32.mxu0 %vm1407_vm2, %v5424_v48 }
0x2cf0   :  { %9489 = vmatmul.mubr.msk.f32.vlgmr.msra.gmra.mxu0 %vm1407_vm2, %v5425_v50  ;;  %v5406_v32 = vmul.f32 %v10053_v1, %v5374_v18  ;;  %v5417_v54 = vmul.f32 %v8240_v40, %v5407_v44 }
0x2cf1   :  { %9495 = vmatpush3.msra.mxu0 %v8255_v38 }
0x2cf2   :  { %9496 = vmatprep.subr.mxu0 %v8254_v53  ;;  %v5416_v8 = vmul.f32 %v8240_v40, %v5406_v32  ;;  %v5427_v5 = vadd.f32 %v8241_v46, %v5417_v54 }
0x2cf3   :  { %9497 = vmatpush3.msra.mxu0 %v8254_v53 }
0x2cf4   :  { %v5426_v10 = vadd.f32 %v8241_v46, %v5416_v8  ;;  %9498 = vmatprep.subr.mxu0 %v8253_v63  ;;  %v11667_v46 = vld [vmem:[%s12184_s4 + $0x18] sm:$0xff] }
0x2cf5   :  { %9499 = vmatpush3.msra.mxu0 %v8253_v63 }
0x2cf6   :  { %9491 = vmatprep.mubr.msk.f32.mxu0 %vm1407_vm2, %v5426_v10  ;;  %9500 = vmatprep.subr.mxu0 %v8252_v56 }
0x2cf7   :  { %9492 = vmatmul.mubr.msk.f32.gmra.mxu0 %vm1407_vm2, %v5427_v5 }
0x2cf8   :  { %9502 = vmatprep.mubr.msk.f32.mxu0 %vm1407_vm2, %v5424_v48  ;;  %9501 = vmatpush3.msra.mxu0 %v8252_v56 }
0x2cf9   :  { %9508 = vmatprep.subr.mxu0 %v8265_v7 }
0x2cfb   :  { %9503 = vmatmul.mubr.msk.f32.vlgmr.msra.gmra.mxu0 %vm1407_vm2, %v5425_v50 }
0x2cfc   :  { %9505 = vmatprep.mubr.msk.f32.mxu0 %vm1407_vm2, %v5426_v10  ;;  %9509 = vmatpush3.msra.mxu0 %v8265_v7 }
0x2cfd   :  { %9510 = vmatprep.subr.mxu0 %v8264_v52 }
0x2cfe   :  { %9511 = vmatpush3.msra.mxu0 %v8264_v52 }
0x2cff   :  { %9506 = vmatmul.mubr.msk.f32.gmra.mxu0 %vm1407_vm2, %v5427_v5  ;;  %9512 = vmatprep.subr.mxu0 %v8263_v12 }
0x2d00   :  { %9513 = vmatpush3.msra.mxu0 %v8263_v12  ;;  %9516 = vmatprep.mubr.msk.f32.mxu0 %vm1407_vm2, %v5424_v48 }
0x2d01   :  { %9514 = vmatprep.subr.mxu0 %v8262_v11 }
0x2d02   :  { %9515 = vmatpush3.msra.mxu0 %v8262_v11 }
0x2d03   :  { %9517 = vmatmul.mubr.msk.f32.vlgmr.msra.gmra.mxu0 %vm1407_vm2, %v5425_v50  ;;  %v11672_v50 = vld [vmem:[%s12184_s4 + $0x10] sm:$0xff] }
0x2d04   :  { %9519 = vmatprep.mubr.msk.f32.mxu0 %vm1407_vm2, %v5426_v10 }
0x2d07   :  { %9520 = vmatmul.mubr.msk.f32.gmra.mxu0 %vm1407_vm2, %v5427_v5 }
0x2db0   :  { %v9490_v31 = vpop.f32.mrf.mxu0 }
0x2db1   :  { %v11643_v26 = vadd.f32 %v9490_v31, %v8247_v20 }
0x2db2   :  { %v5519_v4 = vpop.f32.mrf.mxu0 }
0x2db3   :  { %v11599_v33 = vadd.f32 %v8247_v20, %v5519_v4 }
0x2db5   :  { %9530 = vmatprep.mubr.msk.f32.mxu0 %vm3776_vm5, %v11599_v33 }
0x2db7   :  { %v9493_v43 = vpop.f32.mrf.mxu0 }
0x2db8   :  { %v11653_v19 = vadd.f32 %v9493_v43, %v8247_v20 }
0x2db9   :  { %v5529_v39 = vpop.f32.mrf.mxu0 }
0x2dba   :  { %v11646_v28 = vadd.f32 %v8247_v20, %v5529_v39 }
0x2dbb   :  { %v9504_v9 = vpop.f32.mrf.mxu0 }
0x2dbc   :  { %v11614_v3 = vadd.f32 %v9504_v9, %v8257_v24 }
0x2dbd   :  { %v5617_v36 = vpop.f32.mrf.mxu0 }
0x2dbe   :  { %v11623_v38 = vadd.f32 %v8257_v24, %v5617_v36 }
0x2dbf   :  { %v9507_v2 = vpop.f32.mrf.mxu0 }
0x2dc0   :  { %v11604_v23 = vadd.f32 %v9507_v2, %v8257_v24 }
0x2dc1   :  { %v5627_v18 = vpop.f32.mrf.mxu0 }
0x2dc2   :  { %v11606_v21 = vadd.f32 %v8257_v24, %v5627_v18  ;;  %9522 = vmatprep.subr.msk.mxu0 %vm3776_vm5, %v11604_v23 }
0x2dc3   :  { %v9518_v22 = vpop.f32.mrf.mxu0  ;;  %9523 = vmatpush3.xpose.msk.msra.mxu0 %vm3776_vm5, %v11604_v23 }
0x2dc4   :  { %9524 = vmatprep.subr.msk.mxu0 %vm3776_vm5, %v11606_v21  ;;  %v11631_v16 = vadd.f32 %v9518_v22, %v8267_v13 }
0x2dc5   :  { %v5715_v60 = vpop.f32.mrf.mxu0 }
0x2dc6   :  { %v11637_v25 = vadd.f32 %v8267_v13, %v5715_v60 }
0x2dc7   :  { %v9521_v35 = vpop.f32.mrf.mxu0  ;;  %9525 = vmatpush3.xpose.msk.msra.mxu0 %vm3776_vm5, %v11606_v21 }
0x2dc8   :  { %v11619_v6 = vadd.f32 %v9521_v35, %v8267_v13  ;;  %9526 = vmatprep.subr.msk.mxu0 %vm3776_vm5, %v11614_v3 }
0x2dc9   :  { %v5725_v14 = vpop.f32.mrf.mxu0 }
0x2dca   :  { %v11625_v15 = vadd.f32 %v8267_v13, %v5725_v14  ;;  %9536 = vmatprep.subr.mxu1 %v11619_v6 }
0x2dcb   :  { %9527 = vmatpush3.xpose.msk.msra.mxu0 %vm3776_vm5, %v11614_v3  ;;  %9537 = vmatpush3.msra.mxu1 %v11619_v6 }
0x2dcc   :  { %9528 = vmatprep.subr.msk.mxu0 %vm3776_vm5, %v11623_v38  ;;  %9538 = vmatprep.subr.mxu1 %v11625_v15 }
0x2dcd   :  { %9539 = vmatpush3.msra.mxu1 %v11625_v15 }
0x2dce   :  { %9540 = vmatprep.subr.mxu1 %v11631_v16 }
0x2dcf   :  { %9529 = vmatpush3.xpose.msk.msra.mxu0 %vm3776_vm5, %v11623_v38  ;;  %9541 = vmatpush3.msra.mxu1 %v11631_v16 }
0x2dd0   :  { %9542 = vmatprep.subr.mxu1 %v11637_v25 }
0x2dd1   :  { %9543 = vmatpush3.msra.mxu1 %v11637_v25 }
0x2dd2   :  { %9531 = vmatmul.mubr.msk.f32.vlgmr.msra.gmra.mxu0 %vm3776_vm5, %v11643_v26 }
0x2dd3   :  { %9533 = vmatprep.mubr.msk.f32.mxu0 %vm3776_vm5, %v11646_v28 }
0x2dd6   :  { %9534 = vmatmul.mubr.msk.f32.gmra.mxu0 %vm3776_vm5, %v11653_v19 }
0x2e92   :  { %v9532_v29 = vpop.f32.mrf.mxu0 }
0x2e93   :  { %v5844_v57 = vmul.f32 0.35355338, %v9532_v29 }
0x2e94   :  { %v5824_v61 = vpop.f32.mrf.mxu0 }
0x2e95   :  { %v5848_v30 = vadd.f32 %v11658_v62, %v5844_v57  ;;  %v5843_v49 = vmul.f32 0.35355338, %v5824_v61 }
0x2e96   :  { %v9535_v34 = vpop.f32.mrf.mxu0 }
0x2e97   :  { %v5847_v40 = vadd.f32 %v11662_v41, %v5843_v49  ;;  %v5846_v45 = vmul.f32 0.35355338, %v9535_v34  ;;  %v5854_v42 = vsel %vm1407_vm2, %v5848_v30, -inf }
0x2e98   :  { %5855 = vmax.xlane.f32.xlu1 %v5854_v42  ;;  %v5834_v0 = vpop.f32.mrf.mxu0 }
0x2e99   :  { %v5850_v37 = vadd.f32 %v11667_v46, %v5846_v45  ;;  %v5845_v47 = vmul.f32 0.35355338, %v5834_v0  ;;  %v5851_v48 = vsel %vm1407_vm2, %v5847_v40, -inf }
0x2e9a   :  { %5852 = vmax.xlane.f32.xlu0 %v5851_v48 }
0x2e9b   :  { %v5849_v44 = vadd.f32 %v11672_v50, %v5845_v47  ;;  %v5860_v1 = vsel %vm1407_vm2, %v5850_v37, -inf }
0x2e9c   :  { %5861 = vmax.xlane.f32.xlu1 %v5860_v1 }
0x2e9d   :  { %v5857_v53 = vsel %vm1407_vm2, %v5849_v44, -inf }
0x2e9e   :  { %5858 = vmax.xlane.f32.xlu0 %v5857_v53 }
0x2f21   :  { %v5856_v32 = vpop.xlane.xlu1 %5855 }
0x2f22   :  { %v5864_v54 = vsub.f32 %v5848_v30, %v5856_v32 }
0x2f23   :  { %v5853_v63 = vpop.xlane.xlu0 %5852 }
0x2f24   :  { %v5869_v8 = vmul.f32 1.442695, %v5864_v54  ;;  %v5863_v56 = vsub.f32 %v5847_v40, %v5853_v63 }
0x2f25   :  { %v5862_v10 = vpop.xlane.xlu1 %5861 }
0x2f26   :  { %10054 = vpow2.f32 %v5869_v8  ;;  %v5867_v5 = vmul.f32 1.442695, %v5863_v56  ;;  %v5866_v7 = vsub.f32 %v5850_v37, %v5862_v10 }
0x2f27   :  { %v5859_v52 = vpop.xlane.xlu0 %5858 }
0x2f28   :  { %10056 = vpow2.f32 %v5867_v5  ;;  %v5873_v12 = vmul.f32 1.442695, %v5866_v7  ;;  %v5865_v11 = vsub.f32 %v5849_v44, %v5859_v52 }
0x2f2a   :  { %10058 = vpow2.f32 %v5873_v12  ;;  %v5871_v31 = vmul.f32 1.442695, %v5865_v11 }
0x2f2c   :  { %10060 = vpow2.f32 %v5871_v31 }
0x2f33   :  { %v10055_v20 = vpop.eup %10054 }
0x2f34   :  { %v5878_v4 = vsel %vm1407_vm2, %v10055_v20, 0.0 }
0x2f35   :  { %v10057_v43 = vpop.eup %10056  ;;  %5879 = vadd.xlane.f32.xlu1 %v5878_v4 }
0x2f36   :  { %v5875_v39 = vsel %vm1407_vm2, %v10057_v43, 0.0 }
0x2f37   :  { %v10059_v9 = vpop.eup %10058  ;;  %5876 = vadd.xlane.f32.xlu0 %v5875_v39 }
0x2f38   :  { %v5884_v36 = vsel %vm1407_vm2, %v10059_v9, 0.0 }
0x2f39   :  { %v10061_v24 = vpop.eup %10060  ;;  %5885 = vadd.xlane.f32.xlu1 %v5884_v36 }
0x2f3a   :  { %v5881_v2 = vsel %vm1407_vm2, %v10061_v24, 0.0 }
0x2f3b   :  { %5882 = vadd.xlane.f32.xlu0 %v5881_v2 }
0x2f4a   :  { %6004 = vrot.lane.b32.xlu1 %v11606_v21, %s10275_s11 }
0x2f4e   :  { %6002 = vrot.lane.b32.xlu1 %v11614_v3, %s10275_s11 }
0x2f51   :  { %6006 = vrot.lane.b32.xlu0 %v11604_v23, %s10275_s11 }
0x2f52   :  { %6000 = vrot.lane.b32.xlu1 %v11623_v38, %s10275_s11 }
0x2f55   :  { %5992 = vrot.lane.b32.xlu0 %v11599_v33, %s10275_s11 }
0x2f56   :  { %5994 = vrot.lane.b32.xlu1 %v11643_v26, %s10275_s11 }
0x2f59   :  { %5996 = vrot.lane.b32.xlu0 %v11646_v28, %s10275_s11 }
0x2f5a   :  { %5998 = vrot.lane.b32.xlu1 %v11653_v19, %s10275_s11 }
0x2fbe   :  { %v5880_v18 = vpop.xlane.xlu1 %5879 }
0x2fbf   :  { %10062 = vrcp.f32 %v5880_v18 }
0x2fc0   :  { %v5877_v22 = vpop.xlane.xlu0 %5876 }
0x2fc1   :  { %10064 = vrcp.f32 %v5877_v22 }
0x2fc2   :  { %v5886_v60 = vpop.xlane.xlu1 %5885 }
0x2fc3   :  { %10066 = vrcp.f32 %v5886_v60 }
0x2fc4   :  { %v5883_v13 = vpop.xlane.xlu0 %5882 }
0x2fc5   :  { %10068 = vrcp.f32 %v5883_v13 }
0x2fc6   :  { %v6005_v29 = vpop.permute.xlu1 %6004 }
0x2fc8   :  { %v6007_v35 = vpop.permute.xlu0 %6006 }
0x2fc9   :  { %9550 = vmatprep.subr.msk.mxu1 %vm3776_vm5, %v6007_v35 }
0x2fca   :  { %v6003_v40 = vpop.permute.xlu1 %6002 }
0x2fcc   :  { %v10063_v14 = vpop.eup %10062  ;;  %v5993_v0 = vpop.permute.xlu0 %5992 }
0x2fcd   :  { %v5890_v30 = vmul.f32 %v10063_v14, %v10055_v20 }
0x2fce   :  { %v10065_v57 = vpop.eup %10064  ;;  %v6001_v37 = vpop.permute.xlu1 %6000 }
0x2fcf   :  { %v5888_v61 = vmul.f32 %v10065_v57, %v10057_v43 }
0x2fd0   :  { %v10067_v49 = vpop.eup %10066  ;;  %v5997_v48 = vpop.permute.xlu0 %5996 }
0x2fd1   :  { %9544 = vmatprep.mubr.msk.f32.mxu1 %vm1407_vm2, %v5888_v61  ;;  %v5894_v42 = vmul.f32 %v10067_v49, %v10059_v9 }
0x2fd2   :  { %v10069_v34 = vpop.eup %10068  ;;  %9545 = vmatmul.mubr.msk.f32.vlgmr.msra.gmra.mxu1 %vm1407_vm2, %v5890_v30  ;;  %v5995_v47 = vpop.permute.xlu1 %5994 }
0x2fd3   :  { %9551 = vmatpush3.xpose.msk.msra.mxu1 %vm3776_vm5, %v6007_v35  ;;  %v5892_v45 = vmul.f32 %v10069_v34, %v10061_v24 }
0x2fd4   :  { %9552 = vmatprep.subr.msk.mxu1 %vm3776_vm5, %v6005_v29 }
0x2fd5   :  { %9547 = vmatprep.mubr.msk.f32.mxu1 %vm1407_vm2, %v5892_v45 }
0x2fd6   :  { %9548 = vmatmul.mubr.msk.f32.gmra.mxu1 %vm1407_vm2, %v5894_v42  ;;  %v5999_v44 = vpop.permute.xlu1 %5998 }
0x2fd7   :  { %9553 = vmatpush3.xpose.msk.msra.mxu1 %vm3776_vm5, %v6005_v29  ;;  %9558 = vmatprep.mubr.msk.f32.mxu1 %vm3776_vm5, %v5993_v0 }
0x2fd8   :  { %9554 = vmatprep.subr.msk.mxu1 %vm3776_vm5, %v6003_v40 }
0x2fdb   :  { %9555 = vmatpush3.xpose.msk.msra.mxu1 %vm3776_vm5, %v6003_v40 }
0x2fdc   :  { %9556 = vmatprep.subr.msk.mxu1 %vm3776_vm5, %v6001_v37 }
0x2fdf   :  { %9557 = vmatpush3.xpose.msk.msra.mxu1 %vm3776_vm5, %v6001_v37 }
0x2fe2   :  { %9559 = vmatmul.mubr.msk.f32.vlgmr.msra.gmra.mxu1 %vm3776_vm5, %v5995_v47 }
0x2fe3   :  { %9561 = vmatprep.mubr.msk.f32.mxu1 %vm3776_vm5, %v5997_v48 }
0x2fe6   :  { %9562 = vmatmul.mubr.msk.f32.gmra.mxu1 %vm3776_vm5, %v5999_v44 }
0x3092   :  { %v11713_v1 = vpop.f32.mrf.mxu1 }
0x3094   :  { %v11715_v53 = vpop.f32.mrf.mxu1 }
0x3096   :  { %v11717_v32 = vpop.f32.mrf.mxu1 }
0x3098   :  { %v11719_v54 = vpop.f32.mrf.mxu1 }
0x30a2   :  { %v9560_v63 = vpop.f32.mrf.mxu1 }
0x30a3   :  { %v6110_v8 = vmul.f32 0.35355338, %v9560_v63 }
0x30a4   :  { %v6090_v56 = vpop.f32.mrf.mxu1 }
0x30a5   :  { %v6114_v10 = vadd.f32 %v11658_v62, %v6110_v8  ;;  %v6109_v5 = vmul.f32 0.35355338, %v6090_v56 }
0x30a6   :  { %v9563_v7 = vpop.f32.mrf.mxu1 }
0x30a7   :  { %v6113_v52 = vadd.f32 %v11662_v41, %v6109_v5  ;;  %v6112_v12 = vmul.f32 0.35355338, %v9563_v7  ;;  %v6120_v11 = vsel %vm1407_vm2, %v6114_v10, -inf }
0x30a8   :  { %6121 = vmax.xlane.f32.xlu1 %v6120_v11  ;;  %v6100_v31 = vpop.f32.mrf.mxu1 }
0x30a9   :  { %v6116_v20 = vadd.f32 %v11667_v46, %v6112_v12  ;;  %v6111_v4 = vmul.f32 0.35355338, %v6100_v31  ;;  %v6117_v43 = vsel %vm1407_vm2, %v6113_v52, -inf }
0x30aa   :  { %6118 = vmax.xlane.f32.xlu0 %v6117_v43 }
0x30ab   :  { %v6115_v39 = vadd.f32 %v11672_v50, %v6111_v4  ;;  %v6126_v9 = vsel %vm1407_vm2, %v6116_v20, -inf }
0x30ad   :  { %v6123_v36 = vsel %vm1407_vm2, %v6115_v39, -inf }
0x30ae   :  { %6127 = vmax.xlane.f32.xlu0 %v6126_v9 }
0x30b2   :  { %6124 = vmax.xlane.f32.xlu0 %v6123_v36 }
0x30b9   :  { %6169 = vrot.lane.b32.xlu1 %v11625_v15, %s10275_s11 }
0x30bd   :  { %6167 = vrot.lane.b32.xlu1 %v11631_v16, %s10275_s11 }
0x30c1   :  { %6165 = vrot.lane.b32.xlu1 %v11637_v25, %s10275_s11 }
0x30c8   :  { %6171 = vrot.lane.b32.xlu0 %v11619_v6, %s10275_s11 }
0x3131   :  { %v6122_v24 = vpop.xlane.xlu1 %6121 }
0x3132   :  { %v6130_v2 = vsub.f32 %v6114_v10, %v6122_v24 }
0x3133   :  { %v6119_v18 = vpop.xlane.xlu0 %6118 }
0x3134   :  { %v6135_v22 = vmul.f32 1.442695, %v6130_v2  ;;  %v6129_v60 = vsub.f32 %v6113_v52, %v6119_v18 }
0x3135   :  { %v6170_v14 = vpop.permute.xlu1 %6169 }
0x3136   :  { %10070 = vpow2.f32 %v6135_v22  ;;  %v6133_v13 = vmul.f32 1.442695, %v6129_v60 }
0x3137   :  { %v6128_v35 = vpop.xlane.xlu0 %6127 }
0x3138   :  { %10072 = vpow2.f32 %v6133_v13  ;;  %v6132_v42 = vsub.f32 %v6116_v20, %v6128_v35 }
0x3139   :  { %v6168_v57 = vpop.permute.xlu1 %6167 }
0x313a   :  { %v6139_v37 = vmul.f32 1.442695, %v6132_v42 }
0x313b   :  { %v6125_v29 = vpop.xlane.xlu0 %6124 }
0x313c   :  { %v6131_v0 = vsub.f32 %v6115_v39, %v6125_v29  ;;  %10074 = vpow2.f32 %v6139_v37 }
0x313d   :  { %v6166_v40 = vpop.permute.xlu1 %6165 }
0x313e   :  { %v6137_v47 = vmul.f32 1.442695, %v6131_v0 }
0x313f   :  { %v6172_v61 = vpop.permute.xlu0 %6171 }
0x3140   :  { %9564 = vmatprep.subr.mxu0 %v6172_v61  ;;  %10076 = vpow2.f32 %v6137_v47 }
0x3141   :  { %9565 = vmatpush3.msra.mxu0 %v6172_v61 }
0x3142   :  { %9566 = vmatprep.subr.mxu0 %v6170_v14 }
0x3143   :  { %v10071_v30 = vpop.eup %10070  ;;  %9567 = vmatpush3.msra.mxu0 %v6170_v14 }
0x3144   :  { %9568 = vmatprep.subr.mxu0 %v6168_v57  ;;  %v6144_v49 = vsel %vm1407_vm2, %v10071_v30, 0.0 }
0x3145   :  { %v10073_v34 = vpop.eup %10072  ;;  %6145 = vadd.xlane.f32.xlu1 %v6144_v49  ;;  %9569 = vmatpush3.msra.mxu0 %v6168_v57 }
0x3146   :  { %9570 = vmatprep.subr.mxu0 %v6166_v40  ;;  %v6141_v45 = vsel %vm1407_vm2, %v10073_v34, 0.0 }
0x3147   :  { %6142 = vadd.xlane.f32.xlu0 %v6141_v45  ;;  %9571 = vmatpush3.msra.mxu0 %v6166_v40 }
0x3149   :  { %v10075_v48 = vpop.eup %10074 }
0x314a   :  { %v6150_v63 = vsel %vm1407_vm2, %v10075_v48, 0.0 }
0x314d   :  { %v10077_v44 = vpop.eup %10076 }
0x314e   :  { %v6147_v8 = vsel %vm1407_vm2, %v10077_v44, 0.0 }
0x3156   :  { %6286 = vrot.lane.b32.xlu1 %v11606_v21, %s10267_s5 }
0x315d   :  { %6288 = vrot.lane.b32.xlu0 %v11604_v23, %s10267_s5 }
0x317a   :  { %6151 = vadd.xlane.f32.xlu1 %v6150_v63 }
0x317c   :  { %6148 = vadd.xlane.f32.xlu0 %v6147_v8 }
0x318b   :  { %6282 = vrot.lane.b32.xlu1 %v11623_v38, %s10267_s5 }
0x318f   :  { %6276 = vrot.lane.b32.xlu1 %v11643_v26, %s10267_s5 }
0x3192   :  { %6284 = vrot.lane.b32.xlu0 %v11614_v3, %s10267_s5 }
0x3193   :  { %6280 = vrot.lane.b32.xlu1 %v11653_v19, %s10267_s5 }
0x3196   :  { %6274 = vrot.lane.b32.xlu0 %v11599_v33, %s10267_s5 }
0x319a   :  { %6278 = vrot.lane.b32.xlu0 %v11646_v28, %s10267_s5 }
0x31ce   :  { %v6146_v56 = vpop.xlane.xlu1 %6145 }
0x31cf   :  { %10078 = vrcp.f32 %v6146_v56 }
0x31d0   :  { %v6143_v10 = vpop.xlane.xlu0 %6142 }
0x31d1   :  { %10080 = vrcp.f32 %v6143_v10 }
0x31d2   :  { %v6287_v31 = vpop.permute.xlu1 %6286 }
0x31d4   :  { %v6289_v5 = vpop.permute.xlu0 %6288 }
0x31d5   :  { %9578 = vmatprep.subr.msk.mxu0 %vm3776_vm5, %v6289_v5 }
0x31dc   :  { %v10079_v7 = vpop.eup %10078 }
0x31dd   :  { %v6156_v11 = vmul.f32 %v10079_v7, %v10071_v30 }
0x31de   :  { %v10081_v52 = vpop.eup %10080 }
0x31df   :  { %v6154_v12 = vmul.f32 %v10081_v52, %v10073_v34 }
0x31e1   :  { %9572 = vmatprep.mubr.msk.f32.mxu0 %vm1407_vm2, %v6154_v12 }
0x31e2   :  { %9573 = vmatmul.mubr.msk.f32.vlgmr.msra.gmra.mxu0 %vm1407_vm2, %v6156_v11 }
0x31e3   :  { %9579 = vmatpush3.xpose.msk.msra.mxu0 %vm3776_vm5, %v6289_v5 }
0x31e4   :  { %9580 = vmatprep.subr.msk.mxu0 %vm3776_vm5, %v6287_v31 }
0x31e7   :  { %9581 = vmatpush3.xpose.msk.msra.mxu0 %vm3776_vm5, %v6287_v31 }
0x3203   :  { %v6152_v20 = vpop.xlane.xlu1 %6151 }
0x3204   :  { %10082 = vrcp.f32 %v6152_v20 }
0x3205   :  { %v6149_v4 = vpop.xlane.xlu0 %6148 }
0x3206   :  { %10084 = vrcp.f32 %v6149_v4 }
0x3207   :  { %v6283_v39 = vpop.permute.xlu1 %6282 }
0x3209   :  { %v6285_v43 = vpop.permute.xlu0 %6284 }
0x320a   :  { %9582 = vmatprep.subr.msk.mxu0 %vm3776_vm5, %v6285_v43 }
0x320b   :  { %9583 = vmatpush3.xpose.msk.msra.mxu0 %vm3776_vm5, %v6285_v43  ;;  %v6277_v22 = vpop.permute.xlu1 %6276 }
0x320c   :  { %9584 = vmatprep.subr.msk.mxu0 %vm3776_vm5, %v6283_v39 }
0x320d   :  { %v6275_v2 = vpop.permute.xlu0 %6274 }
0x320f   :  { %9585 = vmatpush3.xpose.msk.msra.mxu0 %vm3776_vm5, %v6283_v39  ;;  %v6281_v13 = vpop.permute.xlu1 %6280 }
0x3211   :  { %v10083_v9 = vpop.eup %10082  ;;  %v6279_v60 = vpop.permute.xlu0 %6278 }
0x3212   :  { %v6160_v18 = vmul.f32 %v10083_v9, %v10075_v48 }
0x3213   :  { %v10085_v36 = vpop.eup %10084 }
0x3214   :  { %v6158_v24 = vmul.f32 %v10085_v36, %v10077_v44 }
0x3216   :  { %9575 = vmatprep.mubr.msk.f32.mxu0 %vm1407_vm2, %v6158_v24 }
0x3217   :  { %9576 = vmatmul.mubr.msk.f32.gmra.mxu0 %vm1407_vm2, %v6160_v18 }
0x3218   :  { %9586 = vmatprep.mubr.msk.f32.mxu0 %vm3776_vm5, %v6275_v2 }
0x321b   :  { %9587 = vmatmul.mubr.msk.f32.vlgmr.msra.gmra.mxu0 %vm3776_vm5, %v6277_v22 }
0x321c   :  { %9589 = vmatprep.mubr.msk.f32.mxu0 %vm3776_vm5, %v6279_v60 }
0x321f   :  { %9590 = vmatmul.mubr.msk.f32.gmra.mxu0 %vm3776_vm5, %v6281_v13 }
0x32a2   :  { %v11773_v35 = vpop.f32.mrf.mxu0 }
0x32a4   :  { %v11775_v14 = vpop.f32.mrf.mxu0 }
0x32d7   :  { %v11777_v29 = vpop.f32.mrf.mxu0 }
0x32d9   :  { %v11779_v57 = vpop.f32.mrf.mxu0 }
0x32db   :  { %v9588_v61 = vpop.f32.mrf.mxu0 }
0x32dc   :  { %v6392_v30 = vmul.f32 0.35355338, %v9588_v61 }
0x32dd   :  { %v6372_v49 = vpop.f32.mrf.mxu0 }
0x32de   :  { %v6396_v34 = vadd.f32 %v11658_v62, %v6392_v30  ;;  %v6391_v40 = vmul.f32 0.35355338, %v6372_v49 }
0x32df   :  { %v9591_v45 = vpop.f32.mrf.mxu0 }
0x32e0   :  { %v6395_v42 = vadd.f32 %v11662_v41, %v6391_v40  ;;  %v6394_v0 = vmul.f32 0.35355338, %v9591_v45  ;;  %v6402_v37 = vsel %vm1407_vm2, %v6396_v34, -inf }
0x32e1   :  { %6403 = vmax.xlane.f32.xlu1 %v6402_v37  ;;  %v6382_v47 = vpop.f32.mrf.mxu0 }
0x32e2   :  { %v6398_v48 = vadd.f32 %v11667_v46, %v6394_v0  ;;  %v6393_v44 = vmul.f32 0.35355338, %v6382_v47  ;;  %v6399_v63 = vsel %vm1407_vm2, %v6395_v42, -inf }
0x32e3   :  { %6400 = vmax.xlane.f32.xlu0 %v6399_v63 }
0x32e4   :  { %v6397_v8 = vadd.f32 %v11672_v50, %v6393_v44  ;;  %v6408_v56 = vsel %vm1407_vm2, %v6398_v48, -inf }
0x32e6   :  { %v6405_v10 = vsel %vm1407_vm2, %v6397_v8, -inf }
0x32e7   :  { %6409 = vmax.xlane.f32.xlu0 %v6408_v56 }
0x32eb   :  { %6406 = vmax.xlane.f32.xlu0 %v6405_v10 }
0x32f2   :  { %6447 = vrot.lane.b32.xlu1 %v11625_v15, %s10267_s5 }
0x32f6   :  { %6445 = vrot.lane.b32.xlu1 %v11631_v16, %s10267_s5 }
0x32fa   :  { %6443 = vrot.lane.b32.xlu1 %v11637_v25, %s10267_s5 }
0x3301   :  { %6449 = vrot.lane.b32.xlu0 %v11619_v6, %s10267_s5  ;;  %s12193_s5 = sld [smem:[#allocation37_spill]] }
0x336a   :  { %v6404_v5 = vpop.xlane.xlu1 %6403 }
0x336b   :  { %v6412_v7 = vsub.f32 %v6396_v34, %v6404_v5 }
0x336c   :  { %v6401_v52 = vpop.xlane.xlu0 %6400 }
0x336d   :  { %v6417_v12 = vmul.f32 1.442695, %v6412_v7  ;;  %v6411_v11 = vsub.f32 %v6395_v42, %v6401_v52 }
0x336e   :  { %v6448_v4 = vpop.permute.xlu1 %6447 }
0x336f   :  { %10086 = vpow2.f32 %v6417_v12  ;;  %v6415_v31 = vmul.f32 1.442695, %v6411_v11 }
0x3370   :  { %v6410_v20 = vpop.xlane.xlu0 %6409 }
0x3371   :  { %10088 = vpow2.f32 %v6415_v31  ;;  %v6414_v60 = vsub.f32 %v6398_v48, %v6410_v20 }
0x3372   :  { %v6446_v39 = vpop.permute.xlu1 %6445 }
0x3373   :  { %v6421_v61 = vmul.f32 1.442695, %v6414_v60 }
0x3374   :  { %v6407_v43 = vpop.xlane.xlu0 %6406 }
0x3375   :  { %v6413_v13 = vsub.f32 %v6397_v8, %v6407_v43  ;;  %10090 = vpow2.f32 %v6421_v61 }
0x3376   :  { %v6444_v18 = vpop.permute.xlu1 %6443 }
0x3377   :  { %v6419_v30 = vmul.f32 1.442695, %v6413_v13 }
0x3378   :  { %v6450_v9 = vpop.permute.xlu0 %6449 }
0x3379   :  { %9592 = vmatprep.subr.mxu1 %v6450_v9  ;;  %10092 = vpow2.f32 %v6419_v30 }
0x337a   :  { %9593 = vmatpush3.msra.mxu1 %v6450_v9 }
0x337b   :  { %9594 = vmatprep.subr.mxu1 %v6448_v4 }
0x337c   :  { %v10087_v36 = vpop.eup %10086  ;;  %9595 = vmatpush3.msra.mxu1 %v6448_v4 }
0x337d   :  { %9596 = vmatprep.subr.mxu1 %v6446_v39  ;;  %v6426_v24 = vsel %vm1407_vm2, %v10087_v36, 0.0 }
0x337e   :  { %v10089_v2 = vpop.eup %10088  ;;  %6427 = vadd.xlane.f32.xlu1 %v6426_v24  ;;  %9597 = vmatpush3.msra.mxu1 %v6446_v39 }
0x337f   :  { %9598 = vmatprep.subr.mxu1 %v6444_v18  ;;  %v6423_v22 = vsel %vm1407_vm2, %v10089_v2, 0.0 }
0x3380   :  { %6424 = vadd.xlane.f32.xlu0 %v6423_v22  ;;  %9599 = vmatpush3.msra.mxu1 %v6444_v18 }
0x3382   :  { %v10091_v49 = vpop.eup %10090 }
0x3383   :  { %v6432_v40 = vsel %vm1407_vm2, %v10091_v49, 0.0 }
0x3386   :  { %v10093_v34 = vpop.eup %10092 }
0x3387   :  { %v6429_v45 = vsel %vm1407_vm2, %v10093_v34, 0.0 }
0x338f   :  { %6564 = vrot.lane.b32.xlu1 %v11606_v21, %s10276_s16 }
0x3396   :  { %6566 = vrot.lane.b32.xlu0 %v11604_v23, %s10276_s16 }
0x33b3   :  { %6433 = vadd.xlane.f32.xlu1 %v6432_v40 }
0x33b5   :  { %6430 = vadd.xlane.f32.xlu0 %v6429_v45 }
0x33c4   :  { %6560 = vrot.lane.b32.xlu1 %v11623_v38, %s10276_s16 }
0x33c8   :  { %6554 = vrot.lane.b32.xlu1 %v11643_v26, %s10276_s16 }
0x33cb   :  { %6562 = vrot.lane.b32.xlu0 %v11614_v3, %s10276_s16 }
0x33cc   :  { %6558 = vrot.lane.b32.xlu1 %v11653_v19, %s10276_s16 }
0x33cf   :  { %6552 = vrot.lane.b32.xlu0 %v11599_v33, %s10276_s16 }
0x33d3   :  { %6556 = vrot.lane.b32.xlu0 %v11646_v28, %s10276_s16 }
0x3407   :  { %v6428_v23 = vpop.xlane.xlu1 %6427 }
0x3408   :  { %10094 = vrcp.f32 %v6428_v23 }
0x3409   :  { %v6425_v21 = vpop.xlane.xlu0 %6424 }
0x340a   :  { %10096 = vrcp.f32 %v6425_v21 }
0x340b   :  { %v6565_v19 = vpop.permute.xlu1 %6564 }
0x340d   :  { %v6567_v38 = vpop.permute.xlu0 %6566 }
0x340e   :  { %9606 = vmatprep.subr.msk.mxu1 %vm3776_vm5, %v6567_v38 }
0x3415   :  { %v10095_v26 = vpop.eup %10094 }
0x3416   :  { %v6438_v3 = vmul.f32 %v10095_v26, %v10087_v36 }
0x3417   :  { %v10097_v42 = vpop.eup %10096 }
0x3418   :  { %v6436_v0 = vmul.f32 %v10097_v42, %v10089_v2 }
0x341a   :  { %9600 = vmatprep.mubr.msk.f32.mxu1 %vm1407_vm2, %v6436_v0 }
0x341b   :  { %9601 = vmatmul.mubr.msk.f32.vlgmr.msra.gmra.mxu1 %vm1407_vm2, %v6438_v3 }
0x341c   :  { %9607 = vmatpush3.xpose.msk.msra.mxu1 %vm3776_vm5, %v6567_v38 }
0x341d   :  { %9608 = vmatprep.subr.msk.mxu1 %vm3776_vm5, %v6565_v19 }
0x3420   :  { %9609 = vmatpush3.xpose.msk.msra.mxu1 %vm3776_vm5, %v6565_v19 }
0x343c   :  { %v6434_v33 = vpop.xlane.xlu1 %6433 }
0x343d   :  { %10098 = vrcp.f32 %v6434_v33 }
0x343e   :  { %v6431_v28 = vpop.xlane.xlu0 %6430 }
0x343f   :  { %10100 = vrcp.f32 %v6431_v28 }
0x3440   :  { %v6561_v47 = vpop.permute.xlu1 %6560 }
0x3442   :  { %v6563_v37 = vpop.permute.xlu0 %6562 }
0x3443   :  { %9610 = vmatprep.subr.msk.mxu1 %vm3776_vm5, %v6563_v37 }
0x3444   :  { %9611 = vmatpush3.xpose.msk.msra.mxu1 %vm3776_vm5, %v6563_v37  ;;  %v6555_v10 = vpop.permute.xlu1 %6554 }
0x3445   :  { %9612 = vmatprep.subr.msk.mxu1 %vm3776_vm5, %v6561_v47 }
0x3446   :  { %v6553_v8 = vpop.permute.xlu0 %6552 }
0x3448   :  { %9613 = vmatpush3.xpose.msk.msra.mxu1 %vm3776_vm5, %v6561_v47  ;;  %v6559_v7 = vpop.permute.xlu1 %6558 }
0x344a   :  { %v10099_v48 = vpop.eup %10098  ;;  %v6557_v5 = vpop.permute.xlu0 %6556 }
0x344b   :  { %v6442_v56 = vmul.f32 %v10099_v48, %v10091_v49 }
0x344c   :  { %v10101_v44 = vpop.eup %10100 }
0x344d   :  { %v6440_v63 = vmul.f32 %v10101_v44, %v10093_v34 }
0x344f   :  { %9603 = vmatprep.mubr.msk.f32.mxu1 %vm1407_vm2, %v6440_v63 }
0x3450   :  { %9604 = vmatmul.mubr.msk.f32.gmra.mxu1 %vm1407_vm2, %v6442_v56 }
0x3451   :  { %9614 = vmatprep.mubr.msk.f32.mxu1 %vm3776_vm5, %v6553_v8 }
0x3454   :  { %9615 = vmatmul.mubr.msk.f32.vlgmr.msra.gmra.mxu1 %vm3776_vm5, %v6555_v10 }
0x3455   :  { %9617 = vmatprep.mubr.msk.f32.mxu1 %vm3776_vm5, %v6557_v5 }
0x3458   :  { %9618 = vmatmul.mubr.msk.f32.gmra.mxu1 %vm3776_vm5, %v6559_v7 }
0x34db   :  { %v9602_v52 = vpop.f32.mrf.mxu1 }
0x34dd   :  { %v6533_v12 = vpop.f32.mrf.mxu1 }
0x3510   :  { %v9605_v11 = vpop.f32.mrf.mxu1 }
0x3512   :  { %v6543_v31 = vpop.f32.mrf.mxu1 }
0x3514   :  { %v9616_v20 = vpop.f32.mrf.mxu1 }
0x3515   :  { %v6670_v4 = vmul.f32 0.35355338, %v9616_v20  ;;  %v8321_v20 = vld [vmem:[%s12185_s18 + $0x28] sm:$0xff] }
0x3516   :  { %v6650_v43 = vpop.f32.mrf.mxu1 }
0x3517   :  { %v6674_v39 = vadd.f32 %v11658_v62, %v6670_v4  ;;  %v6669_v9 = vmul.f32 0.35355338, %v6650_v43  ;;  %v8320_v4 = vld [vmem:[%s12185_s18 + $0x20] sm:$0xff] }
0x3518   :  { %v9619_v36 = vpop.f32.mrf.mxu1 }
0x3519   :  { %v6673_v24 = vadd.f32 %v11662_v41, %v6669_v9  ;;  %v6680_v2 = vsel %vm1407_vm2, %v6674_v39, -inf  ;;  %v6672_v22 = vmul.f32 0.35355338, %v9619_v36 }
0x351a   :  { %6681 = vmax.xlane.f32.xlu1 %v6680_v2  ;;  %v6660_v18 = vpop.f32.mrf.mxu1 }
0x351b   :  { %v6671_v60 = vmul.f32 0.35355338, %v6660_v18  ;;  %v6677_v13 = vsel %vm1407_vm2, %v6673_v24, -inf  ;;  %v6676_v30 = vadd.f32 %v11667_v46, %v6672_v22 }
0x351c   :  { %6678 = vmax.xlane.f32.xlu0 %v6677_v13 }
0x351d   :  { %v6675_v61 = vadd.f32 %v11672_v50, %v6671_v60  ;;  %v6686_v62 = vsel %vm1407_vm2, %v6676_v30, -inf }
0x351f   :  { %v6683_v49 = vsel %vm1407_vm2, %v6675_v61, -inf }
0x3520   :  { %6684 = vmax.xlane.f32.xlu0 %v6683_v49 }
0x3524   :  { %6687 = vmax.xlane.f32.xlu0 %v6686_v62 }
0x35a3   :  { %v6682_v41 = vpop.xlane.xlu1 %6681 }
0x35a4   :  { %v6690_v34 = vsub.f32 %v6674_v39, %v6682_v41 }
0x35a5   :  { %v6679_v40 = vpop.xlane.xlu0 %6678 }
0x35a6   :  { %v6695_v45 = vmul.f32 1.442695, %v6690_v34  ;;  %v6689_v23 = vsub.f32 %v6673_v24, %v6679_v40 }
0x35a8   :  { %10102 = vpow2.f32 %v6695_v45  ;;  %v6693_v21 = vmul.f32 1.442695, %v6689_v23 }
0x35a9   :  { %v6685_v38 = vpop.xlane.xlu0 %6684 }
0x35aa   :  { %10104 = vpow2.f32 %v6693_v21  ;;  %v6691_v26 = vsub.f32 %v6675_v61, %v6685_v38 }
0x35ac   :  { %v6697_v42 = vmul.f32 1.442695, %v6691_v26 }
0x35ad   :  { %v6688_v50 = vpop.xlane.xlu0 %6687 }
0x35ae   :  { %10106 = vpow2.f32 %v6697_v42  ;;  %v6692_v46 = vsub.f32 %v6676_v30, %v6688_v50 }
0x35b0   :  { %v6699_v0 = vmul.f32 1.442695, %v6692_v46 }
0x35b2   :  { %10108 = vpow2.f32 %v6699_v0 }
0x35b5   :  { %v10103_v3 = vpop.eup %10102 }
0x35b6   :  { %v6704_v19 = vsel %vm1407_vm2, %v10103_v3, 0.0 }
0x35b7   :  { %v10105_v33 = vpop.eup %10104  ;;  %6705 = vadd.xlane.f32.xlu1 %v6704_v19 }
0x35b8   :  { %v6701_v28 = vsel %vm1407_vm2, %v10105_v33, 0.0 }
0x35b9   :  { %6702 = vadd.xlane.f32.xlu0 %v6701_v28 }
0x35bb   :  { %v10107_v37 = vpop.eup %10106 }
0x35bc   :  { %v6707_v47 = vsel %vm1407_vm2, %v10107_v37, 0.0 }
0x35bd   :  { %6708 = vadd.xlane.f32.xlu0 %v6707_v47 }
0x35bf   :  { %v10109_v48 = vpop.eup %10108 }
0x35c0   :  { %v6710_v44 = vsel %vm1407_vm2, %v10109_v48, 0.0 }
0x35c1   :  { %6711 = vadd.xlane.f32.xlu1 %v6710_v44 }
0x35d2   :  { %6725 = vrot.lane.b32.xlu1 %v11625_v15, %s10276_s16 }
0x35d3   :  { %6727 = vrot.lane.b32.xlu0 %v11619_v6, %s10276_s16 }
0x35d6   :  { %6723 = vrot.lane.b32.xlu1 %v11631_v16, %s10276_s16 }
0x35d7   :  { %6834 = vrot.lane.b32.xlu0 %v11775_v14, %s10277_s15 }
0x35da   :  { %6721 = vrot.lane.b32.xlu1 %v11637_v25, %s10276_s16 }
0x35db   :  { %6850 = vrot.lane.b32.xlu0 %v6533_v12, %s10270_s22 }
0x35de   :  { %6836 = vrot.lane.b32.xlu1 %v11773_v35, %s10277_s15 }
0x35df   :  { %6838 = vrot.lane.b32.xlu0 %v11779_v57, %s10277_s15 }
0x35e2   :  { %6852 = vrot.lane.b32.xlu1 %v9602_v52, %s10270_s22 }
0x35e3   :  { %6854 = vrot.lane.b32.xlu0 %v6543_v31, %s10270_s22  ;;  %v8322_v31 = vld [vmem:[%s12185_s18 + $0x30] sm:$0xff] }
0x35e6   :  { %6840 = vrot.lane.b32.xlu1 %v11777_v29, %s10277_s15 }
0x35ea   :  { %6856 = vrot.lane.b32.xlu1 %v9605_v11, %s10270_s22  ;;  %v8323_v11 = vld [vmem:[%s12185_s18 + $0x38] sm:$0xff]  ;;  %s12194_s22 = sld [smem:[#allocation38_spill]] }
0x3640   :  { %v6706_v15 = vpop.xlane.xlu1 %6705 }
0x3642   :  { %v6703_v6 = vpop.xlane.xlu0 %6702 }
0x3643   :  { %10110 = vrcp.f32 %v6703_v6 }
0x3644   :  { %10112 = vrcp.f32 %v6706_v15 }
0x3646   :  { %v6709_v16 = vpop.xlane.xlu0 %6708 }
0x3647   :  { %10114 = vrcp.f32 %v6709_v16 }
0x364a   :  { %v6712_v25 = vpop.xlane.xlu1 %6711  ;;  %v6728_v35 = vpop.permute.xlu0 %6727 }
0x364b   :  { %10116 = vrcp.f32 %v6712_v25  ;;  %9620 = vmatprep.subr.mxu0 %v6728_v35 }
0x364c   :  { %9621 = vmatpush3.msra.mxu0 %v6728_v35 }
0x364e   :  { %v6726_v14 = vpop.permute.xlu1 %6725  ;;  %v6835_v2 = vpop.permute.xlu0 %6834 }
0x364f   :  { %9622 = vmatprep.subr.mxu0 %v6726_v14  ;;  %v6878_v62 = vsel %vm3776_vm5, %v11715_v53, %v6835_v2  ;;  %v8335_v2 = vld [vmem:[%s12187_s13 + $0x28] sm:$0xff] }
0x3650   :  { %v10111_v57 = vpop.eup %10110  ;;  %9623 = vmatpush3.msra.mxu0 %v6726_v14 }
0x3651   :  { %v6714_v63 = vmul.f32 %v10111_v57, %v10105_v33  ;;  %v10113_v29 = vpop.eup %10112 }
0x3652   :  { %v6724_v8 = vpop.permute.xlu1 %6723  ;;  %v6716_v5 = vmul.f32 %v10113_v29, %v10103_v3  ;;  %v6851_v22 = vpop.permute.xlu0 %6850  ;;  %v8329_v3 = vld [vmem:[%s12186_s23 + $0x1] ss:$0 sm:$0xff] }
0x3653   :  { %9624 = vmatprep.subr.mxu0 %v6724_v8  ;;  %9628 = vmatprep.mubr.msk.f32.mxu0 %vm1407_vm2, %v6714_v63  ;;  %v6882_v41 = vsel %vm572_vm1, %v6878_v62, %v6851_v22  ;;  %v8359_v22 = vld [vmem:[%s12188_s27 + $0xf8] sm:$0xff]  ;;  %v8353_v62 = vld [vmem:[%s12188_s27 + $0xc8] sm:$0xff] }
0x3654   :  { %9625 = vmatpush3.msra.mxu0 %v6724_v8  ;;  %v10115_v56 = vpop.eup %10114 }
0x3655   :  { %v6718_v52 = vmul.f32 %v10115_v56, %v10107_v37 }
0x3656   :  { %v6722_v10 = vpop.permute.xlu1 %6721  ;;  %v6839_v13 = vpop.permute.xlu0 %6838 }
0x3657   :  { %9626 = vmatprep.subr.mxu0 %v6722_v10  ;;  %v6880_v38 = vsel %vm3776_vm5, %v11719_v54, %v6839_v13  ;;  %v8357_v13 = vld [vmem:[%s12188_s27 + $0xe8] sm:$0xff] }
0x3658   :  { %v10117_v7 = vpop.eup %10116  ;;  %9627 = vmatpush3.msra.mxu0 %v6722_v10 }
0x3659   :  { %9629 = vmatmul.mubr.msk.f32.vlgmr.msra.gmra.mxu0 %vm1407_vm2, %v6716_v5  ;;  %v6720_v12 = vmul.f32 %v10117_v7, %v10109_v48  ;;  %9634 = vmatprep.subr.mxu0 %v8323_v11 }
0x365a   :  { %9631 = vmatprep.mubr.msk.f32.mxu0 %vm1407_vm2, %v6718_v52  ;;  %9635 = vmatpush3.msra.mxu0 %v8323_v11  ;;  %v6837_v24 = vpop.permute.xlu1 %6836  ;;  %v6855_v30 = vpop.permute.xlu0 %6854 }
0x365b   :  { %9636 = vmatprep.subr.mxu0 %v8322_v31  ;;  %v6879_v34 = vsel %vm3776_vm5, %v11713_v1, %v6837_v24  ;;  %v6884_v53 = vsel %vm572_vm1, %v6880_v38, %v6855_v30  ;;  %v8336_v24 = vld [vmem:[%s12187_s13 + $0x30] sm:$0xff]  ;;  %v8355_v30 = vld [vmem:[%s12188_s27 + $0xd8] sm:$0xff] }
0x365c   :  { %9637 = vmatpush3.msra.mxu0 %v8322_v31 }
0x365d   :  { %9632 = vmatmul.mubr.msk.f32.gmra.mxu0 %vm1407_vm2, %v6720_v12  ;;  %9638 = vmatprep.subr.mxu0 %v8321_v20 }
0x365e   :  { %9639 = vmatpush3.msra.mxu0 %v8321_v20  ;;  %v6853_v18 = vpop.permute.xlu1 %6852 }
0x365f   :  { %9640 = vmatprep.subr.mxu0 %v8320_v4  ;;  %v6883_v45 = vsel %vm572_vm1, %v6879_v34, %v6853_v18  ;;  %v8334_v18 = vld [vmem:[%s12187_s13 + $0x20] sm:$0xff]  ;;  %v8351_v34 = vld [vmem:[%s12188_s27 + $0xb8] sm:$0xff] }
0x3660   :  { %9641 = vmatpush3.msra.mxu0 %v8320_v4 }
0x3661   :  { %9662 = vmatprep.subr.mxu0 %v8359_v22 }
0x3662   :  { %v6841_v60 = vpop.permute.xlu1 %6840 }
0x3663   :  { %v6881_v1 = vsel %vm3776_vm5, %v11717_v32, %v6841_v60  ;;  %v8358_v60 = vld [vmem:[%s12188_s27 + $0xf0] sm:$0xff] }
0x3666   :  { %v6857_v61 = vpop.permute.xlu1 %6856 }
0x3667   :  { %v6885_v50 = vsel %vm572_vm1, %v6881_v1, %v6857_v61  ;;  %v8356_v61 = vld [vmem:[%s12188_s27 + $0xe0] sm:$0xff] }
0x3719   :  { %v9630_v43 = vpop.f32.mrf.mxu0 }
0x371a   :  { %6868 = vrot.lane.b32.xlu1 %v9630_v43, %s10278_s0 }
0x371b   :  { %v6811_v39 = vpop.f32.mrf.mxu0 }
0x371c   :  { %6866 = vrot.lane.b32.xlu0 %v6811_v39, %s10278_s0 }
0x371d   :  { %v9633_v9 = vpop.f32.mrf.mxu0 }
0x371e   :  { %6872 = vrot.lane.b32.xlu1 %v9633_v9, %s10278_s0 }
0x371f   :  { %v6821_v36 = vpop.f32.mrf.mxu0 }
0x3720   :  { %6870 = vrot.lane.b32.xlu0 %v6821_v36, %s10278_s0  ;;  %v8337_v36 = vld [vmem:[%s12187_s13 + $0x38] sm:$0xff] }
0x3721   :  { %9648 = vmatprep.subr.mxu1 %v8337_v36 }
0x3722   :  { %9649 = vmatpush3.msra.mxu1 %v8337_v36 }
0x3723   :  { %9650 = vmatprep.subr.mxu1 %v8336_v24 }
0x3724   :  { %9651 = vmatpush3.msra.mxu1 %v8336_v24 }
0x3725   :  { %9652 = vmatprep.subr.mxu1 %v8335_v2 }
0x3726   :  { %9653 = vmatpush3.msra.mxu1 %v8335_v2 }
0x3727   :  { %9654 = vmatprep.subr.mxu1 %v8334_v18 }
0x3728   :  { %9655 = vmatpush3.msra.mxu1 %v8334_v18 }
0x3729   :  { %9700 = vmatprep.subr.mxu1 %v10273_v59 }
0x378c   :  { %v6869_v49 = vpop.permute.xlu1 %6868 }
0x378d   :  { %v6887_v21 = vsel %vm4929_vm6, %v6883_v45, %v6869_v49  ;;  %v8354_v49 = vld [vmem:[%s12188_s27 + $0xd0] sm:$0xff]  ;;  %v8349_v45 = vld [vmem:[%s12188_s27 + $0xa8] sm:$0xff] }
0x378e   :  { %v6867_v40 = vpop.permute.xlu0 %6866 }
0x378f   :  { %v6886_v23 = vsel %vm4929_vm6, %v6882_v41, %v6867_v40  ;;  %v8352_v41 = vld [vmem:[%s12188_s27 + $0xc0] sm:$0xff]  ;;  %v8350_v40 = vld [vmem:[%s12188_s27 + $0xb0] sm:$0xff] }
0x3790   :  { %9642 = vmatprep.mubr.msk.f32.mxu0 %vm1407_vm2, %v6886_v23  ;;  %v6873_v26 = vpop.permute.xlu1 %6872  ;;  %v8348_v23 = vld [vmem:[%s12188_s27 + $0xa0] sm:$0xff] }
0x3791   :  { %9643 = vmatmul.mubr.msk.f32.vlgmr.msra.gmra.mxu0 %vm1407_vm2, %v6887_v21  ;;  %v6889_v0 = vsel %vm4929_vm6, %v6885_v50, %v6873_v26 }
0x3792   :  { %v6871_v42 = vpop.permute.xlu0 %6870  ;;  %9663 = vmatpush3.msra.mxu0 %v8359_v22 }
0x3793   :  { %v6888_v46 = vsel %vm4929_vm6, %v6884_v53, %v6871_v42  ;;  %9664 = vmatprep.subr.mxu0 %v8358_v60 }
0x3794   :  { %9645 = vmatprep.mubr.msk.f32.mxu0 %vm1407_vm2, %v6888_v46  ;;  %9665 = vmatpush3.msra.mxu0 %v8358_v60 }
0x3795   :  { %9646 = vmatmul.mubr.msk.f32.gmra.mxu0 %vm1407_vm2, %v6889_v0  ;;  %9666 = vmatprep.subr.mxu0 %v8357_v13 }
0x3796   :  { %9667 = vmatpush3.msra.mxu0 %v8357_v13 }
0x3797   :  { %9668 = vmatprep.subr.mxu0 %v8356_v61 }
0x3798   :  { %9669 = vmatpush3.msra.mxu0 %v8356_v61 }
0x3799   :  { %9670 = vmatprep.subr.mxu0 %v8355_v30 }
0x379a   :  { %9671 = vmatpush3.msra.mxu0 %v8355_v30 }
0x379b   :  { %9672 = vmatprep.subr.mxu0 %v8354_v49 }
0x379c   :  { %9673 = vmatpush3.msra.mxu0 %v8354_v49 }
0x379d   :  { %9674 = vmatprep.subr.mxu0 %v8353_v62 }
0x379e   :  { %9675 = vmatpush3.msra.mxu0 %v8353_v62  ;;  %v8361_v62 = vld [vmem:[%s12192_s2 + $0x1] ss:$0 sm:$0xff] }
0x379f   :  { %9676 = vmatprep.subr.mxu0 %v8352_v41 }
0x37a0   :  { %9677 = vmatpush3.msra.mxu0 %v8352_v41 }
0x37a1   :  { %9678 = vmatprep.subr.mxu0 %v8351_v34 }
0x37a2   :  { %9679 = vmatpush3.msra.mxu0 %v8351_v34 }
0x37a3   :  { %9680 = vmatprep.subr.mxu0 %v8350_v40 }
0x37a4   :  { %9681 = vmatpush3.msra.mxu0 %v8350_v40 }
0x37a5   :  { %9682 = vmatprep.subr.mxu0 %v8349_v45 }
0x37a6   :  { %9683 = vmatpush3.msra.mxu0 %v8349_v45 }
0x37a7   :  { %9684 = vmatprep.subr.mxu0 %v8348_v23 }
0x37a8   :  { %9685 = vmatpush3.msra.mxu0 %v8348_v23 }
0x3851   :  { %v9644_v54 = vpop.f32.mrf.mxu0 }
0x3852   :  { %v6993_v19 = vadd.f32 %v9644_v54, %v11545_v51 }
0x3853   :  { %v6973_v33 = vpop.f32.mrf.mxu0 }
0x3854   :  { %v11899_v28 = vadd.f32 %v8329_v3, %v6993_v19  ;;  %v6992_v32 = vadd.f32 %v6973_v33, %v11548_v27 }
0x3855   :  { %v9647_v37 = vpop.f32.mrf.mxu0 }
0x3856   :  { %v11902_v47 = vadd.f32 %v8329_v3, %v6992_v32  ;;  %v7015_v48 = vsel %vm1407_vm2, %v11899_v28, 0.0  ;;  %v6995_v6 = vadd.f32 %v9647_v37, %v11555_v17  ;;  %v8332_v37 = vld [vmem:[%s12189_s26 + $0x1] ss:$0 sm:$0xff] }
0x3857   :  { %7016 = vadd.xlane.f32.xlu1 %v7015_v48  ;;  %v6983_v44 = vpop.f32.mrf.mxu0 }
0x3858   :  { %v6994_v15 = vadd.f32 %v6983_v44, %v11558_v58  ;;  %v7012_v51 = vsel %vm1407_vm2, %v11902_v47, 0.0  ;;  %v11912_v25 = vadd.f32 %v8329_v3, %v6995_v6 }
0x3859   :  { %7013 = vadd.xlane.f32.xlu0 %v7012_v51 }
0x385a   :  { %v11910_v16 = vadd.f32 %v8329_v3, %v6994_v15  ;;  %v7021_v35 = vsel %vm1407_vm2, %v11912_v25, 0.0  ;;  %v8333_v15 = vld [vmem:[%s12190_s1 + $0x1] ss:$0 sm:$0xff] }
0x385c   :  { %v7018_v27 = vsel %vm1407_vm2, %v11910_v16, 0.0 }
0x385d   :  { %7019 = vadd.xlane.f32.xlu0 %v7018_v27 }
0x3861   :  { %7022 = vadd.xlane.f32.xlu0 %v7021_v35 }
0x38e0   :  { %v7017_v14 = vpop.xlane.xlu1 %7016 }
0x38e1   :  { %v7025_v17 = vmul.f32 0.03125, %v7017_v14 }
0x38e2   :  { %v7014_v57 = vpop.xlane.xlu0 %7013 }
0x38e3   :  { %v11919_v58 = vsub.f32 %v11899_v28, %v7025_v17  ;;  %v7024_v63 = vmul.f32 0.03125, %v7014_v57 }
0x38e5   :  { %v11922_v8 = vsub.f32 %v11902_v47, %v7024_v63  ;;  %v7033_v29 = vmul.f32 %v11919_v58, %v11919_v58 }
0x38e6   :  { %v7020_v56 = vpop.xlane.xlu0 %7019 }
0x38e7   :  { %v7026_v10 = vmul.f32 0.03125, %v7020_v56  ;;  %v7039_v5 = vsel %vm1407_vm2, %v7033_v29, 0.0  ;;  %v7032_v7 = vmul.f32 %v11922_v8, %v11922_v8 }
0x38e8   :  { %7040 = vadd.xlane.f32.xlu1 %v7039_v5  ;;  %v8346_v5 = vld [vmem:[%s12188_s27 + $0x90] sm:$0xff] }
0x38e9   :  { %v11930_v52 = vsub.f32 %v11910_v16, %v7026_v10  ;;  %v7036_v12 = vsel %vm1407_vm2, %v7032_v7, 0.0  ;;  %v8347_v10 = vld [vmem:[%s12188_s27 + $0x98] sm:$0xff]  ;;  %v8345_v7 = vld [vmem:[%s12188_s27 + $0x88] sm:$0xff] }
0x38ea   :  { %7037 = vadd.xlane.f32.xlu0 %v7036_v12  ;;  %v7023_v11 = vpop.xlane.xlu0 %7022  ;;  %9686 = vmatprep.subr.mxu0 %v8347_v10  ;;  %v8339_v12 = vld [vmem:[%s12191_s28 + $0x1] ss:$0 sm:$0xff] }
0x38eb   :  { %v7027_v31 = vmul.f32 0.03125, %v7023_v11  ;;  %v7034_v20 = vmul.f32 %v11930_v52, %v11930_v52  ;;  %9687 = vmatpush3.msra.mxu0 %v8347_v10 }
0x38ec   :  { %9688 = vmatprep.subr.mxu0 %v8346_v5 }
0x38ed   :  { %v11936_v4 = vsub.f32 %v11912_v25, %v7027_v31  ;;  %v7042_v43 = vsel %vm1407_vm2, %v7034_v20, 0.0  ;;  %9689 = vmatpush3.msra.mxu0 %v8346_v5 }
0x38ee   :  { %7043 = vadd.xlane.f32.xlu0 %v7042_v43  ;;  %9690 = vmatprep.subr.mxu0 %v8345_v7 }
0x38ef   :  { %v7035_v39 = vmul.f32 %v11936_v4, %v11936_v4  ;;  %9691 = vmatpush3.msra.mxu0 %v8345_v7 }
0x38f1   :  { %v7045_v9 = vsel %vm1407_vm2, %v7035_v39, 0.0 }
0x38f2   :  { %7046 = vadd.xlane.f32.xlu1 %v7045_v9 }
0x3971   :  { %v7041_v21 = vpop.xlane.xlu1 %7040 }
0x3972   :  { %v7049_v38 = vmul.f32 0.03125, %v7041_v21 }
0x3973   :  { %v7038_v26 = vpop.xlane.xlu0 %7037 }
0x3974   :  { %v7053_v53 = vadd.f32 1e-05, %v7049_v38  ;;  %v7048_v1 = vmul.f32 0.03125, %v7038_v26 }
0x3976   :  { %10118 = vrsqrt.f32 %v7053_v53  ;;  %v7052_v42 = vadd.f32 1e-05, %v7048_v1 }
0x3977   :  { %v7044_v50 = vpop.xlane.xlu0 %7043 }
0x3978   :  { %10120 = vrsqrt.f32 %v7052_v42  ;;  %v7050_v46 = vmul.f32 0.03125, %v7044_v50 }
0x397a   :  { %v7054_v0 = vadd.f32 1e-05, %v7050_v46 }
0x397b   :  { %v7047_v54 = vpop.xlane.xlu1 %7046 }
0x397c   :  { %10122 = vrsqrt.f32 %v7054_v0  ;;  %v7051_v3 = vmul.f32 0.03125, %v7047_v54 }
0x397e   :  { %v7055_v19 = vadd.f32 1e-05, %v7051_v3 }
0x3980   :  { %10124 = vrsqrt.f32 %v7055_v19 }
0x3983   :  { %v10119_v33 = vpop.eup %10118 }
0x3984   :  { %v7061_v32 = vmul.f32 %v10119_v33, %v11919_v58 }
0x3985   :  { %v10121_v48 = vpop.eup %10120 }
0x3986   :  { %v7060_v44 = vmul.f32 %v10121_v48, %v11922_v8  ;;  %v7071_v6 = vmul.f32 %v8332_v37, %v7061_v32 }
0x3988   :  { %v7070_v51 = vmul.f32 %v8332_v37, %v7060_v44  ;;  %v7081_v17 = vadd.f32 %v8333_v15, %v7071_v6 }
0x3989   :  { %v10123_v27 = vpop.eup %10122 }
0x398a   :  { %v7080_v35 = vadd.f32 %v8333_v15, %v7070_v51  ;;  %v7062_v14 = vmul.f32 %v10123_v27, %v11930_v52  ;;  %v8344_v52 = vld [vmem:[%s12188_s27 + $0x80] sm:$0xff] }
0x398b   :  { %9692 = vmatprep.subr.mxu0 %v8344_v52 }
0x398c   :  { %9656 = vmatprep.mubr.msk.f32.mxu1 %vm1407_vm2, %v7080_v35  ;;  %v7072_v57 = vmul.f32 %v8332_v37, %v7062_v14  ;;  %9693 = vmatpush3.msra.mxu0 %v8344_v52 }
0x398d   :  { %v10125_v63 = vpop.eup %10124  ;;  %9657 = vmatmul.mubr.msk.f32.vlgmr.msra.gmra.mxu1 %vm1407_vm2, %v7081_v17  ;;  %9741 = vmatprep.subr.mxu0 %v10273_v59 }
0x398e   :  { %v7082_v58 = vadd.f32 %v8333_v15, %v7072_v57  ;;  %v7063_v8 = vmul.f32 %v10125_v63, %v11936_v4 }
0x3990   :  { %9659 = vmatprep.mubr.msk.f32.mxu1 %vm1407_vm2, %v7082_v58  ;;  %v7073_v29 = vmul.f32 %v8332_v37, %v7063_v8 }
0x3992   :  { %v7083_v56 = vadd.f32 %v8333_v15, %v7073_v29 }
0x3994   :  { %9660 = vmatmul.mubr.msk.f32.gmra.mxu1 %vm1407_vm2, %v7083_v56 }
0x3995   :  { %9708 = vmatprep.mubr.msk.f32.mxu1 %vm10274_vm4, %v10273_v59 }
0x3a4d   :  { %v9658_v11 = vpop.f32.mrf.mxu1 }
0x3a4e   :  { %v7181_v31 = vadd.f32 %v9658_v11, %v8339_v12  ;;  %v8362_v11 = vld [vmem:[%s12193_s5] ss:$0 sm:$0xff] }
0x3a4f   :  { %v7175_v20 = vpop.f32.mrf.mxu1 }
0x3a50   :  { %v7176_v4 = vadd.f32 %v8339_v12, %v7175_v20  ;;  %v7195_v39 = vmax.f32 %v7181_v31, 0.0 }
0x3a52   :  { %v7194_v43 = vmax.f32 %v7176_v4, 0.0  ;;  %v8363_v4 = vld [vmem:[%s12194_s22] ss:$0 sm:$0xff] }
0x3a54   :  { %v9661_v9 = vpop.f32.mrf.mxu1  ;;  %9694 = vmatprep.mubr.f32.mxu0 %v7194_v43 }
0x3a55   :  { %9695 = vmatmul.mubr.f32.vlgmr.msra.gmra.mxu0 %v7195_v39  ;;  %v7191_v36 = vadd.f32 %v9661_v9, %v8339_v12 }
0x3a56   :  { %v7185_v24 = vpop.f32.mrf.mxu1 }
0x3a57   :  { %v7186_v2 = vadd.f32 %v8339_v12, %v7185_v24  ;;  %v7197_v22 = vmax.f32 %v7191_v36, 0.0 }
0x3a59   :  { %v7196_v18 = vmax.f32 %v7186_v2, 0.0 }
0x3a5b   :  { %9697 = vmatprep.mubr.f32.mxu0 %v7196_v18 }
0x3a5c   :  { %9698 = vmatmul.mubr.f32.gmra.mxu0 %v7197_v22 }
0x3a5d   :  { %9765 = vmatprep.mubr.msk.f32.mxu0 %vm10274_vm4, %v10273_v59 }
0x3b15   :  { %v9696_v60 = vpop.f32.mrf.mxu0 }
0x3b16   :  { %v7301_v30 = vadd.f32 %v9696_v60, %v11899_v28 }
0x3b17   :  { %v7281_v13 = vpop.f32.mrf.mxu0 }
0x3b18   :  { %v7300_v34 = vadd.f32 %v7281_v13, %v11902_v47  ;;  %v7313_v23 = vadd.f32 %v8361_v62, %v7301_v30 }
0x3b1a   :  { %v7312_v26 = vadd.f32 %v8361_v62, %v7300_v34  ;;  %v7319_v28 = vsel %vm1407_vm2, %v7313_v23, 0.0  ;;  %v7471_v34 = vld [vmem:[%s12196_s10 + $0x10] sm:$0xff] }
0x3b1c   :  { %v9699_v61 = vpop.f32.mrf.mxu0 }
0x3b1d   :  { %v7303_v49 = vadd.f32 %v9699_v61, %v11912_v25  ;;  %v7316_v25 = vsel %vm1407_vm2, %v7312_v26, 0.0 }
0x3b1e   :  { %v7291_v41 = vpop.f32.mrf.mxu0 }
0x3b1f   :  { %v7315_v40 = vadd.f32 %v8361_v62, %v7303_v49  ;;  %v7302_v45 = vadd.f32 %v7291_v41, %v11910_v16  ;;  %v7472_v41 = vld [vmem:[%s12196_s10 + $0x18] sm:$0xff] }
0x3b21   :  { %v7314_v21 = vadd.f32 %v8361_v62, %v7302_v45  ;;  %v7325_v38 = vsel %vm1407_vm2, %v7315_v40, 0.0  ;;  %v3398_v62 = vld [vmem:[%s12195_s7] sm:$0x3] }
0x3b22   :  { %7326 = vadd.xlane.f32.xlu0 %v7325_v38  ;;  %v7469_v45 = vld [vmem:[%s12196_s10] sm:$0xff]  ;;  %v7468_v38 = vld [vmem:[%s12198_s17 + $0x38] sm:$0xff] }
0x3b23   :  { %v7322_v53 = vsel %vm1407_vm2, %v7314_v21, 0.0 }
0x3b24   :  { %7323 = vadd.xlane.f32.xlu1 %v7322_v53  ;;  %v7467_v53 = vld [vmem:[%s12198_s17 + $0x30] sm:$0xff] }
0x3b26   :  { %7320 = vadd.xlane.f32.xlu0 %v7319_v28 }
0x3b28   :  { %7317 = vadd.xlane.f32.xlu1 %v7316_v25  ;;  %v7466_v25 = vld [vmem:[%s12198_s17 + $0x28] sm:$0xff] }
0x3bab   :  { %v7327_v1 = vpop.xlane.xlu0 %7326 }
0x3bac   :  { %v7331_v47 = vmul.f32 0.03125, %v7327_v1  ;;  %v7465_v1 = vld [vmem:[%s12198_s17 + $0x20] sm:$0xff] }
0x3bad   :  { %v7324_v42 = vpop.xlane.xlu1 %7323 }
0x3bae   :  { %v7335_v50 = vsub.f32 %v7315_v40, %v7331_v47  ;;  %v7330_v16 = vmul.f32 0.03125, %v7324_v42  ;;  %v7470_v40 = vld [vmem:[%s12196_s10 + $0x8] sm:$0xff]  ;;  %v7464_v47 = vld [vmem:[%s12198_s17 + $0x18] sm:$0xff]  ;;  %v7463_v42 = vld [vmem:[%s12198_s17 + $0x10] sm:$0xff] }
0x3baf   :  { %v7321_v46 = vpop.xlane.xlu0 %7320 }
0x3bb0   :  { %v7334_v0 = vsub.f32 %v7314_v21, %v7330_v16  ;;  %v7329_v54 = vmul.f32 0.03125, %v7321_v46  ;;  %v7339_v3 = vmul.f32 %v7335_v50, %v7335_v50  ;;  %v7637_v21 = vld [vmem:[%s12197_s9 + $0x50] sm:$0xff]  ;;  %v7461_v16 = vld [vmem:[%s12198_s17] sm:$0xff]  ;;  %v7636_v46 = vld [vmem:[%s12197_s9 + $0x48] sm:$0xff] }
0x3bb1   :  { %v7318_v19 = vpop.xlane.xlu1 %7317 }
0x3bb2   :  { %v7333_v33 = vsub.f32 %v7313_v23, %v7329_v54  ;;  %v7328_v32 = vmul.f32 0.03125, %v7318_v19  ;;  %v7349_v37 = vsel %vm1407_vm2, %v7339_v3, 0.0  ;;  %v7338_v48 = vmul.f32 %v7334_v0, %v7334_v0  ;;  %v7638_v23 = vld [vmem:[%s12197_s9 + $0x58] sm:$0xff]  ;;  %v7633_v3 = vld [vmem:[%s12197_s9 + $0x30] sm:$0xff]  ;;  %v7631_v19 = vld [vmem:[%s12197_s9 + $0x20] sm:$0xff] }
0x3bb3   :  { %7350 = vadd.xlane.f32.xlu0 %v7349_v37  ;;  %9742 = vmatpush3.msra.mxu0 %v7638_v23  ;;  %v7634_v54 = vld [vmem:[%s12197_s9 + $0x38] sm:$0xff]  ;;  %v7628_v37 = vld [vmem:[%s12197_s9 + $0x8] sm:$0xff] }
0x3bb4   :  { %v7332_v44 = vsub.f32 %v7312_v26, %v7328_v32  ;;  %v7346_v6 = vsel %vm1407_vm2, %v7338_v48, 0.0  ;;  %v7337_v15 = vmul.f32 %v7333_v33, %v7333_v33  ;;  %9743 = vmatprep.subr.mxu0 %v10273_v59  ;;  %v7629_v32 = vld [vmem:[%s12197_s9 + $0x10] sm:$0xff]  ;;  %v7627_v48 = vld [vmem:[%s12197_s9] sm:$0xff] }
0x3bb5   :  { %7347 = vadd.xlane.f32.xlu1 %v7346_v6  ;;  %9744 = vmatpush3.msra.mxu0 %v7637_v21 }
0x3bb6   :  { %v7343_v51 = vsel %vm1407_vm2, %v7337_v15, 0.0  ;;  %v7336_v27 = vmul.f32 %v7332_v44, %v7332_v44  ;;  %9745 = vmatprep.subr.mxu0 %v10273_v59 }
0x3bb7   :  { %7344 = vadd.xlane.f32.xlu0 %v7343_v51  ;;  %9746 = vmatpush3.msra.mxu0 %v7636_v46  ;;  %v8367_v51 = vld [vmem:[%s12199_s21] ss:$0 sm:$0xff] }
0x3bb8   :  { %v7340_v35 = vsel %vm1407_vm2, %v7336_v27, 0.0  ;;  %9747 = vmatprep.subr.mxu0 %v10273_v59 }
0x3bb9   :  { %7341 = vadd.xlane.f32.xlu1 %v7340_v35 }
0x3c3c   :  { %v7351_v14 = vpop.xlane.xlu0 %7350 }
0x3c3d   :  { %v7355_v17 = vmul.f32 0.03125, %v7351_v14 }
0x3c3e   :  { %v7348_v57 = vpop.xlane.xlu1 %7347 }
0x3c3f   :  { %v7359_v63 = vadd.f32 1e-05, %v7355_v17  ;;  %v7354_v58 = vmul.f32 0.03125, %v7348_v57  ;;  %v8368_v17 = vld [vmem:[%s12200_s25] ss:$0 sm:$0xff] }
0x3c40   :  { %v7345_v8 = vpop.xlane.xlu0 %7344 }
0x3c41   :  { %10126 = vrsqrt.f32 %v7359_v63  ;;  %v7358_v29 = vadd.f32 1e-05, %v7354_v58  ;;  %v7353_v56 = vmul.f32 0.03125, %v7345_v8 }
0x3c42   :  { %v7342_v10 = vpop.xlane.xlu1 %7341 }
0x3c43   :  { %10128 = vrsqrt.f32 %v7358_v29  ;;  %v7357_v5 = vadd.f32 1e-05, %v7353_v56  ;;  %v7352_v7 = vmul.f32 0.03125, %v7342_v10 }
0x3c45   :  { %10130 = vrsqrt.f32 %v7357_v5  ;;  %v7356_v52 = vadd.f32 1e-05, %v7352_v7 }
0x3c47   :  { %10132 = vrsqrt.f32 %v7356_v52  ;;  %v7762_v52 = vld [vmem:[%s12201_s29 + $0x58] sm:$0xff] }
0x3c4e   :  { %v10127_v12 = vpop.eup %10126 }
0x3c4f   :  { %v7367_v31 = vmul.f32 %v10127_v12, %v7335_v50  ;;  %v7462_v50 = vld [vmem:[%s12198_s17 + $0x8] sm:$0xff]  ;;  %v7761_v12 = vld [vmem:[%s12201_s29 + $0x50] sm:$0xff] }
0x3c50   :  { %v10129_v20 = vpop.eup %10128 }
0x3c51   :  { %v7377_v43 = vmul.f32 %v8362_v11, %v7367_v31  ;;  %v7366_v39 = vmul.f32 %v10129_v20, %v7334_v0  ;;  %v7635_v0 = vld [vmem:[%s12197_s9 + $0x40] sm:$0xff]  ;;  %v7758_v20 = vld [vmem:[%s12201_s29 + $0x38] sm:$0xff] }
0x3c52   :  { %v10131_v9 = vpop.eup %10130  ;;  %9748 = vmatpush3.msra.mxu0 %v7635_v0  ;;  %v7759_v31 = vld [vmem:[%s12201_s29 + $0x40] sm:$0xff] }
0x3c53   :  { %v7387_v36 = vadd.f32 %v8363_v4, %v7377_v43  ;;  %v7376_v24 = vmul.f32 %v8362_v11, %v7366_v39  ;;  %v7365_v2 = vmul.f32 %v10131_v9, %v7333_v33  ;;  %9749 = vmatprep.subr.mxu0 %v10273_v59  ;;  %v7630_v33 = vld [vmem:[%s12197_s9 + $0x18] sm:$0xff]  ;;  %v7756_v43 = vld [vmem:[%s12201_s29 + $0x28] sm:$0xff]  ;;  %v7755_v39 = vld [vmem:[%s12201_s29 + $0x20] sm:$0xff] }
0x3c54   :  { %v10133_v18 = vpop.eup %10132  ;;  %9750 = vmatpush3.msra.mxu0 %v7634_v54  ;;  %v7754_v9 = vld [vmem:[%s12201_s29 + $0x18] sm:$0xff] }
0x3c55   :  { %9701 = vmatpush3.msra.mxu1 %v7387_v36  ;;  %v7386_v22 = vadd.f32 %v8363_v4, %v7376_v24  ;;  %v7375_v60 = vmul.f32 %v8362_v11, %v7365_v2  ;;  %v7364_v13 = vmul.f32 %v10133_v18, %v7332_v44  ;;  %9751 = vmatprep.subr.mxu0 %v10273_v59  ;;  %v7753_v36 = vld [vmem:[%s12201_s29 + $0x10] sm:$0xff]  ;;  %v7752_v24 = vld [vmem:[%s12201_s29 + $0x8] sm:$0xff]  ;;  %v7751_v2 = vld [vmem:[%s12201_s29] sm:$0xff] }
0x3c56   :  { %9702 = vmatprep.subr.mxu1 %v10273_v59  ;;  %9752 = vmatpush3.msra.mxu0 %v7633_v3  ;;  %v7851_v18 = vld [vmem:[%s10541_s12 + $0x38] sm:$0xff] }
0x3c57   :  { %9703 = vmatpush3.msra.mxu1 %v7386_v22  ;;  %v7385_v61 = vadd.f32 %v8363_v4, %v7375_v60  ;;  %v7374_v30 = vmul.f32 %v8362_v11, %v7364_v13  ;;  %9753 = vmatprep.subr.mxu0 %v10273_v59  ;;  %v7760_v11 = vld [vmem:[%s12201_s29 + $0x48] sm:$0xff]  ;;  %v7850_v22 = vld [vmem:[%s10541_s12 + $0x30] sm:$0xff]  ;;  %v7848_v13 = vld [vmem:[%s10541_s12 + $0x20] sm:$0xff] }
0x3c58   :  { %9704 = vmatprep.subr.mxu1 %v10273_v59  ;;  %v7849_v60 = vld [vmem:[%s10541_s12 + $0x28] sm:$0xff] }
0x3c59   :  { %9705 = vmatpush3.msra.mxu1 %v7385_v61  ;;  %v7384_v49 = vadd.f32 %v8363_v4, %v7374_v30  ;;  %v7757_v4 = vld [vmem:[%s12201_s29 + $0x30] sm:$0xff]  ;;  %v7847_v61 = vld [vmem:[%s10541_s12 + $0x18] sm:$0xff] }
0x3c5a   :  { %9706 = vmatprep.subr.mxu1 %v10273_v59 }
0x3c5b   :  { %9707 = vmatpush3.msra.mxu1 %v7384_v49 }
0x3c5c   :  { %9709 = vmatmul.mubr.msk.f32.vlgmr.msra.gmra.mxu1 %vm1407_vm2, %v3398_v62  ;;  %9711 = vmatprep.subr.mxu1 %v10273_v59 }
0x3c5d   :  { %9712 = vmatpush3.msra.mxu1 %v7472_v41  ;;  %9719 = vmatprep.mubr.msk.f32.mxu1 %vm10274_vm4, %v10273_v59 }
0x3c5e   :  { %9713 = vmatprep.subr.mxu1 %v10273_v59 }
0x3c5f   :  { %9714 = vmatpush3.msra.mxu1 %v7471_v34  ;;  %v8370_v34 = vld [vmem:[%s12202_s3] ss:$0 sm:$0xff] }
0x3c60   :  { %9715 = vmatprep.subr.mxu1 %v10273_v59 }
0x3c61   :  { %9716 = vmatpush3.msra.mxu1 %v7470_v40 }
0x3c62   :  { %9717 = vmatprep.subr.mxu1 %v10273_v59 }
0x3c63   :  { %9718 = vmatpush3.msra.mxu1 %v7469_v45  ;;  %v8371_v45 = vld [vmem:[%s12203_s8] ss:$0 sm:$0xff] }
0x3c64   :  { %9722 = vmatprep.subr.mxu1 %v10273_v59 }
0x3d1c   :  { %v7457_v26 = vpop.f32.mrf.mxu1 }
0x3d1d   :  { %9720 = vmatmul.mubr.msk.f32.vlgmr.msra.gmra.mxu1 %vm1407_vm2, %v7457_v26  ;;  %v7845_v26 = vld [vmem:[%s10541_s12 + $0x8] sm:$0xff] }
0x3d1e   :  { %9723 = vmatpush3.msra.mxu1 %v7468_v38  ;;  %v9710_v28 = vpop.f32.mrf.mxu1  ;;  %9738 = vmatprep.mubr.msk.f32.mxu1 %vm10274_vm4, %v10273_v59  ;;  %v7846_v38 = vld [vmem:[%s10541_s12 + $0x10] sm:$0xff] }
0x3d1f   :  { %9724 = vmatprep.subr.mxu1 %v10273_v59  ;;  %v8372_v28 = vld [vmem:[#allocation2] ss:$0 sm:$0xff] }
0x3d20   :  { %9725 = vmatpush3.msra.mxu1 %v7467_v53  ;;  %v7844_v53 = vld [vmem:[%s10541_s12] sm:$0xff] }
0x3d21   :  { %9726 = vmatprep.subr.mxu1 %v10273_v59 }
0x3d22   :  { %9727 = vmatpush3.msra.mxu1 %v7466_v25 }
0x3d23   :  { %9728 = vmatprep.subr.mxu1 %v10273_v59 }
0x3d24   :  { %9729 = vmatpush3.msra.mxu1 %v7465_v1 }
0x3d25   :  { %9730 = vmatprep.subr.mxu1 %v10273_v59 }
0x3d26   :  { %9731 = vmatpush3.msra.mxu1 %v7464_v47 }
0x3d27   :  { %9732 = vmatprep.subr.mxu1 %v10273_v59 }
0x3d28   :  { %9733 = vmatpush3.msra.mxu1 %v7463_v42 }
0x3d29   :  { %9734 = vmatprep.subr.mxu1 %v10273_v59 }
0x3d2a   :  { %9735 = vmatpush3.msra.mxu1 %v7462_v50  ;;  %v8374_v50 = vld [vmem:[#allocation5] ss:$0 sm:$0xff] }
0x3d2b   :  { %9736 = vmatprep.subr.mxu1 %v10273_v59 }
0x3d2c   :  { %9737 = vmatpush3.msra.mxu1 %v7461_v16 }
0x3d2d   :  { %9739 = vmatmul.mubr.msk.f32.vlgmr.msra.gmra.mxu1 %vm252_vm0, %v11166_v55  ;;  %9768 = vmatprep.subr.mxu1 %v10273_v59  ;;  %v7632_v55 = vld [vmem:[%s12197_s9 + $0x28] sm:$0xff] }
0x3d2e   :  { %9792 = vmatprep.mubr.msk.f32.mxu1 %vm10274_vm4, %v10273_v59  ;;  %9754 = vmatpush3.msra.mxu0 %v7632_v55 }
0x3d2f   :  { %9755 = vmatprep.subr.mxu0 %v10273_v59  ;;  %9769 = vmatpush3.msra.mxu1 %v7762_v52 }
0x3d30   :  { %9756 = vmatpush3.msra.mxu0 %v7631_v19  ;;  %9770 = vmatprep.subr.mxu1 %v10273_v59 }
0x3d31   :  { %9757 = vmatprep.subr.mxu0 %v10273_v59  ;;  %9771 = vmatpush3.msra.mxu1 %v7761_v12 }
0x3d32   :  { %9758 = vmatpush3.msra.mxu0 %v7630_v33  ;;  %9772 = vmatprep.subr.mxu1 %v10273_v59 }
0x3d33   :  { %9759 = vmatprep.subr.mxu0 %v10273_v59  ;;  %9773 = vmatpush3.msra.mxu1 %v7760_v11 }
0x3d34   :  { %9760 = vmatpush3.msra.mxu0 %v7629_v32  ;;  %9774 = vmatprep.subr.mxu1 %v10273_v59 }
0x3d35   :  { %9761 = vmatprep.subr.mxu0 %v10273_v59  ;;  %9775 = vmatpush3.msra.mxu1 %v7759_v31 }
0x3d36   :  { %9762 = vmatpush3.msra.mxu0 %v7628_v37  ;;  %9776 = vmatprep.subr.mxu1 %v10273_v59 }
0x3d37   :  { %9763 = vmatprep.subr.mxu0 %v10273_v59  ;;  %9777 = vmatpush3.msra.mxu1 %v7758_v20 }
0x3d38   :  { %9764 = vmatpush3.msra.mxu0 %v7627_v48  ;;  %9778 = vmatprep.subr.mxu1 %v10273_v59 }
0x3d39   :  { %9795 = vmatprep.subr.mxu0 %v10273_v59  ;;  %9779 = vmatpush3.msra.mxu1 %v7757_v4 }
0x3d3a   :  { %9780 = vmatprep.subr.mxu1 %v10273_v59 }
0x3d3b   :  { %9781 = vmatpush3.msra.mxu1 %v7756_v43 }
0x3d3c   :  { %9782 = vmatprep.subr.mxu1 %v10273_v59 }
0x3d3d   :  { %9783 = vmatpush3.msra.mxu1 %v7755_v39 }
0x3d3e   :  { %9784 = vmatprep.subr.mxu1 %v10273_v59 }
0x3d3f   :  { %9785 = vmatpush3.msra.mxu1 %v7754_v9 }
0x3d40   :  { %9786 = vmatprep.subr.mxu1 %v10273_v59 }
0x3d41   :  { %9787 = vmatpush3.msra.mxu1 %v7753_v36 }
0x3d42   :  { %9788 = vmatprep.subr.mxu1 %v10273_v59 }
0x3d43   :  { %9789 = vmatpush3.msra.mxu1 %v7752_v24 }
0x3d44   :  { %9790 = vmatprep.subr.mxu1 %v10273_v59 }
0x3d45   :  { %9791 = vmatpush3.msra.mxu1 %v7751_v2 }
0x3ddd   :  { %v7542_v44 = vpop.f32.mrf.mxu1 }
0x3ddf   :  { %v9721_v6 = vpop.f32.mrf.mxu1 }
0x3ded   :  { %v7615_v15 = vpop.f32.mrf.mxu1 }
0x3dee   :  { %v7616_v27 = vadd.f32 %v7615_v15, %v7542_v44 }
0x3def   :  { %v9740_v35 = vpop.f32.mrf.mxu1 }
0x3df0   :  { %v7626_v14 = vadd.f32 %v8367_v51, %v7616_v27 }
0x3df2   :  { %9766 = vmatmul.mubr.msk.f32.vlgmr.msra.gmra.mxu0 %vm7646_vm7, %v7626_v14 }
0x3df3   :  { %9811 = vmatprep.mubr.msk.f32.mxu0 %vm10274_vm4, %v10273_v59  ;;  %9796 = vmatpush3.msra.mxu0 %v7851_v18 }
0x3df4   :  { %9797 = vmatprep.subr.mxu0 %v10273_v59 }
0x3df5   :  { %9798 = vmatpush3.msra.mxu0 %v7850_v22 }
0x3df6   :  { %9799 = vmatprep.subr.mxu0 %v10273_v59 }
0x3df7   :  { %9800 = vmatpush3.msra.mxu0 %v7849_v60 }
0x3df8   :  { %9801 = vmatprep.subr.mxu0 %v10273_v59 }
0x3df9   :  { %9802 = vmatpush3.msra.mxu0 %v7848_v13 }
0x3dfa   :  { %9803 = vmatprep.subr.mxu0 %v10273_v59 }
0x3dfb   :  { %9804 = vmatpush3.msra.mxu0 %v7847_v61 }
0x3dfc   :  { %9805 = vmatprep.subr.mxu0 %v10273_v59 }
0x3dfd   :  { %9806 = vmatpush3.msra.mxu0 %v7846_v38 }
0x3dfe   :  { %9807 = vmatprep.subr.mxu0 %v10273_v59 }
0x3dff   :  { %9808 = vmatpush3.msra.mxu0 %v7845_v26 }
0x3e00   :  { %9809 = vmatprep.subr.mxu0 %v10273_v59 }
0x3e01   :  { %9810 = vmatpush3.msra.mxu0 %v7844_v53 }
0x3eb2   :  { %v7716_v57 = vpop.f32.mrf.mxu0 }
0x3eb3   :  { %v7717_v63 = vadd.f32 %v8368_v17, %v7716_v57 }
0x3eb4   :  { %v9767_v58 = vpop.f32.mrf.mxu0 }
0x3eb5   :  { %v7723_v8 = vsel %vm7722_vm8, %v7717_v63, 0.0 }
0x3eb6   :  { %7724 = vadd.xlane.f32.xlu0 %v7723_v8 }
0x3f3f   :  { %v7725_v29 = vpop.xlane.xlu0 %7724 }
0x3f40   :  { %v7727_v56 = vmul.f32 0.010416667, %v7725_v29 }
0x3f42   :  { %v7728_v10 = vsub.f32 %v7717_v63, %v7727_v56 }
0x3f44   :  { %v7729_v5 = vmul.f32 %v7728_v10, %v7728_v10 }
0x3f46   :  { %v7730_v7 = vsel %vm7722_vm8, %v7729_v5, 0.0 }
0x3f47   :  { %7731 = vadd.xlane.f32.xlu1 %v7730_v7 }
0x3fd0   :  { %v7732_v30 = vpop.xlane.xlu1 %7731 }
0x3fd1   :  { %v7733_v49 = vmul.f32 0.010416667, %v7732_v30 }
0x3fd3   :  { %v7734_v62 = vadd.f32 1e-05, %v7733_v49 }
0x3fd5   :  { %10134 = vrsqrt.f32 %v7734_v62 }
0x3fe2   :  { %v10135_v41 = vpop.eup %10134 }
0x3fe3   :  { %v7736_v40 = vmul.f32 %v10135_v41, %v7728_v10 }
0x3fe5   :  { %v7743_v23 = vmul.f32 %v8370_v34, %v7736_v40 }
0x3fe7   :  { %v7750_v21 = vadd.f32 %v8371_v45, %v7743_v23 }
0x3fe9   :  { %9793 = vmatmul.mubr.msk.f32.vlgmr.msra.gmra.mxu1 %vm7646_vm7, %v7750_v21 }
0x40a9   :  { %v7839_v25 = vpop.f32.mrf.mxu1 }
0x40aa   :  { %v7840_v1 = vadd.f32 %v8372_v28, %v7839_v25 }
0x40ab   :  { %v9794_v47 = vpop.f32.mrf.mxu1 }
0x40ac   :  { %v7843_v42 = vmax.f32 %v7840_v1, 0.0 }
0x40ae   :  { %9812 = vmatmul.mubr.msk.f32.vlgmr.msra.gmra.mxu0 %vm252_vm0, %v7843_v42 }
0x416e   :  { %v7928_v16 = vpop.f32.mrf.mxu0 }
0x416f   :  { %v7929_v46 = vadd.f32 %v8374_v50, %v7928_v16 }
0x4170   :  { %v9813_v0 = vpop.f32.mrf.mxu0 }
0x4171   :  { %7933 = vst.msk [vmem:[#allocation7] sm:$0x3] %vm7932_vm9, %v7929_v46 }
0x4172   :  { %10197 = shalt.err (!%p10194_p0)
}
0x4173   :  { %7943 = dma.vmem_to_hbm [thread:$0]  %s7941_s19, 32, %s10551_s6, [#allocation4]  }
0x4174   :  { %10210 = dma.done.wait [#allocation4], 32  }
0x4175   :  { %10211 = vsyncadd [#allocation4], 4294967264 }
0x4176   :  { %7947 = vsyncpa [#allocation3], 1 }
0x4177   :  { %7948 = vsyncpa [#allocation6], 1 }
0x4178   :  { %7949 = vsyncpa [#allocation4], 1 }

</bundles_post_ra>
